<compile_context>
chip_gen: v7x
topology: tpu7x:2x2x1
jax: 0.10.0
libtpu: 0.0.40
codegen_flags: <defaults>
</compile_context>

<pallas_src>
import jax
import jax.numpy as jnp
from jax.experimental import pallas as pl
from jax.experimental.pallas import tpu as pltpu

# Scaled-down DCGAN generator hyper-params (architecture identical to the
# PyTorch module, just smaller so the toy test runs fast).
NZ = 32      # latent dim             (PyTorch default: 100)
NGF = 16     # generator feature maps (PyTorch default: 64)
NC = 3       # output image channels
KSIZE = 4
EPS = 1e-5   # nn.BatchNorm2d default eps

LAYER_CHANNELS = [(NZ, NGF * 8), (NGF * 8, NGF * 4), (NGF * 4, NGF * 2),
                  (NGF * 2, NGF), (NGF, NC)]
LAYER_STRIDES = [1, 2, 2, 2, 2]
LAYER_PADS = [0, 1, 1, 1, 1]

# Sub-pixel tap table for a stride-2 / pad-1 / k=4 transposed conv.
# With xpad = pad(x, 1) along a spatial dim:
#   even output y=2a:   w[...,3]*xpad[a+0] + w[...,1]*xpad[a+1]
#   odd  output y=2a+1: w[...,2]*xpad[a+1] + w[...,0]*xpad[a+2]
# entries are (padded-input offset, kernel index).
_SUBPIX_TAPS = (((0, 3), (1, 1)), ((1, 2), (2, 0)))


def _num_channel_blocks(cout):
    """Channel-block grid split only pays when a second TensorCore exists
    (v7x) AND each half-block still occupies the MXU reasonably.  On
    single-TC chips the grid is a serial loop: splitting adds per-step
    overhead and halves MXU row occupancy."""
    try:
        kind = jax.devices()[0].device_kind.lower()
    except Exception:
        kind = ""
    two_tc = "v7" in kind
    return 2 if (two_tc and cout >= 64 and cout % 16 == 0) else 1


# ---------------------- fused Pallas kernels (hot path) ----------------------

def _convt_bn_relu_kernel(w_ref, p_ref, g_ref, b_ref, o_ref):
    """Fused conv-as-matmul + training-mode BatchNorm + ReLU.

    w_ref: (P, Cb, K) bf16  per-parity weight matrices (channel block)
    p_ref: (P, K, M)  bf16  per-parity im2col patches (full pixel axis)
    g_ref, b_ref: (Cb, 1) f32
    o_ref: (P, Cb, M) bf16

    NOTE: BN statistics are per-output-channel over ALL parities and all
    N*H*W pixels, so the grid may only ever be split along the channel axis
    (never over P or M) -- splitting those would silently compute per-block
    statistics.
    """
    n_par = w_ref.shape[0]
    m = p_ref.shape[2]
    inv_cnt = 1.0 / float(n_par * m)
    accs = [jnp.dot(w_ref[p], p_ref[p], preferred_element_type=jnp.float32)
            for p in range(n_par)]
    # One-pass per-channel batch statistics (sum and sum of squares).
    s1 = accs[0].sum(axis=1, keepdims=True)
    s2 = jnp.square(accs[0]).sum(axis=1, keepdims=True)
    for p in range(1, n_par):
        s1 = s1 + accs[p].sum(axis=1, keepdims=True)
        s2 = s2 + jnp.square(accs[p]).sum(axis=1, keepdims=True)
    mean = s1 * inv_cnt
    var = jnp.maximum(s2 * inv_cnt - jnp.square(mean), 0.0)   # biased var (BN training)
    scale = g_ref[...] * jax.lax.rsqrt(var + EPS)
    shift = b_ref[...] - mean * scale
    for p in range(n_par):
        o_ref[p] = jnp.maximum(accs[p] * scale + shift, 0.0).astype(o_ref.dtype)


def _convt_tanh_kernel(w_ref, p_ref, o_ref):
    """Fused conv-as-matmul + Tanh (final layer)."""
    n_par = w_ref.shape[0]
    for p in range(n_par):
        acc = jnp.dot(w_ref[p], p_ref[p], preferred_element_type=jnp.float32)
        o_ref[p] = jnp.tanh(acc)


def fused_convt_bn_relu(wstack, pstack, gamma, beta):
    """(P,Cout,K) x (P,K,M) -> BN+ReLU -> (P,Cout,M) bf16; grid over channel blocks."""
    n_par, cout, k = wstack.shape
    m = pstack.shape[2]
    wstack = wstack.astype(jnp.bfloat16)          # pre-cast: half the weight DMA bytes
    ncb = _num_channel_blocks(cout)               # 1 on v5e/v6e; 2 on v7x for big layers
    cb = cout // ncb
    return pl.pallas_call(
        _convt_bn_relu_kernel,
        out_shape=jax.ShapeDtypeStruct((n_par, cout, m), jnp.bfloat16),
        grid=(ncb,),
        in_specs=[pl.BlockSpec((n_par, cb, k), lambda i: (0, i, 0)),
                  pl.BlockSpec((n_par, k, m), lambda i: (0, 0, 0)),
                  pl.BlockSpec((cb, 1), lambda i: (i, 0)),
                  pl.BlockSpec((cb, 1), lambda i: (i, 0))],
        out_specs=pl.BlockSpec((n_par, cb, m), lambda i: (0, i, 0)),
        compiler_params=pltpu.CompilerParams(
            dimension_semantics=("parallel",)),
    )(wstack, pstack, gamma, beta)


def fused_convt_tanh(wstack, pstack):
    """(P,Cout,K) x (P,K,M) -> Tanh -> (P,Cout,M) f32; grid over lane-dense pixel blocks."""
    n_par, cout, k = wstack.shape
    m = pstack.shape[2]
    wstack = wstack.astype(jnp.bfloat16)
    nmb = 2 if m % 256 == 0 else 1                # megacore split over the lane-dense M axis
    mb = m // nmb
    return pl.pallas_call(
        _convt_tanh_kernel,
        out_shape=jax.ShapeDtypeStruct((n_par, cout, m), jnp.float32),
        grid=(nmb,),
        in_specs=[pl.BlockSpec((n_par, cout, k), lambda j: (0, 0, 0)),
                  pl.BlockSpec((n_par, k, mb), lambda j: (0, 0, j))],
        out_specs=pl.BlockSpec((n_par, cout, mb), lambda j: (0, 0, j)),
        compiler_params=pltpu.CompilerParams(
            dimension_semantics=("parallel",)),
    )(wstack, pstack)


# ------------- XLA glue: layout / patch extraction (no per-element compute) -------------

def _im2col_first_layer(h, w):
    """ConvTranspose2d(k=4, s=1, p=0) on a 1x1 input == pad-3 conv with flipped kernel.
    h: (Cin, N, 1, 1) CNHW (bf16); w: (Cin, Cout, 4, 4) (PyTorch layout, f32).
    Returns Wstack (1, Cout, Cin*16) f32, Pstack (1, Cin*16, N*16) bf16."""
    cin, n = h.shape[0], h.shape[1]
    cout = w.shape[1]
    xpad = jnp.pad(h, ((0, 0), (0, 0), (3, 3), (3, 3)))           # (Cin, N, 7, 7)
    pat = jnp.stack([xpad[:, :, di:di + 4, dj:dj + 4]
                     for di in range(4) for dj in range(4)], axis=1)
    pstack = pat.reshape(cin * 16, n * 16)[None]                  # K=(cin,di,dj), M=(n,oh,ow)
    wmat = jnp.transpose(w[:, :, ::-1, ::-1], (1, 0, 2, 3)).reshape(cout, cin * 16)
    return wmat[None], pstack


def _im2col_subpixel(h, w):
    """Stride-2 / pad-1 / k=4 ConvTranspose2d -> 4 parity sub-convs (2x2 taps each).
    h: (Cin, N, H, W) CNHW (bf16); w: (Cin, Cout, 4, 4) f32.
    Returns Wstack (4, Cout, Cin*4) f32, Pstack (4, Cin*4, N*H*W) bf16; parity p = 2*r + t."""
    cin, n, hh, ww = h.shape
    cout = w.shape[1]
    xpad = jnp.pad(h, ((0, 0), (0, 0), (1, 1), (1, 1)))
    wstacks, pstacks = [], []
    for r in range(2):
        for t in range(2):
            taps = [(di, dj, kr, kc)
                    for (di, kr) in _SUBPIX_TAPS[r]
                    for (dj, kc) in _SUBPIX_TAPS[t]]
            pat = jnp.stack([xpad[:, :, di:di + hh, dj:dj + ww]
                             for (di, dj, _, _) in taps], axis=1)   # (Cin,4,N,H,W)
            pstacks.append(pat.reshape(cin * 4, n * hh * ww))
            wm = jnp.stack([w[:, :, kr, kc] for (_, _, kr, kc) in taps], axis=1)
            wstacks.append(jnp.transpose(wm, (2, 0, 1)).reshape(cout, cin * 4))
    return jnp.stack(wstacks), jnp.stack(pstacks)


# ------------------------------- Generator forward -------------------------------

def init_params(key):
    params = {"w": [], "gamma": [], "beta": []}
    for li, (cin, cout) in enumerate(LAYER_CHANNELS):
        key, kw, kg, kb = jax.random.split(key, 4)
        # DCGAN-style deterministic init: N(0, 0.02) conv weights.
        params["w"].append(
            0.02 * jax.random.normal(kw, (cin, cout, KSIZE, KSIZE), jnp.float32))
        if li < len(LAYER_CHANNELS) - 1:
            params["gamma"].append(
                1.0 + 0.1 * jax.random.normal(kg, (cout, 1), jnp.float32))
            params["beta"].append(
                0.1 * jax.random.normal(kb, (cout, 1), jnp.float32))
    return params


@jax.jit
def generator_forward(x, params):
    """x: (N, NZ, 1, 1) NCHW f32 -> (N, NC, 64, 64) NCHW f32."""
    n = x.shape[0]
    # CNHW internally; bf16 activations (MXU operands + intermediate storage).
    h = jnp.transpose(x, (1, 0, 2, 3)).astype(jnp.bfloat16)

    # Layer 0: ConvT(NZ, 8*NGF, 4, 1, 0) + BN + ReLU
    wstack, pstack = _im2col_first_layer(h, params["w"][0])
    out = fused_convt_bn_relu(wstack, pstack, params["gamma"][0], params["beta"][0])
    cout = LAYER_CHANNELS[0][1]
    h = out.reshape(cout, n, 4, 4)                              # (Cout, N, 4, 4) bf16

    # Layers 1..4: stride-2 ConvT (+BN+ReLU, or Tanh on the last)
    for li in range(1, len(LAYER_CHANNELS)):
        cout = LAYER_CHANNELS[li][1]
        hh, ww = h.shape[2], h.shape[3]
        wstack, pstack = _im2col_subpixel(h, params["w"][li])
        if li < len(LAYER_CHANNELS) - 1:
            out = fused_convt_bn_relu(wstack, pstack,
                                      params["gamma"][li], params["beta"][li])
        else:
            out = fused_convt_tanh(wstack, pstack)
        # pixel shuffle: (p=2r+t, Cout, N*H*W) -> (Cout, N, 2H, 2W)
        out = out.reshape(2, 2, cout, n, hh, ww)
        h = jnp.transpose(out, (2, 3, 4, 0, 5, 1)).reshape(cout, n, 2 * hh, 2 * ww)

    return jnp.transpose(h, (1, 0, 2, 3)).astype(jnp.float32)   # back to NCHW


# Pure-JAX reference (XLA conv path, f32) used only as a correctness check.
def reference_forward(x, params):
    h = x
    for li in range(len(LAYER_CHANNELS)):
        w = params["w"][li]
        s, p = LAYER_STRIDES[li], LAYER_PADS[li]
        w_conv = jnp.transpose(w[:, :, ::-1, ::-1], (1, 0, 2, 3))   # (Cout,Cin,kh,kw)
        h = jax.lax.conv_general_dilated(
            h, w_conv, window_strides=(1, 1),
            padding=[(KSIZE - 1 - p,) * 2] * 2,
            lhs_dilation=(s, s),
            dimension_numbers=("NCHW", "OIHW", "NCHW"))
        if li < len(LAYER_CHANNELS) - 1:
            mean = jnp.mean(h, axis=(0, 2, 3), keepdims=True)
            var = jnp.mean(jnp.square(h - mean), axis=(0, 2, 3), keepdims=True)
            g = params["gamma"][li].reshape(1, -1, 1, 1)
            b = params["beta"][li].reshape(1, -1, 1, 1)
            h = jnp.maximum((h - mean) * jax.lax.rsqrt(var + EPS) * g + b, 0.0)
        else:
            h = jnp.tanh(h)
    return h


if __name__ == "__main__":
    key = jax.random.PRNGKey(0)
    kx, kp = jax.random.split(key)
    batch = 2
    x = jax.random.normal(kx, (batch, NZ, 1, 1), jnp.float32)   # NCHW latent
    params = init_params(kp)

    out = jax.block_until_ready(generator_forward(x, params))
    assert out.shape == (batch, NC, 64, 64), out.shape
    assert bool(jnp.all(jnp.isfinite(out)))

    ref = reference_forward(x, params)
    max_err = float(jnp.max(jnp.abs(out - ref)))
    # bf16 MXU operands + bf16 intermediate activations (f32 accumulation & BN
    # math) -> slightly looser tolerance than pure f32.
    assert bool(jnp.allclose(out, ref, atol=5e-2, rtol=5e-2)), max_err

    print("KERNEL_OK")
</pallas_src>

<mosaic_0001>
module attributes {stable_mosaic.version = 11 : i64} {
  func.func @_convt_bn_relu_kernel(%arg0: i32, %arg1: memref<1x128x512xbf16, #tpu.memory_space<vmem>>, %arg2: memref<1x512x32xbf16, #tpu.memory_space<vmem>>, %arg3: memref<128x1xf32, #tpu.memory_space<vmem>>, %arg4: memref<128x1xf32, #tpu.memory_space<vmem>>, %arg5: memref<1x128x32xbf16, #tpu.memory_space<vmem>>) attributes {dimension_semantics = [#tpu.dimension_semantics<parallel>], iteration_bounds = array<i64: 1>, scalar_prefetch = 0 : i64, scratch_operands = 0 : i64, tpu.core_type = #tpu.core_type<tc>, window_params = [{transform_indices = @transform_0, window_bounds = array<i64: 1, 128, 512>}, {pipeline_mode = #tpu.pipeline_mode<synchronous>, transform_indices = @transform_1, window_bounds = array<i64: 1, 512, 32>}, {transform_indices = @transform_2, window_bounds = array<i64: 128, 1>}, {transform_indices = @transform_3, window_bounds = array<i64: 128, 1>}, {transform_indices = @transform_4, window_bounds = array<i64: 1, 128, 32>}]} {
    %c0 = arith.constant 0 : index
    %c0_0 = arith.constant 0 : index
    %c0_1 = arith.constant 0 : index
    %0 = vector.load %arg1[%c0, %c0_0, %c0_1] : memref<1x128x512xbf16, #tpu.memory_space<vmem>>, vector<1x128x512xbf16>
    %1 = vector.shape_cast %0 : vector<1x128x512xbf16> to vector<128x512xbf16>
    %c0_2 = arith.constant 0 : index
    %c0_3 = arith.constant 0 : index
    %c0_4 = arith.constant 0 : index
    %2 = vector.load %arg2[%c0_2, %c0_3, %c0_4] : memref<1x512x32xbf16, #tpu.memory_space<vmem>>, vector<1x512x32xbf16>
    %3 = vector.shape_cast %2 : vector<1x512x32xbf16> to vector<512x32xbf16>
    %cst = arith.constant dense<0.000000e+00> : vector<128x32xf32>
    %4 = tpu.matmul %1, %3, %cst {dimension_numbers = #tpu.dot_dimension_numbers<[1], [0], [0], [1], [0, 0, 1, 1], [], []>} : vector<128x512xbf16>, vector<512x32xbf16>, vector<128x32xf32> -> vector<128x32xf32>
    %cst_5 = arith.constant dense<0.000000e+00> : vector<128xf32>
    %5 = vector.multi_reduction <add>, %4, %cst_5 [1] : vector<128x32xf32> to vector<128xf32>
    %6 = vector.shape_cast %5 : vector<128xf32> to vector<128x1xf32>
    %7 = arith.mulf %4, %4 : vector<128x32xf32>
    %cst_6 = arith.constant dense<0.000000e+00> : vector<128xf32>
    %8 = vector.multi_reduction <add>, %7, %cst_6 [1] : vector<128x32xf32> to vector<128xf32>
    %9 = vector.shape_cast %8 : vector<128xf32> to vector<128x1xf32>
    %cst_7 = arith.constant 3.125000e-02 : f32
    %10 = vector.broadcast %cst_7 : f32 to vector<128x1xf32>
    %11 = arith.mulf %6, %10 : vector<128x1xf32>
    %cst_8 = arith.constant 3.125000e-02 : f32
    %12 = vector.broadcast %cst_8 : f32 to vector<128x1xf32>
    %13 = arith.mulf %9, %12 : vector<128x1xf32>
    %14 = arith.mulf %11, %11 : vector<128x1xf32>
    %15 = arith.subf %13, %14 : vector<128x1xf32>
    %cst_9 = arith.constant 0.000000e+00 : f32
    %16 = vector.broadcast %cst_9 : f32 to vector<128x1xf32>
    %17 = arith.maximumf %15, %16 : vector<128x1xf32>
    %c0_10 = arith.constant 0 : index
    %c0_11 = arith.constant 0 : index
    %18 = vector.load %arg3[%c0_10, %c0_11] : memref<128x1xf32, #tpu.memory_space<vmem>>, vector<128x1xf32>
    %cst_12 = arith.constant 9.99999974E-6 : f32
    %19 = vector.broadcast %cst_12 : f32 to vector<128x1xf32>
    %20 = arith.addf %17, %19 : vector<128x1xf32>
    %21 = math.rsqrt %20 : vector<128x1xf32>
    %22 = arith.mulf %18, %21 : vector<128x1xf32>
    %c0_13 = arith.constant 0 : index
    %c0_14 = arith.constant 0 : index
    %23 = vector.load %arg4[%c0_13, %c0_14] : memref<128x1xf32, #tpu.memory_space<vmem>>, vector<128x1xf32>
    %24 = arith.mulf %11, %22 : vector<128x1xf32>
    %25 = arith.subf %23, %24 : vector<128x1xf32>
    %26 = vector.broadcast %22 : vector<128x1xf32> to vector<128x32xf32>
    %27 = arith.mulf %4, %26 : vector<128x32xf32>
    %28 = vector.broadcast %25 : vector<128x1xf32> to vector<128x32xf32>
    %29 = arith.addf %27, %28 : vector<128x32xf32>
    %cst_15 = arith.constant 0.000000e+00 : f32
    %30 = vector.broadcast %cst_15 : f32 to vector<128x32xf32>
    %31 = arith.maximumf %29, %30 : vector<128x32xf32>
    %32 = arith.truncf %31 : vector<128x32xf32> to vector<128x32xbf16>
    %c0_16 = arith.constant 0 : index
    %c0_17 = arith.constant 0 : index
    %c0_18 = arith.constant 0 : index
    %33 = vector.load %arg5[%c0_16, %c0_17, %c0_18] : memref<1x128x32xbf16, #tpu.memory_space<vmem>>, vector<1x128x32xbf16>
    %34 = vector.shape_cast %33 : vector<1x128x32xbf16> to vector<128x32xbf16>
    %35 = vector.shape_cast %32 : vector<128x32xbf16> to vector<1x128x32xbf16>
    tpu.vector_store %arg5[%c0_16, %c0_17, %c0_18], %35 {strides = array<i32>} : memref<1x128x32xbf16, #tpu.memory_space<vmem>>, vector<1x128x32xbf16>,
    return
  }
  func.func @transform_0(%arg0: i32) -> (i32, i32, i32) {
    %c0_i32 = arith.constant 0 : i32
    %c0_i32_0 = arith.constant 0 : i32
    %c0_i32_1 = arith.constant 0 : i32
    return %c0_i32, %arg0, %c0_i32_0 : i32, i32, i32
  }
  func.func @transform_1(%arg0: i32) -> (i32, i32, i32) {
    %c0_i32 = arith.constant 0 : i32
    %c0_i32_0 = arith.constant 0 : i32
    %c0_i32_1 = arith.constant 0 : i32
    %c0_i32_2 = arith.constant 0 : i32
    return %c0_i32, %c0_i32_0, %c0_i32_1 : i32, i32, i32
  }
  func.func @transform_2(%arg0: i32) -> (i32, i32) {
    %c0_i32 = arith.constant 0 : i32
    %c0_i32_0 = arith.constant 0 : i32
    return %arg0, %c0_i32 : i32, i32
  }
  func.func @transform_3(%arg0: i32) -> (i32, i32) {
    %c0_i32 = arith.constant 0 : i32
    %c0_i32_0 = arith.constant 0 : i32
    return %arg0, %c0_i32 : i32, i32
  }
  func.func @transform_4(%arg0: i32) -> (i32, i32, i32) {
    %c0_i32 = arith.constant 0 : i32
    %c0_i32_0 = arith.constant 0 : i32
    %c0_i32_1 = arith.constant 0 : i32
    return %c0_i32, %arg0, %c0_i32_0 : i32, i32, i32
  }
}

module attributes {stable_mosaic.version = 11 : i64} {
  func.func @_convt_bn_relu_kernel(%arg0: i32, %arg1: memref<4x64x512xbf16, #tpu.memory_space<vmem>>, %arg2: memref<4x512x32xbf16, #tpu.memory_space<vmem>>, %arg3: memref<64x1xf32, #tpu.memory_space<vmem>>, %arg4: memref<64x1xf32, #tpu.memory_space<vmem>>, %arg5: memref<4x64x32xbf16, #tpu.memory_space<vmem>>) attributes {dimension_semantics = [#tpu.dimension_semantics<parallel>], iteration_bounds = array<i64: 1>, scalar_prefetch = 0 : i64, scratch_operands = 0 : i64, tpu.core_type = #tpu.core_type<tc>, window_params = [{transform_indices = @transform_0, window_bounds = array<i64: 4, 64, 512>}, {pipeline_mode = #tpu.pipeline_mode<synchronous>, transform_indices = @transform_1, window_bounds = array<i64: 4, 512, 32>}, {transform_indices = @transform_2, window_bounds = array<i64: 64, 1>}, {transform_indices = @transform_3, window_bounds = array<i64: 64, 1>}, {transform_indices = @transform_4, window_bounds = array<i64: 4, 64, 32>}]} {
    %c0 = arith.constant 0 : index
    %c0_0 = arith.constant 0 : index
    %c0_1 = arith.constant 0 : index
    %0 = vector.load %arg1[%c0, %c0_0, %c0_1] : memref<4x64x512xbf16, #tpu.memory_space<vmem>>, vector<1x64x512xbf16>
    %1 = vector.shape_cast %0 : vector<1x64x512xbf16> to vector<64x512xbf16>
    %c0_2 = arith.constant 0 : index
    %c0_3 = arith.constant 0 : index
    %c0_4 = arith.constant 0 : index
    %2 = vector.load %arg2[%c0_2, %c0_3, %c0_4] : memref<4x512x32xbf16, #tpu.memory_space<vmem>>, vector<1x512x32xbf16>
    %3 = vector.shape_cast %2 : vector<1x512x32xbf16> to vector<512x32xbf16>
    %cst = arith.constant dense<0.000000e+00> : vector<64x32xf32>
    %4 = tpu.matmul %1, %3, %cst {dimension_numbers = #tpu.dot_dimension_numbers<[1], [0], [0], [1], [0, 0, 1, 1], [], []>} : vector<64x512xbf16>, vector<512x32xbf16>, vector<64x32xf32> -> vector<64x32xf32>
    %c1 = arith.constant 1 : index
    %c0_5 = arith.constant 0 : index
    %c0_6 = arith.constant 0 : index
    %5 = vector.load %arg1[%c1, %c0_5, %c0_6] : memref<4x64x512xbf16, #tpu.memory_space<vmem>>, vector<1x64x512xbf16>
    %6 = vector.shape_cast %5 : vector<1x64x512xbf16> to vector<64x512xbf16>
    %c1_7 = arith.constant 1 : index
    %c0_8 = arith.constant 0 : index
    %c0_9 = arith.constant 0 : index
    %7 = vector.load %arg2[%c1_7, %c0_8, %c0_9] : memref<4x512x32xbf16, #tpu.memory_space<vmem>>, vector<1x512x32xbf16>
    %8 = vector.shape_cast %7 : vector<1x512x32xbf16> to vector<512x32xbf16>
    %cst_10 = arith.constant dense<0.000000e+00> : vector<64x32xf32>
    %9 = tpu.matmul %6, %8, %cst_10 {dimension_numbers = #tpu.dot_dimension_numbers<[1], [0], [0], [1], [0, 0, 1, 1], [], []>} : vector<64x512xbf16>, vector<512x32xbf16>, vector<64x32xf32> -> vector<64x32xf32>
    %c2 = arith.constant 2 : index
    %c0_11 = arith.constant 0 : index
    %c0_12 = arith.constant 0 : index
    %10 = vector.load %arg1[%c2, %c0_11, %c0_12] : memref<4x64x512xbf16, #tpu.memory_space<vmem>>, vector<1x64x512xbf16>
    %11 = vector.shape_cast %10 : vector<1x64x512xbf16> to vector<64x512xbf16>
    %c2_13 = arith.constant 2 : index
    %c0_14 = arith.constant 0 : index
    %c0_15 = arith.constant 0 : index
    %12 = vector.load %arg2[%c2_13, %c0_14, %c0_15] : memref<4x512x32xbf16, #tpu.memory_space<vmem>>, vector<1x512x32xbf16>
    %13 = vector.shape_cast %12 : vector<1x512x32xbf16> to vector<512x32xbf16>
    %cst_16 = arith.constant dense<0.000000e+00> : vector<64x32xf32>
    %14 = tpu.matmul %11, %13, %cst_16 {dimension_numbers = #tpu.dot_dimension_numbers<[1], [0], [0], [1], [0, 0, 1, 1], [], []>} : vector<64x512xbf16>, vector<512x32xbf16>, vector<64x32xf32> -> vector<64x32xf32>
    %c3 = arith.constant 3 : index
    %c0_17 = arith.constant 0 : index
    %c0_18 = arith.constant 0 : index
    %15 = vector.load %arg1[%c3, %c0_17, %c0_18] : memref<4x64x512xbf16, #tpu.memory_space<vmem>>, vector<1x64x512xbf16>
    %16 = vector.shape_cast %15 : vector<1x64x512xbf16> to vector<64x512xbf16>
    %c3_19 = arith.constant 3 : index
    %c0_20 = arith.constant 0 : index
    %c0_21 = arith.constant 0 : index
    %17 = vector.load %arg2[%c3_19, %c0_20, %c0_21] : memref<4x512x32xbf16, #tpu.memory_space<vmem>>, vector<1x512x32xbf16>
    %18 = vector.shape_cast %17 : vector<1x512x32xbf16> to vector<512x32xbf16>
    %cst_22 = arith.constant dense<0.000000e+00> : vector<64x32xf32>
    %19 = tpu.matmul %16, %18, %cst_22 {dimension_numbers = #tpu.dot_dimension_numbers<[1], [0], [0], [1], [0, 0, 1, 1], [], []>} : vector<64x512xbf16>, vector<512x32xbf16>, vector<64x32xf32> -> vector<64x32xf32>
    %cst_23 = arith.constant dense<0.000000e+00> : vector<64xf32>
    %20 = vector.multi_reduction <add>, %4, %cst_23 [1] : vector<64x32xf32> to vector<64xf32>
    %21 = vector.shape_cast %20 : vector<64xf32> to vector<64x1xf32>
    %22 = arith.mulf %4, %4 : vector<64x32xf32>
    %cst_24 = arith.constant dense<0.000000e+00> : vector<64xf32>
    %23 = vector.multi_reduction <add>, %22, %cst_24 [1] : vector<64x32xf32> to vector<64xf32>
    %24 = vector.shape_cast %23 : vector<64xf32> to vector<64x1xf32>
    %cst_25 = arith.constant dense<0.000000e+00> : vector<64xf32>
    %25 = vector.multi_reduction <add>, %9, %cst_25 [1] : vector<64x32xf32> to vector<64xf32>
    %26 = vector.shape_cast %25 : vector<64xf32> to vector<64x1xf32>
    %27 = arith.addf %21, %26 : vector<64x1xf32>
    %28 = arith.mulf %9, %9 : vector<64x32xf32>
    %cst_26 = arith.constant dense<0.000000e+00> : vector<64xf32>
    %29 = vector.multi_reduction <add>, %28, %cst_26 [1] : vector<64x32xf32> to vector<64xf32>
    %30 = vector.shape_cast %29 : vector<64xf32> to vector<64x1xf32>
    %31 = arith.addf %24, %30 : vector<64x1xf32>
    %cst_27 = arith.constant dense<0.000000e+00> : vector<64xf32>
    %32 = vector.multi_reduction <add>, %14, %cst_27 [1] : vector<64x32xf32> to vector<64xf32>
    %33 = vector.shape_cast %32 : vector<64xf32> to vector<64x1xf32>
    %34 = arith.addf %27, %33 : vector<64x1xf32>
    %35 = arith.mulf %14, %14 : vector<64x32xf32>
    %cst_28 = arith.constant dense<0.000000e+00> : vector<64xf32>
    %36 = vector.multi_reduction <add>, %35, %cst_28 [1] : vector<64x32xf32> to vector<64xf32>
    %37 = vector.shape_cast %36 : vector<64xf32> to vector<64x1xf32>
    %38 = arith.addf %31, %37 : vector<64x1xf32>
    %cst_29 = arith.constant dense<0.000000e+00> : vector<64xf32>
    %39 = vector.multi_reduction <add>, %19, %cst_29 [1] : vector<64x32xf32> to vector<64xf32>
    %40 = vector.shape_cast %39 : vector<64xf32> to vector<64x1xf32>
    %41 = arith.addf %34, %40 : vector<64x1xf32>
    %42 = arith.mulf %19, %19 : vector<64x32xf32>
    %cst_30 = arith.constant dense<0.000000e+00> : vector<64xf32>
    %43 = vector.multi_reduction <add>, %42, %cst_30 [1] : vector<64x32xf32> to vector<64xf32>
    %44 = vector.shape_cast %43 : vector<64xf32> to vector<64x1xf32>
    %45 = arith.addf %38, %44 : vector<64x1xf32>
    %cst_31 = arith.constant 7.812500e-03 : f32
    %46 = vector.broadcast %cst_31 : f32 to vector<64x1xf32>
    %47 = arith.mulf %41, %46 : vector<64x1xf32>
    %cst_32 = arith.constant 7.812500e-03 : f32
    %48 = vector.broadcast %cst_32 : f32 to vector<64x1xf32>
    %49 = arith.mulf %45, %48 : vector<64x1xf32>
    %50 = arith.mulf %47, %47 : vector<64x1xf32>
    %51 = arith.subf %49, %50 : vector<64x1xf32>
    %cst_33 = arith.constant 0.000000e+00 : f32
    %52 = vector.broadcast %cst_33 : f32 to vector<64x1xf32>
    %53 = arith.maximumf %51, %52 : vector<64x1xf32>
    %c0_34 = arith.constant 0 : index
    %c0_35 = arith.constant 0 : index
    %54 = vector.load %arg3[%c0_34, %c0_35] : memref<64x1xf32, #tpu.memory_space<vmem>>, vector<64x1xf32>
    %cst_36 = arith.constant 9.99999974E-6 : f32
    %55 = vector.broadcast %cst_36 : f32 to vector<64x1xf32>
    %56 = arith.addf %53, %55 : vector<64x1xf32>
    %57 = math.rsqrt %56 : vector<64x1xf32>
    %58 = arith.mulf %54, %57 : vector<64x1xf32>
    %c0_37 = arith.constant 0 : index
    %c0_38 = arith.constant 0 : index
    %59 = vector.load %arg4[%c0_37, %c0_38] : memref<64x1xf32, #tpu.memory_space<vmem>>, vector<64x1xf32>
    %60 = arith.mulf %47, %58 : vector<64x1xf32>
    %61 = arith.subf %59, %60 : vector<64x1xf32>
    %62 = vector.broadcast %58 : vector<64x1xf32> to vector<64x32xf32>
    %63 = arith.mulf %4, %62 : vector<64x32xf32>
    %64 = vector.broadcast %61 : vector<64x1xf32> to vector<64x32xf32>
    %65 = arith.addf %63, %64 : vector<64x32xf32>
    %cst_39 = arith.constant 0.000000e+00 : f32
    %66 = vector.broadcast %cst_39 : f32 to vector<64x32xf32>
    %67 = arith.maximumf %65, %66 : vector<64x32xf32>
    %68 = arith.truncf %67 : vector<64x32xf32> to vector<64x32xbf16>
    %c0_40 = arith.constant 0 : index
    %c0_41 = arith.constant 0 : index
    %c0_42 = arith.constant 0 : index
    %69 = vector.load %arg5[%c0_40, %c0_41, %c0_42] : memref<4x64x32xbf16, #tpu.memory_space<vmem>>, vector<1x64x32xbf16>
    %70 = vector.shape_cast %69 : vector<1x64x32xbf16> to vector<64x32xbf16>
    %71 = vector.shape_cast %68 : vector<64x32xbf16> to vector<1x64x32xbf16>
    tpu.vector_store %arg5[%c0_40, %c0_41, %c0_42], %71 {strides = array<i32>} : memref<4x64x32xbf16, #tpu.memory_space<vmem>>, vector<1x64x32xbf16>,
    %72 = vector.broadcast %58 : vector<64x1xf32> to vector<64x32xf32>
    %73 = arith.mulf %9, %72 : vector<64x32xf32>
    %74 = vector.broadcast %61 : vector<64x1xf32> to vector<64x32xf32>
    %75 = arith.addf %73, %74 : vector<64x32xf32>
    %cst_43 = arith.constant 0.000000e+00 : f32
    %76 = vector.broadcast %cst_43 : f32 to vector<64x32xf32>
    %77 = arith.maximumf %75, %76 : vector<64x32xf32>
    %78 = arith.truncf %77 : vector<64x32xf32> to vector<64x32xbf16>
    %c1_44 = arith.constant 1 : index
    %c0_45 = arith.constant 0 : index
    %c0_46 = arith.constant 0 : index
    %79 = vector.load %arg5[%c1_44, %c0_45, %c0_46] : memref<4x64x32xbf16, #tpu.memory_space<vmem>>, vector<1x64x32xbf16>
    %80 = vector.shape_cast %79 : vector<1x64x32xbf16> to vector<64x32xbf16>
    %81 = vector.shape_cast %78 : vector<64x32xbf16> to vector<1x64x32xbf16>
    tpu.vector_store %arg5[%c1_44, %c0_45, %c0_46], %81 {strides = array<i32>} : memref<4x64x32xbf16, #tpu.memory_space<vmem>>, vector<1x64x32xbf16>,
    %82 = vector.broadcast %58 : vector<64x1xf32> to vector<64x32xf32>
    %83 = arith.mulf %14, %82 : vector<64x32xf32>
    %84 = vector.broadcast %61 : vector<64x1xf32> to vector<64x32xf32>
    %85 = arith.addf %83, %84 : vector<64x32xf32>
    %cst_47 = arith.constant 0.000000e+00 : f32
    %86 = vector.broadcast %cst_47 : f32 to vector<64x32xf32>
    %87 = arith.maximumf %85, %86 : vector<64x32xf32>
    %88 = arith.truncf %87 : vector<64x32xf32> to vector<64x32xbf16>
    %c2_48 = arith.constant 2 : index
    %c0_49 = arith.constant 0 : index
    %c0_50 = arith.constant 0 : index
    %89 = vector.load %arg5[%c2_48, %c0_49, %c0_50] : memref<4x64x32xbf16, #tpu.memory_space<vmem>>, vector<1x64x32xbf16>
    %90 = vector.shape_cast %89 : vector<1x64x32xbf16> to vector<64x32xbf16>
    %91 = vector.shape_cast %88 : vector<64x32xbf16> to vector<1x64x32xbf16>
    tpu.vector_store %arg5[%c2_48, %c0_49, %c0_50], %91 {strides = array<i32>} : memref<4x64x32xbf16, #tpu.memory_space<vmem>>, vector<1x64x32xbf16>,
    %92 = vector.broadcast %58 : vector<64x1xf32> to vector<64x32xf32>
    %93 = arith.mulf %19, %92 : vector<64x32xf32>
    %94 = vector.broadcast %61 : vector<64x1xf32> to vector<64x32xf32>
    %95 = arith.addf %93, %94 : vector<64x32xf32>
    %cst_51 = arith.constant 0.000000e+00 : f32
    %96 = vector.broadcast %cst_51 : f32 to vector<64x32xf32>
    %97 = arith.maximumf %95, %96 : vector<64x32xf32>
    %98 = arith.truncf %97 : vector<64x32xf32> to vector<64x32xbf16>
    %c3_52 = arith.constant 3 : index
    %c0_53 = arith.constant 0 : index
    %c0_54 = arith.constant 0 : index
    %99 = vector.load %arg5[%c3_52, %c0_53, %c0_54] : memref<4x64x32xbf16, #tpu.memory_space<vmem>>, vector<1x64x32xbf16>
    %100 = vector.shape_cast %99 : vector<1x64x32xbf16> to vector<64x32xbf16>
    %101 = vector.shape_cast %98 : vector<64x32xbf16> to vector<1x64x32xbf16>
    tpu.vector_store %arg5[%c3_52, %c0_53, %c0_54], %101 {strides = array<i32>} : memref<4x64x32xbf16, #tpu.memory_space<vmem>>, vector<1x64x32xbf16>,
    return
  }
  func.func @transform_0(%arg0: i32) -> (i32, i32, i32) {
    %c0_i32 = arith.constant 0 : i32
    %c0_i32_0 = arith.constant 0 : i32
    %c0_i32_1 = arith.constant 0 : i32
    return %c0_i32, %arg0, %c0_i32_0 : i32, i32, i32
  }
  func.func @transform_1(%arg0: i32) -> (i32, i32, i32) {
    %c0_i32 = arith.constant 0 : i32
    %c0_i32_0 = arith.constant 0 : i32
    %c0_i32_1 = arith.constant 0 : i32
    %c0_i32_2 = arith.constant 0 : i32
    return %c0_i32, %c0_i32_0, %c0_i32_1 : i32, i32, i32
  }
  func.func @transform_2(%arg0: i32) -> (i32, i32) {
    %c0_i32 = arith.constant 0 : i32
    %c0_i32_0 = arith.constant 0 : i32
    return %arg0, %c0_i32 : i32, i32
  }
  func.func @transform_3(%arg0: i32) -> (i32, i32) {
    %c0_i32 = arith.constant 0 : i32
    %c0_i32_0 = arith.constant 0 : i32
    return %arg0, %c0_i32 : i32, i32
  }
  func.func @transform_4(%arg0: i32) -> (i32, i32, i32) {
    %c0_i32 = arith.constant 0 : i32
    %c0_i32_0 = arith.constant 0 : i32
    %c0_i32_1 = arith.constant 0 : i32
    return %c0_i32, %arg0, %c0_i32_0 : i32, i32, i32
  }
}

module attributes {stable_mosaic.version = 11 : i64} {
  func.func @_convt_bn_relu_kernel(%arg0: i32, %arg1: memref<4x32x256xbf16, #tpu.memory_space<vmem>>, %arg2: memref<4x256x128xbf16, #tpu.memory_space<vmem>>, %arg3: memref<32x1xf32, #tpu.memory_space<vmem>>, %arg4: memref<32x1xf32, #tpu.memory_space<vmem>>, %arg5: memref<4x32x128xbf16, #tpu.memory_space<vmem>>) attributes {dimension_semantics = [#tpu.dimension_semantics<parallel>], iteration_bounds = array<i64: 1>, scalar_prefetch = 0 : i64, scratch_operands = 0 : i64, tpu.core_type = #tpu.core_type<tc>, window_params = [{transform_indices = @transform_0, window_bounds = array<i64: 4, 32, 256>}, {pipeline_mode = #tpu.pipeline_mode<synchronous>, transform_indices = @transform_1, window_bounds = array<i64: 4, 256, 128>}, {transform_indices = @transform_2, window_bounds = array<i64: 32, 1>}, {transform_indices = @transform_3, window_bounds = array<i64: 32, 1>}, {transform_indices = @transform_4, window_bounds = array<i64: 4, 32, 128>}]} {
    %c0 = arith.constant 0 : index
    %c0_0 = arith.constant 0 : index
    %c0_1 = arith.constant 0 : index
    %0 = vector.load %arg1[%c0, %c0_0, %c0_1] : memref<4x32x256xbf16, #tpu.memory_space<vmem>>, vector<1x32x256xbf16>
    %1 = vector.shape_cast %0 : vector<1x32x256xbf16> to vector<32x256xbf16>
    %c0_2 = arith.constant 0 : index
    %c0_3 = arith.constant 0 : index
    %c0_4 = arith.constant 0 : index
    %2 = vector.load %arg2[%c0_2, %c0_3, %c0_4] : memref<4x256x128xbf16, #tpu.memory_space<vmem>>, vector<1x256x128xbf16>
    %3 = vector.shape_cast %2 : vector<1x256x128xbf16> to vector<256x128xbf16>
    %cst = arith.constant dense<0.000000e+00> : vector<32x128xf32>
    %4 = tpu.matmul %1, %3, %cst {dimension_numbers = #tpu.dot_dimension_numbers<[1], [0], [0], [1], [0, 0, 1, 1], [], []>} : vector<32x256xbf16>, vector<256x128xbf16>, vector<32x128xf32> -> vector<32x128xf32>
    %c1 = arith.constant 1 : index
    %c0_5 = arith.constant 0 : index
    %c0_6 = arith.constant 0 : index
    %5 = vector.load %arg1[%c1, %c0_5, %c0_6] : memref<4x32x256xbf16, #tpu.memory_space<vmem>>, vector<1x32x256xbf16>
    %6 = vector.shape_cast %5 : vector<1x32x256xbf16> to vector<32x256xbf16>
    %c1_7 = arith.constant 1 : index
    %c0_8 = arith.constant 0 : index
    %c0_9 = arith.constant 0 : index
    %7 = vector.load %arg2[%c1_7, %c0_8, %c0_9] : memref<4x256x128xbf16, #tpu.memory_space<vmem>>, vector<1x256x128xbf16>
    %8 = vector.shape_cast %7 : vector<1x256x128xbf16> to vector<256x128xbf16>
    %cst_10 = arith.constant dense<0.000000e+00> : vector<32x128xf32>
    %9 = tpu.matmul %6, %8, %cst_10 {dimension_numbers = #tpu.dot_dimension_numbers<[1], [0], [0], [1], [0, 0, 1, 1], [], []>} : vector<32x256xbf16>, vector<256x128xbf16>, vector<32x128xf32> -> vector<32x128xf32>
    %c2 = arith.constant 2 : index
    %c0_11 = arith.constant 0 : index
    %c0_12 = arith.constant 0 : index
    %10 = vector.load %arg1[%c2, %c0_11, %c0_12] : memref<4x32x256xbf16, #tpu.memory_space<vmem>>, vector<1x32x256xbf16>
    %11 = vector.shape_cast %10 : vector<1x32x256xbf16> to vector<32x256xbf16>
    %c2_13 = arith.constant 2 : index
    %c0_14 = arith.constant 0 : index
    %c0_15 = arith.constant 0 : index
    %12 = vector.load %arg2[%c2_13, %c0_14, %c0_15] : memref<4x256x128xbf16, #tpu.memory_space<vmem>>, vector<1x256x128xbf16>
    %13 = vector.shape_cast %12 : vector<1x256x128xbf16> to vector<256x128xbf16>
    %cst_16 = arith.constant dense<0.000000e+00> : vector<32x128xf32>
    %14 = tpu.matmul %11, %13, %cst_16 {dimension_numbers = #tpu.dot_dimension_numbers<[1], [0], [0], [1], [0, 0, 1, 1], [], []>} : vector<32x256xbf16>, vector<256x128xbf16>, vector<32x128xf32> -> vector<32x128xf32>
    %c3 = arith.constant 3 : index
    %c0_17 = arith.constant 0 : index
    %c0_18 = arith.constant 0 : index
    %15 = vector.load %arg1[%c3, %c0_17, %c0_18] : memref<4x32x256xbf16, #tpu.memory_space<vmem>>, vector<1x32x256xbf16>
    %16 = vector.shape_cast %15 : vector<1x32x256xbf16> to vector<32x256xbf16>
    %c3_19 = arith.constant 3 : index
    %c0_20 = arith.constant 0 : index
    %c0_21 = arith.constant 0 : index
    %17 = vector.load %arg2[%c3_19, %c0_20, %c0_21] : memref<4x256x128xbf16, #tpu.memory_space<vmem>>, vector<1x256x128xbf16>
    %18 = vector.shape_cast %17 : vector<1x256x128xbf16> to vector<256x128xbf16>
    %cst_22 = arith.constant dense<0.000000e+00> : vector<32x128xf32>
    %19 = tpu.matmul %16, %18, %cst_22 {dimension_numbers = #tpu.dot_dimension_numbers<[1], [0], [0], [1], [0, 0, 1, 1], [], []>} : vector<32x256xbf16>, vector<256x128xbf16>, vector<32x128xf32> -> vector<32x128xf32>
    %cst_23 = arith.constant dense<0.000000e+00> : vector<32xf32>
    %20 = vector.multi_reduction <add>, %4, %cst_23 [1] : vector<32x128xf32> to vector<32xf32>
    %21 = vector.shape_cast %20 : vector<32xf32> to vector<32x1xf32>
    %22 = arith.mulf %4, %4 : vector<32x128xf32>
    %cst_24 = arith.constant dense<0.000000e+00> : vector<32xf32>
    %23 = vector.multi_reduction <add>, %22, %cst_24 [1] : vector<32x128xf32> to vector<32xf32>
    %24 = vector.shape_cast %23 : vector<32xf32> to vector<32x1xf32>
    %cst_25 = arith.constant dense<0.000000e+00> : vector<32xf32>
    %25 = vector.multi_reduction <add>, %9, %cst_25 [1] : vector<32x128xf32> to vector<32xf32>
    %26 = vector.shape_cast %25 : vector<32xf32> to vector<32x1xf32>
    %27 = arith.addf %21, %26 : vector<32x1xf32>
    %28 = arith.mulf %9, %9 : vector<32x128xf32>
    %cst_26 = arith.constant dense<0.000000e+00> : vector<32xf32>
    %29 = vector.multi_reduction <add>, %28, %cst_26 [1] : vector<32x128xf32> to vector<32xf32>
    %30 = vector.shape_cast %29 : vector<32xf32> to vector<32x1xf32>
    %31 = arith.addf %24, %30 : vector<32x1xf32>
    %cst_27 = arith.constant dense<0.000000e+00> : vector<32xf32>
    %32 = vector.multi_reduction <add>, %14, %cst_27 [1] : vector<32x128xf32> to vector<32xf32>
    %33 = vector.shape_cast %32 : vector<32xf32> to vector<32x1xf32>
    %34 = arith.addf %27, %33 : vector<32x1xf32>
    %35 = arith.mulf %14, %14 : vector<32x128xf32>
    %cst_28 = arith.constant dense<0.000000e+00> : vector<32xf32>
    %36 = vector.multi_reduction <add>, %35, %cst_28 [1] : vector<32x128xf32> to vector<32xf32>
    %37 = vector.shape_cast %36 : vector<32xf32> to vector<32x1xf32>
    %38 = arith.addf %31, %37 : vector<32x1xf32>
    %cst_29 = arith.constant dense<0.000000e+00> : vector<32xf32>
    %39 = vector.multi_reduction <add>, %19, %cst_29 [1] : vector<32x128xf32> to vector<32xf32>
    %40 = vector.shape_cast %39 : vector<32xf32> to vector<32x1xf32>
    %41 = arith.addf %34, %40 : vector<32x1xf32>
    %42 = arith.mulf %19, %19 : vector<32x128xf32>
    %cst_30 = arith.constant dense<0.000000e+00> : vector<32xf32>
    %43 = vector.multi_reduction <add>, %42, %cst_30 [1] : vector<32x128xf32> to vector<32xf32>
    %44 = vector.shape_cast %43 : vector<32xf32> to vector<32x1xf32>
    %45 = arith.addf %38, %44 : vector<32x1xf32>
    %cst_31 = arith.constant 0.001953125 : f32
    %46 = vector.broadcast %cst_31 : f32 to vector<32x1xf32>
    %47 = arith.mulf %41, %46 : vector<32x1xf32>
    %cst_32 = arith.constant 0.001953125 : f32
    %48 = vector.broadcast %cst_32 : f32 to vector<32x1xf32>
    %49 = arith.mulf %45, %48 : vector<32x1xf32>
    %50 = arith.mulf %47, %47 : vector<32x1xf32>
    %51 = arith.subf %49, %50 : vector<32x1xf32>
    %cst_33 = arith.constant 0.000000e+00 : f32
    %52 = vector.broadcast %cst_33 : f32 to vector<32x1xf32>
    %53 = arith.maximumf %51, %52 : vector<32x1xf32>
    %c0_34 = arith.constant 0 : index
    %c0_35 = arith.constant 0 : index
    %54 = vector.load %arg3[%c0_34, %c0_35] : memref<32x1xf32, #tpu.memory_space<vmem>>, vector<32x1xf32>
    %cst_36 = arith.constant 9.99999974E-6 : f32
    %55 = vector.broadcast %cst_36 : f32 to vector<32x1xf32>
    %56 = arith.addf %53, %55 : vector<32x1xf32>
    %57 = math.rsqrt %56 : vector<32x1xf32>
    %58 = arith.mulf %54, %57 : vector<32x1xf32>
    %c0_37 = arith.constant 0 : index
    %c0_38 = arith.constant 0 : index
    %59 = vector.load %arg4[%c0_37, %c0_38] : memref<32x1xf32, #tpu.memory_space<vmem>>, vector<32x1xf32>
    %60 = arith.mulf %47, %58 : vector<32x1xf32>
    %61 = arith.subf %59, %60 : vector<32x1xf32>
    %62 = vector.broadcast %58 : vector<32x1xf32> to vector<32x128xf32>
    %63 = arith.mulf %4, %62 : vector<32x128xf32>
    %64 = vector.broadcast %61 : vector<32x1xf32> to vector<32x128xf32>
    %65 = arith.addf %63, %64 : vector<32x128xf32>
    %cst_39 = arith.constant 0.000000e+00 : f32
    %66 = vector.broadcast %cst_39 : f32 to vector<32x128xf32>
    %67 = arith.maximumf %65, %66 : vector<32x128xf32>
    %68 = arith.truncf %67 : vector<32x128xf32> to vector<32x128xbf16>
    %c0_40 = arith.constant 0 : index
    %c0_41 = arith.constant 0 : index
    %c0_42 = arith.constant 0 : index
    %69 = vector.load %arg5[%c0_40, %c0_41, %c0_42] : memref<4x32x128xbf16, #tpu.memory_space<vmem>>, vector<1x32x128xbf16>
    %70 = vector.shape_cast %69 : vector<1x32x128xbf16> to vector<32x128xbf16>
    %71 = vector.shape_cast %68 : vector<32x128xbf16> to vector<1x32x128xbf16>
    tpu.vector_store %arg5[%c0_40, %c0_41, %c0_42], %71 {strides = array<i32>} : memref<4x32x128xbf16, #tpu.memory_space<vmem>>, vector<1x32x128xbf16>,
    %72 = vector.broadcast %58 : vector<32x1xf32> to vector<32x128xf32>
    %73 = arith.mulf %9, %72 : vector<32x128xf32>
    %74 = vector.broadcast %61 : vector<32x1xf32> to vector<32x128xf32>
    %75 = arith.addf %73, %74 : vector<32x128xf32>
    %cst_43 = arith.constant 0.000000e+00 : f32
    %76 = vector.broadcast %cst_43 : f32 to vector<32x128xf32>
    %77 = arith.maximumf %75, %76 : vector<32x128xf32>
    %78 = arith.truncf %77 : vector<32x128xf32> to vector<32x128xbf16>
    %c1_44 = arith.constant 1 : index
    %c0_45 = arith.constant 0 : index
    %c0_46 = arith.constant 0 : index
    %79 = vector.load %arg5[%c1_44, %c0_45, %c0_46] : memref<4x32x128xbf16, #tpu.memory_space<vmem>>, vector<1x32x128xbf16>
    %80 = vector.shape_cast %79 : vector<1x32x128xbf16> to vector<32x128xbf16>
    %81 = vector.shape_cast %78 : vector<32x128xbf16> to vector<1x32x128xbf16>
    tpu.vector_store %arg5[%c1_44, %c0_45, %c0_46], %81 {strides = array<i32>} : memref<4x32x128xbf16, #tpu.memory_space<vmem>>, vector<1x32x128xbf16>,
    %82 = vector.broadcast %58 : vector<32x1xf32> to vector<32x128xf32>
    %83 = arith.mulf %14, %82 : vector<32x128xf32>
    %84 = vector.broadcast %61 : vector<32x1xf32> to vector<32x128xf32>
    %85 = arith.addf %83, %84 : vector<32x128xf32>
    %cst_47 = arith.constant 0.000000e+00 : f32
    %86 = vector.broadcast %cst_47 : f32 to vector<32x128xf32>
    %87 = arith.maximumf %85, %86 : vector<32x128xf32>
    %88 = arith.truncf %87 : vector<32x128xf32> to vector<32x128xbf16>
    %c2_48 = arith.constant 2 : index
    %c0_49 = arith.constant 0 : index
    %c0_50 = arith.constant 0 : index
    %89 = vector.load %arg5[%c2_48, %c0_49, %c0_50] : memref<4x32x128xbf16, #tpu.memory_space<vmem>>, vector<1x32x128xbf16>
    %90 = vector.shape_cast %89 : vector<1x32x128xbf16> to vector<32x128xbf16>
    %91 = vector.shape_cast %88 : vector<32x128xbf16> to vector<1x32x128xbf16>
    tpu.vector_store %arg5[%c2_48, %c0_49, %c0_50], %91 {strides = array<i32>} : memref<4x32x128xbf16, #tpu.memory_space<vmem>>, vector<1x32x128xbf16>,
    %92 = vector.broadcast %58 : vector<32x1xf32> to vector<32x128xf32>
    %93 = arith.mulf %19, %92 : vector<32x128xf32>
    %94 = vector.broadcast %61 : vector<32x1xf32> to vector<32x128xf32>
    %95 = arith.addf %93, %94 : vector<32x128xf32>
    %cst_51 = arith.constant 0.000000e+00 : f32
    %96 = vector.broadcast %cst_51 : f32 to vector<32x128xf32>
    %97 = arith.maximumf %95, %96 : vector<32x128xf32>
    %98 = arith.truncf %97 : vector<32x128xf32> to vector<32x128xbf16>
    %c3_52 = arith.constant 3 : index
    %c0_53 = arith.constant 0 : index
    %c0_54 = arith.constant 0 : index
    %99 = vector.load %arg5[%c3_52, %c0_53, %c0_54] : memref<4x32x128xbf16, #tpu.memory_space<vmem>>, vector<1x32x128xbf16>
    %100 = vector.shape_cast %99 : vector<1x32x128xbf16> to vector<32x128xbf16>
    %101 = vector.shape_cast %98 : vector<32x128xbf16> to vector<1x32x128xbf16>
    tpu.vector_store %arg5[%c3_52, %c0_53, %c0_54], %101 {strides = array<i32>} : memref<4x32x128xbf16, #tpu.memory_space<vmem>>, vector<1x32x128xbf16>,
    return
  }
  func.func @transform_0(%arg0: i32) -> (i32, i32, i32) {
    %c0_i32 = arith.constant 0 : i32
    %c0_i32_0 = arith.constant 0 : i32
    %c0_i32_1 = arith.constant 0 : i32
    return %c0_i32, %arg0, %c0_i32_0 : i32, i32, i32
  }
  func.func @transform_1(%arg0: i32) -> (i32, i32, i32) {
    %c0_i32 = arith.constant 0 : i32
    %c0_i32_0 = arith.constant 0 : i32
    %c0_i32_1 = arith.constant 0 : i32
    %c0_i32_2 = arith.constant 0 : i32
    return %c0_i32, %c0_i32_0, %c0_i32_1 : i32, i32, i32
  }
  func.func @transform_2(%arg0: i32) -> (i32, i32) {
    %c0_i32 = arith.constant 0 : i32
    %c0_i32_0 = arith.constant 0 : i32
    return %arg0, %c0_i32 : i32, i32
  }
  func.func @transform_3(%arg0: i32) -> (i32, i32) {
    %c0_i32 = arith.constant 0 : i32
    %c0_i32_0 = arith.constant 0 : i32
    return %arg0, %c0_i32 : i32, i32
  }
  func.func @transform_4(%arg0: i32) -> (i32, i32, i32) {
    %c0_i32 = arith.constant 0 : i32
    %c0_i32_0 = arith.constant 0 : i32
    %c0_i32_1 = arith.constant 0 : i32
    return %c0_i32, %arg0, %c0_i32_0 : i32, i32, i32
  }
}

module attributes {stable_mosaic.version = 11 : i64} {
  func.func @_convt_bn_relu_kernel(%arg0: i32, %arg1: memref<4x16x128xbf16, #tpu.memory_space<vmem>>, %arg2: memref<4x128x512xbf16, #tpu.memory_space<vmem>>, %arg3: memref<16x1xf32, #tpu.memory_space<vmem>>, %arg4: memref<16x1xf32, #tpu.memory_space<vmem>>, %arg5: memref<4x16x512xbf16, #tpu.memory_space<vmem>>) attributes {dimension_semantics = [#tpu.dimension_semantics<parallel>], iteration_bounds = array<i64: 1>, scalar_prefetch = 0 : i64, scratch_operands = 0 : i64, tpu.core_type = #tpu.core_type<tc>, window_params = [{transform_indices = @transform_0, window_bounds = array<i64: 4, 16, 128>}, {pipeline_mode = #tpu.pipeline_mode<synchronous>, transform_indices = @transform_1, window_bounds = array<i64: 4, 128, 512>}, {transform_indices = @transform_2, window_bounds = array<i64: 16, 1>}, {transform_indices = @transform_3, window_bounds = array<i64: 16, 1>}, {transform_indices = @transform_4, window_bounds = array<i64: 4, 16, 512>}]} {
    %c0 = arith.constant 0 : index
    %c0_0 = arith.constant 0 : index
    %c0_1 = arith.constant 0 : index
    %0 = vector.load %arg1[%c0, %c0_0, %c0_1] : memref<4x16x128xbf16, #tpu.memory_space<vmem>>, vector<1x16x128xbf16>
    %1 = vector.shape_cast %0 : vector<1x16x128xbf16> to vector<16x128xbf16>
    %c0_2 = arith.constant 0 : index
    %c0_3 = arith.constant 0 : index
    %c0_4 = arith.constant 0 : index
    %2 = vector.load %arg2[%c0_2, %c0_3, %c0_4] : memref<4x128x512xbf16, #tpu.memory_space<vmem>>, vector<1x128x512xbf16>
    %3 = vector.shape_cast %2 : vector<1x128x512xbf16> to vector<128x512xbf16>
    %cst = arith.constant dense<0.000000e+00> : vector<16x512xf32>
    %4 = tpu.matmul %1, %3, %cst {dimension_numbers = #tpu.dot_dimension_numbers<[1], [0], [0], [1], [0, 0, 1, 1], [], []>} : vector<16x128xbf16>, vector<128x512xbf16>, vector<16x512xf32> -> vector<16x512xf32>
    %c1 = arith.constant 1 : index
    %c0_5 = arith.constant 0 : index
    %c0_6 = arith.constant 0 : index
    %5 = vector.load %arg1[%c1, %c0_5, %c0_6] : memref<4x16x128xbf16, #tpu.memory_space<vmem>>, vector<1x16x128xbf16>
    %6 = vector.shape_cast %5 : vector<1x16x128xbf16> to vector<16x128xbf16>
    %c1_7 = arith.constant 1 : index
    %c0_8 = arith.constant 0 : index
    %c0_9 = arith.constant 0 : index
    %7 = vector.load %arg2[%c1_7, %c0_8, %c0_9] : memref<4x128x512xbf16, #tpu.memory_space<vmem>>, vector<1x128x512xbf16>
    %8 = vector.shape_cast %7 : vector<1x128x512xbf16> to vector<128x512xbf16>
    %cst_10 = arith.constant dense<0.000000e+00> : vector<16x512xf32>
    %9 = tpu.matmul %6, %8, %cst_10 {dimension_numbers = #tpu.dot_dimension_numbers<[1], [0], [0], [1], [0, 0, 1, 1], [], []>} : vector<16x128xbf16>, vector<128x512xbf16>, vector<16x512xf32> -> vector<16x512xf32>
    %c2 = arith.constant 2 : index
    %c0_11 = arith.constant 0 : index
    %c0_12 = arith.constant 0 : index
    %10 = vector.load %arg1[%c2, %c0_11, %c0_12] : memref<4x16x128xbf16, #tpu.memory_space<vmem>>, vector<1x16x128xbf16>
    %11 = vector.shape_cast %10 : vector<1x16x128xbf16> to vector<16x128xbf16>
    %c2_13 = arith.constant 2 : index
    %c0_14 = arith.constant 0 : index
    %c0_15 = arith.constant 0 : index
    %12 = vector.load %arg2[%c2_13, %c0_14, %c0_15] : memref<4x128x512xbf16, #tpu.memory_space<vmem>>, vector<1x128x512xbf16>
    %13 = vector.shape_cast %12 : vector<1x128x512xbf16> to vector<128x512xbf16>
    %cst_16 = arith.constant dense<0.000000e+00> : vector<16x512xf32>
    %14 = tpu.matmul %11, %13, %cst_16 {dimension_numbers = #tpu.dot_dimension_numbers<[1], [0], [0], [1], [0, 0, 1, 1], [], []>} : vector<16x128xbf16>, vector<128x512xbf16>, vector<16x512xf32> -> vector<16x512xf32>
    %c3 = arith.constant 3 : index
    %c0_17 = arith.constant 0 : index
    %c0_18 = arith.constant 0 : index
    %15 = vector.load %arg1[%c3, %c0_17, %c0_18] : memref<4x16x128xbf16, #tpu.memory_space<vmem>>, vector<1x16x128xbf16>
    %16 = vector.shape_cast %15 : vector<1x16x128xbf16> to vector<16x128xbf16>
    %c3_19 = arith.constant 3 : index
    %c0_20 = arith.constant 0 : index
    %c0_21 = arith.constant 0 : index
    %17 = vector.load %arg2[%c3_19, %c0_20, %c0_21] : memref<4x128x512xbf16, #tpu.memory_space<vmem>>, vector<1x128x512xbf16>
    %18 = vector.shape_cast %17 : vector<1x128x512xbf16> to vector<128x512xbf16>
    %cst_22 = arith.constant dense<0.000000e+00> : vector<16x512xf32>
    %19 = tpu.matmul %16, %18, %cst_22 {dimension_numbers = #tpu.dot_dimension_numbers<[1], [0], [0], [1], [0, 0, 1, 1], [], []>} : vector<16x128xbf16>, vector<128x512xbf16>, vector<16x512xf32> -> vector<16x512xf32>
    %cst_23 = arith.constant dense<0.000000e+00> : vector<16xf32>
    %20 = vector.multi_reduction <add>, %4, %cst_23 [1] : vector<16x512xf32> to vector<16xf32>
    %21 = vector.shape_cast %20 : vector<16xf32> to vector<16x1xf32>
    %22 = arith.mulf %4, %4 : vector<16x512xf32>
    %cst_24 = arith.constant dense<0.000000e+00> : vector<16xf32>
    %23 = vector.multi_reduction <add>, %22, %cst_24 [1] : vector<16x512xf32> to vector<16xf32>
    %24 = vector.shape_cast %23 : vector<16xf32> to vector<16x1xf32>
    %cst_25 = arith.constant dense<0.000000e+00> : vector<16xf32>
    %25 = vector.multi_reduction <add>, %9, %cst_25 [1] : vector<16x512xf32> to vector<16xf32>
    %26 = vector.shape_cast %25 : vector<16xf32> to vector<16x1xf32>
    %27 = arith.addf %21, %26 : vector<16x1xf32>
    %28 = arith.mulf %9, %9 : vector<16x512xf32>
    %cst_26 = arith.constant dense<0.000000e+00> : vector<16xf32>
    %29 = vector.multi_reduction <add>, %28, %cst_26 [1] : vector<16x512xf32> to vector<16xf32>
    %30 = vector.shape_cast %29 : vector<16xf32> to vector<16x1xf32>
    %31 = arith.addf %24, %30 : vector<16x1xf32>
    %cst_27 = arith.constant dense<0.000000e+00> : vector<16xf32>
    %32 = vector.multi_reduction <add>, %14, %cst_27 [1] : vector<16x512xf32> to vector<16xf32>
    %33 = vector.shape_cast %32 : vector<16xf32> to vector<16x1xf32>
    %34 = arith.addf %27, %33 : vector<16x1xf32>
    %35 = arith.mulf %14, %14 : vector<16x512xf32>
    %cst_28 = arith.constant dense<0.000000e+00> : vector<16xf32>
    %36 = vector.multi_reduction <add>, %35, %cst_28 [1] : vector<16x512xf32> to vector<16xf32>
    %37 = vector.shape_cast %36 : vector<16xf32> to vector<16x1xf32>
    %38 = arith.addf %31, %37 : vector<16x1xf32>
    %cst_29 = arith.constant dense<0.000000e+00> : vector<16xf32>
    %39 = vector.multi_reduction <add>, %19, %cst_29 [1] : vector<16x512xf32> to vector<16xf32>
    %40 = vector.shape_cast %39 : vector<16xf32> to vector<16x1xf32>
    %41 = arith.addf %34, %40 : vector<16x1xf32>
    %42 = arith.mulf %19, %19 : vector<16x512xf32>
    %cst_30 = arith.constant dense<0.000000e+00> : vector<16xf32>
    %43 = vector.multi_reduction <add>, %42, %cst_30 [1] : vector<16x512xf32> to vector<16xf32>
    %44 = vector.shape_cast %43 : vector<16xf32> to vector<16x1xf32>
    %45 = arith.addf %38, %44 : vector<16x1xf32>
    %cst_31 = arith.constant 4.8828125E-4 : f32
    %46 = vector.broadcast %cst_31 : f32 to vector<16x1xf32>
    %47 = arith.mulf %41, %46 : vector<16x1xf32>
    %cst_32 = arith.constant 4.8828125E-4 : f32
    %48 = vector.broadcast %cst_32 : f32 to vector<16x1xf32>
    %49 = arith.mulf %45, %48 : vector<16x1xf32>
    %50 = arith.mulf %47, %47 : vector<16x1xf32>
    %51 = arith.subf %49, %50 : vector<16x1xf32>
    %cst_33 = arith.constant 0.000000e+00 : f32
    %52 = vector.broadcast %cst_33 : f32 to vector<16x1xf32>
    %53 = arith.maximumf %51, %52 : vector<16x1xf32>
    %c0_34 = arith.constant 0 : index
    %c0_35 = arith.constant 0 : index
    %54 = vector.load %arg3[%c0_34, %c0_35] : memref<16x1xf32, #tpu.memory_space<vmem>>, vector<16x1xf32>
    %cst_36 = arith.constant 9.99999974E-6 : f32
    %55 = vector.broadcast %cst_36 : f32 to vector<16x1xf32>
    %56 = arith.addf %53, %55 : vector<16x1xf32>
    %57 = math.rsqrt %56 : vector<16x1xf32>
    %58 = arith.mulf %54, %57 : vector<16x1xf32>
    %c0_37 = arith.constant 0 : index
    %c0_38 = arith.constant 0 : index
    %59 = vector.load %arg4[%c0_37, %c0_38] : memref<16x1xf32, #tpu.memory_space<vmem>>, vector<16x1xf32>
    %60 = arith.mulf %47, %58 : vector<16x1xf32>
    %61 = arith.subf %59, %60 : vector<16x1xf32>
    %62 = vector.broadcast %58 : vector<16x1xf32> to vector<16x512xf32>
    %63 = arith.mulf %4, %62 : vector<16x512xf32>
    %64 = vector.broadcast %61 : vector<16x1xf32> to vector<16x512xf32>
    %65 = arith.addf %63, %64 : vector<16x512xf32>
    %cst_39 = arith.constant 0.000000e+00 : f32
    %66 = vector.broadcast %cst_39 : f32 to vector<16x512xf32>
    %67 = arith.maximumf %65, %66 : vector<16x512xf32>
    %68 = arith.truncf %67 : vector<16x512xf32> to vector<16x512xbf16>
    %c0_40 = arith.constant 0 : index
    %c0_41 = arith.constant 0 : index
    %c0_42 = arith.constant 0 : index
    %69 = vector.load %arg5[%c0_40, %c0_41, %c0_42] : memref<4x16x512xbf16, #tpu.memory_space<vmem>>, vector<1x16x512xbf16>
    %70 = vector.shape_cast %69 : vector<1x16x512xbf16> to vector<16x512xbf16>
    %71 = vector.shape_cast %68 : vector<16x512xbf16> to vector<1x16x512xbf16>
    tpu.vector_store %arg5[%c0_40, %c0_41, %c0_42], %71 {strides = array<i32>} : memref<4x16x512xbf16, #tpu.memory_space<vmem>>, vector<1x16x512xbf16>,
    %72 = vector.broadcast %58 : vector<16x1xf32> to vector<16x512xf32>
    %73 = arith.mulf %9, %72 : vector<16x512xf32>
    %74 = vector.broadcast %61 : vector<16x1xf32> to vector<16x512xf32>
    %75 = arith.addf %73, %74 : vector<16x512xf32>
    %cst_43 = arith.constant 0.000000e+00 : f32
    %76 = vector.broadcast %cst_43 : f32 to vector<16x512xf32>
    %77 = arith.maximumf %75, %76 : vector<16x512xf32>
    %78 = arith.truncf %77 : vector<16x512xf32> to vector<16x512xbf16>
    %c1_44 = arith.constant 1 : index
    %c0_45 = arith.constant 0 : index
    %c0_46 = arith.constant 0 : index
    %79 = vector.load %arg5[%c1_44, %c0_45, %c0_46] : memref<4x16x512xbf16, #tpu.memory_space<vmem>>, vector<1x16x512xbf16>
    %80 = vector.shape_cast %79 : vector<1x16x512xbf16> to vector<16x512xbf16>
    %81 = vector.shape_cast %78 : vector<16x512xbf16> to vector<1x16x512xbf16>
    tpu.vector_store %arg5[%c1_44, %c0_45, %c0_46], %81 {strides = array<i32>} : memref<4x16x512xbf16, #tpu.memory_space<vmem>>, vector<1x16x512xbf16>,
    %82 = vector.broadcast %58 : vector<16x1xf32> to vector<16x512xf32>
    %83 = arith.mulf %14, %82 : vector<16x512xf32>
    %84 = vector.broadcast %61 : vector<16x1xf32> to vector<16x512xf32>
    %85 = arith.addf %83, %84 : vector<16x512xf32>
    %cst_47 = arith.constant 0.000000e+00 : f32
    %86 = vector.broadcast %cst_47 : f32 to vector<16x512xf32>
    %87 = arith.maximumf %85, %86 : vector<16x512xf32>
    %88 = arith.truncf %87 : vector<16x512xf32> to vector<16x512xbf16>
    %c2_48 = arith.constant 2 : index
    %c0_49 = arith.constant 0 : index
    %c0_50 = arith.constant 0 : index
    %89 = vector.load %arg5[%c2_48, %c0_49, %c0_50] : memref<4x16x512xbf16, #tpu.memory_space<vmem>>, vector<1x16x512xbf16>
    %90 = vector.shape_cast %89 : vector<1x16x512xbf16> to vector<16x512xbf16>
    %91 = vector.shape_cast %88 : vector<16x512xbf16> to vector<1x16x512xbf16>
    tpu.vector_store %arg5[%c2_48, %c0_49, %c0_50], %91 {strides = array<i32>} : memref<4x16x512xbf16, #tpu.memory_space<vmem>>, vector<1x16x512xbf16>,
    %92 = vector.broadcast %58 : vector<16x1xf32> to vector<16x512xf32>
    %93 = arith.mulf %19, %92 : vector<16x512xf32>
    %94 = vector.broadcast %61 : vector<16x1xf32> to vector<16x512xf32>
    %95 = arith.addf %93, %94 : vector<16x512xf32>
    %cst_51 = arith.constant 0.000000e+00 : f32
    %96 = vector.broadcast %cst_51 : f32 to vector<16x512xf32>
    %97 = arith.maximumf %95, %96 : vector<16x512xf32>
    %98 = arith.truncf %97 : vector<16x512xf32> to vector<16x512xbf16>
    %c3_52 = arith.constant 3 : index
    %c0_53 = arith.constant 0 : index
    %c0_54 = arith.constant 0 : index
    %99 = vector.load %arg5[%c3_52, %c0_53, %c0_54] : memref<4x16x512xbf16, #tpu.memory_space<vmem>>, vector<1x16x512xbf16>
    %100 = vector.shape_cast %99 : vector<1x16x512xbf16> to vector<16x512xbf16>
    %101 = vector.shape_cast %98 : vector<16x512xbf16> to vector<1x16x512xbf16>
    tpu.vector_store %arg5[%c3_52, %c0_53, %c0_54], %101 {strides = array<i32>} : memref<4x16x512xbf16, #tpu.memory_space<vmem>>, vector<1x16x512xbf16>,
    return
  }
  func.func @transform_0(%arg0: i32) -> (i32, i32, i32) {
    %c0_i32 = arith.constant 0 : i32
    %c0_i32_0 = arith.constant 0 : i32
    %c0_i32_1 = arith.constant 0 : i32
    return %c0_i32, %arg0, %c0_i32_0 : i32, i32, i32
  }
  func.func @transform_1(%arg0: i32) -> (i32, i32, i32) {
    %c0_i32 = arith.constant 0 : i32
    %c0_i32_0 = arith.constant 0 : i32
    %c0_i32_1 = arith.constant 0 : i32
    %c0_i32_2 = arith.constant 0 : i32
    return %c0_i32, %c0_i32_0, %c0_i32_1 : i32, i32, i32
  }
  func.func @transform_2(%arg0: i32) -> (i32, i32) {
    %c0_i32 = arith.constant 0 : i32
    %c0_i32_0 = arith.constant 0 : i32
    return %arg0, %c0_i32 : i32, i32
  }
  func.func @transform_3(%arg0: i32) -> (i32, i32) {
    %c0_i32 = arith.constant 0 : i32
    %c0_i32_0 = arith.constant 0 : i32
    return %arg0, %c0_i32 : i32, i32
  }
  func.func @transform_4(%arg0: i32) -> (i32, i32, i32) {
    %c0_i32 = arith.constant 0 : i32
    %c0_i32_0 = arith.constant 0 : i32
    %c0_i32_1 = arith.constant 0 : i32
    return %c0_i32, %arg0, %c0_i32_0 : i32, i32, i32
  }
}

module attributes {stable_mosaic.version = 11 : i64} {
  func.func @_convt_tanh_kernel(%arg0: i32, %arg1: memref<4x3x64xbf16, #tpu.memory_space<vmem>>, %arg2: memref<4x64x1024xbf16, #tpu.memory_space<vmem>>, %arg3: memref<4x3x1024xf32, #tpu.memory_space<vmem>>) attributes {dimension_semantics = [#tpu.dimension_semantics<parallel>], iteration_bounds = array<i64: 2>, scalar_prefetch = 0 : i64, scratch_operands = 0 : i64, tpu.core_type = #tpu.core_type<tc>, window_params = [{pipeline_mode = #tpu.pipeline_mode<synchronous>, transform_indices = @transform_0, window_bounds = array<i64: 4, 3, 64>}, {transform_indices = @transform_1, window_bounds = array<i64: 4, 64, 1024>}, {transform_indices = @transform_2, window_bounds = array<i64: 4, 3, 1024>}]} {
    %c0 = arith.constant 0 : index
    %c0_0 = arith.constant 0 : index
    %c0_1 = arith.constant 0 : index
    %0 = vector.load %arg1[%c0, %c0_0, %c0_1] : memref<4x3x64xbf16, #tpu.memory_space<vmem>>, vector<1x3x64xbf16>
    %1 = vector.shape_cast %0 : vector<1x3x64xbf16> to vector<3x64xbf16>
    %c0_2 = arith.constant 0 : index
    %c0_3 = arith.constant 0 : index
    %c0_4 = arith.constant 0 : index
    %2 = vector.load %arg2[%c0_2, %c0_3, %c0_4] : memref<4x64x1024xbf16, #tpu.memory_space<vmem>>, vector<1x64x1024xbf16>
    %3 = vector.shape_cast %2 : vector<1x64x1024xbf16> to vector<64x1024xbf16>
    %cst = arith.constant dense<0.000000e+00> : vector<3x1024xf32>
    %4 = tpu.matmul %1, %3, %cst {dimension_numbers = #tpu.dot_dimension_numbers<[1], [0], [0], [1], [0, 0, 1, 1], [], []>} : vector<3x64xbf16>, vector<64x1024xbf16>, vector<3x1024xf32> -> vector<3x1024xf32>
    %5 = math.tanh %4 : vector<3x1024xf32>
    %c0_5 = arith.constant 0 : index
    %c0_6 = arith.constant 0 : index
    %c0_7 = arith.constant 0 : index
    %6 = vector.load %arg3[%c0_5, %c0_6, %c0_7] : memref<4x3x1024xf32, #tpu.memory_space<vmem>>, vector<1x3x1024xf32>
    %7 = vector.shape_cast %6 : vector<1x3x1024xf32> to vector<3x1024xf32>
    %8 = vector.shape_cast %5 : vector<3x1024xf32> to vector<1x3x1024xf32>
    tpu.vector_store %arg3[%c0_5, %c0_6, %c0_7], %8 {strides = array<i32>} : memref<4x3x1024xf32, #tpu.memory_space<vmem>>, vector<1x3x1024xf32>,
    %c1 = arith.constant 1 : index
    %c0_8 = arith.constant 0 : index
    %c0_9 = arith.constant 0 : index
    %9 = vector.load %arg1[%c1, %c0_8, %c0_9] : memref<4x3x64xbf16, #tpu.memory_space<vmem>>, vector<1x3x64xbf16>
    %10 = vector.shape_cast %9 : vector<1x3x64xbf16> to vector<3x64xbf16>
    %c1_10 = arith.constant 1 : index
    %c0_11 = arith.constant 0 : index
    %c0_12 = arith.constant 0 : index
    %11 = vector.load %arg2[%c1_10, %c0_11, %c0_12] : memref<4x64x1024xbf16, #tpu.memory_space<vmem>>, vector<1x64x1024xbf16>
    %12 = vector.shape_cast %11 : vector<1x64x1024xbf16> to vector<64x1024xbf16>
    %cst_13 = arith.constant dense<0.000000e+00> : vector<3x1024xf32>
    %13 = tpu.matmul %10, %12, %cst_13 {dimension_numbers = #tpu.dot_dimension_numbers<[1], [0], [0], [1], [0, 0, 1, 1], [], []>} : vector<3x64xbf16>, vector<64x1024xbf16>, vector<3x1024xf32> -> vector<3x1024xf32>
    %14 = math.tanh %13 : vector<3x1024xf32>
    %c1_14 = arith.constant 1 : index
    %c0_15 = arith.constant 0 : index
    %c0_16 = arith.constant 0 : index
    %15 = vector.load %arg3[%c1_14, %c0_15, %c0_16] : memref<4x3x1024xf32, #tpu.memory_space<vmem>>, vector<1x3x1024xf32>
    %16 = vector.shape_cast %15 : vector<1x3x1024xf32> to vector<3x1024xf32>
    %17 = vector.shape_cast %14 : vector<3x1024xf32> to vector<1x3x1024xf32>
    tpu.vector_store %arg3[%c1_14, %c0_15, %c0_16], %17 {strides = array<i32>} : memref<4x3x1024xf32, #tpu.memory_space<vmem>>, vector<1x3x1024xf32>,
    %c2 = arith.constant 2 : index
    %c0_17 = arith.constant 0 : index
    %c0_18 = arith.constant 0 : index
    %18 = vector.load %arg1[%c2, %c0_17, %c0_18] : memref<4x3x64xbf16, #tpu.memory_space<vmem>>, vector<1x3x64xbf16>
    %19 = vector.shape_cast %18 : vector<1x3x64xbf16> to vector<3x64xbf16>
    %c2_19 = arith.constant 2 : index
    %c0_20 = arith.constant 0 : index
    %c0_21 = arith.constant 0 : index
    %20 = vector.load %arg2[%c2_19, %c0_20, %c0_21] : memref<4x64x1024xbf16, #tpu.memory_space<vmem>>, vector<1x64x1024xbf16>
    %21 = vector.shape_cast %20 : vector<1x64x1024xbf16> to vector<64x1024xbf16>
    %cst_22 = arith.constant dense<0.000000e+00> : vector<3x1024xf32>
    %22 = tpu.matmul %19, %21, %cst_22 {dimension_numbers = #tpu.dot_dimension_numbers<[1], [0], [0], [1], [0, 0, 1, 1], [], []>} : vector<3x64xbf16>, vector<64x1024xbf16>, vector<3x1024xf32> -> vector<3x1024xf32>
    %23 = math.tanh %22 : vector<3x1024xf32>
    %c2_23 = arith.constant 2 : index
    %c0_24 = arith.constant 0 : index
    %c0_25 = arith.constant 0 : index
    %24 = vector.load %arg3[%c2_23, %c0_24, %c0_25] : memref<4x3x1024xf32, #tpu.memory_space<vmem>>, vector<1x3x1024xf32>
    %25 = vector.shape_cast %24 : vector<1x3x1024xf32> to vector<3x1024xf32>
    %26 = vector.shape_cast %23 : vector<3x1024xf32> to vector<1x3x1024xf32>
    tpu.vector_store %arg3[%c2_23, %c0_24, %c0_25], %26 {strides = array<i32>} : memref<4x3x1024xf32, #tpu.memory_space<vmem>>, vector<1x3x1024xf32>,
    %c3 = arith.constant 3 : index
    %c0_26 = arith.constant 0 : index
    %c0_27 = arith.constant 0 : index
    %27 = vector.load %arg1[%c3, %c0_26, %c0_27] : memref<4x3x64xbf16, #tpu.memory_space<vmem>>, vector<1x3x64xbf16>
    %28 = vector.shape_cast %27 : vector<1x3x64xbf16> to vector<3x64xbf16>
    %c3_28 = arith.constant 3 : index
    %c0_29 = arith.constant 0 : index
    %c0_30 = arith.constant 0 : index
    %29 = vector.load %arg2[%c3_28, %c0_29, %c0_30] : memref<4x64x1024xbf16, #tpu.memory_space<vmem>>, vector<1x64x1024xbf16>
    %30 = vector.shape_cast %29 : vector<1x64x1024xbf16> to vector<64x1024xbf16>
    %cst_31 = arith.constant dense<0.000000e+00> : vector<3x1024xf32>
    %31 = tpu.matmul %28, %30, %cst_31 {dimension_numbers = #tpu.dot_dimension_numbers<[1], [0], [0], [1], [0, 0, 1, 1], [], []>} : vector<3x64xbf16>, vector<64x1024xbf16>, vector<3x1024xf32> -> vector<3x1024xf32>
    %32 = math.tanh %31 : vector<3x1024xf32>
    %c3_32 = arith.constant 3 : index
    %c0_33 = arith.constant 0 : index
    %c0_34 = arith.constant 0 : index
    %33 = vector.load %arg3[%c3_32, %c0_33, %c0_34] : memref<4x3x1024xf32, #tpu.memory_space<vmem>>, vector<1x3x1024xf32>
    %34 = vector.shape_cast %33 : vector<1x3x1024xf32> to vector<3x1024xf32>
    %35 = vector.shape_cast %32 : vector<3x1024xf32> to vector<1x3x1024xf32>
    tpu.vector_store %arg3[%c3_32, %c0_33, %c0_34], %35 {strides = array<i32>} : memref<4x3x1024xf32, #tpu.memory_space<vmem>>, vector<1x3x1024xf32>,
    return
  }
  func.func @transform_0(%arg0: i32) -> (i32, i32, i32) {
    %c0_i32 = arith.constant 0 : i32
    %c0_i32_0 = arith.constant 0 : i32
    %c0_i32_1 = arith.constant 0 : i32
    %c0_i32_2 = arith.constant 0 : i32
    return %c0_i32, %c0_i32_0, %c0_i32_1 : i32, i32, i32
  }
  func.func @transform_1(%arg0: i32) -> (i32, i32, i32) {
    %c0_i32 = arith.constant 0 : i32
    %c0_i32_0 = arith.constant 0 : i32
    %c0_i32_1 = arith.constant 0 : i32
    return %c0_i32, %c0_i32_0, %arg0 : i32, i32, i32
  }
  func.func @transform_2(%arg0: i32) -> (i32, i32, i32) {
    %c0_i32 = arith.constant 0 : i32
    %c0_i32_0 = arith.constant 0 : i32
    %c0_i32_1 = arith.constant 0 : i32
    return %c0_i32, %c0_i32_0, %arg0 : i32, i32, i32
  }
}

</mosaic_0001>

<bundles_post_ra>
// kernel: generator_forward.5
= control target key start
LH: loop header
LB: loop body
LE: loop exit
PB: predicated region body
PF: predicated region fallthrough
CT: control target
= control target key end

     0   :  { %vm660_vm0 = vcmask 261120   ;;  %vm1237_vm1 = vcmask 257024   ;;  %s2178_s1 = inlined_call_operand.vmem [shape: bf16[1,512,32], index: 1, kind: input, shape index: {}]   ;;  %s2179_s0 = inlined_call_operand.vmem [shape: bf16[1,128,512], index: 0, kind: input, shape index: {}]   ;;  %s2180_s2 = inlined_call_operand.vmem [shape: f32[128,1], index: 2, kind: input, shape index: {}]   ;;  %s2181_s3 = inlined_call_operand.vmem [shape: f32[128,1], index: 3, kind: input, shape index: {}]   ;;  %s2182_s4 = inlined_call_operand.vmem [shape: bf16[1,128,32], index: 4, kind: output, shape index: {}]  }
   0x1   :  { %v1485_v0 = vld [vmem:[%s2178_s1 + $0x40] sm:$0xff]   ;;  %v1489_v4 = vld [vmem:[%s2178_s1 + $0x48] sm:$0xff]   ;;  %v1493_v8 = vld [vmem:[%s2178_s1 + $0x50] sm:$0xff]  }
   0x2   :  { %v1486_v1 = vld [vmem:[%s2178_s1 + $0xc0] sm:$0xff]   ;;  %1354 = vmatprep.subr.bf16.mxu0 %v1485_v0  ;;  %v1490_v5 = vld [vmem:[%s2178_s1 + $0xc8] sm:$0xff]   ;;  %v1494_v9 = vld [vmem:[%s2178_s1 + $0xd0] sm:$0xff]  }
   0x3   :  { %v1487_v2 = vld [vmem:[%s2178_s1] sm:$0xff]   ;;  %1418 = vmatprep.subr.bf16.mxu1 %v1486_v1  ;;  %v1491_v6 = vld [vmem:[%s2178_s1 + $0x8] sm:$0xff]   ;;  %v1495_v10 = vld [vmem:[%s2178_s1 + $0x10] sm:$0xff]  }
   0x4   :  { %v1488_v3 = vld [vmem:[%s2178_s1 + $0x80] sm:$0xff]   ;;  %1355 = vmatpush3.bf16.msra.mxu0 %v1487_v2  ;;  %v1492_v7 = vld [vmem:[%s2178_s1 + $0x88] sm:$0xff]   ;;  %v1496_v11 = vld [vmem:[%s2178_s1 + $0x90] sm:$0xff]  }
   0x5   :  { %1419 = vmatpush3.bf16.msra.mxu1 %v1488_v3  ;;  %1356 = vmatprep.subr.bf16.mxu0 %v1489_v4  ;;  %v1497_v12 = vld [vmem:[%s2178_s1 + $0x58] sm:$0xff]   ;;  %v1501_v16 = vld [vmem:[%s2178_s1 + $0x60] sm:$0xff]   ;;  %v1505_v20 = vld [vmem:[%s2178_s1 + $0x68] sm:$0xff]  }
   0x6   :  { %1420 = vmatprep.subr.bf16.mxu1 %v1490_v5  ;;  %v1498_v13 = vld [vmem:[%s2178_s1 + $0xd8] sm:$0xff]   ;;  %v1502_v17 = vld [vmem:[%s2178_s1 + $0xe0] sm:$0xff]   ;;  %v1506_v21 = vld [vmem:[%s2178_s1 + $0xe8] sm:$0xff]  }
   0x7   :  { %v1499_v14 = vld [vmem:[%s2178_s1 + $0x18] sm:$0xff]   ;;  %v1503_v18 = vld [vmem:[%s2178_s1 + $0x20] sm:$0xff]   ;;  %v1507_v22 = vld [vmem:[%s2178_s1 + $0x28] sm:$0xff]  }
   0x8   :  { %1357 = vmatpush3.bf16.msra.mxu0 %v1491_v6  ;;  %v1500_v15 = vld [vmem:[%s2178_s1 + $0x98] sm:$0xff]   ;;  %v1504_v19 = vld [vmem:[%s2178_s1 + $0xa0] sm:$0xff]   ;;  %v1508_v23 = vld [vmem:[%s2178_s1 + $0xa8] sm:$0xff]  }
   0x9   :  { %1421 = vmatpush3.bf16.msra.mxu1 %v1492_v7  ;;  %1358 = vmatprep.subr.bf16.mxu0 %v1493_v8  ;;  %v1509_v24 = vld [vmem:[%s2178_s1 + $0x70] sm:$0xff]   ;;  %v1513_v28 = vld [vmem:[%s2178_s1 + $0x78] sm:$0xff]  }
   0xa   :  { %1422 = vmatprep.subr.bf16.mxu1 %v1494_v9  ;;  %v1510_v25 = vld [vmem:[%s2178_s1 + $0xf0] sm:$0xff]   ;;  %v1514_v29 = vld [vmem:[%s2178_s1 + $0xf8] sm:$0xff]  }
   0xb   :  { %v1511_v26 = vld [vmem:[%s2178_s1 + $0x30] sm:$0xff]   ;;  %v1515_v30 = vld [vmem:[%s2178_s1 + $0x38] sm:$0xff]  }
   0xc   :  { %1359 = vmatpush3.bf16.msra.mxu0 %v1495_v10  ;;  %v1512_v27 = vld [vmem:[%s2178_s1 + $0xb0] sm:$0xff]   ;;  %v1516_v31 = vld [vmem:[%s2178_s1 + $0xb8] sm:$0xff]  }
   0xd   :  { %1423 = vmatpush3.bf16.msra.mxu1 %v1496_v11  ;;  %1360 = vmatprep.subr.bf16.mxu0 %v1497_v12  ;;  %v1517_v32 = vld [vmem:[%s2179_s0] ss:$16 sps:$4 sm:$0xff]   ;;  %v1519_v33 = vld [vmem:[%s2179_s0 + $0x4] ss:$16 sps:$4 sm:$0xff]   ;;  %v1520_v34 = vld [vmem:[%s2179_s0 + $0x8] ss:$16 sps:$4 sm:$0xff]  }
   0xe   :  { %1424 = vmatprep.subr.bf16.mxu1 %v1498_v13  ;;  %v1522_v35 = vld [vmem:[%s2179_s0 + $0xc] ss:$16 sps:$4 sm:$0xff]   ;;  %498 = vmatprep.mubr.bf16.mxu0 %v1519_v33  ;;  %v1523_v36 = vld [vmem:[%s2179_s0 + $0x24] ss:$16 sps:$4 sm:$0xff]   ;;  %v1527_v38 = vld [vmem:[%s2179_s0 + $0x20] ss:$16 sps:$4 sm:$0xff]  }
   0xf   :  { %595 = vmatprep.mubr.bf16.mxu1 %v1522_v35  ;;  %v1525_v37 = vld [vmem:[%s2179_s0 + $0x2c] ss:$16 sps:$4 sm:$0xff]   ;;  %v1528_v39 = vld [vmem:[%s2179_s0 + $0x28] ss:$16 sps:$4 sm:$0xff]   ;;  %v1529_v40 = vld [vmem:[%s2179_s0 + $0x44] ss:$16 sps:$4 sm:$0xff]  }
  0x10   :  { %1361 = vmatpush3.bf16.msra.mxu0 %v1499_v14  ;;  %v1531_v41 = vld [vmem:[%s2179_s0 + $0x4c] ss:$16 sps:$4 sm:$0xff]   ;;  %v1533_v42 = vld [vmem:[%s2179_s0 + $0x40] ss:$16 sps:$4 sm:$0xff]   ;;  %v1534_v43 = vld [vmem:[%s2179_s0 + $0x48] ss:$16 sps:$4 sm:$0xff]  }
  0x11   :  { %1425 = vmatpush3.bf16.msra.mxu1 %v1500_v15  ;;  %1362 = vmatprep.subr.bf16.mxu0 %v1501_v16  ;;  %v1535_v44 = vld [vmem:[%s2179_s0 + $0x64] ss:$16 sps:$4 sm:$0xff]   ;;  %v1537_v45 = vld [vmem:[%s2179_s0 + $0x6c] ss:$16 sps:$4 sm:$0xff]   ;;  %v1539_v46 = vld [vmem:[%s2179_s0 + $0x60] ss:$16 sps:$4 sm:$0xff]  }
  0x12   :  { %1426 = vmatprep.subr.bf16.mxu1 %v1502_v17  ;;  %v1540_v47 = vld [vmem:[%s2179_s0 + $0x68] ss:$16 sps:$4 sm:$0xff]   ;;  %v1541_v48 = vld [vmem:[%s2179_s0 + $0x84] ss:$16 sps:$4 sm:$0xff]   ;;  %v1543_v49 = vld [vmem:[%s2179_s0 + $0x8c] ss:$16 sps:$4 sm:$0xff]  }
  0x13   :  { %v1545_v50 = vld [vmem:[%s2179_s0 + $0x80] ss:$16 sps:$4 sm:$0xff]   ;;  %v1546_v51 = vld [vmem:[%s2179_s0 + $0x88] ss:$16 sps:$4 sm:$0xff]   ;;  %v1547_v52 = vld [vmem:[%s2179_s0 + $0xa4] ss:$16 sps:$4 sm:$0xff]  }
  0x14   :  { %1363 = vmatpush3.bf16.msra.mxu0 %v1503_v18  ;;  %v1549_v53 = vld [vmem:[%s2179_s0 + $0xac] ss:$16 sps:$4 sm:$0xff]   ;;  %v1551_v54 = vld [vmem:[%s2179_s0 + $0xa0] ss:$16 sps:$4 sm:$0xff]   ;;  %v1552_v55 = vld [vmem:[%s2179_s0 + $0xa8] ss:$16 sps:$4 sm:$0xff]  }
  0x15   :  { %1427 = vmatpush3.bf16.msra.mxu1 %v1504_v19  ;;  %1364 = vmatprep.subr.bf16.mxu0 %v1505_v20  ;;  %v1553_v56 = vld [vmem:[%s2179_s0 + $0xc4] ss:$16 sps:$4 sm:$0xff]   ;;  %v1555_v57 = vld [vmem:[%s2179_s0 + $0xcc] ss:$16 sps:$4 sm:$0xff]   ;;  %v1557_v58 = vld [vmem:[%s2179_s0 + $0xc0] ss:$16 sps:$4 sm:$0xff]  }
  0x16   :  { %1428 = vmatprep.subr.bf16.mxu1 %v1506_v21  ;;  %v1558_v59 = vld [vmem:[%s2179_s0 + $0xc8] ss:$16 sps:$4 sm:$0xff]   ;;  %v1559_v60 = vld [vmem:[%s2179_s0 + $0xe4] ss:$16 sps:$4 sm:$0xff]   ;;  %v1561_v61 = vld [vmem:[%s2179_s0 + $0xec] ss:$16 sps:$4 sm:$0xff]  }
  0x17   :  { %v1563_v62 = vld [vmem:[%s2179_s0 + $0xe0] ss:$16 sps:$4 sm:$0xff]   ;;  %v1564_v63 = vld [vmem:[%s2179_s0 + $0xe8] ss:$16 sps:$4 sm:$0xff]  }
  0x18   :  { %1365 = vmatpush3.bf16.msra.mxu0 %v1507_v22 }
  0x19   :  { %1429 = vmatpush3.bf16.msra.mxu1 %v1508_v23  ;;  %1366 = vmatprep.subr.bf16.mxu0 %v1509_v24 }
  0x1a   :  { %1430 = vmatprep.subr.bf16.mxu1 %v1510_v25 }
  0x1c   :  { %1367 = vmatpush3.bf16.msra.mxu0 %v1511_v26 }
  0x1d   :  { %1431 = vmatpush3.bf16.msra.mxu1 %v1512_v27  ;;  %1368 = vmatprep.subr.bf16.mxu0 %v1513_v28 }
  0x1e   :  { %1432 = vmatprep.subr.bf16.mxu1 %v1514_v29 }
  0x20   :  { %1369 = vmatpush3.bf16.msra.mxu0 %v1515_v30 }
  0x21   :  { %1433 = vmatpush3.bf16.msra.mxu1 %v1516_v31 }
  0x23   :  { %499 = vmatmul.mubr.bf16.vlgmr.msra.gmra.mrb[0].mxu0 %v1517_v32 }
  0x24   :  { %596 = vmatmul.mubr.bf16.vlgmr.msra.gmra.mrb[0].mxu1 %v1520_v34  ;;  %506 = vmatprep.mubr.bf16.mxu0 %v1523_v36 }
  0x25   :  { %603 = vmatprep.mubr.bf16.mxu1 %v1525_v37 }
  0x2b   :  { %507 = vmatmul.mubr.bf16.gmra.mrb[4].mxu0 %v1527_v38 }
  0x2c   :  { %604 = vmatmul.mubr.bf16.gmra.mrb[4].mxu1 %v1528_v39  ;;  %514 = vmatprep.mubr.bf16.mxu0 %v1529_v40 }
  0x2d   :  { %611 = vmatprep.mubr.bf16.mxu1 %v1531_v41 }
  0x33   :  { %515 = vmatmul.mubr.bf16.gmra.mrb[8].mxu0 %v1533_v42 }
  0x34   :  { %612 = vmatmul.mubr.bf16.gmra.mrb[8].mxu1 %v1534_v43  ;;  %522 = vmatprep.mubr.bf16.mxu0 %v1535_v44 }
  0x35   :  { %619 = vmatprep.mubr.bf16.mxu1 %v1537_v45 }
  0x3b   :  { %523 = vmatmul.mubr.bf16.gmra.mrb[12].mxu0 %v1539_v46 }
  0x3c   :  { %620 = vmatmul.mubr.bf16.gmra.mrb[12].mxu1 %v1540_v47  ;;  %530 = vmatprep.mubr.bf16.mxu0 %v1541_v48 }
  0x3d   :  { %627 = vmatprep.mubr.bf16.mxu1 %v1543_v49 }
  0x43   :  { %531 = vmatmul.mubr.bf16.gmra.mrb[16].mxu0 %v1545_v50 }
  0x44   :  { %628 = vmatmul.mubr.bf16.gmra.mrb[16].mxu1 %v1546_v51  ;;  %538 = vmatprep.mubr.bf16.mxu0 %v1547_v52 }
  0x45   :  { %635 = vmatprep.mubr.bf16.mxu1 %v1549_v53 }
  0x4b   :  { %539 = vmatmul.mubr.bf16.gmra.mrb[20].mxu0 %v1551_v54 }
  0x4c   :  { %636 = vmatmul.mubr.bf16.gmra.mrb[20].mxu1 %v1552_v55  ;;  %546 = vmatprep.mubr.bf16.mxu0 %v1553_v56 }
  0x4d   :  { %643 = vmatprep.mubr.bf16.mxu1 %v1555_v57 }
  0x53   :  { %547 = vmatmul.mubr.bf16.gmra.mrb[24].mxu0 %v1557_v58 }
  0x54   :  { %644 = vmatmul.mubr.bf16.gmra.mrb[24].mxu1 %v1558_v59  ;;  %554 = vmatprep.mubr.bf16.mxu0 %v1559_v60 }
  0x55   :  { %651 = vmatprep.mubr.bf16.mxu1 %v1561_v61 }
  0x5b   :  { %555 = vmatmul.mubr.bf16.gmra.mrb[28].mxu0 %v1563_v62 }
  0x5c   :  { %652 = vmatmul.mubr.bf16.gmra.mrb[28].mxu1 %v1564_v63 }
  0xf6   :  { %v1370_v0 = vpop.f32.mrb[0].mxu0 }
  0xf7   :  { %v1434_v1 = vpop.f32.mrb[0].mxu1  ;;  %v1371_v2 = vpop.f32.mrb[1].mxu0 }
  0xf8   :  { %v1372_v3 = vadd.f32 %v1371_v2, %v1370_v0  ;;  %v1435_v4 = vpop.f32.mrb[1].mxu1  ;;  %v1373_v5 = vpop.f32.mrb[2].mxu0 }
  0xf9   :  { %v1436_v6 = vadd.f32 %v1435_v4, %v1434_v1  ;;  %v1437_v7 = vpop.f32.mrb[2].mxu1  ;;  %v1374_v8 = vpop.f32.mrb[3].mxu0 }
  0xfa   :  { %v1375_v9 = vadd.f32 %v1374_v8, %v1373_v5  ;;  %v1438_v10 = vpop.f32.mrb[3].mxu1 }
  0xfb   :  { %v1815_v11 = vadd.f32 %v1436_v6, %v1372_v3  ;;  %v1439_v12 = vadd.f32 %v1438_v10, %v1437_v7 }
  0xfd   :  { %v1817_v13 = vadd.f32 %v1439_v12, %v1375_v9  ;;  %v661_v14 = vsel %vm660_vm0, %v1815_v11, 0.0  ;;  %v709_v27 = vmul.f32 %v1815_v11, %v1815_v11 }
  0xfe   :  { %662 = vadd.xlane.f32.xlu0 %v661_v14  ;;  %v1376_v15 = vpop.f32.mrb[4].mxu0 }
  0xff   :  { %v1440_v16 = vpop.f32.mrb[4].mxu1  ;;  %v1377_v17 = vpop.f32.mrb[5].mxu0  ;;  %v710_v18 = vmul.f32 %v1817_v13, %v1817_v13  ;;  %v664_v25 = vsel %vm660_vm0, %v1817_v13, 0.0  ;;  %v725_v34 = vsel %vm660_vm0, %v709_v27, 0.0 }
 0x100   :  { %v1378_v19 = vadd.f32 %v1377_v17, %v1376_v15  ;;  %v1441_v20 = vpop.f32.mrb[5].mxu1  ;;  %v1379_v21 = vpop.f32.mrb[6].mxu0 }
 0x101   :  { %v1442_v22 = vadd.f32 %v1441_v20, %v1440_v16  ;;  %v1443_v23 = vpop.f32.mrb[6].mxu1  ;;  %v728_v24 = vsel %vm660_vm0, %v710_v18, 0.0  ;;  %v1380_v26 = vpop.f32.mrb[7].mxu0 }
 0x102   :  { %729 = vadd.xlane.f32.xlu1 %v728_v24  ;;  %665 = vadd.xlane.f32.xlu0 %v664_v25  ;;  %v1381_v28 = vadd.f32 %v1380_v26, %v1379_v21  ;;  %v1444_v29 = vpop.f32.mrb[7].mxu1 }
 0x103   :  { %v1828_v30 = vadd.f32 %v1442_v22, %v1378_v19  ;;  %v1445_v31 = vadd.f32 %v1444_v29, %v1443_v23 }
 0x105   :  { %v1830_v32 = vadd.f32 %v1445_v31, %v1381_v28  ;;  %v667_v33 = vsel %vm660_vm0, %v1828_v30, 0.0  ;;  %v711_v35 = vmul.f32 %v1828_v30, %v1828_v30 }
 0x106   :  { %668 = vadd.xlane.f32.xlu1 %v667_v33  ;;  %726 = vadd.xlane.f32.xlu0 %v725_v34  ;;  %v1382_v36 = vpop.f32.mrb[8].mxu0 }
 0x107   :  { %v1446_v37 = vpop.f32.mrb[8].mxu1  ;;  %v1383_v38 = vpop.f32.mrb[9].mxu0  ;;  %v670_v39 = vsel %vm660_vm0, %v1830_v32, 0.0  ;;  %v731_v40 = vsel %vm660_vm0, %v711_v35, 0.0  ;;  %v712_v47 = vmul.f32 %v1830_v32, %v1830_v32 }
 0x108   :  { %v1384_v41 = vadd.f32 %v1383_v38, %v1382_v36  ;;  %v1447_v42 = vpop.f32.mrb[9].mxu1  ;;  %v1385_v43 = vpop.f32.mrb[10].mxu0 }
 0x109   :  { %v1448_v44 = vadd.f32 %v1447_v42, %v1446_v37  ;;  %v1449_v45 = vpop.f32.mrb[10].mxu1  ;;  %v1386_v46 = vpop.f32.mrb[11].mxu0  ;;  %v734_v53 = vsel %vm660_vm0, %v712_v47, 0.0 }
 0x10a   :  { %671 = vadd.xlane.f32.xlu1 %v670_v39  ;;  %732 = vadd.xlane.f32.xlu0 %v731_v40  ;;  %v1387_v48 = vadd.f32 %v1386_v46, %v1385_v43  ;;  %v1450_v49 = vpop.f32.mrb[11].mxu1 }
 0x10b   :  { %v1842_v50 = vadd.f32 %v1448_v44, %v1384_v41  ;;  %v1451_v51 = vadd.f32 %v1450_v49, %v1449_v45 }
 0x10d   :  { %v1844_v52 = vadd.f32 %v1451_v51, %v1387_v48  ;;  %v673_v54 = vsel %vm660_vm0, %v1842_v50, 0.0  ;;  %v713_v55 = vmul.f32 %v1842_v50, %v1842_v50 }
 0x10e   :  { %735 = vadd.xlane.f32.xlu1 %v734_v53  ;;  %674 = vadd.xlane.f32.xlu0 %v673_v54  ;;  %v1388_v56 = vpop.f32.mrb[12].mxu0 }
 0x10f   :  { %v1452_v57 = vpop.f32.mrb[12].mxu1  ;;  %v1389_v58 = vpop.f32.mrb[13].mxu0  ;;  %v676_v59 = vsel %vm660_vm0, %v1844_v52, 0.0  ;;  %v737_v60 = vsel %vm660_vm0, %v713_v55, 0.0  ;;  %v714_v61 = vmul.f32 %v1844_v52, %v1844_v52 }
 0x110   :  { %v1390_v62 = vadd.f32 %v1389_v58, %v1388_v56  ;;  %v1453_v63 = vpop.f32.mrb[13].mxu1  ;;  %v1391_v0 = vpop.f32.mrb[14].mxu0 }
 0x111   :  { %v1454_v1 = vadd.f32 %v1453_v63, %v1452_v57  ;;  %v1455_v2 = vpop.f32.mrb[14].mxu1  ;;  %v1392_v3 = vpop.f32.mrb[15].mxu0  ;;  %v740_v8 = vsel %vm660_vm0, %v714_v61, 0.0 }
 0x112   :  { %677 = vadd.xlane.f32.xlu1 %v676_v59  ;;  %738 = vadd.xlane.f32.xlu0 %v737_v60  ;;  %v1393_v4 = vadd.f32 %v1392_v3, %v1391_v0  ;;  %v1456_v5 = vpop.f32.mrb[15].mxu1  ;;  %v1597_v0 = vmov 0  }
 0x113   :  { %v1856_v6 = vadd.f32 %v1454_v1, %v1390_v62  ;;  %v1457_v7 = vadd.f32 %v1456_v5, %v1455_v2  ;;  %1484 = vset.pattern.permute.xlu1 %v1597_v0  ;;  %1483 = vset.pattern.permute.xlu0 %v1597_v0 }
 0x115   :  { %v1859_v9 = vadd.f32 %v1457_v7, %v1393_v4  ;;  %v679_v10 = vsel %vm660_vm0, %v1856_v6, 0.0  ;;  %v715_v12 = vmul.f32 %v1856_v6, %v1856_v6 }
 0x116   :  { %741 = vadd.xlane.f32.xlu1 %v740_v8  ;;  %680 = vadd.xlane.f32.xlu0 %v679_v10  ;;  %v1394_v14 = vpop.f32.mrb[16].mxu0 }
 0x117   :  { %v1458_v15 = vpop.f32.mrb[16].mxu1  ;;  %v1395_v16 = vpop.f32.mrb[17].mxu0  ;;  %v682_v17 = vsel %vm660_vm0, %v1859_v9, 0.0  ;;  %v743_v18 = vsel %vm660_vm0, %v715_v12, 0.0  ;;  %v716_v19 = vmul.f32 %v1859_v9, %v1859_v9 }
 0x118   :  { %v1396_v20 = vadd.f32 %v1395_v16, %v1394_v14  ;;  %v1459_v21 = vpop.f32.mrb[17].mxu1  ;;  %v1397_v22 = vpop.f32.mrb[18].mxu0 }
 0x119   :  { %v1460_v23 = vadd.f32 %v1459_v21, %v1458_v15  ;;  %v1461_v24 = vpop.f32.mrb[18].mxu1  ;;  %v1398_v25 = vpop.f32.mrb[19].mxu0  ;;  %v746_v31 = vsel %vm660_vm0, %v716_v19, 0.0 }
 0x11a   :  { %683 = vadd.xlane.f32.xlu1 %v682_v17  ;;  %744 = vadd.xlane.f32.xlu0 %v743_v18  ;;  %v1399_v26 = vadd.f32 %v1398_v25, %v1397_v22  ;;  %v1462_v27 = vpop.f32.mrb[19].mxu1 }
 0x11b   :  { %v1870_v28 = vadd.f32 %v1460_v23, %v1396_v20  ;;  %v1463_v29 = vadd.f32 %v1462_v27, %v1461_v24 }
 0x11d   :  { %v1873_v33 = vadd.f32 %v1463_v29, %v1399_v26  ;;  %v685_v34 = vsel %vm660_vm0, %v1870_v28, 0.0  ;;  %v717_v35 = vmul.f32 %v1870_v28, %v1870_v28 }
 0x11e   :  { %747 = vadd.xlane.f32.xlu1 %v746_v31  ;;  %686 = vadd.xlane.f32.xlu0 %v685_v34  ;;  %v1400_v36 = vpop.f32.mrb[20].mxu0 }
 0x11f   :  { %v1464_v37 = vpop.f32.mrb[20].mxu1  ;;  %v1401_v38 = vpop.f32.mrb[21].mxu0  ;;  %v688_v39 = vsel %vm660_vm0, %v1873_v33, 0.0  ;;  %v749_v40 = vsel %vm660_vm0, %v717_v35, 0.0  ;;  %v718_v41 = vmul.f32 %v1873_v33, %v1873_v33 }
 0x120   :  { %v1402_v42 = vadd.f32 %v1401_v38, %v1400_v36  ;;  %v1465_v43 = vpop.f32.mrb[21].mxu1  ;;  %v1403_v44 = vpop.f32.mrb[22].mxu0 }
 0x121   :  { %v1466_v45 = vadd.f32 %v1465_v43, %v1464_v37  ;;  %v1467_v46 = vpop.f32.mrb[22].mxu1  ;;  %v1404_v47 = vpop.f32.mrb[23].mxu0  ;;  %v752_v54 = vsel %vm660_vm0, %v718_v41, 0.0 }
 0x122   :  { %689 = vadd.xlane.f32.xlu1 %v688_v39  ;;  %750 = vadd.xlane.f32.xlu0 %v749_v40  ;;  %v1405_v48 = vadd.f32 %v1404_v47, %v1403_v44  ;;  %v1468_v49 = vpop.f32.mrb[23].mxu1 }
 0x123   :  { %v1884_v51 = vadd.f32 %v1466_v45, %v1402_v42  ;;  %v1469_v53 = vadd.f32 %v1468_v49, %v1467_v46 }
 0x125   :  { %v1887_v55 = vadd.f32 %v1469_v53, %v1405_v48  ;;  %v691_v56 = vsel %vm660_vm0, %v1884_v51, 0.0  ;;  %v719_v57 = vmul.f32 %v1884_v51, %v1884_v51 }
 0x126   :  { %753 = vadd.xlane.f32.xlu1 %v752_v54  ;;  %692 = vadd.xlane.f32.xlu0 %v691_v56  ;;  %v1406_v58 = vpop.f32.mrb[24].mxu0 }
 0x127   :  { %v1470_v59 = vpop.f32.mrb[24].mxu1  ;;  %v1407_v60 = vpop.f32.mrb[25].mxu0  ;;  %v694_v61 = vsel %vm660_vm0, %v1887_v55, 0.0  ;;  %v755_v62 = vsel %vm660_vm0, %v719_v57, 0.0  ;;  %v720_v63 = vmul.f32 %v1887_v55, %v1887_v55 }
 0x128   :  { %v1408_v1 = vadd.f32 %v1407_v60, %v1406_v58  ;;  %v1471_v2 = vpop.f32.mrb[25].mxu1  ;;  %v1409_v3 = vpop.f32.mrb[26].mxu0 }
 0x129   :  { %v1472_v4 = vadd.f32 %v1471_v2, %v1470_v59  ;;  %v1473_v5 = vpop.f32.mrb[26].mxu1  ;;  %v1410_v7 = vpop.f32.mrb[27].mxu0  ;;  %v758_v15 = vsel %vm660_vm0, %v720_v63, 0.0 }
 0x12a   :  { %695 = vadd.xlane.f32.xlu1 %v694_v61  ;;  %756 = vadd.xlane.f32.xlu0 %v755_v62  ;;  %v1411_v8 = vadd.f32 %v1410_v7, %v1409_v3  ;;  %v1474_v10 = vpop.f32.mrb[27].mxu1 }
 0x12b   :  { %v1898_v12 = vadd.f32 %v1472_v4, %v1408_v1  ;;  %v1475_v14 = vadd.f32 %v1474_v10, %v1473_v5 }
 0x12d   :  { %v1901_v16 = vadd.f32 %v1475_v14, %v1411_v8  ;;  %v697_v17 = vsel %vm660_vm0, %v1898_v12, 0.0  ;;  %v721_v18 = vmul.f32 %v1898_v12, %v1898_v12 }
 0x12e   :  { %759 = vadd.xlane.f32.xlu1 %v758_v15  ;;  %698 = vadd.xlane.f32.xlu0 %v697_v17  ;;  %v1412_v19 = vpop.f32.mrb[28].mxu0 }
 0x12f   :  { %v1476_v20 = vpop.f32.mrb[28].mxu1  ;;  %v1413_v21 = vpop.f32.mrb[29].mxu0  ;;  %v700_v22 = vsel %vm660_vm0, %v1901_v16, 0.0  ;;  %v761_v23 = vsel %vm660_vm0, %v721_v18, 0.0  ;;  %v722_v24 = vmul.f32 %v1901_v16, %v1901_v16 }
 0x130   :  { %v1414_v25 = vadd.f32 %v1413_v21, %v1412_v19  ;;  %v1477_v26 = vpop.f32.mrb[29].mxu1  ;;  %v1415_v27 = vpop.f32.mrb[30].mxu0 }
 0x131   :  { %v1478_v29 = vadd.f32 %v1477_v26, %v1476_v20  ;;  %v1479_v31 = vpop.f32.mrb[30].mxu1  ;;  %v1416_v34 = vpop.f32.mrb[31].mxu0  ;;  %v764_v39 = vsel %vm660_vm0, %v722_v24, 0.0 }
 0x132   :  { %701 = vadd.xlane.f32.xlu1 %v700_v22  ;;  %762 = vadd.xlane.f32.xlu0 %v761_v23  ;;  %v1417_v35 = vadd.f32 %v1416_v34, %v1415_v27  ;;  %v1480_v36 = vpop.f32.mrb[31].mxu1 }
 0x133   :  { %v1912_v37 = vadd.f32 %v1478_v29, %v1414_v25  ;;  %v1481_v38 = vadd.f32 %v1480_v36, %v1479_v31 }
 0x135   :  { %v1915_v40 = vadd.f32 %v1481_v38, %v1417_v35  ;;  %v703_v41 = vsel %vm660_vm0, %v1912_v37, 0.0  ;;  %v723_v42 = vmul.f32 %v1912_v37, %v1912_v37  ;;  %v854_v35 = vld [vmem:[%s2180_s2 + $0x8] sm:$0xff] }
 0x136   :  { %765 = vadd.xlane.f32.xlu1 %v764_v39  ;;  %704 = vadd.xlane.f32.xlu0 %v703_v41 }
 0x137   :  { %v706_v43 = vsel %vm660_vm0, %v1915_v40, 0.0  ;;  %v767_v44 = vsel %vm660_vm0, %v723_v42, 0.0  ;;  %v724_v45 = vmul.f32 %v1915_v40, %v1915_v40 }
 0x139   :  { %v770_v46 = vsel %vm660_vm0, %v724_v45, 0.0  ;;  %v853_v45 = vld [vmem:[%s2180_s2] sm:$0xff] }
 0x13a   :  { %707 = vadd.xlane.f32.xlu1 %v706_v43  ;;  %768 = vadd.xlane.f32.xlu0 %v767_v44 }
 0x13e   :  { %771 = vadd.xlane.f32.xlu1 %v770_v46 }
 0x18b   :  { %v663_v47 = vpop.xlane.xlu0 %662 }
 0x18c   :  { %v1927_v53 = vmul.f32 0.03125, %v663_v47 }
 0x18e   :  { %v805_v60 = vmul.f32 %v1927_v53, %v1927_v53 }
 0x18f   :  { %v730_v48 = vpop.xlane.xlu1 %729  ;;  %v666_v49 = vpop.xlane.xlu0 %665 }
 0x190   :  { %v774_v54 = vmul.f32 0.03125, %v666_v49  ;;  %v790_v56 = vmul.f32 0.03125, %v730_v48 }
 0x192   :  { %v806_v57 = vmul.f32 %v774_v54, %v774_v54 }
 0x193   :  { %v669_v58 = vpop.xlane.xlu1 %668  ;;  %v727_v59 = vpop.xlane.xlu0 %726 }
 0x194   :  { %v822_v61 = vsub.f32 %v790_v56, %v806_v57  ;;  %v1931_v62 = vmul.f32 0.03125, %v669_v58  ;;  %v789_v63 = vmul.f32 0.03125, %v727_v59 }
 0x196   :  { %v838_v0 = vmax.f32 %v822_v61, 0.0  ;;  %v807_v1 = vmul.f32 %v1931_v62, %v1931_v62  ;;  %v821_v2 = vsub.f32 %v789_v63, %v805_v60 }
 0x197   :  { %v672_v3 = vpop.xlane.xlu1 %671  ;;  %v733_v4 = vpop.xlane.xlu0 %732 }
 0x198   :  { %v870_v5 = vadd.f32 1e-05, %v838_v0  ;;  %v837_v7 = vmax.f32 %v821_v2, 0.0  ;;  %v1935_v8 = vmul.f32 0.03125, %v672_v3  ;;  %v791_v10 = vmul.f32 0.03125, %v733_v4  ;;  %v918_v0 = vld [vmem:[%s2181_s3 + $0x8] sm:$0xff] }
 0x19a   :  { %1565 = vrsqrt.f32 %v870_v5  ;;  %v869_v14 = vadd.f32 1e-05, %v837_v7  ;;  %v823_v15 = vsub.f32 %v791_v10, %v807_v1  ;;  %v808_v17 = vmul.f32 %v1935_v8, %v1935_v8  ;;  %v917_v1 = vld [vmem:[%s2181_s3] sm:$0xff] }
 0x19b   :  { %v736_v18 = vpop.xlane.xlu1 %735  ;;  %v675_v19 = vpop.xlane.xlu0 %674 }
 0x19c   :  { %1567 = vrsqrt.f32 %v869_v14  ;;  %v839_v20 = vmax.f32 %v823_v15, 0.0  ;;  %v792_v21 = vmul.f32 0.03125, %v736_v18  ;;  %v1939_v22 = vmul.f32 0.03125, %v675_v19 }
 0x19e   :  { %v871_v23 = vadd.f32 1e-05, %v839_v20  ;;  %v824_v24 = vsub.f32 %v792_v21, %v808_v17  ;;  %v809_v25 = vmul.f32 %v1939_v22, %v1939_v22  ;;  %v855_v20 = vld [vmem:[%s2180_s2 + $0x10] sm:$0xff] }
 0x19f   :  { %v678_v26 = vpop.xlane.xlu1 %677  ;;  %v739_v27 = vpop.xlane.xlu0 %738 }
 0x1a0   :  { %v840_v29 = vmax.f32 %v824_v24, 0.0  ;;  %v1943_v31 = vmul.f32 0.03125, %v678_v26  ;;  %v793_v34 = vmul.f32 0.03125, %v739_v27  ;;  %1569 = vrsqrt.f32 %v871_v23 }
 0x1a2   :  { %v872_v36 = vadd.f32 1e-05, %v840_v29  ;;  %v810_v38 = vmul.f32 %v1943_v31, %v1943_v31  ;;  %v825_v39 = vsub.f32 %v793_v34, %v809_v25 }
 0x1a3   :  { %v742_v41 = vpop.xlane.xlu1 %741  ;;  %v681_v42 = vpop.xlane.xlu0 %680 }
 0x1a4   :  { %v1566_v43 = vpop.eup %1565  ;;  %1571 = vrsqrt.f32 %v872_v36  ;;  %v794_v44 = vmul.f32 0.03125, %v742_v41  ;;  %v1953_v47 = vmul.f32 0.03125, %v681_v42  ;;  %v841_v49 = vmax.f32 %v825_v39, 0.0 }
 0x1a5   :  { %v902_v46 = vmul.f32 %v1566_v43, %v854_v35 }
 0x1a6   :  { %v1568_v48 = vpop.eup %1567  ;;  %v826_v56 = vsub.f32 %v794_v44, %v810_v38  ;;  %v811_v2 = vmul.f32 %v1953_v47, %v1953_v47  ;;  %v873_v4 = vadd.f32 1e-05, %v841_v49  ;;  %v920_v38 = vld [vmem:[%s2181_s3 + $0x18] sm:$0xff] }
 0x1a7   :  { %v934_v57 = vmul.f32 %v902_v46, %v774_v54  ;;  %v684_v58 = vpop.xlane.xlu1 %683  ;;  %972 = vperm.xlu1 %1484, %v902_v46   ;;  %v745_v59 = vpop.xlane.xlu0 %744  ;;  %v901_v60 = vmul.f32 %v1568_v48, %v853_v45 }
 0x1a8   :  { %v842_v61 = vmax.f32 %v826_v56, 0.0  ;;  %v1955_v63 = vmul.f32 0.03125, %v684_v58  ;;  %v795_v3 = vmul.f32 0.03125, %v745_v59  ;;  %v919_v58 = vld [vmem:[%s2181_s3 + $0x10] sm:$0xff] }
 0x1a9   :  { %967 = vperm.xlu0 %1483, %v901_v60   ;;  %v933_v54 = vmul.f32 %v901_v60, %v1927_v53  ;;  %v950_v15 = vsub.f32 %v918_v0, %v934_v57  ;;  %v856_v53 = vld [vmem:[%s2180_s2 + $0x18] sm:$0xff] }
 0x1aa   :  { %v874_v5 = vadd.f32 1e-05, %v842_v61  ;;  %v812_v7 = vmul.f32 %v1955_v63, %v1955_v63  ;;  %v1570_v18 = vpop.eup %1569  ;;  %v827_v21 = vsub.f32 %v795_v3, %v811_v2 }
 0x1ab   :  { %v748_v10 = vpop.xlane.xlu1 %747  ;;  %v687_v14 = vpop.xlane.xlu0 %686  ;;  %v949_v17 = vsub.f32 %v917_v1, %v933_v54  ;;  %v903_v29 = vmul.f32 %v1570_v18, %v855_v20 }
 0x1ac   :  { %1573 = vrsqrt.f32 %v874_v5  ;;  %v796_v19 = vmul.f32 0.03125, %v748_v10  ;;  %v1974_v25 = vmul.f32 0.03125, %v687_v14  ;;  %v843_v39 = vmax.f32 %v827_v21, 0.0  ;;  %v922_v10 = vld [vmem:[%s2181_s3 + $0x28] sm:$0xff]  ;;  %v857_v14 = vld [vmem:[%s2180_s2 + $0x20] sm:$0xff] }
 0x1ad   :  { %1068 = vperm.xlu0 %1483, %v950_v15   ;;  %1063 = vperm.xlu1 %1484, %v949_v17   ;;  %1575 = vrsqrt.f32 %v873_v4  ;;  %v935_v56 = vmul.f32 %v903_v29, %v1931_v62 }
 0x1ae   :  { %v1572_v23 = vpop.eup %1571  ;;  %v828_v24 = vsub.f32 %v796_v19, %v812_v7  ;;  %v813_v43 = vmul.f32 %v1974_v25, %v1974_v25  ;;  %v875_v61 = vadd.f32 1e-05, %v843_v39 }
 0x1af   :  { %v690_v26 = vpop.xlane.xlu1 %689  ;;  %v751_v27 = vpop.xlane.xlu0 %750  ;;  %v904_v34 = vmul.f32 %v1572_v23, %v856_v53  ;;  %v951_v3 = vsub.f32 %v919_v58, %v935_v56 }
 0x1b0   :  { %v844_v35 = vmax.f32 %v828_v24, 0.0  ;;  %v1976_v36 = vmul.f32 0.03125, %v690_v26  ;;  %v797_v45 = vmul.f32 0.03125, %v751_v27 }
 0x1b1   :  { %977 = vperm.xlu1 %1484, %v903_v29   ;;  %v936_v41 = vmul.f32 %v904_v34, %v1935_v8  ;;  %v858_v8 = vld [vmem:[%s2180_s2 + $0x28] sm:$0xff]  ;;  %v860_v29 = vld [vmem:[%s2180_s2 + $0x38] sm:$0xff] }
 0x1b2   :  { %v876_v42 = vadd.f32 1e-05, %v844_v35  ;;  %v814_v44 = vmul.f32 %v1976_v36, %v1976_v36  ;;  %v829_v0 = vsub.f32 %v797_v45, %v813_v43 }
 0x1b3   :  { %v754_v46 = vpop.xlane.xlu1 %753  ;;  %v693_v48 = vpop.xlane.xlu0 %692  ;;  %v952_v49 = vsub.f32 %v920_v38, %v936_v41 }
 0x1b4   :  { %1577 = vrsqrt.f32 %v876_v42  ;;  %v798_v57 = vmul.f32 0.03125, %v754_v46  ;;  %v1993_v59 = vmul.f32 0.03125, %v693_v48  ;;  %v845_v19 = vmax.f32 %v829_v0, 0.0  ;;  %v924_v48 = vld [vmem:[%s2181_s3 + $0x38] sm:$0xff] }
 0x1b5   :  { %1078 = vperm.xlu0 %1483, %v952_v49   ;;  %982 = vperm.xlu1 %1484, %v904_v34   ;;  %1579 = vrsqrt.f32 %v875_v61  ;;  %v921_v49 = vld [vmem:[%s2181_s3 + $0x20] sm:$0xff] }
 0x1b6   :  { %v1574_v60 = vpop.eup %1573  ;;  %v830_v1 = vsub.f32 %v798_v57, %v814_v44  ;;  %v815_v15 = vmul.f32 %v1993_v59, %v1993_v59  ;;  %v877_v38 = vadd.f32 1e-05, %v845_v19 }
 0x1b7   :  { %v696_v2 = vpop.xlane.xlu1 %695  ;;  %v757_v62 = vpop.xlane.xlu0 %756  ;;  %v906_v54 = vmul.f32 %v1574_v60, %v858_v8 }
 0x1b8   :  { %v1576_v4 = vpop.eup %1575  ;;  %v846_v5 = vmax.f32 %v830_v1, 0.0  ;;  %v1995_v7 = vmul.f32 0.03125, %v696_v2  ;;  %v799_v17 = vmul.f32 0.03125, %v757_v62 }
 0x1b9   :  { %1073 = vperm.xlu1 %1484, %v951_v3   ;;  %v938_v18 = vmul.f32 %v906_v54, %v1943_v31  ;;  %v905_v26 = vmul.f32 %v1576_v4, %v857_v14  ;;  %v862_v4 = vld [vmem:[%s2180_s2 + $0x48] sm:$0xff] }
 0x1ba   :  { %v878_v20 = vadd.f32 1e-05, %v846_v5  ;;  %v816_v53 = vmul.f32 %v1995_v7, %v1995_v7  ;;  %v831_v34 = vsub.f32 %v799_v17, %v815_v15 }
 0x1bb   :  { %v760_v21 = vpop.xlane.xlu1 %759  ;;  %v699_v23 = vpop.xlane.xlu0 %698  ;;  %v954_v24 = vsub.f32 %v922_v10, %v938_v18  ;;  %v937_v44 = vmul.f32 %v905_v26, %v1939_v22 }
 0x1bc   :  { %1581 = vrsqrt.f32 %v878_v20  ;;  %v800_v27 = vmul.f32 0.03125, %v760_v21  ;;  %v2011_v35 = vmul.f32 0.03125, %v699_v23  ;;  %v847_v56 = vmax.f32 %v831_v34, 0.0  ;;  %v926_v23 = vld [vmem:[%s2181_s3 + $0x48] sm:$0xff] }
 0x1bd   :  { %1088 = vperm.xlu0 %1483, %v954_v24   ;;  %987 = vperm.xlu1 %1484, %v905_v26   ;;  %1583 = vrsqrt.f32 %v877_v38  ;;  %v953_v2 = vsub.f32 %v921_v49, %v937_v44 }
 0x1be   :  { %v1578_v31 = vpop.eup %1577  ;;  %v832_v39 = vsub.f32 %v800_v27, %v816_v53  ;;  %v817_v57 = vmul.f32 %v2011_v35, %v2011_v35 }
 0x1bf   :  { %v702_v41 = vpop.xlane.xlu1 %701  ;;  %v763_v42 = vpop.xlane.xlu0 %762  ;;  %v908_v43 = vmul.f32 %v1578_v31, %v860_v29 }
 0x1c0   :  { %v848_v45 = vmax.f32 %v832_v39, 0.0  ;;  %v2014_v46 = vmul.f32 0.03125, %v702_v41  ;;  %v801_v58 = vmul.f32 0.03125, %v763_v42  ;;  %v1580_v62 = vpop.eup %1579 }
 0x1c1   :  { %992 = vperm.xlu1 %1484, %v906_v54   ;;  %v940_v8 = vmul.f32 %v908_v43, %v1955_v63  ;;  %v859_v63 = vld [vmem:[%s2180_s2 + $0x30] sm:$0xff]  ;;  %v879_v54 = vadd.f32 1e-05, %v847_v56 }
 0x1c2   :  { %v880_v22 = vadd.f32 1e-05, %v848_v45  ;;  %v818_v60 = vmul.f32 %v2014_v46, %v2014_v46  ;;  %v833_v5 = vsub.f32 %v801_v58, %v817_v57  ;;  %v907_v20 = vmul.f32 %v1580_v62, %v859_v63  ;;  %v864_v45 = vld [vmem:[%s2180_s2 + $0x58] sm:$0xff]  ;;  %v925_v63 = vld [vmem:[%s2181_s3 + $0x40] sm:$0xff] }
 0x1c3   :  { %v766_v61 = vpop.xlane.xlu1 %765  ;;  %v705_v0 = vpop.xlane.xlu0 %704  ;;  %v956_v1 = vsub.f32 %v924_v48, %v940_v8  ;;  %v861_v48 = vld [vmem:[%s2180_s2 + $0x40] sm:$0xff] }
 0x1c4   :  { %1585 = vrsqrt.f32 %v880_v22  ;;  %v802_v3 = vmul.f32 0.03125, %v766_v61  ;;  %v2033_v15 = vmul.f32 0.03125, %v705_v0  ;;  %v849_v24 = vmax.f32 %v833_v5, 0.0  ;;  %v928_v61 = vld [vmem:[%s2181_s3 + $0x58] sm:$0xff] }
 0x1c5   :  { %1098 = vperm.xlu0 %1483, %v956_v1   ;;  %1083 = vperm.xlu1 %1484, %v953_v2   ;;  %1587 = vrsqrt.f32 %v879_v54  ;;  %v939_v41 = vmul.f32 %v907_v20, %v1953_v47 }
 0x1c6   :  { %v1582_v10 = vpop.eup %1581  ;;  %v834_v14 = vsub.f32 %v802_v3, %v818_v60  ;;  %v819_v29 = vmul.f32 %v2033_v15, %v2033_v15  ;;  %v881_v56 = vadd.f32 1e-05, %v849_v24  ;;  %v927_v24 = vld [vmem:[%s2181_s3 + $0x50] sm:$0xff] }
 0x1c7   :  { %v708_v17 = vpop.xlane.xlu1 %707  ;;  %v769_v18 = vpop.xlane.xlu0 %768  ;;  %v910_v19 = vmul.f32 %v1582_v10, %v862_v4  ;;  %v866_v4 = vld [vmem:[%s2180_s2 + $0x68] sm:$0xff] }
 0x1c8   :  { %v850_v53 = vmax.f32 %v834_v14, 0.0  ;;  %v2035_v21 = vmul.f32 0.03125, %v708_v17  ;;  %v803_v31 = vmul.f32 0.03125, %v769_v18  ;;  %v1584_v42 = vpop.eup %1583  ;;  %v930_v17 = vld [vmem:[%s2181_s3 + $0x68] sm:$0xff] }
 0x1c9   :  { %1012 = vperm.xlu0 %1483, %v910_v19   ;;  %997 = vperm.xlu1 %1484, %v907_v20   ;;  %v942_v26 = vmul.f32 %v910_v19, %v1976_v36  ;;  %v923_v36 = vld [vmem:[%s2181_s3 + $0x30] sm:$0xff]  ;;  %v909_v22 = vmul.f32 %v1584_v42, %v861_v48  ;;  %v929_v42 = vld [vmem:[%s2181_s3 + $0x60] sm:$0xff] }
 0x1ca   :  { %v882_v27 = vadd.f32 1e-05, %v850_v53  ;;  %v820_v34 = vmul.f32 %v2035_v21, %v2035_v21  ;;  %v835_v47 = vsub.f32 %v803_v31, %v819_v29  ;;  %v955_v8 = vsub.f32 %v923_v36, %v939_v41 }
 0x1cb   :  { %v772_v38 = vpop.xlane.xlu1 %771  ;;  %v958_v39 = vsub.f32 %v926_v23, %v942_v26  ;;  %v941_v3 = vmul.f32 %v909_v22, %v1974_v25  ;;  %v868_v23 = vld [vmem:[%s2180_s2 + $0x78] sm:$0xff]  ;;  %v865_v26 = vld [vmem:[%s2180_s2 + $0x60] sm:$0xff] }
 0x1cc   :  { %1589 = vrsqrt.f32 %v882_v27  ;;  %v804_v44 = vmul.f32 0.03125, %v772_v38  ;;  %v851_v1 = vmax.f32 %v835_v47, 0.0 }
 0x1cd   :  { %1108 = vperm.xlu0 %1483, %v958_v39   ;;  %1002 = vperm.xlu1 %1484, %v908_v43   ;;  %1591 = vrsqrt.f32 %v881_v56  ;;  %v957_v14 = vsub.f32 %v925_v63, %v941_v3 }
 0x1ce   :  { %v1586_v49 = vpop.eup %1585  ;;  %v836_v57 = vsub.f32 %v804_v44, %v820_v34  ;;  %v883_v5 = vadd.f32 1e-05, %v851_v1  ;;  %v867_v44 = vld [vmem:[%s2180_s2 + $0x70] sm:$0xff] }
 0x1cf   :  { %v912_v58 = vmul.f32 %v1586_v49, %v864_v45  ;;  %v1588_v43 = vpop.eup %1587 }
 0x1d0   :  { %v852_v60 = vmax.f32 %v836_v57, 0.0 }
 0x1d1   :  { %1022 = vperm.xlu0 %1483, %v912_v58   ;;  %1093 = vperm.xlu1 %1484, %v955_v8   ;;  %v944_v0 = vmul.f32 %v912_v58, %v1995_v7  ;;  %v863_v7 = vld [vmem:[%s2180_s2 + $0x50] sm:$0xff] }
 0x1d2   :  { %v884_v2 = vadd.f32 1e-05, %v852_v60  ;;  %v911_v25 = vmul.f32 %v1588_v43, %v863_v7 }
 0x1d3   :  { %v960_v62 = vsub.f32 %v928_v61, %v944_v0 }
 0x1d4   :  { %1593 = vrsqrt.f32 %v884_v2  ;;  %v943_v20 = vmul.f32 %v911_v25, %v1993_v59  ;;  %v932_v59 = vld [vmem:[%s2181_s3 + $0x78] sm:$0xff] }
 0x1d5   :  { %1118 = vperm.xlu0 %1483, %v960_v62   ;;  %1007 = vperm.xlu1 %1484, %v909_v22   ;;  %1595 = vrsqrt.f32 %v883_v5 }
 0x1d6   :  { %v1590_v54 = vpop.eup %1589  ;;  %v959_v29 = vsub.f32 %v927_v24, %v943_v20 }
 0x1d7   :  { %v914_v10 = vmul.f32 %v1590_v54, %v866_v4  ;;  %v1592_v53 = vpop.eup %1591 }
 0x1d8   :  { %v913_v34 = vmul.f32 %v1592_v53, %v865_v26 }
 0x1d9   :  { %1032 = vperm.xlu0 %1483, %v914_v10   ;;  %1103 = vperm.xlu1 %1484, %v957_v14   ;;  %v946_v18 = vmul.f32 %v914_v10, %v2014_v46 }
 0x1da   :  { %v945_v39 = vmul.f32 %v913_v34, %v2011_v35  ;;  %v931_v35 = vld [vmem:[%s2181_s3 + $0x70] sm:$0xff] }
 0x1db   :  { %v962_v19 = vsub.f32 %v930_v17, %v946_v18 }
 0x1dc   :  { %v961_v45 = vsub.f32 %v929_v42, %v945_v39 }
 0x1dd   :  { %1128 = vperm.xlu0 %1483, %v962_v19   ;;  %1017 = vperm.xlu1 %1484, %v911_v25  }
 0x1de   :  { %v1594_v46 = vpop.eup %1593 }
 0x1df   :  { %v916_v27 = vmul.f32 %v1594_v46, %v868_v23  ;;  %v1596_v41 = vpop.eup %1595 }
 0x1e0   :  { %v915_v36 = vmul.f32 %v1596_v41, %v867_v44 }
 0x1e1   :  { %1042 = vperm.xlu0 %1483, %v916_v27   ;;  %1113 = vperm.xlu1 %1484, %v959_v29   ;;  %v948_v31 = vmul.f32 %v916_v27, %v2035_v21 }
 0x1e2   :  { %v947_v48 = vmul.f32 %v915_v36, %v2033_v15 }
 0x1e3   :  { %v964_v38 = vsub.f32 %v932_v59, %v948_v31 }
 0x1e4   :  { %v963_v21 = vsub.f32 %v931_v35, %v947_v48 }
 0x1e5   :  { %1138 = vperm.xlu0 %1483, %v964_v38   ;;  %1027 = vperm.xlu1 %1484, %v913_v34  }
 0x1e9   :  { %1123 = vperm.xlu1 %1484, %v961_v45  }
 0x1ed   :  { %1037 = vperm.xlu1 %1484, %v915_v36  }
 0x1f1   :  { %1133 = vperm.xlu1 %1484, %v963_v21  }
 0x226   :  { %v973_v49 = vpop.permute.xlu1 %972 }
 0x227   :  { %v1046_v47 = vmul.f32 %v973_v49, %v1817_v13 }
 0x228   :  { %v968_v56 = vpop.permute.xlu0 %967 }
 0x229   :  { %v1045_v57 = vmul.f32 %v968_v56, %v1815_v11 }
 0x22c   :  { %v1064_v58 = vpop.permute.xlu1 %1063  ;;  %v1069_v8 = vpop.permute.xlu0 %1068 }
 0x22d   :  { %v1141_v22 = vadd.f32 %v1064_v58, %v1045_v57  ;;  %v1142_v60 = vadd.f32 %v1069_v8, %v1046_v47 }
 0x22f   :  { %v1157_v61 = vmax.f32 %v1141_v22, 0.0  ;;  %v1158_v0 = vmax.f32 %v1142_v60, 0.0 }
 0x230   :  { %v978_v15 = vpop.permute.xlu1 %977 }
 0x231   :  { %v1338_v1 = vpack.c.bf16 %v1157_v61, %v1157_v61  ;;  %v1339_v2 = vpack.c.bf16 %v1158_v0, %v1158_v0  ;;  %v1047_v62 = vmul.f32 %v978_v15, %v1828_v30 }
 0x233   :  { %1238 = vst.msk [vmem:[%s2182_s4] sm:$0xf] %vm1237_vm1, %v1338_v1  ;;  %1239 = vst.msk [vmem:[%s2182_s4 + $0x4] sm:$0xf] %vm1237_vm1, %v1339_v2 }
 0x234   :  { %v983_v11 = vpop.permute.xlu1 %982  ;;  %v1079_v43 = vpop.permute.xlu0 %1078 }
 0x235   :  { %v1048_v13 = vmul.f32 %v983_v11, %v1830_v32 }
 0x237   :  { %v1144_v3 = vadd.f32 %v1079_v43, %v1048_v13 }
 0x238   :  { %v1074_v4 = vpop.permute.xlu1 %1073 }
 0x239   :  { %v1160_v63 = vmax.f32 %v1144_v3, 0.0  ;;  %v1143_v7 = vadd.f32 %v1074_v4, %v1047_v62 }
 0x23b   :  { %v1341_v54 = vpack.c.bf16 %v1160_v63, %v1160_v63  ;;  %v1159_v5 = vmax.f32 %v1143_v7, 0.0 }
 0x23c   :  { %v988_v10 = vpop.permute.xlu1 %987  ;;  %v1089_v32 = vpop.permute.xlu0 %1088 }
 0x23d   :  { %1241 = vst.msk [vmem:[%s2182_s4 + $0xc] sm:$0xf] %vm1237_vm1, %v1341_v54  ;;  %v1340_v14 = vpack.c.bf16 %v1159_v5, %v1159_v5  ;;  %v1049_v17 = vmul.f32 %v988_v10, %v1842_v50 }
 0x23f   :  { %1240 = vst.msk [vmem:[%s2182_s4 + $0x8] sm:$0xf] %vm1237_vm1, %v1340_v14 }
 0x240   :  { %v993_v30 = vpop.permute.xlu1 %992 }
 0x241   :  { %v1050_v25 = vmul.f32 %v993_v30, %v1844_v52 }
 0x243   :  { %v1146_v18 = vadd.f32 %v1089_v32, %v1050_v25 }
 0x244   :  { %v1084_v19 = vpop.permute.xlu1 %1083  ;;  %v1099_v20 = vpop.permute.xlu0 %1098 }
 0x245   :  { %v1162_v53 = vmax.f32 %v1146_v18, 0.0  ;;  %v1145_v23 = vadd.f32 %v1084_v19, %v1049_v17 }
 0x247   :  { %v1343_v24 = vpack.c.bf16 %v1162_v53, %v1162_v53  ;;  %v1161_v26 = vmax.f32 %v1145_v23, 0.0 }
 0x248   :  { %v998_v46 = vpop.permute.xlu1 %997  ;;  %v1013_v27 = vpop.permute.xlu0 %1012 }
 0x249   :  { %1243 = vst.msk [vmem:[%s2182_s4 + $0x14] sm:$0xf] %vm1237_vm1, %v1343_v24  ;;  %v1342_v29 = vpack.c.bf16 %v1161_v26, %v1161_v26  ;;  %v1054_v50 = vmul.f32 %v1013_v27, %v1873_v33  ;;  %v1051_v38 = vmul.f32 %v998_v46, %v1856_v6 }
 0x24b   :  { %1242 = vst.msk [vmem:[%s2182_s4 + $0x10] sm:$0xf] %vm1237_vm1, %v1342_v29 }
 0x24c   :  { %v1003_v52 = vpop.permute.xlu1 %1002  ;;  %v1109_v34 = vpop.permute.xlu0 %1108 }
 0x24d   :  { %v1052_v59 = vmul.f32 %v1003_v52, %v1859_v9  ;;  %v1150_v31 = vadd.f32 %v1109_v34, %v1054_v50 }
 0x24f   :  { %v1148_v39 = vadd.f32 %v1099_v20, %v1052_v59  ;;  %v1166_v41 = vmax.f32 %v1150_v31, 0.0 }
 0x250   :  { %v1094_v42 = vpop.permute.xlu1 %1093  ;;  %v1023_v44 = vpop.permute.xlu0 %1022 }
 0x251   :  { %v1164_v45 = vmax.f32 %v1148_v39, 0.0  ;;  %v1347_v36 = vpack.c.bf16 %v1166_v41, %v1166_v41  ;;  %v1147_v48 = vadd.f32 %v1094_v42, %v1051_v38  ;;  %v1056_v21 = vmul.f32 %v1023_v44, %v1887_v55 }
 0x253   :  { %v1345_v35 = vpack.c.bf16 %v1164_v45, %v1164_v45  ;;  %1247 = vst.msk [vmem:[%s2182_s4 + $0x24] sm:$0xf] %vm1237_vm1, %v1347_v36  ;;  %v1163_v33 = vmax.f32 %v1147_v48, 0.0 }
 0x254   :  { %v1008_v9 = vpop.permute.xlu1 %1007  ;;  %v1119_v49 = vpop.permute.xlu0 %1118 }
 0x255   :  { %1245 = vst.msk [vmem:[%s2182_s4 + $0x1c] sm:$0xf] %vm1237_vm1, %v1345_v35  ;;  %v1344_v6 = vpack.c.bf16 %v1163_v33, %v1163_v33  ;;  %v1152_v56 = vadd.f32 %v1119_v49, %v1056_v21  ;;  %v1053_v47 = vmul.f32 %v1008_v9, %v1870_v28 }
 0x257   :  { %1244 = vst.msk [vmem:[%s2182_s4 + $0x18] sm:$0xf] %vm1237_vm1, %v1344_v6  ;;  %v1168_v57 = vmax.f32 %v1152_v56, 0.0 }
 0x258   :  { %v1104_v58 = vpop.permute.xlu1 %1103  ;;  %v1033_v8 = vpop.permute.xlu0 %1032 }
 0x259   :  { %v1349_v55 = vpack.c.bf16 %v1168_v57, %v1168_v57  ;;  %v1149_v22 = vadd.f32 %v1104_v58, %v1053_v47  ;;  %v1058_v61 = vmul.f32 %v1033_v8, %v1901_v16 }
 0x25b   :  { %1249 = vst.msk [vmem:[%s2182_s4 + $0x2c] sm:$0xf] %vm1237_vm1, %v1349_v55  ;;  %v1165_v60 = vmax.f32 %v1149_v22, 0.0 }
 0x25c   :  { %v1018_v0 = vpop.permute.xlu1 %1017  ;;  %v1129_v15 = vpop.permute.xlu0 %1128 }
 0x25d   :  { %v1346_v1 = vpack.c.bf16 %v1165_v60, %v1165_v60  ;;  %v1154_v2 = vadd.f32 %v1129_v15, %v1058_v61  ;;  %v1055_v28 = vmul.f32 %v1018_v0, %v1884_v51 }
 0x25f   :  { %1246 = vst.msk [vmem:[%s2182_s4 + $0x20] sm:$0xf] %vm1237_vm1, %v1346_v1  ;;  %v1170_v11 = vmax.f32 %v1154_v2, 0.0 }
 0x260   :  { %v1114_v13 = vpop.permute.xlu1 %1113  ;;  %v1043_v43 = vpop.permute.xlu0 %1042 }
 0x261   :  { %v1351_v62 = vpack.c.bf16 %v1170_v11, %v1170_v11  ;;  %v1151_v3 = vadd.f32 %v1114_v13, %v1055_v28  ;;  %v1060_v4 = vmul.f32 %v1043_v43, %v1915_v40 }
 0x263   :  { %1251 = vst.msk [vmem:[%s2182_s4 + $0x34] sm:$0xf] %vm1237_vm1, %v1351_v62  ;;  %v1167_v16 = vmax.f32 %v1151_v3, 0.0 }
 0x264   :  { %v1028_v63 = vpop.permute.xlu1 %1027  ;;  %v1139_v7 = vpop.permute.xlu0 %1138 }
 0x265   :  { %v1348_v54 = vpack.c.bf16 %v1167_v16, %v1167_v16  ;;  %v1156_v5 = vadd.f32 %v1139_v7, %v1060_v4  ;;  %v1057_v51 = vmul.f32 %v1028_v63, %v1898_v12 }
 0x267   :  { %1248 = vst.msk [vmem:[%s2182_s4 + $0x28] sm:$0xf] %vm1237_vm1, %v1348_v54  ;;  %v1172_v10 = vmax.f32 %v1156_v5, 0.0 }
 0x268   :  { %v1124_v14 = vpop.permute.xlu1 %1123 }
 0x269   :  { %v1353_v32 = vpack.c.bf16 %v1172_v10, %v1172_v10  ;;  %v1153_v30 = vadd.f32 %v1124_v14, %v1057_v51 }
 0x26b   :  { %1253 = vst.msk [vmem:[%s2182_s4 + $0x3c] sm:$0xf] %vm1237_vm1, %v1353_v32  ;;  %v1169_v40 = vmax.f32 %v1153_v30, 0.0 }
 0x26c   :  { %v1038_v25 = vpop.permute.xlu1 %1037 }
 0x26d   :  { %v1350_v17 = vpack.c.bf16 %v1169_v40, %v1169_v40  ;;  %v1059_v18 = vmul.f32 %v1038_v25, %v1912_v37 }
 0x26f   :  { %1250 = vst.msk [vmem:[%s2182_s4 + $0x30] sm:$0xf] %vm1237_vm1, %v1350_v17 }
 0x270   :  { %v1134_v12 = vpop.permute.xlu1 %1133 }
 0x271   :  { %v1155_v19 = vadd.f32 %v1134_v12, %v1059_v18 }
 0x273   :  { %v1171_v20 = vmax.f32 %v1155_v19, 0.0 }
 0x275   :  { %v1352_v53 = vpack.c.bf16 %v1171_v20, %v1171_v20 }
 0x277   :  { %1252 = vst.msk [vmem:[%s2182_s4 + $0x38] sm:$0xf] %vm1237_vm1, %v1352_v53 }

// kernel: generator_forward.6
= control target key start
LH: loop header
LB: loop body
LE: loop exit
PB: predicated region body
PF: predicated region fallthrough
CT: control target
= control target key end

     0   :  { %vm1952_vm0 = vcmask 261120   ;;  %vm2457_vm1 = vcmask 257024   ;;  %s4894_s1 = inlined_call_operand.vmem [shape: bf16[4,512,32], index: 1, kind: input, shape index: {}]   ;;  %s4895_s0 = inlined_call_operand.vmem [shape: bf16[4,64,512], index: 0, kind: input, shape index: {}]   ;;  %s4896_s2 = inlined_call_operand.vmem [shape: f32[64,1], index: 2, kind: input, shape index: {}]   ;;  %s4897_s3 = inlined_call_operand.vmem [shape: f32[64,1], index: 3, kind: input, shape index: {}]   ;;  %s4898_s4 = inlined_call_operand.vmem [shape: bf16[4,64,32], index: 4, kind: output, shape index: {}]  }
   0x1   :  { %v3508_v0 = vld [vmem:[%s4894_s1 + $0x40] sm:$0xff]   ;;  %v3512_v4 = vld [vmem:[%s4894_s1 + $0x48] sm:$0xff]   ;;  %v3516_v8 = vld [vmem:[%s4894_s1 + $0x50] sm:$0xff]  }
   0x2   :  { %v3509_v1 = vld [vmem:[%s4894_s1 + $0xc0] sm:$0xff]   ;;  %3185 = vmatprep.subr.bf16.mxu0 %v3508_v0  ;;  %v3513_v5 = vld [vmem:[%s4894_s1 + $0xc8] sm:$0xff]   ;;  %v3517_v9 = vld [vmem:[%s4894_s1 + $0xd0] sm:$0xff]  }
   0x3   :  { %v3510_v2 = vld [vmem:[%s4894_s1] sm:$0xff]   ;;  %3225 = vmatprep.subr.bf16.mxu1 %v3509_v1  ;;  %v3514_v6 = vld [vmem:[%s4894_s1 + $0x8] sm:$0xff]   ;;  %v3518_v10 = vld [vmem:[%s4894_s1 + $0x10] sm:$0xff]  }
   0x4   :  { %v3511_v3 = vld [vmem:[%s4894_s1 + $0x80] sm:$0xff]   ;;  %3186 = vmatpush3.bf16.msra.mxu0 %v3510_v2  ;;  %v3515_v7 = vld [vmem:[%s4894_s1 + $0x88] sm:$0xff]   ;;  %v3519_v11 = vld [vmem:[%s4894_s1 + $0x90] sm:$0xff]  }
   0x5   :  { %3226 = vmatpush3.bf16.msra.mxu1 %v3511_v3  ;;  %3187 = vmatprep.subr.bf16.mxu0 %v3512_v4  ;;  %v3520_v12 = vld [vmem:[%s4894_s1 + $0x58] sm:$0xff]   ;;  %v3524_v16 = vld [vmem:[%s4894_s1 + $0x60] sm:$0xff]   ;;  %v3528_v20 = vld [vmem:[%s4894_s1 + $0x68] sm:$0xff]  }
   0x6   :  { %3227 = vmatprep.subr.bf16.mxu1 %v3513_v5  ;;  %v3521_v13 = vld [vmem:[%s4894_s1 + $0xd8] sm:$0xff]   ;;  %v3525_v17 = vld [vmem:[%s4894_s1 + $0xe0] sm:$0xff]   ;;  %v3529_v21 = vld [vmem:[%s4894_s1 + $0xe8] sm:$0xff]  }
   0x7   :  { %v3522_v14 = vld [vmem:[%s4894_s1 + $0x18] sm:$0xff]   ;;  %v3526_v18 = vld [vmem:[%s4894_s1 + $0x20] sm:$0xff]   ;;  %v3530_v22 = vld [vmem:[%s4894_s1 + $0x28] sm:$0xff]  }
   0x8   :  { %3188 = vmatpush3.bf16.msra.mxu0 %v3514_v6  ;;  %v3523_v15 = vld [vmem:[%s4894_s1 + $0x98] sm:$0xff]   ;;  %v3527_v19 = vld [vmem:[%s4894_s1 + $0xa0] sm:$0xff]   ;;  %v3531_v23 = vld [vmem:[%s4894_s1 + $0xa8] sm:$0xff]  }
   0x9   :  { %3228 = vmatpush3.bf16.msra.mxu1 %v3515_v7  ;;  %3189 = vmatprep.subr.bf16.mxu0 %v3516_v8  ;;  %v3532_v24 = vld [vmem:[%s4894_s1 + $0x70] sm:$0xff]   ;;  %v3536_v28 = vld [vmem:[%s4894_s1 + $0x78] sm:$0xff]   ;;  %v3546_v36 = vld [vmem:[%s4894_s1 + $0x140] sm:$0xff]  }
   0xa   :  { %3229 = vmatprep.subr.bf16.mxu1 %v3517_v9  ;;  %v3533_v25 = vld [vmem:[%s4894_s1 + $0xf0] sm:$0xff]   ;;  %v3537_v29 = vld [vmem:[%s4894_s1 + $0xf8] sm:$0xff]   ;;  %v3547_v37 = vld [vmem:[%s4894_s1 + $0x1c0] sm:$0xff]  }
   0xb   :  { %v3534_v26 = vld [vmem:[%s4894_s1 + $0x30] sm:$0xff]   ;;  %v3538_v30 = vld [vmem:[%s4894_s1 + $0x38] sm:$0xff]   ;;  %v3548_v38 = vld [vmem:[%s4894_s1 + $0x100] sm:$0xff]  }
   0xc   :  { %3190 = vmatpush3.bf16.msra.mxu0 %v3518_v10  ;;  %v3535_v27 = vld [vmem:[%s4894_s1 + $0xb0] sm:$0xff]   ;;  %v3539_v31 = vld [vmem:[%s4894_s1 + $0xb8] sm:$0xff]   ;;  %v3549_v39 = vld [vmem:[%s4894_s1 + $0x180] sm:$0xff]  }
   0xd   :  { %3230 = vmatpush3.bf16.msra.mxu1 %v3519_v11  ;;  %3191 = vmatprep.subr.bf16.mxu0 %v3520_v12  ;;  %v3540_v32 = vld [vmem:[%s4895_s0] ss:$16 sps:$4 sm:$0xff]   ;;  %v3542_v33 = vld [vmem:[%s4895_s0 + $0x4] ss:$16 sps:$4 sm:$0xff]   ;;  %v3543_v34 = vld [vmem:[%s4895_s0 + $0x8] ss:$16 sps:$4 sm:$0xff]  }
   0xe   :  { %3231 = vmatprep.subr.bf16.mxu1 %v3521_v13  ;;  %v3545_v35 = vld [vmem:[%s4895_s0 + $0xc] ss:$16 sps:$4 sm:$0xff]   ;;  %402 = vmatprep.mubr.bf16.mxu0 %v3542_v33  ;;  %v3554_v44 = vld [vmem:[%s4895_s0 + $0x24] ss:$16 sps:$4 sm:$0xff]   ;;  %v3558_v46 = vld [vmem:[%s4895_s0 + $0x20] ss:$16 sps:$4 sm:$0xff]  }
   0xf   :  { %467 = vmatprep.mubr.bf16.mxu1 %v3545_v35  ;;  %v3550_v40 = vld [vmem:[%s4894_s1 + $0x148] sm:$0xff]   ;;  %v3560_v48 = vld [vmem:[%s4894_s1 + $0x150] sm:$0xff]   ;;  %v3564_v52 = vld [vmem:[%s4894_s1 + $0x158] sm:$0xff]  }
  0x10   :  { %3192 = vmatpush3.bf16.msra.mxu0 %v3522_v14  ;;  %v3551_v41 = vld [vmem:[%s4894_s1 + $0x1c8] sm:$0xff]   ;;  %v3561_v49 = vld [vmem:[%s4894_s1 + $0x1d0] sm:$0xff]   ;;  %v3565_v53 = vld [vmem:[%s4894_s1 + $0x1d8] sm:$0xff]  }
  0x11   :  { %3232 = vmatpush3.bf16.msra.mxu1 %v3523_v15  ;;  %3193 = vmatprep.subr.bf16.mxu0 %v3524_v16  ;;  %v3552_v42 = vld [vmem:[%s4894_s1 + $0x108] sm:$0xff]   ;;  %v3562_v50 = vld [vmem:[%s4894_s1 + $0x110] sm:$0xff]   ;;  %v3566_v54 = vld [vmem:[%s4894_s1 + $0x118] sm:$0xff]  }
  0x12   :  { %3233 = vmatprep.subr.bf16.mxu1 %v3525_v17  ;;  %v3553_v43 = vld [vmem:[%s4894_s1 + $0x188] sm:$0xff]   ;;  %v3563_v51 = vld [vmem:[%s4894_s1 + $0x190] sm:$0xff]   ;;  %v3567_v55 = vld [vmem:[%s4894_s1 + $0x198] sm:$0xff]  }
  0x13   :  { %v3556_v45 = vld [vmem:[%s4895_s0 + $0x2c] ss:$16 sps:$4 sm:$0xff]   ;;  %v3559_v47 = vld [vmem:[%s4895_s0 + $0x28] ss:$16 sps:$4 sm:$0xff]   ;;  %v3568_v56 = vld [vmem:[%s4895_s0 + $0x44] ss:$16 sps:$4 sm:$0xff]  }
  0x14   :  { %3194 = vmatpush3.bf16.msra.mxu0 %v3526_v18  ;;  %v3570_v57 = vld [vmem:[%s4895_s0 + $0x4c] ss:$16 sps:$4 sm:$0xff]   ;;  %v3572_v58 = vld [vmem:[%s4895_s0 + $0x40] ss:$16 sps:$4 sm:$0xff]   ;;  %v3573_v59 = vld [vmem:[%s4895_s0 + $0x48] ss:$16 sps:$4 sm:$0xff]  }
  0x15   :  { %3234 = vmatpush3.bf16.msra.mxu1 %v3527_v19  ;;  %3195 = vmatprep.subr.bf16.mxu0 %v3528_v20  ;;  %v3574_v60 = vld [vmem:[%s4894_s1 + $0x160] sm:$0xff]   ;;  %v3578_v0 = vld [vmem:[%s4894_s1 + $0x168] sm:$0xff]   ;;  %v3588_v8 = vld [vmem:[%s4894_s1 + $0x170] sm:$0xff]  }
  0x16   :  { %3235 = vmatprep.subr.bf16.mxu1 %v3529_v21  ;;  %v3575_v61 = vld [vmem:[%s4894_s1 + $0x1e0] sm:$0xff]   ;;  %v3579_v1 = vld [vmem:[%s4894_s1 + $0x1e8] sm:$0xff]   ;;  %v3589_v9 = vld [vmem:[%s4894_s1 + $0x1f0] sm:$0xff]  }
  0x17   :  { %v3576_v62 = vld [vmem:[%s4894_s1 + $0x120] sm:$0xff]   ;;  %v3580_v2 = vld [vmem:[%s4894_s1 + $0x128] sm:$0xff]   ;;  %v3590_v10 = vld [vmem:[%s4894_s1 + $0x130] sm:$0xff]  }
  0x18   :  { %3196 = vmatpush3.bf16.msra.mxu0 %v3530_v22  ;;  %v3577_v63 = vld [vmem:[%s4894_s1 + $0x1a0] sm:$0xff]   ;;  %v3581_v3 = vld [vmem:[%s4894_s1 + $0x1a8] sm:$0xff]   ;;  %v3591_v11 = vld [vmem:[%s4894_s1 + $0x1b0] sm:$0xff]  }
  0x19   :  { %3236 = vmatpush3.bf16.msra.mxu1 %v3531_v23  ;;  %3197 = vmatprep.subr.bf16.mxu0 %v3532_v24  ;;  %v3582_v4 = vld [vmem:[%s4895_s0 + $0x64] ss:$16 sps:$4 sm:$0xff]   ;;  %v3584_v5 = vld [vmem:[%s4895_s0 + $0x6c] ss:$16 sps:$4 sm:$0xff]   ;;  %v3586_v6 = vld [vmem:[%s4895_s0 + $0x60] ss:$16 sps:$4 sm:$0xff]  }
  0x1a   :  { %3237 = vmatprep.subr.bf16.mxu1 %v3533_v25  ;;  %v3587_v7 = vld [vmem:[%s4895_s0 + $0x68] ss:$16 sps:$4 sm:$0xff]   ;;  %v3596_v16 = vld [vmem:[%s4895_s0 + $0x80] ss:$16 sps:$4 sm:$0xff]   ;;  %v3598_v17 = vld [vmem:[%s4895_s0 + $0x84] ss:$16 sps:$4 sm:$0xff]  }
  0x1b   :  { %v3592_v12 = vld [vmem:[%s4894_s1 + $0x178] sm:$0xff]   ;;  %v3602_v20 = vld [vmem:[%s4894_s1 + $0x240] sm:$0xff]   ;;  %v3606_v24 = vld [vmem:[%s4894_s1 + $0x248] sm:$0xff]  }
  0x1c   :  { %3198 = vmatpush3.bf16.msra.mxu0 %v3534_v26  ;;  %v3593_v13 = vld [vmem:[%s4894_s1 + $0x1f8] sm:$0xff]   ;;  %v3603_v21 = vld [vmem:[%s4894_s1 + $0x2c0] sm:$0xff]   ;;  %v3607_v25 = vld [vmem:[%s4894_s1 + $0x2c8] sm:$0xff]  }
  0x1d   :  { %3238 = vmatpush3.bf16.msra.mxu1 %v3535_v27  ;;  %3199 = vmatprep.subr.bf16.mxu0 %v3536_v28  ;;  %v3594_v14 = vld [vmem:[%s4894_s1 + $0x138] sm:$0xff]   ;;  %v3604_v22 = vld [vmem:[%s4894_s1 + $0x200] sm:$0xff]   ;;  %v3608_v26 = vld [vmem:[%s4894_s1 + $0x208] sm:$0xff]  }
  0x1e   :  { %3239 = vmatprep.subr.bf16.mxu1 %v3537_v29  ;;  %v3595_v15 = vld [vmem:[%s4894_s1 + $0x1b8] sm:$0xff]   ;;  %v3605_v23 = vld [vmem:[%s4894_s1 + $0x280] sm:$0xff]   ;;  %v3609_v27 = vld [vmem:[%s4894_s1 + $0x288] sm:$0xff]  }
  0x1f   :  { %v3599_v18 = vld [vmem:[%s4895_s0 + $0x88] ss:$16 sps:$4 sm:$0xff]   ;;  %v3601_v19 = vld [vmem:[%s4895_s0 + $0x8c] ss:$16 sps:$4 sm:$0xff]   ;;  %v3610_v28 = vld [vmem:[%s4895_s0 + $0xa4] ss:$16 sps:$4 sm:$0xff]  }
  0x20   :  { %3200 = vmatpush3.bf16.msra.mxu0 %v3538_v30  ;;  %v3612_v29 = vld [vmem:[%s4895_s0 + $0xac] ss:$16 sps:$4 sm:$0xff]   ;;  %v3614_v30 = vld [vmem:[%s4895_s0 + $0xa0] ss:$16 sps:$4 sm:$0xff]  }
  0x21   :  { %3240 = vmatpush3.bf16.msra.mxu1 %v3539_v31  ;;  %3265 = vmatprep.subr.bf16.mxu0 %v3546_v36  ;;  %v3615_v31 = vld [vmem:[%s4895_s0 + $0xa8] ss:$16 sps:$4 sm:$0xff]   ;;  %v3617_v33 = vld [vmem:[%s4894_s1 + $0x2d0] sm:$0xff]  }
  0x22   :  { %3305 = vmatprep.subr.bf16.mxu1 %v3547_v37  ;;  %v3619_v35 = vld [vmem:[%s4894_s1 + $0x290] sm:$0xff]   ;;  %v3620_v36 = vld [vmem:[%s4894_s1 + $0x258] sm:$0xff]  }
  0x23   :  { %403 = vmatmul.mubr.bf16.vlgmr.msra.gmra.mrb[0].mxu0 %v3540_v32  ;;  %v3616_v32 = vld [vmem:[%s4894_s1 + $0x250] sm:$0xff]   ;;  %v3621_v37 = vld [vmem:[%s4894_s1 + $0x2d8] sm:$0xff]  }
  0x24   :  { %468 = vmatmul.mubr.bf16.vlgmr.msra.gmra.mrb[0].mxu1 %v3543_v34  ;;  %3266 = vmatpush3.bf16.msra.mxu0 %v3548_v38  ;;  %v3618_v34 = vld [vmem:[%s4894_s1 + $0x210] sm:$0xff]   ;;  %v3622_v38 = vld [vmem:[%s4894_s1 + $0x218] sm:$0xff]  }
  0x25   :  { %3306 = vmatpush3.bf16.msra.mxu1 %v3549_v39  ;;  %3267 = vmatprep.subr.bf16.mxu0 %v3550_v40  ;;  %v3623_v39 = vld [vmem:[%s4894_s1 + $0x298] sm:$0xff]   ;;  %v3624_v40 = vld [vmem:[%s4895_s0 + $0xc4] ss:$16 sps:$4 sm:$0xff]  }
  0x26   :  { %3307 = vmatprep.subr.bf16.mxu1 %v3551_v41  ;;  %410 = vmatprep.mubr.bf16.mxu0 %v3554_v44  ;;  %v3626_v41 = vld [vmem:[%s4895_s0 + $0xcc] ss:$16 sps:$4 sm:$0xff]   ;;  %v3630_v44 = vld [vmem:[%s4894_s1 + $0x260] sm:$0xff]  }
  0x27   :  { %475 = vmatprep.mubr.bf16.mxu1 %v3556_v45  ;;  %v3631_v45 = vld [vmem:[%s4894_s1 + $0x2e0] sm:$0xff]  }
  0x28   :  { %3268 = vmatpush3.bf16.msra.mxu0 %v3552_v42  ;;  %v3628_v42 = vld [vmem:[%s4895_s0 + $0xc0] ss:$16 sps:$4 sm:$0xff]  }
  0x29   :  { %3308 = vmatpush3.bf16.msra.mxu1 %v3553_v43  ;;  %3269 = vmatprep.subr.bf16.mxu0 %v3560_v48  ;;  %v3629_v43 = vld [vmem:[%s4895_s0 + $0xc8] ss:$16 sps:$4 sm:$0xff]  }
  0x2a   :  { %3309 = vmatprep.subr.bf16.mxu1 %v3561_v49  ;;  %v3634_v48 = vld [vmem:[%s4894_s1 + $0x268] sm:$0xff]  }
  0x2b   :  { %411 = vmatmul.mubr.bf16.gmra.mrb[4].mxu0 %v3558_v46  ;;  %v3632_v46 = vld [vmem:[%s4894_s1 + $0x220] sm:$0xff]   ;;  %v3635_v49 = vld [vmem:[%s4894_s1 + $0x2e8] sm:$0xff]  }
  0x2c   :  { %476 = vmatmul.mubr.bf16.gmra.mrb[4].mxu1 %v3559_v47  ;;  %3270 = vmatpush3.bf16.msra.mxu0 %v3562_v50  ;;  %v3633_v47 = vld [vmem:[%s4894_s1 + $0x2a0] sm:$0xff]   ;;  %v3636_v50 = vld [vmem:[%s4894_s1 + $0x228] sm:$0xff]  }
  0x2d   :  { %3310 = vmatpush3.bf16.msra.mxu1 %v3563_v51  ;;  %3271 = vmatprep.subr.bf16.mxu0 %v3564_v52  ;;  %v3637_v51 = vld [vmem:[%s4894_s1 + $0x2a8] sm:$0xff]   ;;  %v3638_v52 = vld [vmem:[%s4895_s0 + $0xe4] ss:$16 sps:$4 sm:$0xff]  }
  0x2e   :  { %3311 = vmatprep.subr.bf16.mxu1 %v3565_v53  ;;  %418 = vmatprep.mubr.bf16.mxu0 %v3568_v56  ;;  %v3640_v53 = vld [vmem:[%s4895_s0 + $0xec] ss:$16 sps:$4 sm:$0xff]   ;;  %v3644_v56 = vld [vmem:[%s4894_s1 + $0x270] sm:$0xff]  }
  0x2f   :  { %483 = vmatprep.mubr.bf16.mxu1 %v3570_v57  ;;  %v3645_v57 = vld [vmem:[%s4894_s1 + $0x2f0] sm:$0xff]  }
  0x30   :  { %3272 = vmatpush3.bf16.msra.mxu0 %v3566_v54  ;;  %v3642_v54 = vld [vmem:[%s4895_s0 + $0xe0] ss:$16 sps:$4 sm:$0xff]  }
  0x31   :  { %3312 = vmatpush3.bf16.msra.mxu1 %v3567_v55  ;;  %3273 = vmatprep.subr.bf16.mxu0 %v3574_v60  ;;  %v3643_v55 = vld [vmem:[%s4895_s0 + $0xe8] ss:$16 sps:$4 sm:$0xff]  }
  0x32   :  { %3313 = vmatprep.subr.bf16.mxu1 %v3575_v61  ;;  %v3648_v60 = vld [vmem:[%s4894_s1 + $0x278] sm:$0xff]  }
  0x33   :  { %419 = vmatmul.mubr.bf16.gmra.mrb[8].mxu0 %v3572_v58  ;;  %v3646_v58 = vld [vmem:[%s4894_s1 + $0x230] sm:$0xff]   ;;  %v3649_v61 = vld [vmem:[%s4894_s1 + $0x2f8] sm:$0xff]  }
  0x34   :  { %484 = vmatmul.mubr.bf16.gmra.mrb[8].mxu1 %v3573_v59  ;;  %3274 = vmatpush3.bf16.msra.mxu0 %v3576_v62  ;;  %v3647_v59 = vld [vmem:[%s4894_s1 + $0x2b0] sm:$0xff]   ;;  %v3650_v62 = vld [vmem:[%s4894_s1 + $0x238] sm:$0xff]  }
  0x35   :  { %3314 = vmatpush3.bf16.msra.mxu1 %v3577_v63  ;;  %3275 = vmatprep.subr.bf16.mxu0 %v3578_v0  ;;  %v3651_v63 = vld [vmem:[%s4894_s1 + $0x2b8] sm:$0xff]   ;;  %v3652_v0 = vld [vmem:[%s4895_s0 + $0x100] ss:$16 sps:$4 sm:$0xff]  }
  0x36   :  { %3315 = vmatprep.subr.bf16.mxu1 %v3579_v1  ;;  %426 = vmatprep.mubr.bf16.mxu0 %v3582_v4  ;;  %v3654_v1 = vld [vmem:[%s4895_s0 + $0x104] ss:$16 sps:$4 sm:$0xff]  }
  0x37   :  { %491 = vmatprep.mubr.bf16.mxu1 %v3584_v5  ;;  %v3658_v4 = vld [vmem:[%s4894_s1 + $0x340] sm:$0xff]  }
  0x38   :  { %3276 = vmatpush3.bf16.msra.mxu0 %v3580_v2  ;;  %v3655_v2 = vld [vmem:[%s4895_s0 + $0x108] ss:$16 sps:$4 sm:$0xff]   ;;  %v3659_v5 = vld [vmem:[%s4894_s1 + $0x3c0] sm:$0xff]  }
  0x39   :  { %3316 = vmatpush3.bf16.msra.mxu1 %v3581_v3  ;;  %3277 = vmatprep.subr.bf16.mxu0 %v3588_v8  ;;  %v3657_v3 = vld [vmem:[%s4895_s0 + $0x10c] ss:$16 sps:$4 sm:$0xff]  }
  0x3a   :  { %3317 = vmatprep.subr.bf16.mxu1 %v3589_v9  ;;  %v3662_v8 = vld [vmem:[%s4894_s1 + $0x348] sm:$0xff]  }
  0x3b   :  { %427 = vmatmul.mubr.bf16.gmra.mrb[12].mxu0 %v3586_v6  ;;  %v3660_v6 = vld [vmem:[%s4894_s1 + $0x300] sm:$0xff]   ;;  %v3663_v9 = vld [vmem:[%s4894_s1 + $0x3c8] sm:$0xff]  }
  0x3c   :  { %492 = vmatmul.mubr.bf16.gmra.mrb[12].mxu1 %v3587_v7  ;;  %3278 = vmatpush3.bf16.msra.mxu0 %v3590_v10  ;;  %v3661_v7 = vld [vmem:[%s4894_s1 + $0x380] sm:$0xff]   ;;  %v3664_v10 = vld [vmem:[%s4894_s1 + $0x308] sm:$0xff]  }
  0x3d   :  { %3318 = vmatpush3.bf16.msra.mxu1 %v3591_v11  ;;  %3279 = vmatprep.subr.bf16.mxu0 %v3592_v12  ;;  %v3665_v11 = vld [vmem:[%s4894_s1 + $0x388] sm:$0xff]   ;;  %v3666_v12 = vld [vmem:[%s4895_s0 + $0x124] ss:$16 sps:$4 sm:$0xff]  }
  0x3e   :  { %3319 = vmatprep.subr.bf16.mxu1 %v3593_v13  ;;  %886 = vmatprep.mubr.bf16.mxu0 %v3598_v17  ;;  %v3668_v13 = vld [vmem:[%s4895_s0 + $0x12c] ss:$16 sps:$4 sm:$0xff]   ;;  %v3673_v17 = vld [vmem:[%s4894_s1 + $0x3d0] sm:$0xff]  }
  0x3f   :  { %951 = vmatprep.mubr.bf16.mxu1 %v3601_v19  ;;  %v3675_v19 = vld [vmem:[%s4894_s1 + $0x390] sm:$0xff]  }
  0x40   :  { %3280 = vmatpush3.bf16.msra.mxu0 %v3594_v14  ;;  %v3670_v14 = vld [vmem:[%s4895_s0 + $0x120] ss:$16 sps:$4 sm:$0xff]  }
  0x41   :  { %3320 = vmatpush3.bf16.msra.mxu1 %v3595_v15  ;;  %3345 = vmatprep.subr.bf16.mxu0 %v3602_v20  ;;  %v3671_v15 = vld [vmem:[%s4895_s0 + $0x128] ss:$16 sps:$4 sm:$0xff]  }
  0x42   :  { %3385 = vmatprep.subr.bf16.mxu1 %v3603_v21  ;;  %v3676_v20 = vld [vmem:[%s4894_s1 + $0x358] sm:$0xff]  }
  0x43   :  { %887 = vmatmul.mubr.bf16.vlgmr.msra.gmra.mrb[16].mxu0 %v3596_v16  ;;  %v3672_v16 = vld [vmem:[%s4894_s1 + $0x350] sm:$0xff]   ;;  %v3677_v21 = vld [vmem:[%s4894_s1 + $0x3d8] sm:$0xff]  }
  0x44   :  { %952 = vmatmul.mubr.bf16.vlgmr.msra.gmra.mrb[16].mxu1 %v3599_v18  ;;  %3346 = vmatpush3.bf16.msra.mxu0 %v3604_v22  ;;  %v3674_v18 = vld [vmem:[%s4894_s1 + $0x310] sm:$0xff]   ;;  %v3678_v22 = vld [vmem:[%s4894_s1 + $0x318] sm:$0xff]  }
  0x45   :  { %3386 = vmatpush3.bf16.msra.mxu1 %v3605_v23  ;;  %3347 = vmatprep.subr.bf16.mxu0 %v3606_v24  ;;  %v3679_v23 = vld [vmem:[%s4894_s1 + $0x398] sm:$0xff]   ;;  %v3680_v24 = vld [vmem:[%s4895_s0 + $0x144] ss:$16 sps:$4 sm:$0xff]  }
  0x46   :  { %3387 = vmatprep.subr.bf16.mxu1 %v3607_v25  ;;  %894 = vmatprep.mubr.bf16.mxu0 %v3610_v28  ;;  %v3682_v25 = vld [vmem:[%s4895_s0 + $0x14c] ss:$16 sps:$4 sm:$0xff]   ;;  %v3686_v28 = vld [vmem:[%s4894_s1 + $0x360] sm:$0xff]  }
  0x47   :  { %959 = vmatprep.mubr.bf16.mxu1 %v3612_v29  ;;  %v3687_v29 = vld [vmem:[%s4894_s1 + $0x3e0] sm:$0xff]  }
  0x48   :  { %3348 = vmatpush3.bf16.msra.mxu0 %v3608_v26  ;;  %v3684_v26 = vld [vmem:[%s4895_s0 + $0x140] ss:$16 sps:$4 sm:$0xff]  }
  0x49   :  { %3388 = vmatpush3.bf16.msra.mxu1 %v3609_v27  ;;  %3349 = vmatprep.subr.bf16.mxu0 %v3616_v32  ;;  %v3685_v27 = vld [vmem:[%s4895_s0 + $0x148] ss:$16 sps:$4 sm:$0xff]  }
  0x4a   :  { %3389 = vmatprep.subr.bf16.mxu1 %v3617_v33  ;;  %v3690_v32 = vld [vmem:[%s4894_s1 + $0x368] sm:$0xff]  }
  0x4b   :  { %895 = vmatmul.mubr.bf16.gmra.mrb[20].mxu0 %v3614_v30  ;;  %v3688_v30 = vld [vmem:[%s4894_s1 + $0x320] sm:$0xff]   ;;  %v3691_v33 = vld [vmem:[%s4894_s1 + $0x3e8] sm:$0xff]  }
  0x4c   :  { %960 = vmatmul.mubr.bf16.gmra.mrb[20].mxu1 %v3615_v31  ;;  %3350 = vmatpush3.bf16.msra.mxu0 %v3618_v34  ;;  %v3689_v31 = vld [vmem:[%s4894_s1 + $0x3a0] sm:$0xff]   ;;  %v3692_v34 = vld [vmem:[%s4894_s1 + $0x328] sm:$0xff]  }
  0x4d   :  { %3390 = vmatpush3.bf16.msra.mxu1 %v3619_v35  ;;  %3351 = vmatprep.subr.bf16.mxu0 %v3620_v36  ;;  %v3693_v35 = vld [vmem:[%s4894_s1 + $0x3a8] sm:$0xff]   ;;  %v3694_v36 = vld [vmem:[%s4895_s0 + $0x164] ss:$16 sps:$4 sm:$0xff]  }
  0x4e   :  { %3391 = vmatprep.subr.bf16.mxu1 %v3621_v37  ;;  %902 = vmatprep.mubr.bf16.mxu0 %v3624_v40  ;;  %v3696_v37 = vld [vmem:[%s4895_s0 + $0x16c] ss:$16 sps:$4 sm:$0xff]   ;;  %v3700_v40 = vld [vmem:[%s4894_s1 + $0x370] sm:$0xff]  }
  0x4f   :  { %967 = vmatprep.mubr.bf16.mxu1 %v3626_v41  ;;  %v3701_v41 = vld [vmem:[%s4894_s1 + $0x3f0] sm:$0xff]  }
  0x50   :  { %3352 = vmatpush3.bf16.msra.mxu0 %v3622_v38  ;;  %v3698_v38 = vld [vmem:[%s4895_s0 + $0x160] ss:$16 sps:$4 sm:$0xff]  }
  0x51   :  { %3392 = vmatpush3.bf16.msra.mxu1 %v3623_v39  ;;  %3353 = vmatprep.subr.bf16.mxu0 %v3630_v44  ;;  %v3699_v39 = vld [vmem:[%s4895_s0 + $0x168] ss:$16 sps:$4 sm:$0xff]  }
  0x52   :  { %3393 = vmatprep.subr.bf16.mxu1 %v3631_v45  ;;  %v3704_v44 = vld [vmem:[%s4894_s1 + $0x378] sm:$0xff]  }
  0x53   :  { %903 = vmatmul.mubr.bf16.gmra.mrb[24].mxu0 %v3628_v42  ;;  %v3702_v42 = vld [vmem:[%s4894_s1 + $0x330] sm:$0xff]   ;;  %v3705_v45 = vld [vmem:[%s4894_s1 + $0x3f8] sm:$0xff]  }
  0x54   :  { %968 = vmatmul.mubr.bf16.gmra.mrb[24].mxu1 %v3629_v43  ;;  %3354 = vmatpush3.bf16.msra.mxu0 %v3632_v46  ;;  %v3703_v43 = vld [vmem:[%s4894_s1 + $0x3b0] sm:$0xff]   ;;  %v3706_v46 = vld [vmem:[%s4894_s1 + $0x338] sm:$0xff]  }
  0x55   :  { %3394 = vmatpush3.bf16.msra.mxu1 %v3633_v47  ;;  %3355 = vmatprep.subr.bf16.mxu0 %v3634_v48  ;;  %v3707_v47 = vld [vmem:[%s4894_s1 + $0x3b8] sm:$0xff]   ;;  %v3708_v48 = vld [vmem:[%s4895_s0 + $0x180] ss:$16 sps:$4 sm:$0xff]  }
  0x56   :  { %3395 = vmatprep.subr.bf16.mxu1 %v3635_v49  ;;  %910 = vmatprep.mubr.bf16.mxu0 %v3638_v52  ;;  %v3710_v49 = vld [vmem:[%s4895_s0 + $0x184] ss:$16 sps:$4 sm:$0xff]  }
  0x57   :  { %975 = vmatprep.mubr.bf16.mxu1 %v3640_v53  ;;  %v3714_v52 = vld [vmem:[%s4895_s0 + $0x1a4] ss:$16 sps:$4 sm:$0xff]   ;;  %v3716_v53 = vld [vmem:[%s4895_s0 + $0x1ac] ss:$16 sps:$4 sm:$0xff]  }
  0x58   :  { %3356 = vmatpush3.bf16.msra.mxu0 %v3636_v50  ;;  %v3711_v50 = vld [vmem:[%s4895_s0 + $0x188] ss:$16 sps:$4 sm:$0xff]  }
  0x59   :  { %3396 = vmatpush3.bf16.msra.mxu1 %v3637_v51  ;;  %3357 = vmatprep.subr.bf16.mxu0 %v3644_v56  ;;  %v3713_v51 = vld [vmem:[%s4895_s0 + $0x18c] ss:$16 sps:$4 sm:$0xff]   ;;  %v3720_v56 = vld [vmem:[%s4895_s0 + $0x1c4] ss:$16 sps:$4 sm:$0xff]  }
  0x5a   :  { %3397 = vmatprep.subr.bf16.mxu1 %v3645_v57  ;;  %v3722_v57 = vld [vmem:[%s4895_s0 + $0x1cc] ss:$16 sps:$4 sm:$0xff]  }
  0x5b   :  { %911 = vmatmul.mubr.bf16.gmra.mrb[28].mxu0 %v3642_v54  ;;  %v3718_v54 = vld [vmem:[%s4895_s0 + $0x1a0] ss:$16 sps:$4 sm:$0xff]  }
  0x5c   :  { %976 = vmatmul.mubr.bf16.gmra.mrb[28].mxu1 %v3643_v55  ;;  %3358 = vmatpush3.bf16.msra.mxu0 %v3646_v58  ;;  %v3719_v55 = vld [vmem:[%s4895_s0 + $0x1a8] ss:$16 sps:$4 sm:$0xff]   ;;  %v3724_v58 = vld [vmem:[%s4895_s0 + $0x1c0] ss:$16 sps:$4 sm:$0xff]  }
  0x5d   :  { %3398 = vmatpush3.bf16.msra.mxu1 %v3647_v59  ;;  %3359 = vmatprep.subr.bf16.mxu0 %v3648_v60  ;;  %v3725_v59 = vld [vmem:[%s4895_s0 + $0x1c8] ss:$16 sps:$4 sm:$0xff]   ;;  %v3726_v60 = vld [vmem:[%s4895_s0 + $0x1e4] ss:$16 sps:$4 sm:$0xff]  }
  0x5e   :  { %3399 = vmatprep.subr.bf16.mxu1 %v3649_v61  ;;  %1370 = vmatprep.mubr.bf16.mxu0 %v3654_v1  ;;  %v3728_v61 = vld [vmem:[%s4895_s0 + $0x1ec] ss:$16 sps:$4 sm:$0xff]  }
  0x5f   :  { %1435 = vmatprep.mubr.bf16.mxu1 %v3657_v3 }
  0x60   :  { %3360 = vmatpush3.bf16.msra.mxu0 %v3650_v62  ;;  %v3730_v62 = vld [vmem:[%s4895_s0 + $0x1e0] ss:$16 sps:$4 sm:$0xff]  }
  0x61   :  { %3400 = vmatpush3.bf16.msra.mxu1 %v3651_v63  ;;  %3425 = vmatprep.subr.bf16.mxu0 %v3658_v4  ;;  %v3731_v63 = vld [vmem:[%s4895_s0 + $0x1e8] ss:$16 sps:$4 sm:$0xff]  }
  0x62   :  { %3465 = vmatprep.subr.bf16.mxu1 %v3659_v5 }
  0x63   :  { %1371 = vmatmul.mubr.bf16.vlgmr.msra.gmra.mrb[32].mxu0 %v3652_v0 }
  0x64   :  { %1436 = vmatmul.mubr.bf16.vlgmr.msra.gmra.mrb[32].mxu1 %v3655_v2  ;;  %3426 = vmatpush3.bf16.msra.mxu0 %v3660_v6 }
  0x65   :  { %3466 = vmatpush3.bf16.msra.mxu1 %v3661_v7  ;;  %3427 = vmatprep.subr.bf16.mxu0 %v3662_v8 }
  0x66   :  { %3467 = vmatprep.subr.bf16.mxu1 %v3663_v9  ;;  %1378 = vmatprep.mubr.bf16.mxu0 %v3666_v12 }
  0x67   :  { %1443 = vmatprep.mubr.bf16.mxu1 %v3668_v13 }
  0x68   :  { %3428 = vmatpush3.bf16.msra.mxu0 %v3664_v10 }
  0x69   :  { %3468 = vmatpush3.bf16.msra.mxu1 %v3665_v11  ;;  %3429 = vmatprep.subr.bf16.mxu0 %v3672_v16 }
  0x6a   :  { %3469 = vmatprep.subr.bf16.mxu1 %v3673_v17 }
  0x6b   :  { %1379 = vmatmul.mubr.bf16.gmra.mrb[36].mxu0 %v3670_v14 }
  0x6c   :  { %1444 = vmatmul.mubr.bf16.gmra.mrb[36].mxu1 %v3671_v15  ;;  %3430 = vmatpush3.bf16.msra.mxu0 %v3674_v18 }
  0x6d   :  { %3470 = vmatpush3.bf16.msra.mxu1 %v3675_v19  ;;  %3431 = vmatprep.subr.bf16.mxu0 %v3676_v20 }
  0x6e   :  { %3471 = vmatprep.subr.bf16.mxu1 %v3677_v21  ;;  %1386 = vmatprep.mubr.bf16.mxu0 %v3680_v24 }
  0x6f   :  { %1451 = vmatprep.mubr.bf16.mxu1 %v3682_v25 }
  0x70   :  { %3432 = vmatpush3.bf16.msra.mxu0 %v3678_v22 }
  0x71   :  { %3472 = vmatpush3.bf16.msra.mxu1 %v3679_v23  ;;  %3433 = vmatprep.subr.bf16.mxu0 %v3686_v28 }
  0x72   :  { %3473 = vmatprep.subr.bf16.mxu1 %v3687_v29 }
  0x73   :  { %1387 = vmatmul.mubr.bf16.gmra.mrb[40].mxu0 %v3684_v26 }
  0x74   :  { %1452 = vmatmul.mubr.bf16.gmra.mrb[40].mxu1 %v3685_v27  ;;  %3434 = vmatpush3.bf16.msra.mxu0 %v3688_v30 }
  0x75   :  { %3474 = vmatpush3.bf16.msra.mxu1 %v3689_v31  ;;  %3435 = vmatprep.subr.bf16.mxu0 %v3690_v32 }
  0x76   :  { %3475 = vmatprep.subr.bf16.mxu1 %v3691_v33  ;;  %1394 = vmatprep.mubr.bf16.mxu0 %v3694_v36 }
  0x77   :  { %1459 = vmatprep.mubr.bf16.mxu1 %v3696_v37 }
  0x78   :  { %3436 = vmatpush3.bf16.msra.mxu0 %v3692_v34 }
  0x79   :  { %3476 = vmatpush3.bf16.msra.mxu1 %v3693_v35  ;;  %3437 = vmatprep.subr.bf16.mxu0 %v3700_v40 }
  0x7a   :  { %3477 = vmatprep.subr.bf16.mxu1 %v3701_v41 }
  0x7b   :  { %1395 = vmatmul.mubr.bf16.gmra.mrb[44].mxu0 %v3698_v38 }
  0x7c   :  { %1460 = vmatmul.mubr.bf16.gmra.mrb[44].mxu1 %v3699_v39  ;;  %3438 = vmatpush3.bf16.msra.mxu0 %v3702_v42 }
  0x7d   :  { %3478 = vmatpush3.bf16.msra.mxu1 %v3703_v43  ;;  %3439 = vmatprep.subr.bf16.mxu0 %v3704_v44 }
  0x7e   :  { %3479 = vmatprep.subr.bf16.mxu1 %v3705_v45  ;;  %1854 = vmatprep.mubr.bf16.mxu0 %v3710_v49 }
  0x7f   :  { %1919 = vmatprep.mubr.bf16.mxu1 %v3713_v51 }
  0x80   :  { %3440 = vmatpush3.bf16.msra.mxu0 %v3706_v46 }
  0x81   :  { %3480 = vmatpush3.bf16.msra.mxu1 %v3707_v47 }
  0x83   :  { %1855 = vmatmul.mubr.bf16.vlgmr.msra.gmra.mrb[48].mxu0 %v3708_v48 }
  0x84   :  { %1920 = vmatmul.mubr.bf16.vlgmr.msra.gmra.mrb[48].mxu1 %v3711_v50  ;;  %1862 = vmatprep.mubr.bf16.mxu0 %v3714_v52 }
  0x85   :  { %1927 = vmatprep.mubr.bf16.mxu1 %v3716_v53 }
  0x8b   :  { %1863 = vmatmul.mubr.bf16.gmra.mrb[52].mxu0 %v3718_v54 }
  0x8c   :  { %1928 = vmatmul.mubr.bf16.gmra.mrb[52].mxu1 %v3719_v55  ;;  %1870 = vmatprep.mubr.bf16.mxu0 %v3720_v56 }
  0x8d   :  { %1935 = vmatprep.mubr.bf16.mxu1 %v3722_v57 }
  0x93   :  { %1871 = vmatmul.mubr.bf16.gmra.mrb[56].mxu0 %v3724_v58 }
  0x94   :  { %1936 = vmatmul.mubr.bf16.gmra.mrb[56].mxu1 %v3725_v59  ;;  %1878 = vmatprep.mubr.bf16.mxu0 %v3726_v60 }
  0x95   :  { %1943 = vmatprep.mubr.bf16.mxu1 %v3728_v61 }
  0x9b   :  { %1879 = vmatmul.mubr.bf16.gmra.mrb[60].mxu0 %v3730_v62 }
  0x9c   :  { %1944 = vmatmul.mubr.bf16.gmra.mrb[60].mxu1 %v3731_v63 }
  0xf6   :  { %v3201_v0 = vpop.f32.mrb[0].mxu0 }
  0xf7   :  { %v3241_v1 = vpop.f32.mrb[0].mxu1  ;;  %v3202_v2 = vpop.f32.mrb[1].mxu0 }
  0xf8   :  { %v3203_v3 = vadd.f32 %v3202_v2, %v3201_v0  ;;  %v3242_v4 = vpop.f32.mrb[1].mxu1  ;;  %v3204_v5 = vpop.f32.mrb[2].mxu0 }
  0xf9   :  { %v3243_v6 = vadd.f32 %v3242_v4, %v3241_v1  ;;  %v3244_v7 = vpop.f32.mrb[2].mxu1  ;;  %v3205_v8 = vpop.f32.mrb[3].mxu0 }
  0xfa   :  { %v3206_v9 = vadd.f32 %v3205_v8, %v3204_v5  ;;  %v3245_v10 = vpop.f32.mrb[3].mxu1 }
  0xfb   :  { %v4350_v11 = vadd.f32 %v3243_v6, %v3203_v3  ;;  %v3246_v12 = vadd.f32 %v3245_v10, %v3244_v7 }
  0xfd   :  { %v4352_v13 = vadd.f32 %v3246_v12, %v3206_v9  ;;  %v1953_v14 = vsel %vm1952_vm0, %v4350_v11, 0.0  ;;  %v1977_v21 = vmul.f32 %v4350_v11, %v4350_v11 }
  0xfe   :  { %1954 = vadd.xlane.f32.xlu0 %v1953_v14  ;;  %v3207_v16 = vpop.f32.mrb[4].mxu0 }
  0xff   :  { %v1978_v15 = vmul.f32 %v4352_v13, %v4352_v13  ;;  %v3247_v17 = vpop.f32.mrb[4].mxu1  ;;  %v3208_v18 = vpop.f32.mrb[5].mxu0  ;;  %v1956_v20 = vsel %vm1952_vm0, %v4352_v13, 0.0  ;;  %v1985_v32 = vsel %vm1952_vm0, %v1977_v21, 0.0 }
 0x100   :  { %v3209_v22 = vadd.f32 %v3208_v18, %v3207_v16  ;;  %v3248_v23 = vpop.f32.mrb[5].mxu1  ;;  %v3210_v24 = vpop.f32.mrb[6].mxu0 }
 0x101   :  { %v1988_v19 = vsel %vm1952_vm0, %v1978_v15, 0.0  ;;  %v3249_v25 = vadd.f32 %v3248_v23, %v3247_v17  ;;  %v3250_v26 = vpop.f32.mrb[6].mxu1  ;;  %v3211_v27 = vpop.f32.mrb[7].mxu0 }
 0x102   :  { %1989 = vadd.xlane.f32.xlu1 %v1988_v19  ;;  %1957 = vadd.xlane.f32.xlu0 %v1956_v20  ;;  %v3212_v28 = vadd.f32 %v3211_v27, %v3210_v24  ;;  %v3251_v29 = vpop.f32.mrb[7].mxu1 }
 0x103   :  { %v4363_v30 = vadd.f32 %v3249_v25, %v3209_v22  ;;  %v3252_v31 = vadd.f32 %v3251_v29, %v3250_v26 }
 0x105   :  { %4926 = vst [vmem:[#allocation2_spill] sm:$0xff] %v4363_v30  ;;  %v4366_v33 = vadd.f32 %v3252_v31, %v3212_v28  ;;  %v1959_v34 = vsel %vm1952_vm0, %v4363_v30, 0.0  ;;  %v1979_v35 = vmul.f32 %v4363_v30, %v4363_v30 }
 0x106   :  { %1986 = vadd.xlane.f32.xlu0 %v1985_v32  ;;  %1960 = vadd.xlane.f32.xlu1 %v1959_v34  ;;  %v3213_v37 = vpop.f32.mrb[8].mxu0 }
 0x107   :  { %4927 = vst [vmem:[#allocation3_spill] sm:$0xff] %v4366_v33  ;;  %v1991_v36 = vsel %vm1952_vm0, %v1979_v35, 0.0  ;;  %v1962_v38 = vsel %vm1952_vm0, %v4366_v33, 0.0  ;;  %v1980_v39 = vmul.f32 %v4366_v33, %v4366_v33  ;;  %v3253_v40 = vpop.f32.mrb[8].mxu1  ;;  %v3214_v41 = vpop.f32.mrb[9].mxu0 }
 0x108   :  { %v3215_v42 = vadd.f32 %v3214_v41, %v3213_v37  ;;  %v3254_v43 = vpop.f32.mrb[9].mxu1  ;;  %v3216_v44 = vpop.f32.mrb[10].mxu0 }
 0x109   :  { %v3255_v45 = vadd.f32 %v3254_v43, %v3253_v40  ;;  %v3256_v46 = vpop.f32.mrb[10].mxu1  ;;  %v3217_v47 = vpop.f32.mrb[11].mxu0  ;;  %v1994_v50 = vsel %vm1952_vm0, %v1980_v39, 0.0 }
 0x10a   :  { %1992 = vadd.xlane.f32.xlu0 %v1991_v36  ;;  %1963 = vadd.xlane.f32.xlu1 %v1962_v38  ;;  %v3218_v48 = vadd.f32 %v3217_v47, %v3216_v44  ;;  %v3257_v49 = vpop.f32.mrb[11].mxu1 }
 0x10b   :  { %v4378_v51 = vadd.f32 %v3255_v45, %v3215_v42  ;;  %v3258_v52 = vadd.f32 %v3257_v49, %v3256_v46 }
 0x10d   :  { %4928 = vst [vmem:[#allocation4_spill] sm:$0xff] %v4378_v51  ;;  %v4380_v53 = vadd.f32 %v3258_v52, %v3218_v48  ;;  %v1965_v54 = vsel %vm1952_vm0, %v4378_v51, 0.0  ;;  %v1981_v55 = vmul.f32 %v4378_v51, %v4378_v51 }
 0x10e   :  { %1995 = vadd.xlane.f32.xlu1 %v1994_v50  ;;  %1966 = vadd.xlane.f32.xlu0 %v1965_v54  ;;  %v3219_v59 = vpop.f32.mrb[12].mxu0 }
 0x10f   :  { %4929 = vst [vmem:[#allocation5_spill] sm:$0xff] %v4380_v53  ;;  %v1968_v56 = vsel %vm1952_vm0, %v4380_v53, 0.0  ;;  %v1997_v57 = vsel %vm1952_vm0, %v1981_v55, 0.0  ;;  %v1982_v58 = vmul.f32 %v4380_v53, %v4380_v53  ;;  %v3259_v60 = vpop.f32.mrb[12].mxu1  ;;  %v3220_v61 = vpop.f32.mrb[13].mxu0 }
 0x110   :  { %v3260_v62 = vpop.f32.mrb[13].mxu1  ;;  %v3221_v63 = vadd.f32 %v3220_v61, %v3219_v59  ;;  %v3222_v1 = vpop.f32.mrb[14].mxu0 }
 0x111   :  { %v3261_v0 = vadd.f32 %v3260_v62, %v3259_v60  ;;  %v3262_v2 = vpop.f32.mrb[14].mxu1  ;;  %v2000_v3 = vsel %vm1952_vm0, %v1982_v58, 0.0  ;;  %v3223_v4 = vpop.f32.mrb[15].mxu0 }
 0x112   :  { %1969 = vadd.xlane.f32.xlu1 %v1968_v56  ;;  %1998 = vadd.xlane.f32.xlu0 %v1997_v57  ;;  %v3263_v5 = vpop.f32.mrb[15].mxu1  ;;  %v3224_v7 = vadd.f32 %v3223_v4, %v3222_v1 }
 0x113   :  { %v4392_v6 = vadd.f32 %v3261_v0, %v3221_v63  ;;  %v3264_v8 = vadd.f32 %v3263_v5, %v3262_v2 }
 0x115   :  { %4930 = vst [vmem:[#allocation6_spill] sm:$0xff] %v4392_v6  ;;  %v4394_v9 = vadd.f32 %v3264_v8, %v3224_v7  ;;  %v1971_v10 = vsel %vm1952_vm0, %v4392_v6, 0.0  ;;  %v1983_v12 = vmul.f32 %v4392_v6, %v4392_v6 }
 0x116   :  { %2001 = vadd.xlane.f32.xlu1 %v2000_v3  ;;  %1972 = vadd.xlane.f32.xlu0 %v1971_v10  ;;  %v3281_v17 = vpop.f32.mrb[16].mxu0 }
 0x117   :  { %4931 = vst [vmem:[#allocation7_spill] sm:$0xff] %v4394_v9  ;;  %v1974_v14 = vsel %vm1952_vm0, %v4394_v9, 0.0  ;;  %v2003_v15 = vsel %vm1952_vm0, %v1983_v12, 0.0  ;;  %v1984_v16 = vmul.f32 %v4394_v9, %v4394_v9  ;;  %v3282_v18 = vpop.f32.mrb[17].mxu0  ;;  %v3321_v19 = vpop.f32.mrb[16].mxu1 }
 0x118   :  { %v3283_v20 = vadd.f32 %v3282_v18, %v3281_v17  ;;  %v3284_v21 = vpop.f32.mrb[18].mxu0  ;;  %v3322_v23 = vpop.f32.mrb[17].mxu1 }
 0x119   :  { %v2006_v22 = vsel %vm1952_vm0, %v1984_v16, 0.0  ;;  %v3285_v24 = vpop.f32.mrb[19].mxu0  ;;  %v3323_v25 = vadd.f32 %v3322_v23, %v3321_v19  ;;  %v3324_v26 = vpop.f32.mrb[18].mxu1 }
 0x11a   :  { %1975 = vadd.xlane.f32.xlu1 %v1974_v14  ;;  %2004 = vadd.xlane.f32.xlu0 %v2003_v15  ;;  %v3286_v27 = vadd.f32 %v3285_v24, %v3284_v21  ;;  %v3325_v28 = vpop.f32.mrb[19].mxu1 }
 0x11b   :  { %v4406_v29 = vadd.f32 %v3323_v25, %v3283_v20  ;;  %v3326_v31 = vadd.f32 %v3325_v28, %v3324_v26 }
 0x11d   :  { %v4408_v32 = vadd.f32 %v3326_v31, %v3286_v27  ;;  %v2009_v34 = vsel %vm1952_vm0, %v4406_v29, 0.0  ;;  %v2041_v35 = vmul.f32 %v4406_v29, %v4406_v29 }
 0x11e   :  { %2007 = vadd.xlane.f32.xlu1 %v2006_v22  ;;  %2010 = vadd.xlane.f32.xlu0 %v2009_v34  ;;  %v3287_v39 = vpop.f32.mrb[20].mxu0 }
 0x11f   :  { %4932 = vst [vmem:[#allocation8_spill] sm:$0xff] %v4408_v32  ;;  %v2012_v36 = vsel %vm1952_vm0, %v4408_v32, 0.0  ;;  %v2049_v37 = vsel %vm1952_vm0, %v2041_v35, 0.0  ;;  %v2042_v38 = vmul.f32 %v4408_v32, %v4408_v32  ;;  %v3327_v40 = vpop.f32.mrb[20].mxu1  ;;  %v3288_v41 = vpop.f32.mrb[21].mxu0 }
 0x120   :  { %v3289_v42 = vadd.f32 %v3288_v41, %v3287_v39  ;;  %v3328_v43 = vpop.f32.mrb[21].mxu1  ;;  %v3290_v44 = vpop.f32.mrb[22].mxu0 }
 0x121   :  { %v3329_v45 = vadd.f32 %v3328_v43, %v3327_v40  ;;  %v3330_v46 = vpop.f32.mrb[22].mxu1  ;;  %v3291_v47 = vpop.f32.mrb[23].mxu0  ;;  %v2052_v48 = vsel %vm1952_vm0, %v2042_v38, 0.0 }
 0x122   :  { %2013 = vadd.xlane.f32.xlu1 %v2012_v36  ;;  %2050 = vadd.xlane.f32.xlu0 %v2049_v37  ;;  %v3292_v49 = vadd.f32 %v3291_v47, %v3290_v44  ;;  %v3331_v50 = vpop.f32.mrb[23].mxu1 }
 0x123   :  { %v4420_v52 = vadd.f32 %v3329_v45, %v3289_v42  ;;  %v3332_v54 = vadd.f32 %v3331_v50, %v3330_v46 }
 0x125   :  { %4933 = vst [vmem:[#allocation9_spill] sm:$0xff] %v4420_v52  ;;  %v4422_v55 = vadd.f32 %v3332_v54, %v3292_v49  ;;  %v2015_v56 = vsel %vm1952_vm0, %v4420_v52, 0.0  ;;  %v2043_v57 = vmul.f32 %v4420_v52, %v4420_v52 }
 0x126   :  { %2053 = vadd.xlane.f32.xlu1 %v2052_v48  ;;  %2016 = vadd.xlane.f32.xlu0 %v2015_v56  ;;  %v3293_v61 = vpop.f32.mrb[24].mxu0 }
 0x127   :  { %4934 = vst [vmem:[#allocation10_spill] sm:$0xff] %v4422_v55  ;;  %v2018_v58 = vsel %vm1952_vm0, %v4422_v55, 0.0  ;;  %v2055_v59 = vsel %vm1952_vm0, %v2043_v57, 0.0  ;;  %v2044_v60 = vmul.f32 %v4422_v55, %v4422_v55  ;;  %v3333_v62 = vpop.f32.mrb[24].mxu1  ;;  %v3294_v63 = vpop.f32.mrb[25].mxu0 }
 0x128   :  { %v3334_v0 = vpop.f32.mrb[25].mxu1  ;;  %v3295_v1 = vadd.f32 %v3294_v63, %v3293_v61  ;;  %v3296_v3 = vpop.f32.mrb[26].mxu0 }
 0x129   :  { %v3335_v2 = vadd.f32 %v3334_v0, %v3333_v62  ;;  %v3336_v4 = vpop.f32.mrb[26].mxu1  ;;  %v2058_v5 = vsel %vm1952_vm0, %v2044_v60, 0.0  ;;  %v3297_v7 = vpop.f32.mrb[27].mxu0 }
 0x12a   :  { %2019 = vadd.xlane.f32.xlu1 %v2018_v58  ;;  %2056 = vadd.xlane.f32.xlu0 %v2055_v59  ;;  %v3337_v8 = vpop.f32.mrb[27].mxu1  ;;  %v3298_v12 = vadd.f32 %v3297_v7, %v3296_v3 }
 0x12b   :  { %v4434_v10 = vadd.f32 %v3335_v2, %v3295_v1  ;;  %v3338_v14 = vadd.f32 %v3337_v8, %v3336_v4 }
 0x12d   :  { %4935 = vst [vmem:[#allocation11_spill] sm:$0xff] %v4434_v10  ;;  %v4436_v15 = vadd.f32 %v3338_v14, %v3298_v12  ;;  %v2021_v16 = vsel %vm1952_vm0, %v4434_v10, 0.0  ;;  %v2045_v17 = vmul.f32 %v4434_v10, %v4434_v10 }
 0x12e   :  { %2059 = vadd.xlane.f32.xlu1 %v2058_v5  ;;  %2022 = vadd.xlane.f32.xlu0 %v2021_v16  ;;  %v3299_v21 = vpop.f32.mrb[28].mxu0 }
 0x12f   :  { %4936 = vst [vmem:[#allocation12_spill] sm:$0xff] %v4436_v15  ;;  %v2024_v18 = vsel %vm1952_vm0, %v4436_v15, 0.0  ;;  %v2061_v19 = vsel %vm1952_vm0, %v2045_v17, 0.0  ;;  %v2046_v20 = vmul.f32 %v4436_v15, %v4436_v15  ;;  %v3339_v22 = vpop.f32.mrb[28].mxu1  ;;  %v3300_v23 = vpop.f32.mrb[29].mxu0 }
 0x130   :  { %v3301_v24 = vadd.f32 %v3300_v23, %v3299_v21  ;;  %v3340_v25 = vpop.f32.mrb[29].mxu1  ;;  %v3302_v26 = vpop.f32.mrb[30].mxu0 }
 0x131   :  { %v2064_v27 = vsel %vm1952_vm0, %v2046_v20, 0.0  ;;  %v3341_v28 = vadd.f32 %v3340_v25, %v3339_v22  ;;  %v3342_v31 = vpop.f32.mrb[30].mxu1  ;;  %v3303_v34 = vpop.f32.mrb[31].mxu0 }
 0x132   :  { %2025 = vadd.xlane.f32.xlu1 %v2024_v18  ;;  %2062 = vadd.xlane.f32.xlu0 %v2061_v19  ;;  %v3304_v35 = vadd.f32 %v3303_v34, %v3302_v26  ;;  %v3343_v36 = vpop.f32.mrb[31].mxu1 }
 0x133   :  { %v4448_v37 = vadd.f32 %v3341_v28, %v3301_v24  ;;  %v3344_v38 = vadd.f32 %v3343_v36, %v3342_v31 }
 0x135   :  { %4937 = vst [vmem:[#allocation13_spill] sm:$0xff] %v4448_v37  ;;  %v4450_v39 = vadd.f32 %v3344_v38, %v3304_v35  ;;  %v2027_v40 = vsel %vm1952_vm0, %v4448_v37, 0.0  ;;  %v2047_v41 = vmul.f32 %v4448_v37, %v4448_v37 }
 0x136   :  { %2065 = vadd.xlane.f32.xlu1 %v2064_v27  ;;  %2028 = vadd.xlane.f32.xlu0 %v2027_v40  ;;  %v3361_v45 = vpop.f32.mrb[32].mxu0 }
 0x137   :  { %4938 = vst [vmem:[#allocation14_spill] sm:$0xff] %v4450_v39  ;;  %v2030_v42 = vsel %vm1952_vm0, %v4450_v39, 0.0  ;;  %v2067_v43 = vsel %vm1952_vm0, %v2047_v41, 0.0  ;;  %v2048_v44 = vmul.f32 %v4450_v39, %v4450_v39  ;;  %v3401_v46 = vpop.f32.mrb[32].mxu1  ;;  %v3362_v47 = vpop.f32.mrb[33].mxu0 }
 0x138   :  { %v3363_v48 = vadd.f32 %v3362_v47, %v3361_v45  ;;  %v3402_v49 = vpop.f32.mrb[33].mxu1  ;;  %v3364_v50 = vpop.f32.mrb[34].mxu0 }
 0x139   :  { %v2070_v54 = vsel %vm1952_vm0, %v2048_v44, 0.0  ;;  %v3403_v56 = vadd.f32 %v3402_v49, %v3401_v46  ;;  %v3404_v57 = vpop.f32.mrb[34].mxu1  ;;  %v3365_v58 = vpop.f32.mrb[35].mxu0 }
 0x13a   :  { %2031 = vadd.xlane.f32.xlu1 %v2030_v42  ;;  %2068 = vadd.xlane.f32.xlu0 %v2067_v43  ;;  %v3366_v59 = vadd.f32 %v3365_v58, %v3364_v50  ;;  %v3405_v60 = vpop.f32.mrb[35].mxu1 }
 0x13b   :  { %v4462_v61 = vadd.f32 %v3403_v56, %v3363_v48  ;;  %v3406_v62 = vadd.f32 %v3405_v60, %v3404_v57 }
 0x13d   :  { %v4464_v63 = vadd.f32 %v3406_v62, %v3366_v59  ;;  %v2081_v0 = vsel %vm1952_vm0, %v4462_v61, 0.0  ;;  %v2113_v1 = vmul.f32 %v4462_v61, %v4462_v61 }
 0x13e   :  { %2071 = vadd.xlane.f32.xlu1 %v2070_v54  ;;  %2082 = vadd.xlane.f32.xlu0 %v2081_v0  ;;  %v3367_v5 = vpop.f32.mrb[36].mxu0 }
 0x13f   :  { %4939 = vst [vmem:[#allocation15_spill] sm:$0xff] %v4464_v63  ;;  %v2084_v2 = vsel %vm1952_vm0, %v4464_v63, 0.0  ;;  %v2121_v3 = vsel %vm1952_vm0, %v2113_v1, 0.0  ;;  %v2114_v4 = vmul.f32 %v4464_v63, %v4464_v63  ;;  %v3407_v7 = vpop.f32.mrb[36].mxu1  ;;  %v3368_v8 = vpop.f32.mrb[37].mxu0 }
 0x140   :  { %v3408_v12 = vpop.f32.mrb[37].mxu1  ;;  %v3369_v14 = vadd.f32 %v3368_v8, %v3367_v5  ;;  %v3370_v17 = vpop.f32.mrb[38].mxu0 }
 0x141   :  { %v3409_v16 = vadd.f32 %v3408_v12, %v3407_v7  ;;  %v3410_v18 = vpop.f32.mrb[38].mxu1  ;;  %v2124_v19 = vsel %vm1952_vm0, %v2114_v4, 0.0  ;;  %v3371_v20 = vpop.f32.mrb[39].mxu0 }
 0x142   :  { %2085 = vadd.xlane.f32.xlu1 %v2084_v2  ;;  %2122 = vadd.xlane.f32.xlu0 %v2121_v3  ;;  %v3411_v21 = vpop.f32.mrb[39].mxu1  ;;  %v3372_v23 = vadd.f32 %v3371_v20, %v3370_v17 }
 0x143   :  { %v4476_v22 = vadd.f32 %v3409_v16, %v3369_v14  ;;  %v3412_v24 = vadd.f32 %v3411_v21, %v3410_v18 }
 0x145   :  { %4940 = vst [vmem:[#allocation16_spill] sm:$0xff] %v4476_v22  ;;  %v4478_v25 = vadd.f32 %v3412_v24, %v3372_v23  ;;  %v2087_v26 = vsel %vm1952_vm0, %v4476_v22, 0.0  ;;  %v2115_v27 = vmul.f32 %v4476_v22, %v4476_v22 }
 0x146   :  { %2125 = vadd.xlane.f32.xlu1 %v2124_v19  ;;  %2088 = vadd.xlane.f32.xlu0 %v2087_v26  ;;  %v3373_v35 = vpop.f32.mrb[40].mxu0 }
 0x147   :  { %4941 = vst [vmem:[#allocation17_spill] sm:$0xff] %v4478_v25  ;;  %v2090_v28 = vsel %vm1952_vm0, %v4478_v25, 0.0  ;;  %v2127_v31 = vsel %vm1952_vm0, %v2115_v27, 0.0  ;;  %v2116_v34 = vmul.f32 %v4478_v25, %v4478_v25  ;;  %v3413_v36 = vpop.f32.mrb[40].mxu1  ;;  %v3374_v38 = vpop.f32.mrb[41].mxu0 }
 0x148   :  { %v3375_v40 = vadd.f32 %v3374_v38, %v3373_v35  ;;  %v3414_v41 = vpop.f32.mrb[41].mxu1  ;;  %v3376_v42 = vpop.f32.mrb[42].mxu0 }
 0x149   :  { %v2130_v43 = vsel %vm1952_vm0, %v2116_v34, 0.0  ;;  %v3415_v44 = vadd.f32 %v3414_v41, %v3413_v36  ;;  %v3416_v45 = vpop.f32.mrb[42].mxu1  ;;  %v3377_v46 = vpop.f32.mrb[43].mxu0 }
 0x14a   :  { %2091 = vadd.xlane.f32.xlu1 %v2090_v28  ;;  %2128 = vadd.xlane.f32.xlu0 %v2127_v31  ;;  %v3378_v47 = vadd.f32 %v3377_v46, %v3376_v42  ;;  %v3417_v48 = vpop.f32.mrb[43].mxu1 }
 0x14b   :  { %v4490_v49 = vadd.f32 %v3415_v44, %v3375_v40  ;;  %v3418_v50 = vadd.f32 %v3417_v48, %v3416_v45 }
 0x14d   :  { %4942 = vst [vmem:[#allocation18_spill] sm:$0xff] %v4490_v49  ;;  %v4492_v54 = vadd.f32 %v3418_v50, %v3378_v47  ;;  %v2093_v56 = vsel %vm1952_vm0, %v4490_v49, 0.0  ;;  %v2117_v57 = vmul.f32 %v4490_v49, %v4490_v49 }
 0x14e   :  { %2131 = vadd.xlane.f32.xlu1 %v2130_v43  ;;  %2094 = vadd.xlane.f32.xlu0 %v2093_v56  ;;  %v3379_v62 = vpop.f32.mrb[44].mxu0 }
 0x14f   :  { %4943 = vst [vmem:[#allocation19_spill] sm:$0xff] %v4492_v54  ;;  %v2096_v58 = vsel %vm1952_vm0, %v4492_v54, 0.0  ;;  %v2133_v59 = vsel %vm1952_vm0, %v2117_v57, 0.0  ;;  %v2118_v60 = vmul.f32 %v4492_v54, %v4492_v54  ;;  %v3419_v0 = vpop.f32.mrb[44].mxu1  ;;  %v3380_v1 = vpop.f32.mrb[45].mxu0 }
 0x150   :  { %v3381_v2 = vadd.f32 %v3380_v1, %v3379_v62  ;;  %v3420_v3 = vpop.f32.mrb[45].mxu1  ;;  %v3382_v4 = vpop.f32.mrb[46].mxu0 }
 0x151   :  { %v2136_v5 = vsel %vm1952_vm0, %v2118_v60, 0.0  ;;  %v3421_v7 = vadd.f32 %v3420_v3, %v3419_v0  ;;  %v3422_v8 = vpop.f32.mrb[46].mxu1  ;;  %v3383_v12 = vpop.f32.mrb[47].mxu0 }
 0x152   :  { %2097 = vadd.xlane.f32.xlu1 %v2096_v58  ;;  %2134 = vadd.xlane.f32.xlu0 %v2133_v59  ;;  %v3384_v14 = vadd.f32 %v3383_v12, %v3382_v4  ;;  %v3423_v16 = vpop.f32.mrb[47].mxu1 }
 0x153   :  { %v4504_v17 = vadd.f32 %v3421_v7, %v3381_v2  ;;  %v3424_v18 = vadd.f32 %v3423_v16, %v3422_v8 }
 0x155   :  { %4944 = vst [vmem:[#allocation20_spill] sm:$0xff] %v4504_v17  ;;  %v4506_v19 = vadd.f32 %v3424_v18, %v3384_v14  ;;  %v2099_v20 = vsel %vm1952_vm0, %v4504_v17, 0.0  ;;  %v2119_v21 = vmul.f32 %v4504_v17, %v4504_v17 }
 0x156   :  { %2137 = vadd.xlane.f32.xlu1 %v2136_v5  ;;  %2100 = vadd.xlane.f32.xlu0 %v2099_v20  ;;  %v3441_v27 = vpop.f32.mrb[48].mxu0 }
 0x157   :  { %4945 = vst [vmem:[#allocation21_spill] sm:$0xff] %v4506_v19  ;;  %v2102_v23 = vsel %vm1952_vm0, %v4506_v19, 0.0  ;;  %v2139_v24 = vsel %vm1952_vm0, %v2119_v21, 0.0  ;;  %v2120_v26 = vmul.f32 %v4506_v19, %v4506_v19  ;;  %v3481_v28 = vpop.f32.mrb[48].mxu1  ;;  %v3442_v31 = vpop.f32.mrb[49].mxu0 }
 0x158   :  { %v3443_v34 = vadd.f32 %v3442_v31, %v3441_v27  ;;  %v3482_v35 = vpop.f32.mrb[49].mxu1  ;;  %v3444_v36 = vpop.f32.mrb[50].mxu0 }
 0x159   :  { %v2142_v38 = vsel %vm1952_vm0, %v2120_v26, 0.0  ;;  %v3483_v40 = vadd.f32 %v3482_v35, %v3481_v28  ;;  %v3484_v41 = vpop.f32.mrb[50].mxu1  ;;  %v3445_v42 = vpop.f32.mrb[51].mxu0 }
 0x15a   :  { %2103 = vadd.xlane.f32.xlu1 %v2102_v23  ;;  %2140 = vadd.xlane.f32.xlu0 %v2139_v24  ;;  %v3446_v43 = vadd.f32 %v3445_v42, %v3444_v36  ;;  %v3485_v44 = vpop.f32.mrb[51].mxu1 }
 0x15b   :  { %v4518_v45 = vadd.f32 %v3483_v40, %v3443_v34  ;;  %v3486_v46 = vadd.f32 %v3485_v44, %v3484_v41 }
 0x15d   :  { %v4520_v47 = vadd.f32 %v3486_v46, %v3446_v43  ;;  %v2153_v48 = vsel %vm1952_vm0, %v4518_v45, 0.0  ;;  %v2185_v50 = vmul.f32 %v4518_v45, %v4518_v45 }
 0x15e   :  { %2143 = vadd.xlane.f32.xlu1 %v2142_v38  ;;  %2154 = vadd.xlane.f32.xlu0 %v2153_v48  ;;  %v3447_v56 = vpop.f32.mrb[52].mxu0 }
 0x15f   :  { %4946 = vst [vmem:[#allocation22_spill] sm:$0xff] %v4520_v47  ;;  %v3487_v57 = vpop.f32.mrb[52].mxu1  ;;  %v3448_v58 = vpop.f32.mrb[53].mxu0  ;;  %v2156_v59 = vsel %vm1952_vm0, %v4520_v47, 0.0  ;;  %v2193_v60 = vsel %vm1952_vm0, %v2185_v50, 0.0  ;;  %v2186_v62 = vmul.f32 %v4520_v47, %v4520_v47 }
 0x160   :  { %v3449_v0 = vadd.f32 %v3448_v58, %v3447_v56  ;;  %v3488_v1 = vpop.f32.mrb[53].mxu1  ;;  %v3450_v2 = vpop.f32.mrb[54].mxu0 }
 0x161   :  { %v3489_v3 = vadd.f32 %v3488_v1, %v3487_v57  ;;  %v3490_v4 = vpop.f32.mrb[54].mxu1  ;;  %v3451_v5 = vpop.f32.mrb[55].mxu0  ;;  %v2196_v16 = vsel %vm1952_vm0, %v2186_v62, 0.0 }
 0x162   :  { %2157 = vadd.xlane.f32.xlu1 %v2156_v59  ;;  %2194 = vadd.xlane.f32.xlu0 %v2193_v60  ;;  %v3452_v7 = vadd.f32 %v3451_v5, %v3450_v2  ;;  %v3491_v8 = vpop.f32.mrb[55].mxu1 }
 0x163   :  { %v4531_v12 = vadd.f32 %v3489_v3, %v3449_v0  ;;  %v3492_v14 = vadd.f32 %v3491_v8, %v3490_v4 }
 0x165   :  { %4947 = vst [vmem:[#allocation23_spill] sm:$0xff] %v4531_v12  ;;  %v4534_v18 = vadd.f32 %v3492_v14, %v3452_v7  ;;  %v2159_v20 = vsel %vm1952_vm0, %v4531_v12, 0.0  ;;  %v2187_v21 = vmul.f32 %v4531_v12, %v4531_v12 }
 0x166   :  { %2197 = vadd.xlane.f32.xlu1 %v2196_v16  ;;  %2160 = vadd.xlane.f32.xlu0 %v2159_v20  ;;  %v3453_v23 = vpop.f32.mrb[56].mxu0 }
 0x167   :  { %4948 = vst [vmem:[#allocation24_spill] sm:$0xff] %v4534_v18  ;;  %v3493_v24 = vpop.f32.mrb[56].mxu1  ;;  %v3454_v26 = vpop.f32.mrb[57].mxu0  ;;  %v2162_v27 = vsel %vm1952_vm0, %v4534_v18, 0.0  ;;  %v2199_v28 = vsel %vm1952_vm0, %v2187_v21, 0.0  ;;  %v2188_v31 = vmul.f32 %v4534_v18, %v4534_v18 }
 0x168   :  { %v3455_v34 = vadd.f32 %v3454_v26, %v3453_v23  ;;  %v3494_v35 = vpop.f32.mrb[57].mxu1  ;;  %v3456_v36 = vpop.f32.mrb[58].mxu0 }
 0x169   :  { %v3495_v38 = vadd.f32 %v3494_v35, %v3493_v24  ;;  %v3496_v40 = vpop.f32.mrb[58].mxu1  ;;  %v3457_v41 = vpop.f32.mrb[59].mxu0  ;;  %v2202_v48 = vsel %vm1952_vm0, %v2188_v31, 0.0 }
 0x16a   :  { %2163 = vadd.xlane.f32.xlu1 %v2162_v27  ;;  %2200 = vadd.xlane.f32.xlu0 %v2199_v28  ;;  %v3458_v42 = vadd.f32 %v3457_v41, %v3456_v36  ;;  %v3497_v43 = vpop.f32.mrb[59].mxu1 }
 0x16b   :  { %v4545_v44 = vadd.f32 %v3495_v38, %v3455_v34  ;;  %v3498_v46 = vadd.f32 %v3497_v43, %v3496_v40 }
 0x16d   :  { %4949 = vst [vmem:[#allocation25_spill] sm:$0xff] %v4545_v44  ;;  %v4548_v50 = vadd.f32 %v3498_v46, %v3458_v42  ;;  %v2165_v56 = vsel %vm1952_vm0, %v4545_v44, 0.0  ;;  %v2189_v57 = vmul.f32 %v4545_v44, %v4545_v44 }
 0x16e   :  { %2203 = vadd.xlane.f32.xlu1 %v2202_v48  ;;  %2166 = vadd.xlane.f32.xlu0 %v2165_v56  ;;  %v3459_v59 = vpop.f32.mrb[60].mxu0 }
 0x16f   :  { %4950 = vst [vmem:[#allocation26_spill] sm:$0xff] %v4548_v50  ;;  %v3499_v60 = vpop.f32.mrb[60].mxu1  ;;  %v3460_v62 = vpop.f32.mrb[61].mxu0  ;;  %v2168_v0 = vsel %vm1952_vm0, %v4548_v50, 0.0  ;;  %v2205_v1 = vsel %vm1952_vm0, %v2189_v57, 0.0  ;;  %v2190_v2 = vmul.f32 %v4548_v50, %v4548_v50 }
 0x170   :  { %v3461_v3 = vadd.f32 %v3460_v62, %v3459_v59  ;;  %v3500_v4 = vpop.f32.mrb[61].mxu1  ;;  %v3462_v5 = vpop.f32.mrb[62].mxu0  ;;  %v3748_v62 = vmov 0  }
 0x171   :  { %v3501_v7 = vadd.f32 %v3500_v4, %v3499_v60  ;;  %v3502_v8 = vpop.f32.mrb[62].mxu1  ;;  %v3463_v14 = vpop.f32.mrb[63].mxu0  ;;  %v2208_v16 = vsel %vm1952_vm0, %v2190_v2, 0.0  ;;  %3506 = vset.pattern.permute.xlu0 %v3748_v62  ;;  %3507 = vset.pattern.permute.xlu1 %v3748_v62 }
 0x172   :  { %2169 = vadd.xlane.f32.xlu1 %v2168_v0  ;;  %2206 = vadd.xlane.f32.xlu0 %v2205_v1  ;;  %v3464_v20 = vadd.f32 %v3463_v14, %v3462_v5  ;;  %v3503_v21 = vpop.f32.mrb[63].mxu1 }
 0x173   :  { %v4564_v24 = vadd.f32 %v3501_v7, %v3461_v3  ;;  %v3504_v26 = vadd.f32 %v3503_v21, %v3502_v8 }
 0x175   :  { %4951 = vst [vmem:[#allocation27_spill] sm:$0xff] %v4564_v24  ;;  %v4568_v28 = vadd.f32 %v3504_v26, %v3464_v20  ;;  %v2171_v31 = vsel %vm1952_vm0, %v4564_v24, 0.0  ;;  %v2191_v34 = vmul.f32 %v4564_v24, %v4564_v24 }
 0x176   :  { %2209 = vadd.xlane.f32.xlu1 %v2208_v16  ;;  %2172 = vadd.xlane.f32.xlu0 %v2171_v31 }
 0x177   :  { %4952 = vst [vmem:[#allocation28_spill] sm:$0xff] %v4568_v28  ;;  %v2174_v36 = vsel %vm1952_vm0, %v4568_v28, 0.0  ;;  %v2211_v38 = vsel %vm1952_vm0, %v2191_v34, 0.0  ;;  %v2192_v40 = vmul.f32 %v4568_v28, %v4568_v28 }
 0x179   :  { %v2214_v42 = vsel %vm1952_vm0, %v2192_v40, 0.0 }
 0x17a   :  { %2175 = vadd.xlane.f32.xlu1 %v2174_v36  ;;  %2212 = vadd.xlane.f32.xlu0 %v2211_v38 }
 0x17e   :  { %2215 = vadd.xlane.f32.xlu1 %v2214_v42 }
 0x18b   :  { %v4554_v58 = vpop.xlane.xlu0 %1954 }
 0x18f   :  { %v4562_v23 = vpop.xlane.xlu1 %1989  ;;  %v4566_v27 = vpop.xlane.xlu0 %1957 }
 0x193   :  { %v1961_v35 = vpop.xlane.xlu1 %1960  ;;  %v1987_v41 = vpop.xlane.xlu0 %1986 }
 0x197   :  { %v4580_v43 = vpop.xlane.xlu1 %1963  ;;  %v4582_v46 = vpop.xlane.xlu0 %1992 }
 0x19b   :  { %v4584_v48 = vpop.xlane.xlu1 %1995  ;;  %v1967_v56 = vpop.xlane.xlu0 %1966 }
 0x19f   :  { %v4586_v57 = vpop.xlane.xlu1 %1969  ;;  %v1999_v59 = vpop.xlane.xlu0 %1998 }
 0x1a3   :  { %v4588_v60 = vpop.xlane.xlu1 %2001  ;;  %v1973_v0 = vpop.xlane.xlu0 %1972 }
 0x1a7   :  { %v4590_v1 = vpop.xlane.xlu1 %1975  ;;  %v2005_v2 = vpop.xlane.xlu0 %2004 }
 0x1ab   :  { %v4592_v3 = vpop.xlane.xlu1 %2007  ;;  %v2011_v4 = vpop.xlane.xlu0 %2010 }
 0x1ac   :  { %v2033_v51 = vadd.f32 %v2011_v4, %v4554_v58 }
 0x1af   :  { %v2014_v5 = vpop.xlane.xlu1 %2013  ;;  %v2051_v7 = vpop.xlane.xlu0 %2050 }
 0x1b0   :  { %v2034_v50 = vadd.f32 %v2014_v5, %v4566_v27  ;;  %v2073_v53 = vadd.f32 %v2051_v7, %v1987_v41 }
 0x1b3   :  { %v2054_v8 = vpop.xlane.xlu1 %2053  ;;  %v2017_v14 = vpop.xlane.xlu0 %2016 }
 0x1b4   :  { %v2035_v16 = vadd.f32 %v2017_v14, %v1961_v35  ;;  %v2074_v30 = vadd.f32 %v2054_v8, %v4562_v23 }
 0x1b7   :  { %v2020_v20 = vpop.xlane.xlu1 %2019  ;;  %v2057_v21 = vpop.xlane.xlu0 %2056 }
 0x1b8   :  { %v2036_v58 = vadd.f32 %v2020_v20, %v4580_v43 }
 0x1bb   :  { %v2060_v26 = vpop.xlane.xlu1 %2059  ;;  %v2023_v31 = vpop.xlane.xlu0 %2022 }
 0x1bc   :  { %v4594_v34 = vadd.f32 %v2023_v31, %v1967_v56 }
 0x1bf   :  { %v4596_v36 = vpop.xlane.xlu1 %2025  ;;  %v2063_v38 = vpop.xlane.xlu0 %2062 }
 0x1c0   :  { %v4598_v40 = vadd.f32 %v2063_v38, %v1999_v59  ;;  %v2038_v7 = vadd.f32 %v4596_v36, %v4586_v57 }
 0x1c3   :  { %v4600_v42 = vpop.xlane.xlu1 %2065  ;;  %v2029_v62 = vpop.xlane.xlu0 %2028 }
 0x1c4   :  { %v4602_v24 = vadd.f32 %v2029_v62, %v1973_v0  ;;  %v2078_v57 = vadd.f32 %v4600_v42, %v4588_v60 }
 0x1c7   :  { %v4604_v17 = vpop.xlane.xlu1 %2031  ;;  %v2069_v37 = vpop.xlane.xlu0 %2068 }
 0x1c8   :  { %v4606_v35 = vadd.f32 %v2069_v37, %v2005_v2  ;;  %v2040_v60 = vadd.f32 %v4604_v17, %v4590_v1 }
 0x1cb   :  { %v4608_v14 = vpop.xlane.xlu1 %2071  ;;  %v2083_v6 = vpop.xlane.xlu0 %2082 }
 0x1cc   :  { %v2105_v54 = vadd.f32 %v2083_v6, %v2033_v51 }
 0x1cf   :  { %v2086_v56 = vpop.xlane.xlu1 %2085  ;;  %v2123_v31 = vpop.xlane.xlu0 %2122 }
 0x1d0   :  { %v2106_v12 = vadd.f32 %v2086_v56, %v2034_v50  ;;  %v2145_v18 = vadd.f32 %v2123_v31, %v2073_v53 }
 0x1d3   :  { %v2126_v28 = vpop.xlane.xlu1 %2125  ;;  %v2089_v19 = vpop.xlane.xlu0 %2088 }
 0x1d4   :  { %v2146_v47 = vadd.f32 %v2126_v28, %v2074_v30  ;;  %v2107_v51 = vadd.f32 %v2089_v19, %v2035_v16 }
 0x1d7   :  { %v2092_v39 = vpop.xlane.xlu1 %2091  ;;  %v2129_v59 = vpop.xlane.xlu0 %2128 }
 0x1d8   :  { %v2108_v50 = vadd.f32 %v2092_v39, %v2036_v58 }
 0x1db   :  { %v2132_v38 = vpop.xlane.xlu1 %2131  ;;  %v2095_v9 = vpop.xlane.xlu0 %2094 }
 0x1dc   :  { %v2109_v16 = vadd.f32 %v2095_v9, %v4594_v34 }
 0x1df   :  { %v2098_v44 = vpop.xlane.xlu1 %2097  ;;  %v4610_v49 = vpop.xlane.xlu0 %2134 }
 0x1e0   :  { %v2149_v34 = vadd.f32 %v4610_v49, %v4598_v40 }
 0x1e3   :  { %v4612_v0 = vpop.xlane.xlu1 %2137  ;;  %v4614_v62 = vpop.xlane.xlu0 %2100 }
 0x1e4   :  { %v2111_v42 = vadd.f32 %v4614_v62, %v4602_v24 }
 0x1e7   :  { %v4616_v37 = vpop.xlane.xlu1 %2103  ;;  %v4618_v2 = vpop.xlane.xlu0 %2140 }
 0x1eb   :  { %v4620_v10 = vpop.xlane.xlu1 %2143  ;;  %v2155_v15 = vpop.xlane.xlu0 %2154 }
 0x1ec   :  { %v2177_v22 = vadd.f32 %v2155_v15, %v2105_v54 }
 0x1ee   :  { %v4625_v25 = vmul.f32 0.0078125, %v2177_v22 }
 0x1ef   :  { %v2158_v52 = vpop.xlane.xlu1 %2157  ;;  %v2195_v33 = vpop.xlane.xlu0 %2194 }
 0x1f0   :  { %v2178_v55 = vadd.f32 %v2158_v52, %v2106_v12  ;;  %v2217_v32 = vadd.f32 %v2195_v33, %v2145_v18  ;;  %v2241_v6 = vmul.f32 %v4625_v25, %v4625_v25  ;;  %v2076_v12 = vadd.f32 %v2060_v26, %v4584_v48 }
 0x1f2   :  { %v4627_v63 = vmul.f32 0.0078125, %v2178_v55  ;;  %v2233_v15 = vmul.f32 0.0078125, %v2217_v32  ;;  %v2075_v55 = vadd.f32 %v2057_v21, %v4582_v46  ;;  %v2148_v39 = vadd.f32 %v2132_v38, %v2076_v12 }
 0x1f3   :  { %v2198_v27 = vpop.xlane.xlu1 %2197  ;;  %v2161_v23 = vpop.xlane.xlu0 %2160  ;;  %v2110_v21 = vadd.f32 %v2098_v44, %v2038_v7  ;;  %v2151_v7 = vadd.f32 %v4618_v2, %v4606_v35  ;;  %v2297_v35 = vld [vmem:[%s4897_s3] sm:$0xff] }
 0x1f4   :  { %v2218_v54 = vadd.f32 %v2198_v27, %v2146_v47  ;;  %v2242_v53 = vmul.f32 %v4627_v63, %v4627_v63  ;;  %v2249_v52 = vsub.f32 %v2233_v15, %v2241_v6  ;;  %v2179_v30 = vadd.f32 %v2161_v23, %v2107_v51 }
 0x1f5   :  { %v2147_v41 = vadd.f32 %v2129_v59, %v2075_v55 }
 0x1f6   :  { %v2234_v22 = vmul.f32 0.0078125, %v2218_v54  ;;  %v2257_v18 = vmax.f32 %v2249_v52, 0.0  ;;  %v4636_v43 = vmul.f32 0.0078125, %v2179_v30  ;;  %v2150_v54 = vadd.f32 %v4612_v0, %v2078_v57  ;;  %v2265_v0 = vld [vmem:[%s4896_s2] sm:$0xff] }
 0x1f7   :  { %v2164_v33 = vpop.xlane.xlu1 %2163  ;;  %v2201_v32 = vpop.xlane.xlu0 %2200 }
 0x1f8   :  { %v2250_v19 = vsub.f32 %v2234_v22, %v2242_v53  ;;  %v2180_v28 = vadd.f32 %v2164_v33, %v2108_v50  ;;  %v2273_v47 = vadd.f32 1e-05, %v2257_v18  ;;  %v2219_v8 = vadd.f32 %v2201_v32, %v2147_v41 }
 0x1f9   :  { %v2243_v26 = vmul.f32 %v4636_v43, %v4636_v43  ;;  %v2112_v33 = vadd.f32 %v4616_v37, %v2040_v60  ;;  %v2080_v37 = vadd.f32 %v4608_v14, %v4592_v3  ;;  %v2298_v3 = vld [vmem:[%s4897_s3 + $0x8] sm:$0xff] }
 0x1fa   :  { %v2258_v4 = vmax.f32 %v2250_v19, 0.0  ;;  %v4638_v5 = vmul.f32 0.0078125, %v2180_v28  ;;  %3732 = vrsqrt.f32 %v2273_v47  ;;  %v2235_v56 = vmul.f32 0.0078125, %v2219_v8  ;;  %v2266_v19 = vld [vmem:[%s4896_s2 + $0x8] sm:$0xff] }
 0x1fb   :  { %v2204_v46 = vpop.xlane.xlu1 %2203  ;;  %v2167_v31 = vpop.xlane.xlu0 %2166 }
 0x1fc   :  { %v2274_v48 = vadd.f32 1e-05, %v2258_v4  ;;  %v2220_v20 = vadd.f32 %v2204_v46, %v2148_v39  ;;  %v2244_v59 = vmul.f32 %v4638_v5, %v4638_v5  ;;  %v2181_v58 = vadd.f32 %v2167_v31, %v2109_v16 }
 0x1fd   :  { %v2251_v36 = vsub.f32 %v2235_v56, %v2243_v26 }
 0x1fe   :  { %3734 = vrsqrt.f32 %v2274_v48  ;;  %v2236_v38 = vmul.f32 0.0078125, %v2220_v20  ;;  %v4651_v27 = vmul.f32 0.0078125, %v2181_v58  ;;  %v2152_v20 = vadd.f32 %v4620_v10, %v2080_v37 }
 0x1ff   :  { %v2170_v9 = vpop.xlane.xlu1 %2169  ;;  %v2259_v6 = vmax.f32 %v2251_v36, 0.0  ;;  %v2207_v15 = vpop.xlane.xlu0 %2206  ;;  %v2267_v36 = vld [vmem:[%s4896_s2 + $0x10] sm:$0xff] }
 0x200   :  { %v2252_v44 = vsub.f32 %v2236_v38, %v2244_v59  ;;  %v2182_v51 = vadd.f32 %v2170_v9, %v2110_v21  ;;  %v2221_v53 = vadd.f32 %v2207_v15, %v2149_v34  ;;  %v2245_v22 = vmul.f32 %v4651_v27, %v4651_v27 }
 0x201   :  { %v2275_v52 = vadd.f32 1e-05, %v2259_v6 }
 0x202   :  { %v2260_v50 = vmax.f32 %v2252_v44, 0.0  ;;  %v4654_v23 = vmul.f32 0.0078125, %v2182_v51  ;;  %v2237_v30 = vmul.f32 0.0078125, %v2221_v53 }
 0x203   :  { %v2210_v49 = vpop.xlane.xlu1 %2209  ;;  %3736 = vrsqrt.f32 %v2275_v52  ;;  %v2173_v1 = vpop.xlane.xlu0 %2172 }
 0x204   :  { %v2276_v40 = vadd.f32 1e-05, %v2260_v50  ;;  %v2222_v55 = vadd.f32 %v2210_v49, %v2150_v54  ;;  %v2246_v17 = vmul.f32 %v4654_v23, %v4654_v23  ;;  %v3733_v24 = vpop.eup %3732  ;;  %v2253_v62 = vsub.f32 %v2237_v30, %v2245_v22  ;;  %v2269_v30 = vld [vmem:[%s4896_s2 + $0x20] sm:$0xff] }
 0x205   :  { %v2183_v18 = vadd.f32 %v2173_v1, %v2111_v42  ;;  %v2289_v41 = vmul.f32 %v3733_v24, %v2265_v0  ;;  %v2300_v42 = vld [vmem:[%s4897_s3 + $0x18] sm:$0xff] }
 0x206   :  { %3738 = vrsqrt.f32 %v2276_v40  ;;  %v2238_v12 = vmul.f32 0.0078125, %v2222_v55  ;;  %v2261_v39 = vmax.f32 %v2253_v62, 0.0 }
 0x207   :  { %v2176_v28 = vpop.xlane.xlu1 %2175  ;;  %v4675_v8 = vmul.f32 0.0078125, %v2183_v18  ;;  %2323 = vperm.xlu0 %3506, %v2289_v41   ;;  %v2213_v46 = vpop.xlane.xlu0 %2212  ;;  %v2305_v48 = vmul.f32 %v2289_v41, %v4625_v25  ;;  %v2272_v41 = vld [vmem:[%s4896_s2 + $0x38] sm:$0xff] }
 0x208   :  { %v3735_v32 = vpop.eup %3734  ;;  %v2254_v47 = vsub.f32 %v2238_v12, %v2246_v17  ;;  %v2184_v4 = vadd.f32 %v2176_v28, %v2112_v33  ;;  %v2277_v21 = vadd.f32 1e-05, %v2261_v39  ;;  %v2223_v14 = vadd.f32 %v2213_v46, %v2151_v7  ;;  %v2299_v33 = vld [vmem:[%s4897_s3 + $0x10] sm:$0xff]  ;;  %v2302_v12 = vld [vmem:[%s4897_s3 + $0x28] sm:$0xff] }
 0x209   :  { %v2290_v16 = vmul.f32 %v3735_v32, %v2266_v19  ;;  %v2247_v59 = vmul.f32 %v4675_v8, %v4675_v8  ;;  %v2313_v57 = vsub.f32 %v2297_v35, %v2305_v48  ;;  %v2271_v28 = vld [vmem:[%s4896_s2 + $0x30] sm:$0xff] }
 0x20a   :  { %v2262_v26 = vmax.f32 %v2254_v47, 0.0  ;;  %v4679_v56 = vmul.f32 0.0078125, %v2184_v4  ;;  %3740 = vrsqrt.f32 %v2277_v21  ;;  %v2239_v38 = vmul.f32 0.0078125, %v2223_v14  ;;  %v2304_v47 = vld [vmem:[%s4897_s3 + $0x38] sm:$0xff]  ;;  %v2303_v48 = vld [vmem:[%s4897_s3 + $0x30] sm:$0xff] }
 0x20b   :  { %v2216_v2 = vpop.xlane.xlu1 %2215  ;;  %2328 = vperm.xlu1 %3507, %v2290_v16   ;;  %v2306_v31 = vmul.f32 %v2290_v16, %v4627_v63  ;;  %v2268_v63 = vld [vmem:[%s4896_s2 + $0x18] sm:$0xff] }
 0x20c   :  { %v2278_v25 = vadd.f32 1e-05, %v2262_v26  ;;  %v2224_v10 = vadd.f32 %v2216_v2, %v2152_v20  ;;  %v2248_v9 = vmul.f32 %v4679_v56, %v4679_v56  ;;  %v2255_v51 = vsub.f32 %v2239_v38, %v2247_v59  ;;  %v4953_v2 = vld [vmem:[#allocation8_spill] sm:$0xff]  ;;  %v4955_v59 = vld [vmem:[#allocation22_spill] sm:$0xff] }
 0x20d   :  { %v2314_v58 = vsub.f32 %v2298_v3, %v2306_v31  ;;  %v3737_v44 = vpop.eup %3736 }
 0x20e   :  { %3742 = vrsqrt.f32 %v2278_v25  ;;  %v2240_v34 = vmul.f32 0.0078125, %v2224_v10  ;;  %v2291_v54 = vmul.f32 %v3737_v44, %v2267_v36  ;;  %v2263_v50 = vmax.f32 %v2255_v51, 0.0  ;;  %v4954_v25 = vld [vmem:[#allocation15_spill] sm:$0xff] }
 0x20f   :  { %2376 = vperm.xlu0 %3506, %v2314_v58   ;;  %2371 = vperm.xlu1 %3507, %v2313_v57  }
 0x210   :  { %v3739_v6 = vpop.eup %3738  ;;  %v2256_v15 = vsub.f32 %v2240_v34, %v2248_v9  ;;  %v2307_v52 = vmul.f32 %v2291_v54, %v4636_v43  ;;  %v2279_v49 = vadd.f32 1e-05, %v2263_v50  ;;  %v2270_v43 = vld [vmem:[%s4896_s2 + $0x28] sm:$0xff] }
 0x211   :  { %v2292_v53 = vmul.f32 %v3739_v6, %v2268_v63 }
 0x212   :  { %v2264_v60 = vmax.f32 %v2256_v15, 0.0  ;;  %3744 = vrsqrt.f32 %v2279_v49  ;;  %v2315_v1 = vsub.f32 %v2299_v33, %v2307_v52 }
 0x213   :  { %2333 = vperm.xlu1 %3507, %v2291_v54   ;;  %v2308_v40 = vmul.f32 %v2292_v53, %v4638_v5 }
 0x214   :  { %v2280_v22 = vadd.f32 1e-05, %v2264_v60  ;;  %v3741_v0 = vpop.eup %3740 }
 0x215   :  { %v2316_v55 = vsub.f32 %v2300_v42, %v2308_v40  ;;  %v2293_v5 = vmul.f32 %v3741_v0, %v2269_v30 }
 0x216   :  { %3746 = vrsqrt.f32 %v2280_v22 }
 0x217   :  { %2386 = vperm.xlu0 %3506, %v2316_v55   ;;  %2338 = vperm.xlu1 %3507, %v2292_v53   ;;  %v2309_v62 = vmul.f32 %v2293_v5, %v4651_v27 }
 0x218   :  { %v3743_v17 = vpop.eup %3742 }
 0x219   :  { %v2294_v24 = vmul.f32 %v3743_v17, %v2270_v43  ;;  %v4956_v43 = vld [vmem:[#allocation3_spill] sm:$0xff]  ;;  %v4957_v17 = vld [vmem:[#allocation10_spill] sm:$0xff] }
 0x21b   :  { %2381 = vperm.xlu1 %3507, %v2315_v1   ;;  %v2310_v18 = vmul.f32 %v2294_v24, %v4654_v23  ;;  %v2301_v23 = vld [vmem:[%s4897_s3 + $0x20] sm:$0xff] }
 0x21c   :  { %v3745_v32 = vpop.eup %3744  ;;  %v2317_v16 = vsub.f32 %v2301_v23, %v2309_v62 }
 0x21d   :  { %v2318_v19 = vsub.f32 %v2302_v12, %v2310_v18  ;;  %v2295_v37 = vmul.f32 %v3745_v32, %v2271_v28  ;;  %v4959_v12 = vld [vmem:[#allocation24_spill] sm:$0xff] }
 0x21f   :  { %2396 = vperm.xlu0 %3506, %v2318_v19   ;;  %2343 = vperm.xlu1 %3507, %v2293_v5   ;;  %v2311_v4 = vmul.f32 %v2295_v37, %v4675_v8 }
 0x220   :  { %v3747_v27 = vpop.eup %3746 }
 0x221   :  { %v2296_v39 = vmul.f32 %v3747_v27, %v2272_v41  ;;  %v2319_v20 = vsub.f32 %v2303_v48, %v2311_v4  ;;  %v4962_v4 = vld [vmem:[#allocation16_spill] sm:$0xff] }
 0x223   :  { %2348 = vperm.xlu1 %3507, %v2294_v24   ;;  %v2312_v7 = vmul.f32 %v2296_v39, %v4679_v56  ;;  %v4958_v24 = vld [vmem:[#allocation17_spill] sm:$0xff] }
 0x225   :  { %v2320_v46 = vsub.f32 %v2304_v47, %v2312_v7  ;;  %v4961_v47 = vld [vmem:[#allocation9_spill] sm:$0xff] }
 0x227   :  { %2406 = vperm.xlu0 %3506, %v2320_v46   ;;  %2391 = vperm.xlu1 %3507, %v2317_v16   ;;  %v4963_v46 = vld [vmem:[#allocation23_spill] sm:$0xff] }
 0x22b   :  { %2353 = vperm.xlu1 %3507, %v2295_v37   ;;  %v4960_v37 = vld [vmem:[#allocation2_spill] sm:$0xff] }
 0x22f   :  { %2358 = vperm.xlu1 %3507, %v2296_v39  }
 0x233   :  { %2401 = vperm.xlu1 %3507, %v2319_v20  }
 0x286   :  { %v2324_v21 = vpop.permute.xlu0 %2323 }
 0x287   :  { %v2361_v8 = vmul.f32 %v2324_v21, %v4350_v11  ;;  %v2466_v3 = vmul.f32 %v2324_v21, %v4406_v29  ;;  %v2531_v56 = vmul.f32 %v2324_v21, %v4462_v61  ;;  %v2596_v35 = vmul.f32 %v2324_v21, %v4518_v45 }
 0x28a   :  { %v2329_v26 = vpop.permute.xlu1 %2328 }
 0x28b   :  { %v2362_v14 = vmul.f32 %v2329_v26, %v4352_v13  ;;  %v2467_v31 = vmul.f32 %v2329_v26, %v4953_v2  ;;  %v2532_v10 = vmul.f32 %v2329_v26, %v4954_v25  ;;  %v2597_v38 = vmul.f32 %v2329_v26, %v4955_v59 }
 0x28e   :  { %v2372_v58 = vpop.permute.xlu1 %2371  ;;  %v2377_v57 = vpop.permute.xlu0 %2376 }
 0x28f   :  { %v2409_v36 = vadd.f32 %v2372_v58, %v2361_v8  ;;  %v2474_v9 = vadd.f32 %v2466_v3, %v2372_v58  ;;  %v2539_v34 = vadd.f32 %v2531_v56, %v2372_v58  ;;  %v2604_v11 = vadd.f32 %v2596_v35, %v2372_v58 }
 0x290   :  { %v2410_v63 = vadd.f32 %v2377_v57, %v2362_v14  ;;  %v2475_v29 = vadd.f32 %v2467_v31, %v2377_v57  ;;  %v2540_v44 = vadd.f32 %v2532_v10, %v2377_v57  ;;  %v2605_v61 = vadd.f32 %v2597_v38, %v2377_v57 }
 0x291   :  { %v2417_v51 = vmax.f32 %v2409_v36, 0.0  ;;  %v2482_v45 = vmax.f32 %v2474_v9, 0.0  ;;  %v2547_v6 = vmax.f32 %v2539_v34, 0.0  ;;  %v2612_v13 = vmax.f32 %v2604_v11, 0.0 }
 0x292   :  { %v2418_v15 = vmax.f32 %v2410_v63, 0.0  ;;  %v2483_v54 = vmax.f32 %v2475_v29, 0.0  ;;  %v2548_v50 = vmax.f32 %v2540_v44, 0.0  ;;  %v2613_v53 = vmax.f32 %v2605_v61, 0.0  ;;  %v2334_v60 = vpop.permute.xlu1 %2333  ;;  %v4964_v44 = vld [vmem:[#allocation5_spill] sm:$0xff] }
 0x293   :  { %v3153_v42 = vpack.c.bf16 %v2417_v51, %v2417_v51  ;;  %v3161_v52 = vpack.c.bf16 %v2482_v45, %v2482_v45  ;;  %v3169_v49 = vpack.c.bf16 %v2547_v6, %v2547_v6  ;;  %v3177_v40 = vpack.c.bf16 %v2612_v13, %v2612_v13  ;;  %v4965_v51 = vld [vmem:[#allocation12_spill] sm:$0xff]  ;;  %v4966_v6 = vld [vmem:[#allocation19_spill] sm:$0xff] }
 0x294   :  { %v3154_v22 = vpack.c.bf16 %v2418_v15, %v2418_v15  ;;  %v3162_v30 = vpack.c.bf16 %v2483_v54, %v2483_v54  ;;  %v3170_v55 = vpack.c.bf16 %v2548_v50, %v2548_v50  ;;  %v3178_v0 = vpack.c.bf16 %v2613_v53, %v2613_v53  ;;  %v4967_v15 = vld [vmem:[#allocation26_spill] sm:$0xff] }
 0x295   :  { %2458 = vst.msk [vmem:[%s4898_s4] sm:$0xf] %vm2457_vm1, %v3153_v42  ;;  %3113 = vst.msk [vmem:[%s4898_s4 + $0x20] sm:$0xf] %vm2457_vm1, %v3161_v52  ;;  %v2363_v39 = vmul.f32 %v2334_v60, %v4960_v37  ;;  %v2468_v23 = vmul.f32 %v2334_v60, %v4961_v47  ;;  %v2533_v7 = vmul.f32 %v2334_v60, %v4962_v4 }
 0x296   :  { %3129 = vst.msk [vmem:[%s4898_s4 + $0x40] sm:$0xf] %vm2457_vm1, %v3169_v49  ;;  %3145 = vst.msk [vmem:[%s4898_s4 + $0x60] sm:$0xf] %vm2457_vm1, %v3177_v40  ;;  %v2339_v33 = vpop.permute.xlu1 %2338  ;;  %v2387_v19 = vpop.permute.xlu0 %2386  ;;  %v2598_v16 = vmul.f32 %v2334_v60, %v4963_v46  ;;  %v4968_v49 = vld [vmem:[#allocation4_spill] sm:$0xff] }
 0x297   :  { %2459 = vst.msk [vmem:[%s4898_s4 + $0x4] sm:$0xf] %vm2457_vm1, %v3154_v22  ;;  %3114 = vst.msk [vmem:[%s4898_s4 + $0x24] sm:$0xf] %vm2457_vm1, %v3162_v30  ;;  %v2364_v5 = vmul.f32 %v2339_v33, %v4956_v43  ;;  %v2469_v1 = vmul.f32 %v2339_v33, %v4957_v17  ;;  %v2534_v62 = vmul.f32 %v2339_v33, %v4958_v24  ;;  %v4969_v22 = vld [vmem:[#allocation11_spill] sm:$0xff] }
 0x298   :  { %3130 = vst.msk [vmem:[%s4898_s4 + $0x44] sm:$0xf] %vm2457_vm1, %v3170_v55  ;;  %3146 = vst.msk [vmem:[%s4898_s4 + $0x64] sm:$0xf] %vm2457_vm1, %v3178_v0  ;;  %v2599_v18 = vmul.f32 %v2339_v33, %v4959_v12  ;;  %v4970_v55 = vld [vmem:[#allocation18_spill] sm:$0xff]  ;;  %v4971_v33 = vld [vmem:[#allocation25_spill] sm:$0xff] }
 0x299   :  { %v2412_v28 = vadd.f32 %v2387_v19, %v2364_v5  ;;  %v2477_v41 = vadd.f32 %v2469_v1, %v2387_v19  ;;  %v2542_v32 = vadd.f32 %v2534_v62, %v2387_v19 }
 0x29a   :  { %v2607_v27 = vadd.f32 %v2599_v18, %v2387_v19  ;;  %v2382_v48 = vpop.permute.xlu1 %2381 }
 0x29b   :  { %v2420_v20 = vmax.f32 %v2412_v28, 0.0  ;;  %v2485_v21 = vmax.f32 %v2477_v41, 0.0  ;;  %v2550_v26 = vmax.f32 %v2542_v32, 0.0  ;;  %v2411_v3 = vadd.f32 %v2382_v48, %v2363_v39 }
 0x29c   :  { %v2615_v8 = vmax.f32 %v2607_v27, 0.0  ;;  %v2476_v56 = vadd.f32 %v2468_v23, %v2382_v48  ;;  %v2541_v35 = vadd.f32 %v2533_v7, %v2382_v48  ;;  %v2606_v14 = vadd.f32 %v2598_v16, %v2382_v48 }
 0x29d   :  { %v3156_v2 = vpack.c.bf16 %v2420_v20, %v2420_v20  ;;  %v3164_v31 = vpack.c.bf16 %v2485_v21, %v2485_v21  ;;  %v3172_v25 = vpack.c.bf16 %v2550_v26, %v2550_v26  ;;  %v2419_v59 = vmax.f32 %v2411_v3, 0.0  ;;  %v4972_v26 = vld [vmem:[#allocation7_spill] sm:$0xff]  ;;  %v4973_v3 = vld [vmem:[#allocation14_spill] sm:$0xff] }
 0x29e   :  { %v3180_v10 = vpack.c.bf16 %v2615_v8, %v2615_v8  ;;  %v2484_v38 = vmax.f32 %v2476_v56, 0.0  ;;  %v2549_v58 = vmax.f32 %v2541_v35, 0.0  ;;  %v2614_v57 = vmax.f32 %v2606_v14, 0.0  ;;  %v2344_v36 = vpop.permute.xlu1 %2343  ;;  %v2397_v50 = vpop.permute.xlu0 %2396  ;;  %v4974_v35 = vld [vmem:[#allocation21_spill] sm:$0xff] }
 0x29f   :  { %2461 = vst.msk [vmem:[%s4898_s4 + $0xc] sm:$0xf] %vm2457_vm1, %v3156_v2  ;;  %3116 = vst.msk [vmem:[%s4898_s4 + $0x2c] sm:$0xf] %vm2457_vm1, %v3164_v31  ;;  %v3155_v9 = vpack.c.bf16 %v2419_v59, %v2419_v59  ;;  %v2365_v40 = vmul.f32 %v2344_v36, %v4968_v49  ;;  %v2470_v30 = vmul.f32 %v2344_v36, %v4969_v22  ;;  %v4975_v2 = vld [vmem:[#allocation28_spill] sm:$0xff] }
 0x2a0   :  { %3132 = vst.msk [vmem:[%s4898_s4 + $0x4c] sm:$0xf] %vm2457_vm1, %v3172_v25  ;;  %3148 = vst.msk [vmem:[%s4898_s4 + $0x6c] sm:$0xf] %vm2457_vm1, %v3180_v10  ;;  %v3163_v34 = vpack.c.bf16 %v2484_v38, %v2484_v38  ;;  %v3171_v11 = vpack.c.bf16 %v2549_v58, %v2549_v58  ;;  %v3179_v63 = vpack.c.bf16 %v2614_v57, %v2614_v57  ;;  %v4976_v57 = vld [vmem:[#allocation6_spill] sm:$0xff] }
 0x2a1   :  { %2460 = vst.msk [vmem:[%s4898_s4 + $0x8] sm:$0xf] %vm2457_vm1, %v3155_v9  ;;  %v2535_v0 = vmul.f32 %v2344_v36, %v4970_v55  ;;  %v2600_v43 = vmul.f32 %v2344_v36, %v4971_v33  ;;  %v4977_v9 = vld [vmem:[#allocation13_spill] sm:$0xff] }
 0x2a2   :  { %3115 = vst.msk [vmem:[%s4898_s4 + $0x28] sm:$0xf] %vm2457_vm1, %v3163_v34  ;;  %3131 = vst.msk [vmem:[%s4898_s4 + $0x48] sm:$0xf] %vm2457_vm1, %v3171_v11  ;;  %v2349_v29 = vpop.permute.xlu1 %2348  ;;  %v4978_v11 = vld [vmem:[#allocation20_spill] sm:$0xff] }
 0x2a3   :  { %3147 = vst.msk [vmem:[%s4898_s4 + $0x68] sm:$0xf] %vm2457_vm1, %v3179_v63  ;;  %v2366_v61 = vmul.f32 %v2349_v29, %v4964_v44  ;;  %v2471_v45 = vmul.f32 %v2349_v29, %v4965_v51  ;;  %v2536_v13 = vmul.f32 %v2349_v29, %v4966_v6  ;;  %v2601_v54 = vmul.f32 %v2349_v29, %v4967_v15  ;;  %v4979_v29 = vld [vmem:[#allocation27_spill] sm:$0xff] }
 0x2a5   :  { %v2414_v53 = vadd.f32 %v2397_v50, %v2366_v61  ;;  %v2479_v60 = vadd.f32 %v2471_v45, %v2397_v50  ;;  %v2544_v42 = vadd.f32 %v2536_v13, %v2397_v50  ;;  %v2609_v52 = vadd.f32 %v2601_v54, %v2397_v50 }
 0x2a6   :  { %v2392_v5 = vpop.permute.xlu1 %2391  ;;  %v2407_v25 = vpop.permute.xlu0 %2406 }
 0x2a7   :  { %v2422_v17 = vmax.f32 %v2414_v53, 0.0  ;;  %v2487_v1 = vmax.f32 %v2479_v60, 0.0  ;;  %v2552_v24 = vmax.f32 %v2544_v42, 0.0  ;;  %v2617_v62 = vmax.f32 %v2609_v52, 0.0 }
 0x2a8   :  { %v2413_v12 = vadd.f32 %v2392_v5, %v2365_v40  ;;  %v2478_v18 = vadd.f32 %v2470_v30, %v2392_v5  ;;  %v2543_v19 = vadd.f32 %v2535_v0, %v2392_v5  ;;  %v2608_v28 = vadd.f32 %v2600_v43, %v2392_v5 }
 0x2a9   :  { %v3158_v41 = vpack.c.bf16 %v2422_v17, %v2422_v17  ;;  %v3166_v32 = vpack.c.bf16 %v2487_v1, %v2487_v1  ;;  %v3174_v27 = vpack.c.bf16 %v2552_v24, %v2552_v24  ;;  %v3182_v37 = vpack.c.bf16 %v2617_v62, %v2617_v62 }
 0x2aa   :  { %v2421_v39 = vmax.f32 %v2413_v12, 0.0  ;;  %v2486_v47 = vmax.f32 %v2478_v18, 0.0  ;;  %v2551_v23 = vmax.f32 %v2543_v19, 0.0  ;;  %v2616_v4 = vmax.f32 %v2608_v28, 0.0  ;;  %v2354_v7 = vpop.permute.xlu1 %2353 }
 0x2ab   :  { %2463 = vst.msk [vmem:[%s4898_s4 + $0x14] sm:$0xf] %vm2457_vm1, %v3158_v41  ;;  %3118 = vst.msk [vmem:[%s4898_s4 + $0x34] sm:$0xf] %vm2457_vm1, %v3166_v32  ;;  %v2367_v36 = vmul.f32 %v2354_v7, %v4976_v57  ;;  %v2472_v34 = vmul.f32 %v2354_v7, %v4977_v9  ;;  %v2537_v63 = vmul.f32 %v2354_v7, %v4978_v11 }
 0x2ac   :  { %3134 = vst.msk [vmem:[%s4898_s4 + $0x54] sm:$0xf] %vm2457_vm1, %v3174_v27  ;;  %3150 = vst.msk [vmem:[%s4898_s4 + $0x74] sm:$0xf] %vm2457_vm1, %v3182_v37  ;;  %v3157_v46 = vpack.c.bf16 %v2421_v39, %v2421_v39  ;;  %v3165_v16 = vpack.c.bf16 %v2486_v47, %v2486_v47  ;;  %v3173_v48 = vpack.c.bf16 %v2551_v23, %v2551_v23 }
 0x2ad   :  { %v3181_v20 = vpack.c.bf16 %v2616_v4, %v2616_v4  ;;  %v2602_v44 = vmul.f32 %v2354_v7, %v4979_v29 }
 0x2ae   :  { %2462 = vst.msk [vmem:[%s4898_s4 + $0x10] sm:$0xf] %vm2457_vm1, %v3157_v46  ;;  %3117 = vst.msk [vmem:[%s4898_s4 + $0x30] sm:$0xf] %vm2457_vm1, %v3165_v16  ;;  %v2359_v21 = vpop.permute.xlu1 %2358 }
 0x2af   :  { %3133 = vst.msk [vmem:[%s4898_s4 + $0x50] sm:$0xf] %vm2457_vm1, %v3173_v48  ;;  %3149 = vst.msk [vmem:[%s4898_s4 + $0x70] sm:$0xf] %vm2457_vm1, %v3181_v20  ;;  %v2368_v8 = vmul.f32 %v2359_v21, %v4972_v26  ;;  %v2473_v56 = vmul.f32 %v2359_v21, %v4973_v3  ;;  %v2538_v14 = vmul.f32 %v2359_v21, %v4974_v35 }
 0x2b0   :  { %v2603_v31 = vmul.f32 %v2359_v21, %v4975_v2 }
 0x2b1   :  { %v2416_v10 = vadd.f32 %v2407_v25, %v2368_v8  ;;  %v2481_v59 = vadd.f32 %v2473_v56, %v2407_v25  ;;  %v2546_v38 = vadd.f32 %v2538_v14, %v2407_v25 }
 0x2b2   :  { %v2611_v58 = vadd.f32 %v2603_v31, %v2407_v25  ;;  %v2402_v61 = vpop.permute.xlu1 %2401 }
 0x2b3   :  { %v2424_v51 = vmax.f32 %v2416_v10, 0.0  ;;  %v2489_v45 = vmax.f32 %v2481_v59, 0.0  ;;  %v2554_v6 = vmax.f32 %v2546_v38, 0.0  ;;  %v2415_v15 = vadd.f32 %v2402_v61, %v2367_v36 }
 0x2b4   :  { %v2619_v13 = vmax.f32 %v2611_v58, 0.0  ;;  %v2480_v54 = vadd.f32 %v2472_v34, %v2402_v61  ;;  %v2545_v50 = vadd.f32 %v2537_v63, %v2402_v61  ;;  %v2610_v53 = vadd.f32 %v2602_v44, %v2402_v61 }
 0x2b5   :  { %v3160_v60 = vpack.c.bf16 %v2424_v51, %v2424_v51  ;;  %v3168_v42 = vpack.c.bf16 %v2489_v45, %v2489_v45  ;;  %v3176_v52 = vpack.c.bf16 %v2554_v6, %v2554_v6  ;;  %v2423_v40 = vmax.f32 %v2415_v15, 0.0 }
 0x2b6   :  { %v3184_v49 = vpack.c.bf16 %v2619_v13, %v2619_v13  ;;  %v2488_v22 = vmax.f32 %v2480_v54, 0.0  ;;  %v2553_v30 = vmax.f32 %v2545_v50, 0.0  ;;  %v2618_v55 = vmax.f32 %v2610_v53, 0.0 }
 0x2b7   :  { %2465 = vst.msk [vmem:[%s4898_s4 + $0x1c] sm:$0xf] %vm2457_vm1, %v3160_v60  ;;  %3120 = vst.msk [vmem:[%s4898_s4 + $0x3c] sm:$0xf] %vm2457_vm1, %v3168_v42  ;;  %v3159_v0 = vpack.c.bf16 %v2423_v40, %v2423_v40 }
 0x2b8   :  { %3136 = vst.msk [vmem:[%s4898_s4 + $0x5c] sm:$0xf] %vm2457_vm1, %v3176_v52  ;;  %3152 = vst.msk [vmem:[%s4898_s4 + $0x7c] sm:$0xf] %vm2457_vm1, %v3184_v49  ;;  %v3167_v33 = vpack.c.bf16 %v2488_v22, %v2488_v22  ;;  %v3175_v43 = vpack.c.bf16 %v2553_v30, %v2553_v30  ;;  %v3183_v5 = vpack.c.bf16 %v2618_v55, %v2618_v55 }
 0x2b9   :  { %2464 = vst.msk [vmem:[%s4898_s4 + $0x18] sm:$0xf] %vm2457_vm1, %v3159_v0 }
 0x2ba   :  { %3119 = vst.msk [vmem:[%s4898_s4 + $0x38] sm:$0xf] %vm2457_vm1, %v3167_v33  ;;  %3135 = vst.msk [vmem:[%s4898_s4 + $0x58] sm:$0xf] %vm2457_vm1, %v3175_v43 }
 0x2bb   :  { %3151 = vst.msk [vmem:[%s4898_s4 + $0x78] sm:$0xf] %vm2457_vm1, %v3183_v5 }

// kernel: generator_forward.7
= control target key start
LH: loop header
LB: loop body
LE: loop exit
PB: predicated region body
PF: predicated region fallthrough
CT: control target
= control target key end

     0   :  { %s2060_s1 = inlined_call_operand.vmem [shape: bf16[4,256,128], index: 1, kind: input, shape index: {}]   ;;  %s2061_s0 = inlined_call_operand.vmem [shape: bf16[4,32,256], index: 0, kind: input, shape index: {}]   ;;  %s2062_s2 = inlined_call_operand.vmem [shape: f32[32,1], index: 2, kind: input, shape index: {}]   ;;  %s2063_s3 = inlined_call_operand.vmem [shape: f32[32,1], index: 3, kind: input, shape index: {}]   ;;  %s2064_s4 = inlined_call_operand.vmem [shape: bf16[4,32,128], index: 4, kind: output, shape index: {}]  }
   0x1   :  { %v1549_v0 = vld [vmem:[%s2060_s1 + $0x40] sm:$0xff]   ;;  %v1553_v4 = vld [vmem:[%s2060_s1 + $0x48] sm:$0xff]   ;;  %v1557_v8 = vld [vmem:[%s2060_s1 + $0x50] sm:$0xff]  }
   0x2   :  { %v1550_v1 = vld [vmem:[%s2060_s1 + $0xc0] sm:$0xff]   ;;  %1434 = vmatprep.subr.bf16.mxu0 %v1549_v0  ;;  %v1554_v5 = vld [vmem:[%s2060_s1 + $0xc8] sm:$0xff]   ;;  %v1558_v9 = vld [vmem:[%s2060_s1 + $0xd0] sm:$0xff]  }
   0x3   :  { %v1551_v2 = vld [vmem:[%s2060_s1] sm:$0xff]   ;;  %1462 = vmatprep.subr.bf16.mxu1 %v1550_v1  ;;  %v1555_v6 = vld [vmem:[%s2060_s1 + $0x8] sm:$0xff]   ;;  %v1559_v10 = vld [vmem:[%s2060_s1 + $0x10] sm:$0xff]  }
   0x4   :  { %v1552_v3 = vld [vmem:[%s2060_s1 + $0x80] sm:$0xff]   ;;  %1435 = vmatpush3.bf16.msra.mxu0 %v1551_v2  ;;  %v1556_v7 = vld [vmem:[%s2060_s1 + $0x88] sm:$0xff]   ;;  %v1560_v11 = vld [vmem:[%s2060_s1 + $0x90] sm:$0xff]  }
   0x5   :  { %1463 = vmatpush3.bf16.msra.mxu1 %v1552_v3  ;;  %1436 = vmatprep.subr.bf16.mxu0 %v1553_v4  ;;  %v1561_v12 = vld [vmem:[%s2060_s1 + $0x58] sm:$0xff]   ;;  %v1565_v16 = vld [vmem:[%s2060_s1 + $0x60] sm:$0xff]   ;;  %v1569_v20 = vld [vmem:[%s2060_s1 + $0x68] sm:$0xff]  }
   0x6   :  { %1464 = vmatprep.subr.bf16.mxu1 %v1554_v5  ;;  %v1562_v13 = vld [vmem:[%s2060_s1 + $0xd8] sm:$0xff]   ;;  %v1566_v17 = vld [vmem:[%s2060_s1 + $0xe0] sm:$0xff]   ;;  %v1570_v21 = vld [vmem:[%s2060_s1 + $0xe8] sm:$0xff]  }
   0x7   :  { %v1563_v14 = vld [vmem:[%s2060_s1 + $0x18] sm:$0xff]   ;;  %v1567_v18 = vld [vmem:[%s2060_s1 + $0x20] sm:$0xff]   ;;  %v1571_v22 = vld [vmem:[%s2060_s1 + $0x28] sm:$0xff]  }
   0x8   :  { %1437 = vmatpush3.bf16.msra.mxu0 %v1555_v6  ;;  %v1564_v15 = vld [vmem:[%s2060_s1 + $0x98] sm:$0xff]   ;;  %v1568_v19 = vld [vmem:[%s2060_s1 + $0xa0] sm:$0xff]   ;;  %v1572_v23 = vld [vmem:[%s2060_s1 + $0xa8] sm:$0xff]  }
   0x9   :  { %1465 = vmatpush3.bf16.msra.mxu1 %v1556_v7  ;;  %1438 = vmatprep.subr.bf16.mxu0 %v1557_v8  ;;  %v1573_v24 = vld [vmem:[%s2060_s1 + $0x70] sm:$0xff]   ;;  %v1577_v28 = vld [vmem:[%s2060_s1 + $0x78] sm:$0xff]   ;;  %v1581_v32 = vld [vmem:[%s2061_s0] ss:$8 sps:$4 sm:$0xff]  }
   0xa   :  { %1466 = vmatprep.subr.bf16.mxu1 %v1558_v9  ;;  %v1574_v25 = vld [vmem:[%s2060_s1 + $0xf0] sm:$0xff]   ;;  %v1578_v29 = vld [vmem:[%s2060_s1 + $0xf8] sm:$0xff]   ;;  %v1583_v33 = vld [vmem:[%s2061_s0 + $0x4] ss:$8 sps:$4 sm:$0xff]  }
   0xb   :  { %v1575_v26 = vld [vmem:[%s2060_s1 + $0x30] sm:$0xff]   ;;  %v1579_v30 = vld [vmem:[%s2060_s1 + $0x38] sm:$0xff]   ;;  %v1584_v34 = vld [vmem:[%s2061_s0 + $0x20] ss:$8 sps:$4 sm:$0xff]   ;;  %202 = vmatprep.mubr.bf16.mxu0 %v1583_v33 }
   0xc   :  { %1439 = vmatpush3.bf16.msra.mxu0 %v1559_v10  ;;  %v1576_v27 = vld [vmem:[%s2060_s1 + $0xb0] sm:$0xff]   ;;  %v1580_v31 = vld [vmem:[%s2060_s1 + $0xb8] sm:$0xff]   ;;  %v1586_v35 = vld [vmem:[%s2061_s0 + $0x24] ss:$8 sps:$4 sm:$0xff]  }
   0xd   :  { %1467 = vmatpush3.bf16.msra.mxu1 %v1560_v11  ;;  %1440 = vmatprep.subr.bf16.mxu0 %v1561_v12  ;;  %v1587_v36 = vld [vmem:[%s2060_s1 + $0x140] sm:$0xff]   ;;  %v1591_v40 = vld [vmem:[%s2060_s1 + $0x148] sm:$0xff]   ;;  %v1595_v44 = vld [vmem:[%s2060_s1 + $0x150] sm:$0xff]  }
   0xe   :  { %1468 = vmatprep.subr.bf16.mxu1 %v1562_v13  ;;  %405 = vmatprep.mubr.bf16.mxu1 %v1586_v35  ;;  %v1588_v37 = vld [vmem:[%s2060_s1 + $0x100] sm:$0xff]   ;;  %v1592_v41 = vld [vmem:[%s2060_s1 + $0x108] sm:$0xff]   ;;  %v1596_v45 = vld [vmem:[%s2060_s1 + $0x110] sm:$0xff]  }
   0xf   :  { %v1589_v38 = vld [vmem:[%s2060_s1 + $0x1c0] sm:$0xff]   ;;  %v1593_v42 = vld [vmem:[%s2060_s1 + $0x1c8] sm:$0xff]   ;;  %v1597_v46 = vld [vmem:[%s2060_s1 + $0x1d0] sm:$0xff]  }
  0x10   :  { %1441 = vmatpush3.bf16.msra.mxu0 %v1563_v14  ;;  %v1590_v39 = vld [vmem:[%s2060_s1 + $0x180] sm:$0xff]   ;;  %v1594_v43 = vld [vmem:[%s2060_s1 + $0x188] sm:$0xff]   ;;  %v1598_v47 = vld [vmem:[%s2060_s1 + $0x190] sm:$0xff]  }
  0x11   :  { %1469 = vmatpush3.bf16.msra.mxu1 %v1564_v15  ;;  %1442 = vmatprep.subr.bf16.mxu0 %v1565_v16  ;;  %v1599_v48 = vld [vmem:[%s2061_s0 + $0x14] ss:$8 sps:$4 sm:$0xff]   ;;  %v1602_v50 = vld [vmem:[%s2061_s0 + $0x10] ss:$8 sps:$4 sm:$0xff]   ;;  %v1608_v55 = vld [vmem:[%s2060_s1 + $0x160] sm:$0xff]  }
  0x12   :  { %1470 = vmatprep.subr.bf16.mxu1 %v1566_v17  ;;  %v1601_v49 = vld [vmem:[%s2060_s1 + $0x158] sm:$0xff]   ;;  %v1610_v57 = vld [vmem:[%s2060_s1 + $0x120] sm:$0xff]   ;;  %v1613_v60 = vld [vmem:[%s2060_s1 + $0x168] sm:$0xff]  }
  0x13   :  { %v1603_v51 = vld [vmem:[%s2060_s1 + $0x118] sm:$0xff]   ;;  %v1611_v58 = vld [vmem:[%s2060_s1 + $0x1e0] sm:$0xff]   ;;  %v1614_v61 = vld [vmem:[%s2060_s1 + $0x128] sm:$0xff]  }
  0x14   :  { %1443 = vmatpush3.bf16.msra.mxu0 %v1567_v18  ;;  %v1604_v52 = vld [vmem:[%s2060_s1 + $0x1d8] sm:$0xff]   ;;  %v1612_v59 = vld [vmem:[%s2060_s1 + $0x1a0] sm:$0xff]   ;;  %v1615_v62 = vld [vmem:[%s2060_s1 + $0x1e8] sm:$0xff]  }
  0x15   :  { %1471 = vmatpush3.bf16.msra.mxu1 %v1568_v19  ;;  %1444 = vmatprep.subr.bf16.mxu0 %v1569_v20  ;;  %v1605_v53 = vld [vmem:[%s2060_s1 + $0x198] sm:$0xff]   ;;  %v1616_v63 = vld [vmem:[%s2060_s1 + $0x1a8] sm:$0xff]   ;;  %v1617_v0 = vld [vmem:[%s2060_s1 + $0x170] sm:$0xff]  }
  0x16   :  { %1472 = vmatprep.subr.bf16.mxu1 %v1570_v21  ;;  %v1606_v54 = vld [vmem:[%s2061_s0 + $0x34] ss:$8 sps:$4 sm:$0xff]   ;;  %v1609_v56 = vld [vmem:[%s2061_s0 + $0x30] ss:$8 sps:$4 sm:$0xff]   ;;  %v1625_v8 = vld [vmem:[%s2061_s0 + $0x40] ss:$8 sps:$4 sm:$0xff]  }
  0x17   :  { %v1618_v1 = vld [vmem:[%s2060_s1 + $0x130] sm:$0xff]   ;;  %v1621_v4 = vld [vmem:[%s2060_s1 + $0x178] sm:$0xff]   ;;  %v1627_v9 = vld [vmem:[%s2061_s0 + $0x44] ss:$8 sps:$4 sm:$0xff]  }
  0x18   :  { %1445 = vmatpush3.bf16.msra.mxu0 %v1571_v22  ;;  %v1619_v2 = vld [vmem:[%s2060_s1 + $0x1f0] sm:$0xff]   ;;  %v1622_v5 = vld [vmem:[%s2060_s1 + $0x138] sm:$0xff]   ;;  %v1628_v10 = vld [vmem:[%s2061_s0 + $0x60] ss:$8 sps:$4 sm:$0xff]  }
  0x19   :  { %1473 = vmatpush3.bf16.msra.mxu1 %v1572_v23  ;;  %1446 = vmatprep.subr.bf16.mxu0 %v1573_v24  ;;  %v1620_v3 = vld [vmem:[%s2060_s1 + $0x1b0] sm:$0xff]   ;;  %v1623_v6 = vld [vmem:[%s2060_s1 + $0x1f8] sm:$0xff]   ;;  %v1630_v11 = vld [vmem:[%s2061_s0 + $0x64] ss:$8 sps:$4 sm:$0xff]  }
  0x1a   :  { %1474 = vmatprep.subr.bf16.mxu1 %v1574_v25  ;;  %v1624_v7 = vld [vmem:[%s2060_s1 + $0x1b8] sm:$0xff]  }
  0x1b   :  { %v1631_v12 = vld [vmem:[%s2061_s0 + $0x54] ss:$8 sps:$4 sm:$0xff]   ;;  %v1633_v14 = vld [vmem:[%s2061_s0 + $0x50] ss:$8 sps:$4 sm:$0xff]  }
  0x1c   :  { %1447 = vmatpush3.bf16.msra.mxu0 %v1575_v26  ;;  %v1634_v13 = vld [vmem:[%s2061_s0 + $0x74] ss:$8 sps:$4 sm:$0xff]   ;;  %v1636_v15 = vld [vmem:[%s2061_s0 + $0x70] ss:$8 sps:$4 sm:$0xff]  }
  0x1d   :  { %1475 = vmatpush3.bf16.msra.mxu1 %v1576_v27  ;;  %1448 = vmatprep.subr.bf16.mxu0 %v1577_v28 }
  0x1e   :  { %1476 = vmatprep.subr.bf16.mxu1 %v1578_v29 }
  0x20   :  { %1449 = vmatpush3.bf16.msra.mxu0 %v1579_v30 }
  0x21   :  { %1477 = vmatpush3.bf16.msra.mxu1 %v1580_v31  ;;  %1490 = vmatprep.subr.bf16.mxu0 %v1587_v36 }
  0x22   :  { %1518 = vmatprep.subr.bf16.mxu1 %v1589_v38 }
  0x23   :  { %203 = vmatmul.mubr.bf16.vlgmr.msra.gmra.mrb[0].mxu0 %v1581_v32 }
  0x24   :  { %406 = vmatmul.mubr.bf16.vlgmr.msra.gmra.mrb[0].mxu1 %v1584_v34  ;;  %1491 = vmatpush3.bf16.msra.mxu0 %v1588_v37 }
  0x25   :  { %1519 = vmatpush3.bf16.msra.mxu1 %v1590_v39  ;;  %1492 = vmatprep.subr.bf16.mxu0 %v1591_v40 }
  0x26   :  { %1520 = vmatprep.subr.bf16.mxu1 %v1593_v42  ;;  %210 = vmatprep.mubr.bf16.mxu0 %v1599_v48 }
  0x27   :  { %413 = vmatprep.mubr.bf16.mxu1 %v1606_v54 }
  0x28   :  { %1493 = vmatpush3.bf16.msra.mxu0 %v1592_v41 }
  0x29   :  { %1521 = vmatpush3.bf16.msra.mxu1 %v1594_v43  ;;  %1494 = vmatprep.subr.bf16.mxu0 %v1595_v44 }
  0x2a   :  { %1522 = vmatprep.subr.bf16.mxu1 %v1597_v46 }
  0x2b   :  { %211 = vmatmul.mubr.bf16.gmra.mrb[4].mxu0 %v1602_v50 }
  0x2c   :  { %1495 = vmatpush3.bf16.msra.mxu0 %v1596_v45  ;;  %414 = vmatmul.mubr.bf16.gmra.mrb[4].mxu1 %v1609_v56 }
  0x2d   :  { %1523 = vmatpush3.bf16.msra.mxu1 %v1598_v47  ;;  %1496 = vmatprep.subr.bf16.mxu0 %v1601_v49 }
  0x2e   :  { %1524 = vmatprep.subr.bf16.mxu1 %v1604_v52  ;;  %608 = vmatprep.mubr.bf16.mxu0 %v1627_v9 }
  0x2f   :  { %811 = vmatprep.mubr.bf16.mxu1 %v1630_v11 }
  0x30   :  { %1497 = vmatpush3.bf16.msra.mxu0 %v1603_v51 }
  0x31   :  { %1525 = vmatpush3.bf16.msra.mxu1 %v1605_v53  ;;  %1498 = vmatprep.subr.bf16.mxu0 %v1608_v55 }
  0x32   :  { %1526 = vmatprep.subr.bf16.mxu1 %v1611_v58 }
  0x34   :  { %1499 = vmatpush3.bf16.msra.mxu0 %v1610_v57 }
  0x35   :  { %1527 = vmatpush3.bf16.msra.mxu1 %v1612_v59  ;;  %1500 = vmatprep.subr.bf16.mxu0 %v1613_v60 }
  0x36   :  { %1528 = vmatprep.subr.bf16.mxu1 %v1615_v62 }
  0x38   :  { %1501 = vmatpush3.bf16.msra.mxu0 %v1614_v61 }
  0x39   :  { %1529 = vmatpush3.bf16.msra.mxu1 %v1616_v63  ;;  %1502 = vmatprep.subr.bf16.mxu0 %v1617_v0 }
  0x3a   :  { %1530 = vmatprep.subr.bf16.mxu1 %v1619_v2 }
  0x3c   :  { %1503 = vmatpush3.bf16.msra.mxu0 %v1618_v1 }
  0x3d   :  { %1531 = vmatpush3.bf16.msra.mxu1 %v1620_v3  ;;  %1504 = vmatprep.subr.bf16.mxu0 %v1621_v4 }
  0x3e   :  { %1532 = vmatprep.subr.bf16.mxu1 %v1623_v6 }
  0x40   :  { %1505 = vmatpush3.bf16.msra.mxu0 %v1622_v5 }
  0x41   :  { %1533 = vmatpush3.bf16.msra.mxu1 %v1624_v7 }
  0x43   :  { %609 = vmatmul.mubr.bf16.vlgmr.msra.gmra.mrb[8].mxu0 %v1625_v8 }
  0x44   :  { %812 = vmatmul.mubr.bf16.vlgmr.msra.gmra.mrb[8].mxu1 %v1628_v10  ;;  %616 = vmatprep.mubr.bf16.mxu0 %v1631_v12 }
  0x45   :  { %819 = vmatprep.mubr.bf16.mxu1 %v1634_v13 }
  0x4b   :  { %617 = vmatmul.mubr.bf16.gmra.mrb[12].mxu0 %v1633_v14 }
  0x4c   :  { %820 = vmatmul.mubr.bf16.gmra.mrb[12].mxu1 %v1636_v15 }
  0xf6   :  { %v1450_v16 = vpop.f32.mrb[0].mxu0 }
  0xf7   :  { %v1478_v17 = vpop.f32.mrb[0].mxu1  ;;  %v1451_v18 = vpop.f32.mrb[1].mxu0 }
  0xf8   :  { %v1911_v19 = vadd.f32 %v1451_v18, %v1450_v16  ;;  %v1479_v20 = vpop.f32.mrb[1].mxu1  ;;  %v1453_v21 = vpop.f32.mrb[2].mxu0  ;;  %v1645_v16 = vmov 0  }
  0xf9   :  { %v1913_v22 = vadd.f32 %v1479_v20, %v1478_v17  ;;  %v1481_v23 = vpop.f32.mrb[2].mxu1  ;;  %v1454_v24 = vpop.f32.mrb[3].mxu0  ;;  %1547 = vset.pattern.permute.xlu0 %v1645_v16  ;;  %1548 = vset.pattern.permute.xlu1 %v1645_v16 }
  0xfa   :  { %v1915_v25 = vadd.f32 %v1454_v24, %v1453_v21  ;;  %v1482_v26 = vpop.f32.mrb[3].mxu1  ;;  %828 = vadd.xlane.f32.xlu0 %v1911_v19  ;;  %v836_v31 = vmul.f32 %v1911_v19, %v1911_v19 }
  0xfb   :  { %v1918_v27 = vadd.f32 %v1482_v26, %v1481_v23  ;;  %v860_v37 = vmul.f32 %v1913_v22, %v1913_v22 }
  0xfc   :  { %v837_v28 = vmul.f32 %v1915_v25, %v1915_v25 }
  0xfd   :  { %850 = vadd.xlane.f32.xlu1 %v1918_v27  ;;  %v861_v29 = vmul.f32 %v1918_v27, %v1918_v27 }
  0xfe   :  { %848 = vadd.xlane.f32.xlu0 %v1913_v22  ;;  %v1456_v30 = vpop.f32.mrb[4].mxu0 }
  0xff   :  { %v1457_v32 = vpop.f32.mrb[5].mxu0  ;;  %v1484_v38 = vpop.f32.mrb[4].mxu1 }
 0x100   :  { %v1929_v33 = vadd.f32 %v1457_v32, %v1456_v30  ;;  %v1459_v34 = vpop.f32.mrb[6].mxu0  ;;  %v1485_v39 = vpop.f32.mrb[5].mxu1 }
 0x101   :  { %842 = vadd.xlane.f32.xlu1 %v837_v28  ;;  %v1460_v35 = vpop.f32.mrb[7].mxu0  ;;  %v1936_v40 = vadd.f32 %v1485_v39, %v1484_v38  ;;  %v1487_v41 = vpop.f32.mrb[6].mxu1 }
 0x102   :  { %830 = vadd.xlane.f32.xlu0 %v1915_v25  ;;  %v1931_v36 = vadd.f32 %v1460_v35, %v1459_v34  ;;  %v1488_v42 = vpop.f32.mrb[7].mxu1  ;;  %v838_v44 = vmul.f32 %v1929_v33, %v1929_v33 }
 0x103   :  { %v1939_v43 = vadd.f32 %v1488_v42, %v1487_v41  ;;  %v862_v46 = vmul.f32 %v1936_v40, %v1936_v40 }
 0x104   :  { %v839_v45 = vmul.f32 %v1931_v36, %v1931_v36 }
 0x105   :  { %866 = vadd.xlane.f32.xlu1 %v861_v29  ;;  %v863_v47 = vmul.f32 %v1939_v43, %v1939_v43 }
 0x106   :  { %840 = vadd.xlane.f32.xlu0 %v836_v31 }
 0x109   :  { %832 = vadd.xlane.f32.xlu1 %v1929_v33 }
 0x10a   :  { %864 = vadd.xlane.f32.xlu0 %v860_v37 }
 0x10d   :  { %834 = vadd.xlane.f32.xlu1 %v1931_v36 }
 0x10e   :  { %852 = vadd.xlane.f32.xlu0 %v1936_v40 }
 0x111   :  { %854 = vadd.xlane.f32.xlu1 %v1939_v43 }
 0x112   :  { %844 = vadd.xlane.f32.xlu0 %v838_v44 }
 0x115   :  { %846 = vadd.xlane.f32.xlu1 %v839_v45 }
 0x116   :  { %868 = vadd.xlane.f32.xlu0 %v862_v46  ;;  %v1506_v48 = vpop.f32.mrb[8].mxu0 }
 0x117   :  { %v1507_v49 = vpop.f32.mrb[9].mxu0  ;;  %v1534_v50 = vpop.f32.mrb[8].mxu1 }
 0x118   :  { %v1951_v51 = vadd.f32 %v1507_v49, %v1506_v48  ;;  %v1509_v52 = vpop.f32.mrb[10].mxu0  ;;  %v1535_v53 = vpop.f32.mrb[9].mxu1 }
 0x119   :  { %870 = vadd.xlane.f32.xlu1 %v863_v47  ;;  %v1953_v54 = vadd.f32 %v1535_v53, %v1534_v50  ;;  %v1510_v55 = vpop.f32.mrb[11].mxu0  ;;  %v1537_v56 = vpop.f32.mrb[10].mxu1 }
 0x11a   :  { %v1955_v57 = vadd.f32 %v1510_v55, %v1509_v52  ;;  %v1538_v58 = vpop.f32.mrb[11].mxu1  ;;  %876 = vadd.xlane.f32.xlu0 %v1951_v51  ;;  %v888_v63 = vmul.f32 %v1951_v51, %v1951_v51 }
 0x11b   :  { %v1958_v59 = vadd.f32 %v1538_v58, %v1537_v56  ;;  %v916_v10 = vmul.f32 %v1953_v54, %v1953_v54 }
 0x11c   :  { %v889_v6 = vmul.f32 %v1955_v57, %v1955_v57 }
 0x11d   :  { %878 = vadd.xlane.f32.xlu1 %v1955_v57  ;;  %v917_v11 = vmul.f32 %v1958_v59, %v1958_v59 }
 0x11e   :  { %904 = vadd.xlane.f32.xlu0 %v1953_v54  ;;  %v1512_v60 = vpop.f32.mrb[12].mxu0 }
 0x11f   :  { %v1513_v61 = vpop.f32.mrb[13].mxu0  ;;  %v1540_v62 = vpop.f32.mrb[12].mxu1 }
 0x120   :  { %v1965_v0 = vadd.f32 %v1513_v61, %v1512_v60  ;;  %v1515_v1 = vpop.f32.mrb[14].mxu0  ;;  %v1541_v2 = vpop.f32.mrb[13].mxu1 }
 0x121   :  { %906 = vadd.xlane.f32.xlu1 %v1958_v59  ;;  %v1516_v3 = vpop.f32.mrb[15].mxu0  ;;  %v1967_v4 = vadd.f32 %v1541_v2, %v1540_v62  ;;  %v1543_v5 = vpop.f32.mrb[14].mxu1 }
 0x122   :  { %892 = vadd.xlane.f32.xlu0 %v888_v63  ;;  %v1971_v7 = vadd.f32 %v1516_v3, %v1515_v1  ;;  %v1544_v8 = vpop.f32.mrb[15].mxu1  ;;  %v890_v12 = vmul.f32 %v1965_v0, %v1965_v0 }
 0x123   :  { %v1973_v9 = vadd.f32 %v1544_v8, %v1543_v5  ;;  %v918_v14 = vmul.f32 %v1967_v4, %v1967_v4 }
 0x124   :  { %v891_v13 = vmul.f32 %v1971_v7, %v1971_v7 }
 0x125   :  { %894 = vadd.xlane.f32.xlu1 %v889_v6  ;;  %v919_v15 = vmul.f32 %v1973_v9, %v1973_v9 }
 0x126   :  { %920 = vadd.xlane.f32.xlu0 %v916_v10 }
 0x129   :  { %922 = vadd.xlane.f32.xlu1 %v917_v11 }
 0x12a   :  { %880 = vadd.xlane.f32.xlu0 %v1965_v0 }
 0x12d   :  { %882 = vadd.xlane.f32.xlu1 %v1971_v7 }
 0x12e   :  { %908 = vadd.xlane.f32.xlu0 %v1967_v4 }
 0x131   :  { %910 = vadd.xlane.f32.xlu1 %v1973_v9 }
 0x132   :  { %896 = vadd.xlane.f32.xlu0 %v890_v12 }
 0x135   :  { %898 = vadd.xlane.f32.xlu1 %v891_v13 }
 0x136   :  { %924 = vadd.xlane.f32.xlu0 %v918_v14 }
 0x139   :  { %926 = vadd.xlane.f32.xlu1 %v919_v15 }
 0x187   :  { %v829_v17 = vpop.xlane.xlu0 %828 }
 0x18a   :  { %v851_v18 = vpop.xlane.xlu1 %850 }
 0x18b   :  { %v849_v20 = vpop.xlane.xlu0 %848 }
 0x18c   :  { %v856_v42 = vadd.f32 %v849_v20, %v829_v17 }
 0x18e   :  { %v843_v21 = vpop.xlane.xlu1 %842 }
 0x18f   :  { %v831_v23 = vpop.xlane.xlu0 %830 }
 0x190   :  { %v857_v45 = vadd.f32 %v851_v18, %v831_v23 }
 0x192   :  { %v867_v24 = vpop.xlane.xlu1 %866 }
 0x193   :  { %v841_v26 = vpop.xlane.xlu0 %840  ;;  %v873_v56 = vadd.f32 %v867_v24, %v843_v21 }
 0x196   :  { %v833_v28 = vpop.xlane.xlu1 %832 }
 0x197   :  { %v865_v29 = vpop.xlane.xlu0 %864 }
 0x198   :  { %v872_v52 = vadd.f32 %v865_v29, %v841_v26 }
 0x19a   :  { %v835_v30 = vpop.xlane.xlu1 %834 }
 0x19b   :  { %v853_v31 = vpop.xlane.xlu0 %852 }
 0x19c   :  { %v858_v14 = vadd.f32 %v853_v31, %v833_v28 }
 0x19e   :  { %v855_v32 = vpop.xlane.xlu1 %854 }
 0x19f   :  { %v845_v34 = vpop.xlane.xlu0 %844  ;;  %v859_v18 = vadd.f32 %v855_v32, %v835_v30 }
 0x1a2   :  { %v847_v35 = vpop.xlane.xlu1 %846 }
 0x1a3   :  { %v869_v37 = vpop.xlane.xlu0 %868 }
 0x1a6   :  { %v871_v38 = vpop.xlane.xlu1 %870 }
 0x1a7   :  { %v877_v39 = vpop.xlane.xlu0 %876 }
 0x1a8   :  { %v884_v46 = vadd.f32 %v877_v39, %v856_v42  ;;  %v874_v42 = vadd.f32 %v869_v37, %v845_v34 }
 0x1aa   :  { %v879_v41 = vpop.xlane.xlu1 %878 }
 0x1ab   :  { %v905_v44 = vpop.xlane.xlu0 %904  ;;  %v885_v48 = vadd.f32 %v879_v41, %v857_v45 }
 0x1ac   :  { %v912_v49 = vadd.f32 %v905_v44, %v884_v46  ;;  %v875_v46 = vadd.f32 %v871_v38, %v847_v35  ;;  %v953_v35 = vld [vmem:[%s2062_s2 + $0x8] sm:$0xff] }
 0x1ae   :  { %v907_v47 = vpop.xlane.xlu1 %906  ;;  %v932_v58 = vmul.f32 0.001953125, %v912_v49 }
 0x1af   :  { %v893_v50 = vpop.xlane.xlu0 %892  ;;  %v913_v53 = vadd.f32 %v907_v47, %v885_v48 }
 0x1b0   :  { %v900_v60 = vadd.f32 %v893_v50, %v872_v52  ;;  %v940_v3 = vmul.f32 %v932_v58, %v932_v58 }
 0x1b1   :  { %v1991_v62 = vmul.f32 0.001953125, %v913_v53 }
 0x1b2   :  { %v895_v55 = vpop.xlane.xlu1 %894 }
 0x1b3   :  { %v921_v61 = vpop.xlane.xlu0 %920  ;;  %v901_v63 = vadd.f32 %v895_v55, %v873_v56  ;;  %v941_v10 = vmul.f32 %v1991_v62, %v1991_v62  ;;  %v952_v55 = vld [vmem:[%s2062_s2] sm:$0xff] }
 0x1b4   :  { %v928_v1 = vadd.f32 %v921_v61, %v900_v60 }
 0x1b6   :  { %v923_v2 = vpop.xlane.xlu1 %922  ;;  %v936_v5 = vmul.f32 0.001953125, %v928_v1 }
 0x1b7   :  { %v929_v6 = vadd.f32 %v923_v2, %v901_v63  ;;  %v881_v8 = vpop.xlane.xlu0 %880 }
 0x1b8   :  { %v944_v11 = vsub.f32 %v936_v5, %v940_v3  ;;  %v886_v23 = vadd.f32 %v881_v8, %v858_v14  ;;  %v968_v8 = vld [vmem:[%s2063_s3] sm:$0xff] }
 0x1b9   :  { %v937_v12 = vmul.f32 0.001953125, %v929_v6 }
 0x1ba   :  { %v883_v13 = vpop.xlane.xlu1 %882  ;;  %v948_v15 = vmax.f32 %v944_v11, 0.0 }
 0x1bb   :  { %v945_v16 = vsub.f32 %v937_v12, %v941_v10  ;;  %v909_v17 = vpop.xlane.xlu0 %908  ;;  %v887_v29 = vadd.f32 %v883_v13, %v859_v18  ;;  %v969_v13 = vld [vmem:[%s2063_s3 + $0x8] sm:$0xff]  ;;  %v955_v18 = vld [vmem:[%s2062_s2 + $0x18] sm:$0xff] }
 0x1bc   :  { %v956_v20 = vadd.f32 1e-05, %v948_v15  ;;  %v914_v39 = vadd.f32 %v909_v17, %v886_v23 }
 0x1bd   :  { %v949_v21 = vmax.f32 %v945_v16, 0.0 }
 0x1be   :  { %v911_v24 = vpop.xlane.xlu1 %910  ;;  %1637 = vrsqrt.f32 %v956_v20  ;;  %v934_v47 = vmul.f32 0.001953125, %v914_v39 }
 0x1bf   :  { %v957_v26 = vadd.f32 1e-05, %v949_v21  ;;  %v897_v41 = vpop.xlane.xlu0 %896  ;;  %v915_v44 = vadd.f32 %v911_v24, %v887_v29  ;;  %v970_v21 = vld [vmem:[%s2063_s3 + $0x10] sm:$0xff] }
 0x1c0   :  { %v902_v28 = vadd.f32 %v897_v41, %v874_v42  ;;  %v942_v50 = vmul.f32 %v934_v47, %v934_v47 }
 0x1c1   :  { %1639 = vrsqrt.f32 %v957_v26  ;;  %v935_v48 = vmul.f32 0.001953125, %v915_v44  ;;  %v971_v26 = vld [vmem:[%s2063_s3 + $0x18] sm:$0xff] }
 0x1c2   :  { %v899_v45 = vpop.xlane.xlu1 %898 }
 0x1c3   :  { %v925_v31 = vpop.xlane.xlu0 %924  ;;  %v903_v49 = vadd.f32 %v899_v45, %v875_v46  ;;  %v943_v34 = vmul.f32 %v935_v48, %v935_v48 }
 0x1c4   :  { %v930_v30 = vadd.f32 %v925_v31, %v902_v28 }
 0x1c6   :  { %v927_v32 = vpop.xlane.xlu1 %926  ;;  %v938_v52 = vmul.f32 0.001953125, %v930_v30 }
 0x1c7   :  { %v931_v53 = vadd.f32 %v927_v32, %v903_v49 }
 0x1c8   :  { %v1638_v56 = vpop.eup %1637  ;;  %v946_v37 = vsub.f32 %v938_v52, %v942_v50 }
 0x1c9   :  { %v939_v60 = vmul.f32 0.001953125, %v931_v53  ;;  %v964_v38 = vmul.f32 %v1638_v56, %v952_v55 }
 0x1ca   :  { %v950_v63 = vmax.f32 %v946_v37, 0.0 }
 0x1cb   :  { %v1640_v61 = vpop.eup %1639  ;;  %v947_v1 = vsub.f32 %v939_v60, %v943_v34  ;;  %982 = vperm.xlu0 %1547, %v964_v38   ;;  %v972_v3 = vmul.f32 %v964_v38, %v932_v58  ;;  %v954_v58 = vld [vmem:[%s2062_s2 + $0x10] sm:$0xff] }
 0x1cc   :  { %v965_v2 = vmul.f32 %v1640_v61, %v953_v35  ;;  %v958_v5 = vadd.f32 1e-05, %v950_v63 }
 0x1cd   :  { %v951_v6 = vmax.f32 %v947_v1, 0.0  ;;  %v976_v11 = vsub.f32 %v968_v8, %v972_v3 }
 0x1ce   :  { %987 = vperm.xlu1 %1548, %v965_v2   ;;  %1641 = vrsqrt.f32 %v958_v5  ;;  %v973_v12 = vmul.f32 %v965_v2, %v1991_v62 }
 0x1cf   :  { %v959_v10 = vadd.f32 1e-05, %v951_v6 }
 0x1d0   :  { %v977_v14 = vsub.f32 %v969_v13, %v973_v12 }
 0x1d1   :  { %1643 = vrsqrt.f32 %v959_v10 }
 0x1d2   :  { %1006 = vperm.xlu1 %1548, %v976_v11  }
 0x1d6   :  { %1011 = vperm.xlu1 %1548, %v977_v14  }
 0x1d8   :  { %v1642_v15 = vpop.eup %1641 }
 0x1d9   :  { %v966_v16 = vmul.f32 %v1642_v15, %v954_v58 }
 0x1db   :  { %v1644_v17 = vpop.eup %1643  ;;  %992 = vperm.xlu1 %1548, %v966_v16   ;;  %v974_v20 = vmul.f32 %v966_v16, %v934_v47 }
 0x1dc   :  { %v967_v62 = vmul.f32 %v1644_v17, %v955_v18 }
 0x1dd   :  { %v978_v23 = vsub.f32 %v970_v21, %v974_v20 }
 0x1de   :  { %v975_v24 = vmul.f32 %v967_v62, %v935_v48 }
 0x1df   :  { %997 = vperm.xlu1 %1548, %v967_v62  }
 0x1e0   :  { %v979_v29 = vsub.f32 %v971_v26, %v975_v24 }
 0x1e3   :  { %1016 = vperm.xlu1 %1548, %v978_v23  }
 0x1e7   :  { %1021 = vperm.xlu1 %1548, %v979_v29  }
 0x24a   :  { %v983_v41 = vpop.permute.xlu0 %982 }
 0x24b   :  { %v1000_v42 = vmul.f32 %v1911_v19, %v983_v41  ;;  %v1052_v44 = vmul.f32 %v1913_v22, %v983_v41  ;;  %v1085_v45 = vmul.f32 %v1951_v51, %v983_v41  ;;  %v1118_v46 = vmul.f32 %v1953_v54, %v983_v41 }
 0x24d   :  { %v988_v39 = vpop.permute.xlu1 %987 }
 0x24e   :  { %v1001_v30 = vmul.f32 %v1915_v25, %v988_v39  ;;  %v1053_v32 = vmul.f32 %v1918_v27, %v988_v39  ;;  %v1086_v50 = vmul.f32 %v1955_v57, %v988_v39  ;;  %v1119_v52 = vmul.f32 %v1958_v59, %v988_v39 }
 0x251   :  { %v1007_v47 = vpop.permute.xlu1 %1006 }
 0x252   :  { %v1024_v28 = vadd.f32 %v1007_v47, %v1000_v42  ;;  %v1056_v31 = vadd.f32 %v1052_v44, %v1007_v47  ;;  %v1089_v48 = vadd.f32 %v1085_v45, %v1007_v47  ;;  %v1122_v49 = vadd.f32 %v1118_v46, %v1007_v47 }
 0x254   :  { %v1028_v56 = vmax.f32 %v1024_v28, 0.0  ;;  %v1060_v54 = vmax.f32 %v1056_v31, 0.0  ;;  %v1093_v34 = vmax.f32 %v1089_v48, 0.0  ;;  %v1126_v37 = vmax.f32 %v1122_v49, 0.0 }
 0x255   :  { %v1012_v19 = vpop.permute.xlu1 %1011 }
 0x256   :  { %v1025_v53 = vadd.f32 %v1012_v19, %v1001_v30  ;;  %v1057_v22 = vadd.f32 %v1053_v32, %v1012_v19  ;;  %v1090_v55 = vadd.f32 %v1086_v50, %v1012_v19  ;;  %v1123_v51 = vadd.f32 %v1119_v52, %v1012_v19 }
 0x258   :  { %v1029_v60 = vmax.f32 %v1025_v53, 0.0  ;;  %v1061_v35 = vmax.f32 %v1057_v22, 0.0  ;;  %v1094_v38 = vmax.f32 %v1090_v55, 0.0  ;;  %v1127_v61 = vmax.f32 %v1123_v51, 0.0 }
 0x25a   :  { %v1390_v25 = vpack.c.bf16 %v1029_v60, %v1028_v56  ;;  %v1400_v63 = vpack.c.bf16 %v1061_v35, %v1060_v54  ;;  %v1410_v27 = vpack.c.bf16 %v1094_v38, %v1093_v34  ;;  %v1420_v1 = vpack.c.bf16 %v1127_v61, %v1126_v37  ;;  %v993_v57 = vpop.permute.xlu1 %992 }
 0x25b   :  { %v1002_v2 = vmul.f32 %v1929_v33, %v993_v57  ;;  %v1054_v3 = vmul.f32 %v1936_v40, %v993_v57  ;;  %v1087_v5 = vmul.f32 %v1965_v0, %v993_v57  ;;  %v1120_v6 = vmul.f32 %v1967_v4, %v993_v57 }
 0x25c   :  { %1391 = vst [vmem:[%s2064_s4] sm:$0xff] %v1390_v25   ;;  %1428 = vst [vmem:[%s2064_s4 + $0x10] sm:$0xff] %v1400_v63  }
 0x25d   :  { %1430 = vst [vmem:[%s2064_s4 + $0x20] sm:$0xff] %v1410_v27   ;;  %1432 = vst [vmem:[%s2064_s4 + $0x30] sm:$0xff] %v1420_v1  }
 0x25e   :  { %v998_v59 = vpop.permute.xlu1 %997 }
 0x25f   :  { %v1003_v14 = vmul.f32 %v1931_v36, %v998_v59  ;;  %v1055_v58 = vmul.f32 %v1939_v43, %v998_v59  ;;  %v1088_v15 = vmul.f32 %v1971_v7, %v998_v59  ;;  %v1121_v16 = vmul.f32 %v1973_v9, %v998_v59 }
 0x262   :  { %v1017_v8 = vpop.permute.xlu1 %1016 }
 0x263   :  { %v1026_v10 = vadd.f32 %v1017_v8, %v1002_v2  ;;  %v1058_v11 = vadd.f32 %v1054_v3, %v1017_v8  ;;  %v1091_v12 = vadd.f32 %v1087_v5, %v1017_v8  ;;  %v1124_v13 = vadd.f32 %v1120_v6, %v1017_v8 }
 0x265   :  { %v1030_v62 = vmax.f32 %v1026_v10, 0.0  ;;  %v1062_v4 = vmax.f32 %v1058_v11, 0.0  ;;  %v1095_v20 = vmax.f32 %v1091_v12, 0.0  ;;  %v1128_v21 = vmax.f32 %v1124_v13, 0.0 }
 0x266   :  { %v1022_v33 = vpop.permute.xlu1 %1021 }
 0x267   :  { %v1027_v17 = vadd.f32 %v1022_v33, %v1003_v14  ;;  %v1059_v40 = vadd.f32 %v1055_v58, %v1022_v33  ;;  %v1092_v18 = vadd.f32 %v1088_v15, %v1022_v33  ;;  %v1125_v0 = vadd.f32 %v1121_v16, %v1022_v33 }
 0x269   :  { %v1031_v23 = vmax.f32 %v1027_v17, 0.0  ;;  %v1063_v24 = vmax.f32 %v1059_v40, 0.0  ;;  %v1096_v26 = vmax.f32 %v1092_v18, 0.0  ;;  %v1129_v29 = vmax.f32 %v1125_v0, 0.0 }
 0x26b   :  { %v1395_v36 = vpack.c.bf16 %v1031_v23, %v1030_v62  ;;  %v1405_v39 = vpack.c.bf16 %v1063_v24, %v1062_v4  ;;  %v1415_v43 = vpack.c.bf16 %v1096_v26, %v1095_v20  ;;  %v1425_v41 = vpack.c.bf16 %v1129_v29, %v1128_v21 }
 0x26d   :  { %1427 = vst [vmem:[%s2064_s4 + $0x8] sm:$0xff] %v1395_v36   ;;  %1429 = vst [vmem:[%s2064_s4 + $0x18] sm:$0xff] %v1405_v39  }
 0x26e   :  { %1431 = vst [vmem:[%s2064_s4 + $0x28] sm:$0xff] %v1415_v43   ;;  %1433 = vst [vmem:[%s2064_s4 + $0x38] sm:$0xff] %v1425_v41  }

// kernel: generator_forward.8
= control target key start
LH: loop header
LB: loop body
LE: loop exit
PB: predicated region body
PF: predicated region fallthrough
CT: control target
= control target key end

     0   :  { %v2032_v1 = vmov 0   ;;  %s2758_s1 = inlined_call_operand.vmem [shape: bf16[4,128,512], index: 1, kind: input, shape index: {}]   ;;  %s2759_s0 = inlined_call_operand.vmem [shape: bf16[4,16,128], index: 0, kind: input, shape index: {}]   ;;  %s2760_s2 = inlined_call_operand.vmem [shape: f32[16,1], index: 2, kind: input, shape index: {}]   ;;  %s2761_s3 = inlined_call_operand.vmem [shape: f32[16,1], index: 3, kind: input, shape index: {}]   ;;  %s2762_s4 = inlined_call_operand.vmem [shape: bf16[4,16,512], index: 4, kind: output, shape index: {}]  }
   0x1   :  { %v1832_v0 = vld [vmem:[%s2758_s1 + $0x4] ss:$16 sps:$4 sm:$0xff]   ;;  %250 = vmatprep.mubr.bf16.mxu0 %v2032_v1  ;;  %293 = vmatprep.mubr.bf16.mxu1 %v2032_v1  ;;  %v1834_v2 = vld [vmem:[%s2758_s1 + $0xc] ss:$16 sps:$4 sm:$0xff]   ;;  %v1836_v3 = vld [vmem:[%s2758_s1] ss:$16 sps:$4 sm:$0xff]  }
   0x2   :  { %1830 = vset.pattern.permute.xlu0 %v2032_v1  ;;  %1831 = vset.pattern.permute.xlu1 %v2032_v1  ;;  %v1837_v4 = vld [vmem:[%s2758_s1 + $0x8] ss:$16 sps:$4 sm:$0xff]   ;;  %v1838_v5 = vld [vmem:[%s2758_s1 + $0x24] ss:$16 sps:$4 sm:$0xff]   ;;  %v1840_v6 = vld [vmem:[%s2758_s1 + $0x2c] ss:$16 sps:$4 sm:$0xff]  }
   0x3   :  { %218 = vmatprep.subr.bf16.mxu0 %v1832_v0  ;;  %261 = vmatprep.subr.bf16.mxu1 %v1834_v2  ;;  %v1842_v7 = vld [vmem:[%s2758_s1 + $0x20] ss:$16 sps:$4 sm:$0xff]   ;;  %v1843_v8 = vld [vmem:[%s2758_s1 + $0x28] ss:$16 sps:$4 sm:$0xff]   ;;  %v1844_v9 = vld [vmem:[%s2758_s1 + $0x44] ss:$16 sps:$4 sm:$0xff]  }
   0x4   :  { %219 = vmatpush1.bf16.msra.mxu0 %v1836_v3  ;;  %262 = vmatpush1.bf16.msra.mxu1 %v1837_v4  ;;  %v1846_v10 = vld [vmem:[%s2758_s1 + $0x4c] ss:$16 sps:$4 sm:$0xff]   ;;  %v1848_v11 = vld [vmem:[%s2758_s1 + $0x40] ss:$16 sps:$4 sm:$0xff]   ;;  %v1849_v12 = vld [vmem:[%s2758_s1 + $0x48] ss:$16 sps:$4 sm:$0xff]  }
   0x5   :  { %220 = vmatprep.subr.bf16.mxu0 %v1838_v5  ;;  %263 = vmatprep.subr.bf16.mxu1 %v1840_v6  ;;  %v1850_v13 = vld [vmem:[%s2758_s1 + $0x64] ss:$16 sps:$4 sm:$0xff]   ;;  %v1852_v14 = vld [vmem:[%s2758_s1 + $0x6c] ss:$16 sps:$4 sm:$0xff]   ;;  %v1854_v15 = vld [vmem:[%s2758_s1 + $0x60] ss:$16 sps:$4 sm:$0xff]  }
   0x6   :  { %v1855_v16 = vld [vmem:[%s2758_s1 + $0x68] ss:$16 sps:$4 sm:$0xff]   ;;  %v1856_v17 = vld [vmem:[%s2758_s1 + $0x84] ss:$16 sps:$4 sm:$0xff]   ;;  %v1858_v18 = vld [vmem:[%s2758_s1 + $0x8c] ss:$16 sps:$4 sm:$0xff]  }
   0x7   :  { %v1860_v19 = vld [vmem:[%s2758_s1 + $0x80] ss:$16 sps:$4 sm:$0xff]   ;;  %v1861_v20 = vld [vmem:[%s2758_s1 + $0x88] ss:$16 sps:$4 sm:$0xff]   ;;  %v1862_v21 = vld [vmem:[%s2758_s1 + $0xa4] ss:$16 sps:$4 sm:$0xff]  }
   0x8   :  { %221 = vmatpush1.bf16.msra.mxu0 %v1842_v7  ;;  %264 = vmatpush1.bf16.msra.mxu1 %v1843_v8  ;;  %v1864_v22 = vld [vmem:[%s2758_s1 + $0xac] ss:$16 sps:$4 sm:$0xff]   ;;  %v1866_v23 = vld [vmem:[%s2758_s1 + $0xa0] ss:$16 sps:$4 sm:$0xff]   ;;  %v1867_v24 = vld [vmem:[%s2758_s1 + $0xa8] ss:$16 sps:$4 sm:$0xff]  }
   0x9   :  { %222 = vmatprep.subr.bf16.mxu0 %v1844_v9  ;;  %265 = vmatprep.subr.bf16.mxu1 %v1846_v10  ;;  %v1868_v25 = vld [vmem:[%s2758_s1 + $0xc4] ss:$16 sps:$4 sm:$0xff]   ;;  %v1870_v26 = vld [vmem:[%s2758_s1 + $0xcc] ss:$16 sps:$4 sm:$0xff]   ;;  %v1872_v27 = vld [vmem:[%s2758_s1 + $0xc0] ss:$16 sps:$4 sm:$0xff]  }
   0xa   :  { %v1873_v28 = vld [vmem:[%s2758_s1 + $0xc8] ss:$16 sps:$4 sm:$0xff]   ;;  %v1874_v29 = vld [vmem:[%s2758_s1 + $0xe4] ss:$16 sps:$4 sm:$0xff]   ;;  %v1876_v30 = vld [vmem:[%s2758_s1 + $0xec] ss:$16 sps:$4 sm:$0xff]  }
   0xb   :  { %v1878_v31 = vld [vmem:[%s2758_s1 + $0xe0] ss:$16 sps:$4 sm:$0xff]   ;;  %v1879_v32 = vld [vmem:[%s2758_s1 + $0xe8] ss:$16 sps:$4 sm:$0xff]   ;;  %v1883_v33 = vld [vmem:[%s2758_s1 + $0x104] ss:$16 sps:$4 sm:$0xff]  }
   0xc   :  { %223 = vmatpush1.bf16.msra.mxu0 %v1848_v11  ;;  %266 = vmatpush1.bf16.msra.mxu1 %v1849_v12  ;;  %v1886_v34 = vld [vmem:[%s2758_s1 + $0x10c] ss:$16 sps:$4 sm:$0xff]   ;;  %v1880_v35 = vld [vmem:[%s2759_s0] sm:$0xff]   ;;  %v1884_v37 = vld [vmem:[%s2758_s1 + $0x108] ss:$16 sps:$4 sm:$0xff]  }
   0xd   :  { %224 = vmatprep.subr.bf16.mxu0 %v1850_v13  ;;  %267 = vmatprep.subr.bf16.mxu1 %v1852_v14  ;;  %v1881_v36 = vld [vmem:[%s2758_s1 + $0x100] ss:$16 sps:$4 sm:$0xff]   ;;  %v1889_v38 = vld [vmem:[%s2758_s1 + $0x124] ss:$16 sps:$4 sm:$0xff]   ;;  %v1892_v39 = vld [vmem:[%s2758_s1 + $0x12c] ss:$16 sps:$4 sm:$0xff]  }
   0xe   :  { %v1887_v40 = vld [vmem:[%s2758_s1 + $0x120] ss:$16 sps:$4 sm:$0xff]   ;;  %v1890_v41 = vld [vmem:[%s2758_s1 + $0x128] ss:$16 sps:$4 sm:$0xff]   ;;  %v1895_v42 = vld [vmem:[%s2758_s1 + $0x144] ss:$16 sps:$4 sm:$0xff]  }
   0xf   :  { %v1898_v43 = vld [vmem:[%s2758_s1 + $0x14c] ss:$16 sps:$4 sm:$0xff]   ;;  %v1893_v44 = vld [vmem:[%s2758_s1 + $0x140] ss:$16 sps:$4 sm:$0xff]   ;;  %v1896_v45 = vld [vmem:[%s2758_s1 + $0x148] ss:$16 sps:$4 sm:$0xff]  }
  0x10   :  { %225 = vmatpush1.bf16.msra.mxu0 %v1854_v15  ;;  %268 = vmatpush1.bf16.msra.mxu1 %v1855_v16  ;;  %v1901_v46 = vld [vmem:[%s2758_s1 + $0x164] ss:$16 sps:$4 sm:$0xff]   ;;  %v1904_v47 = vld [vmem:[%s2758_s1 + $0x16c] ss:$16 sps:$4 sm:$0xff]   ;;  %v1899_v48 = vld [vmem:[%s2758_s1 + $0x160] ss:$16 sps:$4 sm:$0xff]  }
  0x11   :  { %226 = vmatprep.subr.bf16.mxu0 %v1856_v17  ;;  %269 = vmatprep.subr.bf16.mxu1 %v1858_v18  ;;  %v1902_v49 = vld [vmem:[%s2758_s1 + $0x168] ss:$16 sps:$4 sm:$0xff]   ;;  %v1907_v50 = vld [vmem:[%s2758_s1 + $0x184] ss:$16 sps:$4 sm:$0xff]   ;;  %v1910_v51 = vld [vmem:[%s2758_s1 + $0x18c] ss:$16 sps:$4 sm:$0xff]  }
  0x12   :  { %v1905_v52 = vld [vmem:[%s2758_s1 + $0x180] ss:$16 sps:$4 sm:$0xff]   ;;  %v1908_v53 = vld [vmem:[%s2758_s1 + $0x188] ss:$16 sps:$4 sm:$0xff]   ;;  %v1913_v54 = vld [vmem:[%s2758_s1 + $0x1a4] ss:$16 sps:$4 sm:$0xff]  }
  0x13   :  { %v1916_v55 = vld [vmem:[%s2758_s1 + $0x1ac] ss:$16 sps:$4 sm:$0xff]   ;;  %v1911_v56 = vld [vmem:[%s2758_s1 + $0x1a0] ss:$16 sps:$4 sm:$0xff]   ;;  %v1914_v57 = vld [vmem:[%s2758_s1 + $0x1a8] ss:$16 sps:$4 sm:$0xff]  }
  0x14   :  { %227 = vmatpush1.bf16.msra.mxu0 %v1860_v19  ;;  %270 = vmatpush1.bf16.msra.mxu1 %v1861_v20  ;;  %v1919_v58 = vld [vmem:[%s2758_s1 + $0x1c4] ss:$16 sps:$4 sm:$0xff]   ;;  %v1922_v59 = vld [vmem:[%s2758_s1 + $0x1cc] ss:$16 sps:$4 sm:$0xff]   ;;  %v1917_v60 = vld [vmem:[%s2758_s1 + $0x1c0] ss:$16 sps:$4 sm:$0xff]  }
  0x15   :  { %228 = vmatprep.subr.bf16.mxu0 %v1862_v21  ;;  %271 = vmatprep.subr.bf16.mxu1 %v1864_v22  ;;  %v1920_v61 = vld [vmem:[%s2758_s1 + $0x1c8] ss:$16 sps:$4 sm:$0xff]   ;;  %v1925_v62 = vld [vmem:[%s2758_s1 + $0x1e4] ss:$16 sps:$4 sm:$0xff]   ;;  %v1928_v63 = vld [vmem:[%s2758_s1 + $0x1ec] ss:$16 sps:$4 sm:$0xff]  }
  0x16   :  { %v1923_v0 = vld [vmem:[%s2758_s1 + $0x1e0] ss:$16 sps:$4 sm:$0xff]   ;;  %v1926_v2 = vld [vmem:[%s2758_s1 + $0x1e8] ss:$16 sps:$4 sm:$0xff]   ;;  %v1932_v3 = vld [vmem:[%s2758_s1 + $0x204] ss:$16 sps:$4 sm:$0xff]  }
  0x17   :  { %v1935_v4 = vld [vmem:[%s2758_s1 + $0x20c] ss:$16 sps:$4 sm:$0xff]   ;;  %v1930_v6 = vld [vmem:[%s2758_s1 + $0x200] ss:$16 sps:$4 sm:$0xff]   ;;  %v1933_v7 = vld [vmem:[%s2758_s1 + $0x208] ss:$16 sps:$4 sm:$0xff]  }
  0x18   :  { %229 = vmatpush1.bf16.msra.mxu0 %v1866_v23  ;;  %272 = vmatpush1.bf16.msra.mxu1 %v1867_v24  ;;  %v1929_v5 = vld [vmem:[%s2759_s0 + $0x8] sm:$0xff]   ;;  %v1938_v8 = vld [vmem:[%s2758_s1 + $0x224] ss:$16 sps:$4 sm:$0xff]   ;;  %v1936_v10 = vld [vmem:[%s2758_s1 + $0x220] ss:$16 sps:$4 sm:$0xff]  }
  0x19   :  { %230 = vmatprep.subr.bf16.mxu0 %v1868_v25  ;;  %273 = vmatprep.subr.bf16.mxu1 %v1870_v26  ;;  %v1941_v9 = vld [vmem:[%s2758_s1 + $0x22c] ss:$16 sps:$4 sm:$0xff]   ;;  %v1939_v11 = vld [vmem:[%s2758_s1 + $0x228] ss:$16 sps:$4 sm:$0xff]   ;;  %v1944_v12 = vld [vmem:[%s2758_s1 + $0x244] ss:$16 sps:$4 sm:$0xff]  }
  0x1a   :  { %v1947_v13 = vld [vmem:[%s2758_s1 + $0x24c] ss:$16 sps:$4 sm:$0xff]   ;;  %v1942_v14 = vld [vmem:[%s2758_s1 + $0x240] ss:$16 sps:$4 sm:$0xff]   ;;  %v1945_v15 = vld [vmem:[%s2758_s1 + $0x248] ss:$16 sps:$4 sm:$0xff]  }
  0x1b   :  { %v1950_v16 = vld [vmem:[%s2758_s1 + $0x264] ss:$16 sps:$4 sm:$0xff]   ;;  %v1953_v17 = vld [vmem:[%s2758_s1 + $0x26c] ss:$16 sps:$4 sm:$0xff]   ;;  %v1948_v18 = vld [vmem:[%s2758_s1 + $0x260] ss:$16 sps:$4 sm:$0xff]  }
  0x1c   :  { %231 = vmatpush1.bf16.msra.mxu0 %v1872_v27  ;;  %274 = vmatpush1.bf16.msra.mxu1 %v1873_v28  ;;  %v1951_v19 = vld [vmem:[%s2758_s1 + $0x268] ss:$16 sps:$4 sm:$0xff]   ;;  %v1956_v20 = vld [vmem:[%s2758_s1 + $0x284] ss:$16 sps:$4 sm:$0xff]   ;;  %v1959_v21 = vld [vmem:[%s2758_s1 + $0x28c] ss:$16 sps:$4 sm:$0xff]  }
  0x1d   :  { %232 = vmatprep.subr.bf16.mxu0 %v1874_v29  ;;  %275 = vmatprep.subr.bf16.mxu1 %v1876_v30  ;;  %v1954_v22 = vld [vmem:[%s2758_s1 + $0x280] ss:$16 sps:$4 sm:$0xff]   ;;  %v1957_v23 = vld [vmem:[%s2758_s1 + $0x288] ss:$16 sps:$4 sm:$0xff]   ;;  %v1962_v24 = vld [vmem:[%s2758_s1 + $0x2a4] ss:$16 sps:$4 sm:$0xff]  }
  0x1e   :  { %v1965_v25 = vld [vmem:[%s2758_s1 + $0x2ac] ss:$16 sps:$4 sm:$0xff]   ;;  %v1960_v26 = vld [vmem:[%s2758_s1 + $0x2a0] ss:$16 sps:$4 sm:$0xff]   ;;  %v1963_v27 = vld [vmem:[%s2758_s1 + $0x2a8] ss:$16 sps:$4 sm:$0xff]  }
  0x1f   :  { %v1968_v28 = vld [vmem:[%s2758_s1 + $0x2c4] ss:$16 sps:$4 sm:$0xff]   ;;  %v1971_v29 = vld [vmem:[%s2758_s1 + $0x2cc] ss:$16 sps:$4 sm:$0xff]   ;;  %v1966_v30 = vld [vmem:[%s2758_s1 + $0x2c0] ss:$16 sps:$4 sm:$0xff]  }
  0x20   :  { %233 = vmatpush1.bf16.msra.mxu0 %v1878_v31  ;;  %276 = vmatpush1.bf16.msra.mxu1 %v1879_v32  ;;  %v1969_v31 = vld [vmem:[%s2758_s1 + $0x2c8] ss:$16 sps:$4 sm:$0xff]   ;;  %v1974_v32 = vld [vmem:[%s2758_s1 + $0x2e4] ss:$16 sps:$4 sm:$0xff]  }
  0x21   :  { %506 = vmatprep.subr.bf16.mxu0 %v1883_v33  ;;  %549 = vmatprep.subr.bf16.mxu1 %v1886_v34  ;;  %v1977_v33 = vld [vmem:[%s2758_s1 + $0x2ec] ss:$16 sps:$4 sm:$0xff]   ;;  %v1972_v34 = vld [vmem:[%s2758_s1 + $0x2e0] ss:$16 sps:$4 sm:$0xff]  }
  0x23   :  { %251 = vmatmul.mubr.bf16.vlgmr.msra.gmra.mrb[0].mxu0 %v1880_v35  ;;  %294 = vmatmul.mubr.bf16.vlgmr.msra.gmra.mrb[0].mxu1 %v1880_v35  ;;  %v1975_v35 = vld [vmem:[%s2758_s1 + $0x2e8] ss:$16 sps:$4 sm:$0xff]  }
  0x24   :  { %507 = vmatpush1.bf16.msra.mxu0 %v1881_v36  ;;  %550 = vmatpush1.bf16.msra.mxu1 %v1884_v37  ;;  %v1981_v36 = vld [vmem:[%s2758_s1 + $0x304] ss:$16 sps:$4 sm:$0xff]   ;;  %v1984_v37 = vld [vmem:[%s2758_s1 + $0x30c] ss:$16 sps:$4 sm:$0xff]  }
  0x25   :  { %508 = vmatprep.subr.bf16.mxu0 %v1889_v38  ;;  %551 = vmatprep.subr.bf16.mxu1 %v1892_v39  ;;  %v1978_v38 = vld [vmem:[%s2759_s0 + $0x10] sm:$0xff]  }
  0x26   :  { %538 = vmatprep.mubr.bf16.mxu0 %v2032_v1  ;;  %581 = vmatprep.mubr.bf16.mxu1 %v2032_v1  ;;  %v1979_v39 = vld [vmem:[%s2758_s1 + $0x300] ss:$16 sps:$4 sm:$0xff]  }
  0x28   :  { %509 = vmatpush1.bf16.msra.mxu0 %v1887_v40  ;;  %552 = vmatpush1.bf16.msra.mxu1 %v1890_v41  ;;  %v1982_v40 = vld [vmem:[%s2758_s1 + $0x308] ss:$16 sps:$4 sm:$0xff]   ;;  %v1987_v41 = vld [vmem:[%s2758_s1 + $0x324] ss:$16 sps:$4 sm:$0xff]  }
  0x29   :  { %510 = vmatprep.subr.bf16.mxu0 %v1895_v42  ;;  %553 = vmatprep.subr.bf16.mxu1 %v1898_v43  ;;  %v1990_v42 = vld [vmem:[%s2758_s1 + $0x32c] ss:$16 sps:$4 sm:$0xff]   ;;  %v1985_v43 = vld [vmem:[%s2758_s1 + $0x320] ss:$16 sps:$4 sm:$0xff]  }
  0x2c   :  { %511 = vmatpush1.bf16.msra.mxu0 %v1893_v44  ;;  %554 = vmatpush1.bf16.msra.mxu1 %v1896_v45  ;;  %v1988_v44 = vld [vmem:[%s2758_s1 + $0x328] ss:$16 sps:$4 sm:$0xff]   ;;  %v1993_v45 = vld [vmem:[%s2758_s1 + $0x344] ss:$16 sps:$4 sm:$0xff]  }
  0x2d   :  { %512 = vmatprep.subr.bf16.mxu0 %v1901_v46  ;;  %555 = vmatprep.subr.bf16.mxu1 %v1904_v47  ;;  %v1996_v46 = vld [vmem:[%s2758_s1 + $0x34c] ss:$16 sps:$4 sm:$0xff]   ;;  %v1991_v47 = vld [vmem:[%s2758_s1 + $0x340] ss:$16 sps:$4 sm:$0xff]  }
  0x30   :  { %513 = vmatpush1.bf16.msra.mxu0 %v1899_v48  ;;  %556 = vmatpush1.bf16.msra.mxu1 %v1902_v49  ;;  %v1994_v48 = vld [vmem:[%s2758_s1 + $0x348] ss:$16 sps:$4 sm:$0xff]   ;;  %v1999_v49 = vld [vmem:[%s2758_s1 + $0x364] ss:$16 sps:$4 sm:$0xff]  }
  0x31   :  { %514 = vmatprep.subr.bf16.mxu0 %v1907_v50  ;;  %557 = vmatprep.subr.bf16.mxu1 %v1910_v51  ;;  %v1997_v50 = vld [vmem:[%s2758_s1 + $0x360] ss:$16 sps:$4 sm:$0xff]   ;;  %v2000_v51 = vld [vmem:[%s2758_s1 + $0x368] ss:$16 sps:$4 sm:$0xff]  }
  0x34   :  { %515 = vmatpush1.bf16.msra.mxu0 %v1905_v52  ;;  %558 = vmatpush1.bf16.msra.mxu1 %v1908_v53  ;;  %v2005_v52 = vld [vmem:[%s2758_s1 + $0x384] ss:$16 sps:$4 sm:$0xff]   ;;  %v2008_v53 = vld [vmem:[%s2758_s1 + $0x38c] ss:$16 sps:$4 sm:$0xff]  }
  0x35   :  { %516 = vmatprep.subr.bf16.mxu0 %v1913_v54  ;;  %559 = vmatprep.subr.bf16.mxu1 %v1916_v55  ;;  %v2003_v54 = vld [vmem:[%s2758_s1 + $0x380] ss:$16 sps:$4 sm:$0xff]   ;;  %v2006_v55 = vld [vmem:[%s2758_s1 + $0x388] ss:$16 sps:$4 sm:$0xff]  }
  0x38   :  { %517 = vmatpush1.bf16.msra.mxu0 %v1911_v56  ;;  %560 = vmatpush1.bf16.msra.mxu1 %v1914_v57  ;;  %v2011_v56 = vld [vmem:[%s2758_s1 + $0x3a4] ss:$16 sps:$4 sm:$0xff]   ;;  %v2014_v57 = vld [vmem:[%s2758_s1 + $0x3ac] ss:$16 sps:$4 sm:$0xff]  }
  0x39   :  { %518 = vmatprep.subr.bf16.mxu0 %v1919_v58  ;;  %561 = vmatprep.subr.bf16.mxu1 %v1922_v59  ;;  %v2009_v58 = vld [vmem:[%s2758_s1 + $0x3a0] ss:$16 sps:$4 sm:$0xff]   ;;  %v2012_v59 = vld [vmem:[%s2758_s1 + $0x3a8] ss:$16 sps:$4 sm:$0xff]  }
  0x3c   :  { %519 = vmatpush1.bf16.msra.mxu0 %v1917_v60  ;;  %562 = vmatpush1.bf16.msra.mxu1 %v1920_v61  ;;  %v2017_v60 = vld [vmem:[%s2758_s1 + $0x3c4] ss:$16 sps:$4 sm:$0xff]   ;;  %v2020_v61 = vld [vmem:[%s2758_s1 + $0x3cc] ss:$16 sps:$4 sm:$0xff]  }
  0x3d   :  { %520 = vmatprep.subr.bf16.mxu0 %v1925_v62  ;;  %563 = vmatprep.subr.bf16.mxu1 %v1928_v63  ;;  %v2015_v62 = vld [vmem:[%s2758_s1 + $0x3c0] ss:$16 sps:$4 sm:$0xff]   ;;  %v2018_v63 = vld [vmem:[%s2758_s1 + $0x3c8] ss:$16 sps:$4 sm:$0xff]  }
  0x40   :  { %521 = vmatpush1.bf16.msra.mxu0 %v1923_v0  ;;  %564 = vmatpush1.bf16.msra.mxu1 %v1926_v2  ;;  %v2023_v0 = vld [vmem:[%s2758_s1 + $0x3e4] ss:$16 sps:$4 sm:$0xff]   ;;  %v2026_v2 = vld [vmem:[%s2758_s1 + $0x3ec] ss:$16 sps:$4 sm:$0xff]  }
  0x41   :  { %794 = vmatprep.subr.bf16.mxu0 %v1932_v3  ;;  %837 = vmatprep.subr.bf16.mxu1 %v1935_v4  ;;  %v2021_v3 = vld [vmem:[%s2758_s1 + $0x3e0] ss:$16 sps:$4 sm:$0xff]   ;;  %v2024_v4 = vld [vmem:[%s2758_s1 + $0x3e8] ss:$16 sps:$4 sm:$0xff]  }
  0x43   :  { %539 = vmatmul.mubr.bf16.vlgmr.msra.gmra.mrb[4].mxu0 %v1929_v5  ;;  %582 = vmatmul.mubr.bf16.vlgmr.msra.gmra.mrb[4].mxu1 %v1929_v5  ;;  %v2027_v5 = vld [vmem:[%s2759_s0 + $0x18] sm:$0xff]  }
  0x44   :  { %795 = vmatpush1.bf16.msra.mxu0 %v1930_v6  ;;  %838 = vmatpush1.bf16.msra.mxu1 %v1933_v7 }
  0x45   :  { %796 = vmatprep.subr.bf16.mxu0 %v1938_v8  ;;  %839 = vmatprep.subr.bf16.mxu1 %v1941_v9 }
  0x46   :  { %826 = vmatprep.mubr.bf16.mxu0 %v2032_v1  ;;  %869 = vmatprep.mubr.bf16.mxu1 %v2032_v1 }
  0x48   :  { %797 = vmatpush1.bf16.msra.mxu0 %v1936_v10  ;;  %840 = vmatpush1.bf16.msra.mxu1 %v1939_v11 }
  0x49   :  { %798 = vmatprep.subr.bf16.mxu0 %v1944_v12  ;;  %841 = vmatprep.subr.bf16.mxu1 %v1947_v13 }
  0x4c   :  { %799 = vmatpush1.bf16.msra.mxu0 %v1942_v14  ;;  %842 = vmatpush1.bf16.msra.mxu1 %v1945_v15 }
  0x4d   :  { %800 = vmatprep.subr.bf16.mxu0 %v1950_v16  ;;  %843 = vmatprep.subr.bf16.mxu1 %v1953_v17 }
  0x50   :  { %801 = vmatpush1.bf16.msra.mxu0 %v1948_v18  ;;  %844 = vmatpush1.bf16.msra.mxu1 %v1951_v19 }
  0x51   :  { %802 = vmatprep.subr.bf16.mxu0 %v1956_v20  ;;  %845 = vmatprep.subr.bf16.mxu1 %v1959_v21 }
  0x54   :  { %803 = vmatpush1.bf16.msra.mxu0 %v1954_v22  ;;  %846 = vmatpush1.bf16.msra.mxu1 %v1957_v23 }
  0x55   :  { %804 = vmatprep.subr.bf16.mxu0 %v1962_v24  ;;  %847 = vmatprep.subr.bf16.mxu1 %v1965_v25 }
  0x58   :  { %805 = vmatpush1.bf16.msra.mxu0 %v1960_v26  ;;  %848 = vmatpush1.bf16.msra.mxu1 %v1963_v27 }
  0x59   :  { %806 = vmatprep.subr.bf16.mxu0 %v1968_v28  ;;  %849 = vmatprep.subr.bf16.mxu1 %v1971_v29 }
  0x5c   :  { %807 = vmatpush1.bf16.msra.mxu0 %v1966_v30  ;;  %850 = vmatpush1.bf16.msra.mxu1 %v1969_v31 }
  0x5d   :  { %808 = vmatprep.subr.bf16.mxu0 %v1974_v32  ;;  %851 = vmatprep.subr.bf16.mxu1 %v1977_v33 }
  0x60   :  { %809 = vmatpush1.bf16.msra.mxu0 %v1972_v34  ;;  %852 = vmatpush1.bf16.msra.mxu1 %v1975_v35 }
  0x61   :  { %1082 = vmatprep.subr.bf16.mxu0 %v1981_v36  ;;  %1125 = vmatprep.subr.bf16.mxu1 %v1984_v37 }
  0x63   :  { %827 = vmatmul.mubr.bf16.vlgmr.msra.gmra.mrb[8].mxu0 %v1978_v38  ;;  %870 = vmatmul.mubr.bf16.vlgmr.msra.gmra.mrb[8].mxu1 %v1978_v38 }
  0x64   :  { %1083 = vmatpush1.bf16.msra.mxu0 %v1979_v39  ;;  %1126 = vmatpush1.bf16.msra.mxu1 %v1982_v40 }
  0x65   :  { %1084 = vmatprep.subr.bf16.mxu0 %v1987_v41  ;;  %1127 = vmatprep.subr.bf16.mxu1 %v1990_v42 }
  0x66   :  { %1114 = vmatprep.mubr.bf16.mxu0 %v2032_v1  ;;  %1157 = vmatprep.mubr.bf16.mxu1 %v2032_v1  ;;  %v2002_v1 = vld [vmem:[%s2758_s1 + $0x36c] ss:$16 sps:$4 sm:$0xff]  }
  0x68   :  { %1085 = vmatpush1.bf16.msra.mxu0 %v1985_v43  ;;  %1128 = vmatpush1.bf16.msra.mxu1 %v1988_v44 }
  0x69   :  { %1086 = vmatprep.subr.bf16.mxu0 %v1993_v45  ;;  %1129 = vmatprep.subr.bf16.mxu1 %v1996_v46 }
  0x6c   :  { %1087 = vmatpush1.bf16.msra.mxu0 %v1991_v47  ;;  %1130 = vmatpush1.bf16.msra.mxu1 %v1994_v48 }
  0x6d   :  { %1088 = vmatprep.subr.bf16.mxu0 %v1999_v49  ;;  %1131 = vmatprep.subr.bf16.mxu1 %v2002_v1 }
  0x70   :  { %1089 = vmatpush1.bf16.msra.mxu0 %v1997_v50  ;;  %1132 = vmatpush1.bf16.msra.mxu1 %v2000_v51 }
  0x71   :  { %1090 = vmatprep.subr.bf16.mxu0 %v2005_v52  ;;  %1133 = vmatprep.subr.bf16.mxu1 %v2008_v53 }
  0x74   :  { %1091 = vmatpush1.bf16.msra.mxu0 %v2003_v54  ;;  %1134 = vmatpush1.bf16.msra.mxu1 %v2006_v55 }
  0x75   :  { %1092 = vmatprep.subr.bf16.mxu0 %v2011_v56  ;;  %1135 = vmatprep.subr.bf16.mxu1 %v2014_v57 }
  0x78   :  { %1093 = vmatpush1.bf16.msra.mxu0 %v2009_v58  ;;  %1136 = vmatpush1.bf16.msra.mxu1 %v2012_v59 }
  0x79   :  { %1094 = vmatprep.subr.bf16.mxu0 %v2017_v60  ;;  %1137 = vmatprep.subr.bf16.mxu1 %v2020_v61 }
  0x7c   :  { %1095 = vmatpush1.bf16.msra.mxu0 %v2015_v62  ;;  %1138 = vmatpush1.bf16.msra.mxu1 %v2018_v63 }
  0x7d   :  { %1096 = vmatprep.subr.bf16.mxu0 %v2023_v0  ;;  %1139 = vmatprep.subr.bf16.mxu1 %v2026_v2 }
  0x80   :  { %1097 = vmatpush1.bf16.msra.mxu0 %v2021_v3  ;;  %1140 = vmatpush1.bf16.msra.mxu1 %v2024_v4 }
  0x83   :  { %1115 = vmatmul.mubr.bf16.vlgmr.msra.gmra.mrb[12].mxu0 %v2027_v5  ;;  %1158 = vmatmul.mubr.bf16.vlgmr.msra.gmra.mrb[12].mxu1 %v2027_v5 }
  0xf6   :  { %v2464_v6 = vpop.f32.mrb[0].mxu0  ;;  %v2466_v7 = vpop.f32.mrb[0].mxu1 }
  0xf7   :  { %v1178_v8 = vmul.f32 %v2464_v6, %v2464_v6  ;;  %v2470_v9 = vpop.f32.mrb[1].mxu0  ;;  %v2472_v10 = vpop.f32.mrb[1].mxu1  ;;  %v1180_v15 = vmul.f32 %v2466_v7, %v2466_v7 }
  0xf8   :  { %v1168_v11 = vadd.f32 %v2470_v9, %v2464_v6  ;;  %v1179_v12 = vmul.f32 %v2470_v9, %v2470_v9  ;;  %v2478_v13 = vpop.f32.mrb[2].mxu0  ;;  %v2480_v14 = vpop.f32.mrb[2].mxu1  ;;  %v1181_v23 = vmul.f32 %v2472_v10, %v2472_v10 }
  0xf9   :  { %v1182_v16 = vmul.f32 %v2478_v13, %v2478_v13  ;;  %v2486_v17 = vpop.f32.mrb[3].mxu0  ;;  %v2488_v18 = vpop.f32.mrb[3].mxu1  ;;  %v1184_v21 = vmul.f32 %v2480_v14, %v2480_v14 }
  0xfa   :  { %v1173_v19 = vadd.f32 %v2486_v17, %v2478_v13  ;;  %v1183_v20 = vmul.f32 %v2486_v17, %v2486_v17  ;;  %v1169_v22 = vadd.f32 %v1168_v11, %v2466_v7  ;;  %v1186_v24 = vadd.f32 %v1179_v12, %v1178_v8 }
  0xfb   :  { %v1185_v29 = vmul.f32 %v2488_v18, %v2488_v18 }
  0xfc   :  { %v1170_v25 = vadd.f32 %v1169_v22, %v2472_v10  ;;  %v1191_v26 = vadd.f32 %v1183_v20, %v1182_v16  ;;  %v1174_v27 = vadd.f32 %v1173_v19, %v2480_v14  ;;  %v1187_v28 = vadd.f32 %v1186_v24, %v1180_v15 }
  0xfe   :  { %1171 = vadd.xlane.f32.xlu0 %v1170_v25  ;;  %v1192_v30 = vadd.f32 %v1191_v26, %v1184_v21  ;;  %v1175_v31 = vadd.f32 %v1174_v27, %v2488_v18  ;;  %v1188_v32 = vadd.f32 %v1187_v28, %v1181_v23 }
 0x100   :  { %v1193_v33 = vadd.f32 %v1192_v30, %v1185_v29 }
 0x102   :  { %1194 = vadd.xlane.f32.xlu1 %v1193_v33  ;;  %1176 = vadd.xlane.f32.xlu0 %v1175_v31 }
 0x106   :  { %1189 = vadd.xlane.f32.xlu0 %v1188_v32 }
 0x116   :  { %v2504_v34 = vpop.f32.mrb[4].mxu0  ;;  %v2506_v35 = vpop.f32.mrb[4].mxu1 }
 0x117   :  { %v1208_v36 = vmul.f32 %v2504_v34, %v2504_v34  ;;  %v2510_v37 = vpop.f32.mrb[5].mxu0  ;;  %v2512_v38 = vpop.f32.mrb[5].mxu1  ;;  %v1210_v41 = vmul.f32 %v2506_v35, %v2506_v35 }
 0x118   :  { %v1196_v39 = vadd.f32 %v2510_v37, %v2504_v34  ;;  %v1209_v40 = vmul.f32 %v2510_v37, %v2510_v37  ;;  %v2520_v42 = vpop.f32.mrb[6].mxu0  ;;  %v2522_v43 = vpop.f32.mrb[6].mxu1  ;;  %v1211_v48 = vmul.f32 %v2512_v38, %v2512_v38 }
 0x119   :  { %v1212_v44 = vmul.f32 %v2520_v42, %v2520_v42  ;;  %v2526_v45 = vpop.f32.mrb[7].mxu0  ;;  %v1214_v46 = vmul.f32 %v2522_v43, %v2522_v43  ;;  %v2530_v47 = vpop.f32.mrb[7].mxu1 }
 0x11a   :  { %v1201_v49 = vadd.f32 %v2526_v45, %v2520_v42  ;;  %v1213_v1 = vmul.f32 %v2526_v45, %v2526_v45  ;;  %v1197_v50 = vadd.f32 %v1196_v39, %v2506_v35  ;;  %v1216_v51 = vadd.f32 %v1209_v40, %v1208_v36 }
 0x11b   :  { %v1215_v58 = vmul.f32 %v2530_v47, %v2530_v47 }
 0x11c   :  { %v1198_v52 = vadd.f32 %v1197_v50, %v2512_v38  ;;  %v1217_v53 = vadd.f32 %v1216_v51, %v1210_v41  ;;  %v1202_v54 = vadd.f32 %v1201_v49, %v2522_v43  ;;  %v1221_v55 = vadd.f32 %v1213_v1, %v1212_v44 }
 0x11e   :  { %1199 = vadd.xlane.f32.xlu1 %v1198_v52  ;;  %v1218_v56 = vadd.f32 %v1217_v53, %v1211_v48  ;;  %v1203_v57 = vadd.f32 %v1202_v54, %v2530_v47  ;;  %v1222_v59 = vadd.f32 %v1221_v55, %v1214_v46 }
 0x120   :  { %1219 = vadd.xlane.f32.xlu0 %v1218_v56  ;;  %v1223_v60 = vadd.f32 %v1222_v59, %v1215_v58 }
 0x122   :  { %1204 = vadd.xlane.f32.xlu1 %v1203_v57 }
 0x126   :  { %1224 = vadd.xlane.f32.xlu1 %v1223_v60 }
 0x136   :  { %v2544_v61 = vpop.f32.mrb[8].mxu0  ;;  %v2546_v62 = vpop.f32.mrb[8].mxu1 }
 0x137   :  { %v1240_v63 = vmul.f32 %v2544_v61, %v2544_v61  ;;  %v2550_v0 = vpop.f32.mrb[9].mxu0  ;;  %v2552_v2 = vpop.f32.mrb[9].mxu1  ;;  %v1242_v5 = vmul.f32 %v2546_v62, %v2546_v62 }
 0x138   :  { %v1228_v3 = vadd.f32 %v2550_v0, %v2544_v61  ;;  %v1241_v4 = vmul.f32 %v2550_v0, %v2550_v0  ;;  %v2560_v8 = vpop.f32.mrb[10].mxu0  ;;  %v2562_v11 = vpop.f32.mrb[10].mxu1  ;;  %v1243_v20 = vmul.f32 %v2552_v2, %v2552_v2 }
 0x139   :  { %v1244_v12 = vmul.f32 %v2560_v8, %v2560_v8  ;;  %v2566_v15 = vpop.f32.mrb[11].mxu0  ;;  %v1246_v16 = vmul.f32 %v2562_v11, %v2562_v11  ;;  %v2570_v19 = vpop.f32.mrb[11].mxu1 }
 0x13a   :  { %v1233_v21 = vadd.f32 %v2566_v15, %v2560_v8  ;;  %v1245_v22 = vmul.f32 %v2566_v15, %v2566_v15  ;;  %v1229_v23 = vadd.f32 %v1228_v3, %v2546_v62  ;;  %v1248_v24 = vadd.f32 %v1241_v4, %v1240_v63 }
 0x13b   :  { %v1247_v31 = vmul.f32 %v2570_v19, %v2570_v19 }
 0x13c   :  { %v1230_v25 = vadd.f32 %v1229_v23, %v2552_v2  ;;  %v1234_v26 = vadd.f32 %v1233_v21, %v2562_v11  ;;  %v1249_v27 = vadd.f32 %v1248_v24, %v1242_v5  ;;  %v1253_v28 = vadd.f32 %v1245_v22, %v1244_v12 }
 0x13e   :  { %1231 = vadd.xlane.f32.xlu0 %v1230_v25  ;;  %v1235_v29 = vadd.f32 %v1234_v26, %v2570_v19  ;;  %v1250_v30 = vadd.f32 %v1249_v27, %v1243_v20  ;;  %v1254_v32 = vadd.f32 %v1253_v28, %v1246_v16 }
 0x140   :  { %1236 = vadd.xlane.f32.xlu1 %v1235_v29  ;;  %v1255_v33 = vadd.f32 %v1254_v32, %v1247_v31 }
 0x142   :  { %1251 = vadd.xlane.f32.xlu0 %v1250_v30 }
 0x144   :  { %1256 = vadd.xlane.f32.xlu1 %v1255_v33 }
 0x156   :  { %v2584_v36 = vpop.f32.mrb[12].mxu0  ;;  %v2586_v39 = vpop.f32.mrb[12].mxu1 }
 0x157   :  { %v1272_v40 = vmul.f32 %v2584_v36, %v2584_v36  ;;  %v2590_v41 = vpop.f32.mrb[13].mxu0  ;;  %v2592_v44 = vpop.f32.mrb[13].mxu1  ;;  %v1274_v50 = vmul.f32 %v2586_v39, %v2586_v39 }
 0x158   :  { %v1260_v46 = vadd.f32 %v2590_v41, %v2584_v36  ;;  %v1273_v48 = vmul.f32 %v2590_v41, %v2590_v41  ;;  %v2598_v49 = vpop.f32.mrb[14].mxu0  ;;  %v2600_v1 = vpop.f32.mrb[14].mxu1  ;;  %v1275_v3 = vmul.f32 %v2592_v44, %v2592_v44 }
 0x159   :  { %v1276_v51 = vmul.f32 %v2598_v49, %v2598_v49  ;;  %v2606_v52 = vpop.f32.mrb[15].mxu0  ;;  %v2608_v53 = vpop.f32.mrb[15].mxu1  ;;  %v1278_v58 = vmul.f32 %v2600_v1, %v2600_v1 }
 0x15a   :  { %v1265_v54 = vadd.f32 %v2606_v52, %v2598_v49  ;;  %v1277_v55 = vmul.f32 %v2606_v52, %v2606_v52  ;;  %v1261_v56 = vadd.f32 %v1260_v46, %v2586_v39  ;;  %v1280_v57 = vadd.f32 %v1273_v48, %v1272_v40 }
 0x15b   :  { %v1279_v5 = vmul.f32 %v2608_v53, %v2608_v53 }
 0x15c   :  { %v1285_v59 = vadd.f32 %v1277_v55, %v1276_v51  ;;  %v1262_v60 = vadd.f32 %v1261_v56, %v2592_v44  ;;  %v1266_v63 = vadd.f32 %v1265_v54, %v2600_v1  ;;  %v1281_v4 = vadd.f32 %v1280_v57, %v1274_v50 }
 0x15e   :  { %1263 = vadd.xlane.f32.xlu0 %v1262_v60  ;;  %v1267_v12 = vadd.f32 %v1266_v63, %v2608_v53  ;;  %v1286_v16 = vadd.f32 %v1285_v59, %v1278_v58  ;;  %v1282_v20 = vadd.f32 %v1281_v4, %v1275_v3 }
 0x160   :  { %1268 = vadd.xlane.f32.xlu1 %v1267_v12  ;;  %v1287_v21 = vadd.f32 %v1286_v16, %v1279_v5 }
 0x162   :  { %1283 = vadd.xlane.f32.xlu0 %v1282_v20 }
 0x164   :  { %1288 = vadd.xlane.f32.xlu1 %v1287_v21 }
 0x18b   :  { %v1172_v22 = vpop.xlane.xlu0 %1171 }
 0x18f   :  { %v1195_v23 = vpop.xlane.xlu1 %1194  ;;  %v1177_v24 = vpop.xlane.xlu0 %1176 }
 0x193   :  { %v1190_v26 = vpop.xlane.xlu0 %1189 }
 0x1ab   :  { %v1200_v25 = vpop.xlane.xlu1 %1199 }
 0x1ac   :  { %v1206_v33 = vadd.f32 %v1200_v25, %v1172_v22 }
 0x1ad   :  { %v1220_v28 = vpop.xlane.xlu0 %1219 }
 0x1ae   :  { %v1226_v51 = vadd.f32 %v1220_v28, %v1190_v26 }
 0x1af   :  { %v1205_v27 = vpop.xlane.xlu1 %1204 }
 0x1b0   :  { %v1207_v46 = vadd.f32 %v1205_v27, %v1177_v24 }
 0x1b3   :  { %v1225_v29 = vpop.xlane.xlu1 %1224 }
 0x1b4   :  { %v1227_v57 = vadd.f32 %v1225_v29, %v1195_v23  ;;  %v1302_v29 = vld [vmem:[%s2760_s2] sm:$0xff] }
 0x1cb   :  { %v1232_v30 = vpop.xlane.xlu0 %1231 }
 0x1cc   :  { %v1238_v48 = vadd.f32 %v1232_v30, %v1206_v33 }
 0x1cd   :  { %v1237_v31 = vpop.xlane.xlu1 %1236 }
 0x1ce   :  { %v1239_v54 = vadd.f32 %v1237_v31, %v1207_v46 }
 0x1cf   :  { %v1252_v32 = vpop.xlane.xlu0 %1251 }
 0x1d0   :  { %v1258_v58 = vadd.f32 %v1252_v32, %v1226_v51  ;;  %v1303_v32 = vld [vmem:[%s2760_s2 + $0x8] sm:$0xff] }
 0x1d1   :  { %v1257_v40 = vpop.xlane.xlu1 %1256 }
 0x1d2   :  { %v1259_v3 = vadd.f32 %v1257_v40, %v1227_v57 }
 0x1eb   :  { %v1264_v50 = vpop.xlane.xlu0 %1263 }
 0x1ec   :  { %v1270_v55 = vadd.f32 %v1264_v50, %v1238_v48  ;;  %v1310_v50 = vld [vmem:[%s2761_s3] sm:$0xff] }
 0x1ed   :  { %v1269_v56 = vpop.xlane.xlu1 %1268 }
 0x1ee   :  { %v1292_v59 = vmul.f32 0.00048828125, %v1270_v55  ;;  %v1271_v60 = vadd.f32 %v1269_v56, %v1239_v54  ;;  %v1311_v55 = vld [vmem:[%s2761_s3 + $0x8] sm:$0xff] }
 0x1ef   :  { %v1284_v63 = vpop.xlane.xlu0 %1283 }
 0x1f0   :  { %v1293_v4 = vmul.f32 0.00048828125, %v1271_v60  ;;  %v1290_v5 = vadd.f32 %v1284_v63, %v1258_v58  ;;  %v1296_v16 = vmul.f32 %v1292_v59, %v1292_v59 }
 0x1f1   :  { %v1289_v12 = vpop.xlane.xlu1 %1288 }
 0x1f2   :  { %v1294_v20 = vmul.f32 0.00048828125, %v1290_v5  ;;  %v1291_v21 = vadd.f32 %v1289_v12, %v1259_v3  ;;  %v1297_v22 = vmul.f32 %v1293_v4, %v1293_v4 }
 0x1f4   :  { %v1298_v24 = vsub.f32 %v1294_v20, %v1296_v16  ;;  %v1295_v25 = vmul.f32 0.00048828125, %v1291_v21 }
 0x1f6   :  { %v1300_v27 = vmax.f32 %v1298_v24, 0.0  ;;  %v1299_v26 = vsub.f32 %v1295_v25, %v1297_v22 }
 0x1f8   :  { %v1304_v28 = vadd.f32 1e-05, %v1300_v27  ;;  %v1301_v30 = vmax.f32 %v1299_v26, 0.0 }
 0x1fa   :  { %2028 = vrsqrt.f32 %v1304_v28  ;;  %v1305_v23 = vadd.f32 1e-05, %v1301_v30 }
 0x1fc   :  { %2030 = vrsqrt.f32 %v1305_v23 }
 0x204   :  { %v2029_v31 = vpop.eup %2028 }
 0x205   :  { %v1308_v33 = vmul.f32 %v2029_v31, %v1302_v29 }
 0x206   :  { %v2031_v40 = vpop.eup %2030 }
 0x207   :  { %1318 = vperm.xlu0 %1830, %v1308_v33   ;;  %v1309_v46 = vmul.f32 %v2031_v40, %v1303_v32  ;;  %v1312_v48 = vmul.f32 %v1308_v33, %v1292_v59 }
 0x209   :  { %1323 = vperm.xlu1 %1831, %v1309_v46   ;;  %v1314_v51 = vsub.f32 %v1310_v50, %v1312_v48  ;;  %v1313_v54 = vmul.f32 %v1309_v46, %v1293_v4 }
 0x20b   :  { %v1315_v56 = vsub.f32 %v1311_v55, %v1313_v54 }
 0x20d   :  { %1336 = vperm.xlu1 %1831, %v1314_v51  }
 0x211   :  { %1341 = vperm.xlu1 %1831, %v1315_v56  }
 0x286   :  { %v1319_v57 = vpop.permute.xlu0 %1318 }
 0x287   :  { %v1326_v58 = vmul.f32 %v1319_v57, %v2464_v6  ;;  %v1327_v60 = vmul.f32 %v1319_v57, %v2470_v9  ;;  %v1328_v59 = vmul.f32 %v1319_v57, %v2466_v7  ;;  %v1329_v63 = vmul.f32 %v1319_v57, %v2472_v10 }
 0x288   :  { %v1388_v3 = vmul.f32 %v1319_v57, %v2504_v34  ;;  %v1389_v4 = vmul.f32 %v1319_v57, %v2510_v37  ;;  %v1390_v5 = vmul.f32 %v1319_v57, %v2506_v35  ;;  %v1391_v12 = vmul.f32 %v1319_v57, %v2512_v38  ;;  %v2644_v16 = vpop.permute.xlu1 %1323 }
 0x289   :  { %v1441_v20 = vmul.f32 %v1319_v57, %v2544_v61  ;;  %v1442_v6 = vmul.f32 %v1319_v57, %v2550_v0  ;;  %v1443_v9 = vmul.f32 %v1319_v57, %v2546_v62  ;;  %v1444_v7 = vmul.f32 %v1319_v57, %v2552_v2 }
 0x28a   :  { %v1494_v10 = vmul.f32 %v1319_v57, %v2584_v36  ;;  %v1495_v34 = vmul.f32 %v1319_v57, %v2590_v41  ;;  %v1496_v37 = vmul.f32 %v1319_v57, %v2586_v39  ;;  %v1497_v35 = vmul.f32 %v1319_v57, %v2592_v44 }
 0x28b   :  { %v2656_v38 = vmul.f32 %v2644_v16, %v2478_v13  ;;  %v2660_v61 = vmul.f32 %v2644_v16, %v2486_v17  ;;  %v2664_v62 = vmul.f32 %v2644_v16, %v2480_v14  ;;  %v2668_v0 = vmul.f32 %v2644_v16, %v2488_v18 }
 0x28c   :  { %v1337_v2 = vpop.permute.xlu1 %1336  ;;  %v2672_v36 = vmul.f32 %v2644_v16, %v2520_v42  ;;  %v2676_v13 = vmul.f32 %v2644_v16, %v2526_v45  ;;  %v2680_v17 = vmul.f32 %v2644_v16, %v2522_v43  ;;  %v2684_v14 = vmul.f32 %v2644_v16, %v2530_v47 }
 0x28d   :  { %v1344_v39 = vadd.f32 %v1337_v2, %v1326_v58  ;;  %v1345_v18 = vadd.f32 %v1337_v2, %v1327_v60  ;;  %v1346_v41 = vadd.f32 %v1337_v2, %v1328_v59  ;;  %v1347_v44 = vadd.f32 %v1337_v2, %v1329_v63 }
 0x28e   :  { %v1396_v21 = vadd.f32 %v1388_v3, %v1337_v2  ;;  %v1397_v22 = vadd.f32 %v1389_v4, %v1337_v2  ;;  %v1398_v42 = vadd.f32 %v1390_v5, %v1337_v2  ;;  %v1399_v24 = vadd.f32 %v1391_v12, %v1337_v2 }
 0x28f   :  { %v1352_v25 = vmax.f32 %v1344_v39, 0.0  ;;  %v1353_v27 = vmax.f32 %v1345_v18, 0.0  ;;  %v1354_v45 = vmax.f32 %v1346_v41, 0.0  ;;  %v1355_v26 = vmax.f32 %v1347_v44, 0.0 }
 0x290   :  { %v1404_v28 = vmax.f32 %v1396_v21, 0.0  ;;  %v1405_v30 = vmax.f32 %v1397_v22, 0.0  ;;  %v1406_v43 = vmax.f32 %v1398_v42, 0.0  ;;  %v1407_v23 = vmax.f32 %v1399_v24, 0.0 }
 0x291   :  { %v1813_v29 = vpack.c.bf16 %v1353_v27, %v1352_v25  ;;  %v1814_v31 = vpack.c.bf16 %v1355_v26, %v1354_v45  ;;  %v1449_v47 = vadd.f32 %v1441_v20, %v1337_v2  ;;  %v1450_v32 = vadd.f32 %v1442_v6, %v1337_v2 }
 0x292   :  { %v1817_v33 = vpack.c.bf16 %v1405_v30, %v1404_v28  ;;  %v1818_v40 = vpack.c.bf16 %v1407_v23, %v1406_v43  ;;  %v1451_v46 = vadd.f32 %v1443_v9, %v1337_v2  ;;  %v1452_v48 = vadd.f32 %v1444_v7, %v1337_v2  ;;  %v1342_v9 = vpop.permute.xlu1 %1341 }
 0x293   :  { %1384 = vst [vmem:[%s2762_s4] sm:$0xff] %v1813_v29  ;;  %1385 = vst [vmem:[%s2762_s4 + $0x8] sm:$0xff] %v1814_v31  ;;  %v1457_v50 = vmax.f32 %v1449_v47, 0.0  ;;  %v1458_v51 = vmax.f32 %v1450_v32, 0.0  ;;  %v1502_v54 = vadd.f32 %v1494_v10, %v1337_v2  ;;  %v1503_v55 = vadd.f32 %v1495_v34, %v1337_v2 }
 0x294   :  { %1793 = vst [vmem:[%s2762_s4 + $0x20] sm:$0xff] %v1817_v33  ;;  %1794 = vst [vmem:[%s2762_s4 + $0x28] sm:$0xff] %v1818_v40  ;;  %v1459_v56 = vmax.f32 %v1451_v46, 0.0  ;;  %v1460_v57 = vmax.f32 %v1452_v48, 0.0  ;;  %v1504_v58 = vadd.f32 %v1496_v37, %v1337_v2  ;;  %v1505_v60 = vadd.f32 %v1497_v35, %v1337_v2 }
 0x295   :  { %v1821_v59 = vpack.c.bf16 %v1458_v51, %v1457_v50  ;;  %v1510_v63 = vmax.f32 %v1502_v54, 0.0  ;;  %v1511_v3 = vmax.f32 %v1503_v55, 0.0  ;;  %v1445_v4 = vmul.f32 %v2644_v16, %v2560_v8 }
 0x296   :  { %v1822_v5 = vpack.c.bf16 %v1460_v57, %v1459_v56  ;;  %v1512_v12 = vmax.f32 %v1504_v58, 0.0  ;;  %v1513_v20 = vmax.f32 %v1505_v60, 0.0  ;;  %v1446_v6 = vmul.f32 %v2644_v16, %v2566_v15 }
 0x297   :  { %1801 = vst [vmem:[%s2762_s4 + $0x40] sm:$0xff] %v1821_v59  ;;  %v1825_v7 = vpack.c.bf16 %v1511_v3, %v1510_v63  ;;  %v1447_v10 = vmul.f32 %v2644_v16, %v2562_v11  ;;  %v1448_v34 = vmul.f32 %v2644_v16, %v2570_v19  ;;  %v1498_v8 = vmul.f32 %v2644_v16, %v2598_v49 }
 0x298   :  { %1802 = vst [vmem:[%s2762_s4 + $0x48] sm:$0xff] %v1822_v5  ;;  %v1826_v15 = vpack.c.bf16 %v1513_v20, %v1512_v12  ;;  %v1499_v37 = vmul.f32 %v2644_v16, %v2606_v52  ;;  %v1500_v35 = vmul.f32 %v2644_v16, %v2600_v1  ;;  %v1501_v11 = vmul.f32 %v2644_v16, %v2608_v53 }
 0x299   :  { %1809 = vst [vmem:[%s2762_s4 + $0x60] sm:$0xff] %v1825_v7  ;;  %v1348_v19 = vadd.f32 %v1342_v9, %v2656_v38  ;;  %v1349_v49 = vadd.f32 %v1342_v9, %v2660_v61  ;;  %v1350_v2 = vadd.f32 %v1342_v9, %v2664_v62  ;;  %v1351_v39 = vadd.f32 %v1342_v9, %v2668_v0 }
 0x29a   :  { %1810 = vst [vmem:[%s2762_s4 + $0x68] sm:$0xff] %v1826_v15  ;;  %v1400_v1 = vadd.f32 %v2672_v36, %v1342_v9  ;;  %v1401_v52 = vadd.f32 %v2676_v13, %v1342_v9  ;;  %v1402_v53 = vadd.f32 %v2680_v17, %v1342_v9  ;;  %v1403_v16 = vadd.f32 %v2684_v14, %v1342_v9 }
 0x29b   :  { %v1356_v18 = vmax.f32 %v1348_v19, 0.0  ;;  %v1357_v38 = vmax.f32 %v1349_v49, 0.0  ;;  %v1358_v41 = vmax.f32 %v1350_v2, 0.0  ;;  %v1359_v61 = vmax.f32 %v1351_v39, 0.0 }
 0x29c   :  { %v1408_v44 = vmax.f32 %v1400_v1, 0.0  ;;  %v1409_v62 = vmax.f32 %v1401_v52, 0.0  ;;  %v1410_v21 = vmax.f32 %v1402_v53, 0.0  ;;  %v1411_v0 = vmax.f32 %v1403_v16, 0.0 }
 0x29d   :  { %v1815_v22 = vpack.c.bf16 %v1357_v38, %v1356_v18  ;;  %v1816_v42 = vpack.c.bf16 %v1359_v61, %v1358_v41  ;;  %v1453_v24 = vadd.f32 %v1445_v4, %v1342_v9  ;;  %v1454_v25 = vadd.f32 %v1446_v6, %v1342_v9 }
 0x29e   :  { %v1819_v27 = vpack.c.bf16 %v1409_v62, %v1408_v44  ;;  %v1820_v36 = vpack.c.bf16 %v1411_v0, %v1410_v21  ;;  %v1455_v45 = vadd.f32 %v1447_v10, %v1342_v9  ;;  %v1456_v13 = vadd.f32 %v1448_v34, %v1342_v9 }
 0x29f   :  { %1386 = vst [vmem:[%s2762_s4 + $0x10] sm:$0xff] %v1815_v22  ;;  %1387 = vst [vmem:[%s2762_s4 + $0x18] sm:$0xff] %v1816_v42  ;;  %v1461_v17 = vmax.f32 %v1453_v24, 0.0  ;;  %v1462_v14 = vmax.f32 %v1454_v25, 0.0  ;;  %v1506_v26 = vadd.f32 %v1498_v8, %v1342_v9  ;;  %v1507_v28 = vadd.f32 %v1499_v37, %v1342_v9 }
 0x2a0   :  { %1795 = vst [vmem:[%s2762_s4 + $0x30] sm:$0xff] %v1819_v27  ;;  %1796 = vst [vmem:[%s2762_s4 + $0x38] sm:$0xff] %v1820_v36  ;;  %v1463_v30 = vmax.f32 %v1455_v45, 0.0  ;;  %v1464_v43 = vmax.f32 %v1456_v13, 0.0  ;;  %v1508_v23 = vadd.f32 %v1500_v35, %v1342_v9  ;;  %v1509_v29 = vadd.f32 %v1501_v11, %v1342_v9 }
 0x2a1   :  { %v1823_v31 = vpack.c.bf16 %v1462_v14, %v1461_v17  ;;  %v1514_v47 = vmax.f32 %v1506_v26, 0.0  ;;  %v1515_v32 = vmax.f32 %v1507_v28, 0.0 }
 0x2a2   :  { %v1824_v33 = vpack.c.bf16 %v1464_v43, %v1463_v30  ;;  %v1516_v40 = vmax.f32 %v1508_v23, 0.0  ;;  %v1517_v46 = vmax.f32 %v1509_v29, 0.0 }
 0x2a3   :  { %1803 = vst [vmem:[%s2762_s4 + $0x50] sm:$0xff] %v1823_v31  ;;  %v1827_v48 = vpack.c.bf16 %v1515_v32, %v1514_v47 }
 0x2a4   :  { %1804 = vst [vmem:[%s2762_s4 + $0x58] sm:$0xff] %v1824_v33  ;;  %v1828_v50 = vpack.c.bf16 %v1517_v46, %v1516_v40 }
 0x2a5   :  { %1811 = vst [vmem:[%s2762_s4 + $0x70] sm:$0xff] %v1827_v48 }
 0x2a6   :  { %1812 = vst [vmem:[%s2762_s4 + $0x78] sm:$0xff] %v1828_v50 }

// kernel: generator_forward.9
= control target key start
LH: loop header
LB: loop body
LE: loop exit
PB: predicated region body
PF: predicated region fallthrough
CT: control target
= control target key end

     0   :  { %s2491_s9 = smov 0   ;;  %s2493_s10 = smov 0   ;;  %s3041_s0 = inlined_call_operand.vmem [shape: bf16[4,3,64], index: 0, kind: input, shape index: {}]   ;;  %s3042_s1 = inlined_call_operand.vmem [shape: bf16[4,64,2048], index: 1, kind: input, shape index: {}]   ;;  %s3043_s2 = inlined_call_operand.vmem [shape: f32[4,3,2048], index: 2, kind: output, shape index: {}]  }
   0x1   :  { %s2495_s11 = smov 0  }
   0x2 LB: > { %s2090_s12 = sadd.s32 4294967295, %s2473_s11   ;;  %s2508_s13 = sadd.s32 1, %s2473_s11   ;;  %s2473_s11 = sphi %s2495_s11, %s3047_s11   ;;  %s2469_s10 = sphi %s2493_s10, %s3046_s10   ;;  %s2465_s9 = sphi %s2491_s9, %s3045_s9  }
   0x3   : > { %s37_s14 = ssub.s32 %s2473_s11, %s2508_s13  ;;  %s40_s15 = sadd.s32 1, %s2469_s10 }
   0x4   : > { %p38_p0 = scmp.eq.s32.totalorder %s37_s14, 0  ;;  %p47_p1 = scmp.ne.s32.totalorder %s2469_s10, %s2465_s9 }
   0x5   : > { %p48_p2 = scmp.eq.s32.totalorder %s2473_s11, 0  ;;  %p77_p3 = scmp.eq.s32.totalorder %s2090_s12, 1 }
   0x6   : > { %s2519_s16 = scalar_select %p38_p0, %s2469_s10, %s40_s15  }
   0x7   : > { %p49_p4 = por %p48_p2, %p47_p1  ;;  %p2521_p5 = por %p77_p3, %p47_p1 }
   0x8   : > { %p2093_p6 = scmp.ge.s32.totalorder %s2473_s11, 2 }
   0xa   : > { %102 = sbr.rel (%p2093_p6) target bundleno = 85 (0x55), region = 20 }
  0x11   : > { %105 = sbr.rel (!%p49_p4) target bundleno = 85 (0x55), region = 24  ;;  %s107_s18 = sand.u32 (%p49_p4), 1, %s2469_s10  }
  0x12   : > { %s2360_s19 = sshll.u32 (%p49_p4), %s2473_s11, 5  ;;  %s2094_s20 = sshll.u32 (%p49_p4), %s107_s18, 10 }
  0x13   : > { %s2531_s23 = scalar_lea.vmem (%p49_p4), %s3042_s1, %s2360_s19  ;;  %s2536_s24 = scalar_lea.vmem (%p49_p4), [#allocation2], %s2094_s20 }
  0x14   : > { %v125_v0 = vld [vmem:[%s2531_s23] sm:$0xff] (%p49_p4)  ;;  %v127_v1 = vld [vmem:[%s2531_s23 + $0x8] sm:$0xff] (%p49_p4)  ;;  %v129_v2 = vld [vmem:[%s2531_s23 + $0x10] sm:$0xff] (%p49_p4) }
  0x15   : > { %126 = vst [vmem:[%s2536_s24] sm:$0xff] (%p49_p4), %v125_v0  ;;  %128 = vst [vmem:[%s2536_s24 + $0x8] sm:$0xff] (%p49_p4), %v127_v1  ;;  %v131_v3 = vld [vmem:[%s2531_s23 + $0x18] sm:$0xff] (%p49_p4)  ;;  %v133_v4 = vld [vmem:[%s2531_s23 + $0x40] sm:$0xff] (%p49_p4) }
  0x16   : > { %130 = vst [vmem:[%s2536_s24 + $0x10] sm:$0xff] (%p49_p4), %v129_v2  ;;  %v135_v5 = vld [vmem:[%s2531_s23 + $0x48] sm:$0xff] (%p49_p4)  ;;  %132 = vst [vmem:[%s2536_s24 + $0x18] sm:$0xff] (%p49_p4), %v131_v3  ;;  %v137_v6 = vld [vmem:[%s2531_s23 + $0x50] sm:$0xff] (%p49_p4) }
  0x17   : > { %134 = vst [vmem:[%s2536_s24 + $0x20] sm:$0xff] (%p49_p4), %v133_v4  ;;  %136 = vst [vmem:[%s2536_s24 + $0x28] sm:$0xff] (%p49_p4), %v135_v5  ;;  %v139_v7 = vld [vmem:[%s2531_s23 + $0x58] sm:$0xff] (%p49_p4)  ;;  %v141_v8 = vld [vmem:[%s2531_s23 + $0x80] sm:$0xff] (%p49_p4) }
  0x18   : > { %138 = vst [vmem:[%s2536_s24 + $0x30] sm:$0xff] %v137_v6  ;;  %140 = vst [vmem:[%s2536_s24 + $0x38] sm:$0xff] %v139_v7  ;;  %v143_v9 = vld [vmem:[%s2531_s23 + $0x88] sm:$0xff]  ;;  %v145_v10 = vld [vmem:[%s2531_s23 + $0x90] sm:$0xff] }
  0x19   : > { %142 = vst [vmem:[%s2536_s24 + $0x40] sm:$0xff] %v141_v8  ;;  %v147_v11 = vld [vmem:[%s2531_s23 + $0x98] sm:$0xff]  ;;  %144 = vst [vmem:[%s2536_s24 + $0x48] sm:$0xff] %v143_v9  ;;  %v149_v12 = vld [vmem:[%s2531_s23 + $0xc0] sm:$0xff] }
  0x1a   : > { %146 = vst [vmem:[%s2536_s24 + $0x50] sm:$0xff] %v145_v10  ;;  %148 = vst [vmem:[%s2536_s24 + $0x58] sm:$0xff] %v147_v11  ;;  %v151_v13 = vld [vmem:[%s2531_s23 + $0xc8] sm:$0xff]  ;;  %v153_v14 = vld [vmem:[%s2531_s23 + $0xd0] sm:$0xff] }
  0x1b   : > { %150 = vst [vmem:[%s2536_s24 + $0x60] sm:$0xff] %v149_v12  ;;  %152 = vst [vmem:[%s2536_s24 + $0x68] sm:$0xff] %v151_v13  ;;  %v155_v15 = vld [vmem:[%s2531_s23 + $0xd8] sm:$0xff]  ;;  %v157_v16 = vld [vmem:[%s2531_s23 + $0x100] sm:$0xff] }
  0x1c   : > { %154 = vst [vmem:[%s2536_s24 + $0x70] sm:$0xff] %v153_v14  ;;  %v159_v17 = vld [vmem:[%s2531_s23 + $0x108] sm:$0xff]  ;;  %156 = vst [vmem:[%s2536_s24 + $0x78] sm:$0xff] %v155_v15  ;;  %v161_v18 = vld [vmem:[%s2531_s23 + $0x110] sm:$0xff] }
  0x1d   : > { %158 = vst [vmem:[%s2536_s24 + $0x80] sm:$0xff] %v157_v16  ;;  %160 = vst [vmem:[%s2536_s24 + $0x88] sm:$0xff] %v159_v17  ;;  %v163_v19 = vld [vmem:[%s2531_s23 + $0x118] sm:$0xff]  ;;  %v165_v20 = vld [vmem:[%s2531_s23 + $0x140] sm:$0xff] }
  0x1e   : > { %162 = vst [vmem:[%s2536_s24 + $0x90] sm:$0xff] %v161_v18  ;;  %164 = vst [vmem:[%s2536_s24 + $0x98] sm:$0xff] %v163_v19  ;;  %v167_v21 = vld [vmem:[%s2531_s23 + $0x148] sm:$0xff]  ;;  %v169_v22 = vld [vmem:[%s2531_s23 + $0x150] sm:$0xff] }
  0x1f   : > { %166 = vst [vmem:[%s2536_s24 + $0xa0] sm:$0xff] %v165_v20  ;;  %v171_v23 = vld [vmem:[%s2531_s23 + $0x158] sm:$0xff]  ;;  %168 = vst [vmem:[%s2536_s24 + $0xa8] sm:$0xff] %v167_v21  ;;  %v173_v24 = vld [vmem:[%s2531_s23 + $0x180] sm:$0xff] }
  0x20   : > { %170 = vst [vmem:[%s2536_s24 + $0xb0] sm:$0xff] %v169_v22  ;;  %172 = vst [vmem:[%s2536_s24 + $0xb8] sm:$0xff] %v171_v23  ;;  %v175_v25 = vld [vmem:[%s2531_s23 + $0x188] sm:$0xff]  ;;  %v177_v26 = vld [vmem:[%s2531_s23 + $0x190] sm:$0xff] }
  0x21   : > { %174 = vst [vmem:[%s2536_s24 + $0xc0] sm:$0xff] %v173_v24  ;;  %176 = vst [vmem:[%s2536_s24 + $0xc8] sm:$0xff] %v175_v25  ;;  %v179_v27 = vld [vmem:[%s2531_s23 + $0x198] sm:$0xff]  ;;  %v181_v28 = vld [vmem:[%s2531_s23 + $0x1c0] sm:$0xff] }
  0x22   : > { %178 = vst [vmem:[%s2536_s24 + $0xd0] sm:$0xff] %v177_v26  ;;  %v183_v29 = vld [vmem:[%s2531_s23 + $0x1c8] sm:$0xff]  ;;  %180 = vst [vmem:[%s2536_s24 + $0xd8] sm:$0xff] %v179_v27  ;;  %v185_v30 = vld [vmem:[%s2531_s23 + $0x1d0] sm:$0xff] }
  0x23   : > { %182 = vst [vmem:[%s2536_s24 + $0xe0] sm:$0xff] %v181_v28  ;;  %184 = vst [vmem:[%s2536_s24 + $0xe8] sm:$0xff] %v183_v29  ;;  %v187_v31 = vld [vmem:[%s2531_s23 + $0x1d8] sm:$0xff]  ;;  %v189_v32 = vld [vmem:[%s2531_s23 + $0x200] sm:$0xff] }
  0x24   : > { %186 = vst [vmem:[%s2536_s24 + $0xf0] sm:$0xff] %v185_v30  ;;  %188 = vst [vmem:[%s2536_s24 + $0xf8] sm:$0xff] %v187_v31  ;;  %v191_v33 = vld [vmem:[%s2531_s23 + $0x208] sm:$0xff]  ;;  %v193_v34 = vld [vmem:[%s2531_s23 + $0x210] sm:$0xff] }
  0x25   : > { %190 = vst [vmem:[%s2536_s24 + $0x100] sm:$0xff] %v189_v32  ;;  %v195_v35 = vld [vmem:[%s2531_s23 + $0x218] sm:$0xff]  ;;  %192 = vst [vmem:[%s2536_s24 + $0x108] sm:$0xff] %v191_v33  ;;  %v197_v36 = vld [vmem:[%s2531_s23 + $0x240] sm:$0xff] }
  0x26   : > { %194 = vst [vmem:[%s2536_s24 + $0x110] sm:$0xff] %v193_v34  ;;  %196 = vst [vmem:[%s2536_s24 + $0x118] sm:$0xff] %v195_v35  ;;  %v199_v37 = vld [vmem:[%s2531_s23 + $0x248] sm:$0xff]  ;;  %v201_v38 = vld [vmem:[%s2531_s23 + $0x250] sm:$0xff] }
  0x27   : > { %198 = vst [vmem:[%s2536_s24 + $0x120] sm:$0xff] %v197_v36  ;;  %200 = vst [vmem:[%s2536_s24 + $0x128] sm:$0xff] %v199_v37  ;;  %v203_v39 = vld [vmem:[%s2531_s23 + $0x258] sm:$0xff]  ;;  %v205_v40 = vld [vmem:[%s2531_s23 + $0x280] sm:$0xff] }
  0x28   : > { %202 = vst [vmem:[%s2536_s24 + $0x130] sm:$0xff] %v201_v38  ;;  %v207_v41 = vld [vmem:[%s2531_s23 + $0x288] sm:$0xff]  ;;  %204 = vst [vmem:[%s2536_s24 + $0x138] sm:$0xff] %v203_v39  ;;  %v209_v42 = vld [vmem:[%s2531_s23 + $0x290] sm:$0xff] }
  0x29   : > { %206 = vst [vmem:[%s2536_s24 + $0x140] sm:$0xff] %v205_v40  ;;  %208 = vst [vmem:[%s2536_s24 + $0x148] sm:$0xff] %v207_v41  ;;  %v211_v43 = vld [vmem:[%s2531_s23 + $0x298] sm:$0xff]  ;;  %v213_v44 = vld [vmem:[%s2531_s23 + $0x2c0] sm:$0xff] }
  0x2a   : > { %210 = vst [vmem:[%s2536_s24 + $0x150] sm:$0xff] %v209_v42  ;;  %212 = vst [vmem:[%s2536_s24 + $0x158] sm:$0xff] %v211_v43  ;;  %v215_v45 = vld [vmem:[%s2531_s23 + $0x2c8] sm:$0xff]  ;;  %v217_v46 = vld [vmem:[%s2531_s23 + $0x2d0] sm:$0xff] }
  0x2b   : > { %214 = vst [vmem:[%s2536_s24 + $0x160] sm:$0xff] %v213_v44  ;;  %v219_v47 = vld [vmem:[%s2531_s23 + $0x2d8] sm:$0xff]  ;;  %216 = vst [vmem:[%s2536_s24 + $0x168] sm:$0xff] %v215_v45  ;;  %v221_v48 = vld [vmem:[%s2531_s23 + $0x300] sm:$0xff] }
  0x2c   : > { %218 = vst [vmem:[%s2536_s24 + $0x170] sm:$0xff] %v217_v46  ;;  %220 = vst [vmem:[%s2536_s24 + $0x178] sm:$0xff] %v219_v47  ;;  %v223_v49 = vld [vmem:[%s2531_s23 + $0x308] sm:$0xff]  ;;  %v225_v50 = vld [vmem:[%s2531_s23 + $0x310] sm:$0xff] }
  0x2d   : > { %222 = vst [vmem:[%s2536_s24 + $0x180] sm:$0xff] %v221_v48  ;;  %224 = vst [vmem:[%s2536_s24 + $0x188] sm:$0xff] %v223_v49  ;;  %v227_v51 = vld [vmem:[%s2531_s23 + $0x318] sm:$0xff]  ;;  %v229_v52 = vld [vmem:[%s2531_s23 + $0x340] sm:$0xff] }
  0x2e   : > { %226 = vst [vmem:[%s2536_s24 + $0x190] sm:$0xff] %v225_v50  ;;  %v231_v53 = vld [vmem:[%s2531_s23 + $0x348] sm:$0xff]  ;;  %228 = vst [vmem:[%s2536_s24 + $0x198] sm:$0xff] %v227_v51  ;;  %v233_v54 = vld [vmem:[%s2531_s23 + $0x350] sm:$0xff] }
  0x2f   : > { %230 = vst [vmem:[%s2536_s24 + $0x1a0] sm:$0xff] %v229_v52  ;;  %232 = vst [vmem:[%s2536_s24 + $0x1a8] sm:$0xff] %v231_v53  ;;  %v235_v55 = vld [vmem:[%s2531_s23 + $0x358] sm:$0xff]  ;;  %v237_v56 = vld [vmem:[%s2531_s23 + $0x380] sm:$0xff] }
  0x30   : > { %234 = vst [vmem:[%s2536_s24 + $0x1b0] sm:$0xff] %v233_v54  ;;  %236 = vst [vmem:[%s2536_s24 + $0x1b8] sm:$0xff] %v235_v55  ;;  %v239_v57 = vld [vmem:[%s2531_s23 + $0x388] sm:$0xff]  ;;  %v241_v58 = vld [vmem:[%s2531_s23 + $0x390] sm:$0xff] }
  0x31   : > { %238 = vst [vmem:[%s2536_s24 + $0x1c0] sm:$0xff] %v237_v56  ;;  %v243_v59 = vld [vmem:[%s2531_s23 + $0x398] sm:$0xff]  ;;  %240 = vst [vmem:[%s2536_s24 + $0x1c8] sm:$0xff] %v239_v57  ;;  %v245_v60 = vld [vmem:[%s2531_s23 + $0x3c0] sm:$0xff] }
  0x32   : > { %242 = vst [vmem:[%s2536_s24 + $0x1d0] sm:$0xff] %v241_v58  ;;  %244 = vst [vmem:[%s2536_s24 + $0x1d8] sm:$0xff] %v243_v59  ;;  %v247_v61 = vld [vmem:[%s2531_s23 + $0x3c8] sm:$0xff]  ;;  %v249_v62 = vld [vmem:[%s2531_s23 + $0x3d0] sm:$0xff] }
  0x33   : > { %246 = vst [vmem:[%s2536_s24 + $0x1e0] sm:$0xff] %v245_v60  ;;  %248 = vst [vmem:[%s2536_s24 + $0x1e8] sm:$0xff] %v247_v61  ;;  %v251_v63 = vld [vmem:[%s2531_s23 + $0x3d8] sm:$0xff]  ;;  %v253_v0 = vld [vmem:[%s2531_s23 + $0x400] sm:$0xff] }
  0x34   : > { %250 = vst [vmem:[%s2536_s24 + $0x1f0] sm:$0xff] %v249_v62  ;;  %v255_v1 = vld [vmem:[%s2531_s23 + $0x408] sm:$0xff]  ;;  %252 = vst [vmem:[%s2536_s24 + $0x1f8] sm:$0xff] %v251_v63  ;;  %v257_v2 = vld [vmem:[%s2531_s23 + $0x410] sm:$0xff] }
  0x35   : > { %254 = vst [vmem:[%s2536_s24 + $0x200] sm:$0xff] %v253_v0  ;;  %256 = vst [vmem:[%s2536_s24 + $0x208] sm:$0xff] %v255_v1  ;;  %v259_v3 = vld [vmem:[%s2531_s23 + $0x418] sm:$0xff]  ;;  %v261_v4 = vld [vmem:[%s2531_s23 + $0x440] sm:$0xff] }
  0x36   : > { %258 = vst [vmem:[%s2536_s24 + $0x210] sm:$0xff] %v257_v2  ;;  %260 = vst [vmem:[%s2536_s24 + $0x218] sm:$0xff] %v259_v3  ;;  %v263_v5 = vld [vmem:[%s2531_s23 + $0x448] sm:$0xff]  ;;  %v265_v6 = vld [vmem:[%s2531_s23 + $0x450] sm:$0xff] }
  0x37   : > { %262 = vst [vmem:[%s2536_s24 + $0x220] sm:$0xff] %v261_v4  ;;  %v267_v7 = vld [vmem:[%s2531_s23 + $0x458] sm:$0xff]  ;;  %264 = vst [vmem:[%s2536_s24 + $0x228] sm:$0xff] %v263_v5  ;;  %v269_v8 = vld [vmem:[%s2531_s23 + $0x480] sm:$0xff] }
  0x38   : > { %266 = vst [vmem:[%s2536_s24 + $0x230] sm:$0xff] %v265_v6  ;;  %268 = vst [vmem:[%s2536_s24 + $0x238] sm:$0xff] %v267_v7  ;;  %v271_v9 = vld [vmem:[%s2531_s23 + $0x488] sm:$0xff]  ;;  %v273_v10 = vld [vmem:[%s2531_s23 + $0x490] sm:$0xff] }
  0x39   : > { %270 = vst [vmem:[%s2536_s24 + $0x240] sm:$0xff] %v269_v8  ;;  %272 = vst [vmem:[%s2536_s24 + $0x248] sm:$0xff] %v271_v9  ;;  %v275_v11 = vld [vmem:[%s2531_s23 + $0x498] sm:$0xff]  ;;  %v277_v12 = vld [vmem:[%s2531_s23 + $0x4c0] sm:$0xff] }
  0x3a   : > { %274 = vst [vmem:[%s2536_s24 + $0x250] sm:$0xff] %v273_v10  ;;  %v279_v13 = vld [vmem:[%s2531_s23 + $0x4c8] sm:$0xff]  ;;  %276 = vst [vmem:[%s2536_s24 + $0x258] sm:$0xff] %v275_v11  ;;  %v281_v14 = vld [vmem:[%s2531_s23 + $0x4d0] sm:$0xff] }
  0x3b   : > { %278 = vst [vmem:[%s2536_s24 + $0x260] sm:$0xff] %v277_v12  ;;  %280 = vst [vmem:[%s2536_s24 + $0x268] sm:$0xff] %v279_v13  ;;  %v283_v15 = vld [vmem:[%s2531_s23 + $0x4d8] sm:$0xff]  ;;  %v285_v16 = vld [vmem:[%s2531_s23 + $0x500] sm:$0xff] }
  0x3c   : > { %282 = vst [vmem:[%s2536_s24 + $0x270] sm:$0xff] %v281_v14  ;;  %284 = vst [vmem:[%s2536_s24 + $0x278] sm:$0xff] %v283_v15  ;;  %v287_v17 = vld [vmem:[%s2531_s23 + $0x508] sm:$0xff]  ;;  %v289_v18 = vld [vmem:[%s2531_s23 + $0x510] sm:$0xff] }
  0x3d   : > { %286 = vst [vmem:[%s2536_s24 + $0x280] sm:$0xff] %v285_v16  ;;  %v291_v19 = vld [vmem:[%s2531_s23 + $0x518] sm:$0xff]  ;;  %288 = vst [vmem:[%s2536_s24 + $0x288] sm:$0xff] %v287_v17  ;;  %v293_v20 = vld [vmem:[%s2531_s23 + $0x540] sm:$0xff] }
  0x3e   : > { %290 = vst [vmem:[%s2536_s24 + $0x290] sm:$0xff] %v289_v18  ;;  %292 = vst [vmem:[%s2536_s24 + $0x298] sm:$0xff] %v291_v19  ;;  %v295_v21 = vld [vmem:[%s2531_s23 + $0x548] sm:$0xff]  ;;  %v297_v22 = vld [vmem:[%s2531_s23 + $0x550] sm:$0xff] }
  0x3f   : > { %294 = vst [vmem:[%s2536_s24 + $0x2a0] sm:$0xff] %v293_v20  ;;  %296 = vst [vmem:[%s2536_s24 + $0x2a8] sm:$0xff] %v295_v21  ;;  %v299_v23 = vld [vmem:[%s2531_s23 + $0x558] sm:$0xff]  ;;  %v301_v24 = vld [vmem:[%s2531_s23 + $0x580] sm:$0xff] }
  0x40   : > { %298 = vst [vmem:[%s2536_s24 + $0x2b0] sm:$0xff] %v297_v22  ;;  %v303_v25 = vld [vmem:[%s2531_s23 + $0x588] sm:$0xff]  ;;  %300 = vst [vmem:[%s2536_s24 + $0x2b8] sm:$0xff] %v299_v23  ;;  %v305_v26 = vld [vmem:[%s2531_s23 + $0x590] sm:$0xff] }
  0x41   : > { %302 = vst [vmem:[%s2536_s24 + $0x2c0] sm:$0xff] %v301_v24  ;;  %304 = vst [vmem:[%s2536_s24 + $0x2c8] sm:$0xff] %v303_v25  ;;  %v307_v27 = vld [vmem:[%s2531_s23 + $0x598] sm:$0xff]  ;;  %v309_v28 = vld [vmem:[%s2531_s23 + $0x5c0] sm:$0xff] }
  0x42   : > { %306 = vst [vmem:[%s2536_s24 + $0x2d0] sm:$0xff] %v305_v26  ;;  %308 = vst [vmem:[%s2536_s24 + $0x2d8] sm:$0xff] %v307_v27  ;;  %v311_v29 = vld [vmem:[%s2531_s23 + $0x5c8] sm:$0xff]  ;;  %v313_v30 = vld [vmem:[%s2531_s23 + $0x5d0] sm:$0xff] }
  0x43   : > { %310 = vst [vmem:[%s2536_s24 + $0x2e0] sm:$0xff] %v309_v28  ;;  %v315_v31 = vld [vmem:[%s2531_s23 + $0x5d8] sm:$0xff]  ;;  %312 = vst [vmem:[%s2536_s24 + $0x2e8] sm:$0xff] %v311_v29  ;;  %v317_v32 = vld [vmem:[%s2531_s23 + $0x600] sm:$0xff] }
  0x44   : > { %314 = vst [vmem:[%s2536_s24 + $0x2f0] sm:$0xff] %v313_v30  ;;  %316 = vst [vmem:[%s2536_s24 + $0x2f8] sm:$0xff] %v315_v31  ;;  %v319_v33 = vld [vmem:[%s2531_s23 + $0x608] sm:$0xff]  ;;  %v321_v34 = vld [vmem:[%s2531_s23 + $0x610] sm:$0xff] }
  0x45   : > { %318 = vst [vmem:[%s2536_s24 + $0x300] sm:$0xff] %v317_v32  ;;  %320 = vst [vmem:[%s2536_s24 + $0x308] sm:$0xff] %v319_v33  ;;  %v323_v35 = vld [vmem:[%s2531_s23 + $0x618] sm:$0xff]  ;;  %v325_v36 = vld [vmem:[%s2531_s23 + $0x640] sm:$0xff] }
  0x46   : > { %322 = vst [vmem:[%s2536_s24 + $0x310] sm:$0xff] %v321_v34  ;;  %v327_v37 = vld [vmem:[%s2531_s23 + $0x648] sm:$0xff]  ;;  %324 = vst [vmem:[%s2536_s24 + $0x318] sm:$0xff] %v323_v35  ;;  %v329_v38 = vld [vmem:[%s2531_s23 + $0x650] sm:$0xff] }
  0x47   : > { %326 = vst [vmem:[%s2536_s24 + $0x320] sm:$0xff] %v325_v36  ;;  %328 = vst [vmem:[%s2536_s24 + $0x328] sm:$0xff] %v327_v37  ;;  %v331_v39 = vld [vmem:[%s2531_s23 + $0x658] sm:$0xff]  ;;  %v333_v40 = vld [vmem:[%s2531_s23 + $0x680] sm:$0xff] }
  0x48   : > { %330 = vst [vmem:[%s2536_s24 + $0x330] sm:$0xff] %v329_v38  ;;  %332 = vst [vmem:[%s2536_s24 + $0x338] sm:$0xff] %v331_v39  ;;  %v335_v41 = vld [vmem:[%s2531_s23 + $0x688] sm:$0xff]  ;;  %v337_v42 = vld [vmem:[%s2531_s23 + $0x690] sm:$0xff] }
  0x49   : > { %334 = vst [vmem:[%s2536_s24 + $0x340] sm:$0xff] %v333_v40  ;;  %v339_v43 = vld [vmem:[%s2531_s23 + $0x698] sm:$0xff]  ;;  %336 = vst [vmem:[%s2536_s24 + $0x348] sm:$0xff] %v335_v41  ;;  %v341_v44 = vld [vmem:[%s2531_s23 + $0x6c0] sm:$0xff] }
  0x4a   : > { %338 = vst [vmem:[%s2536_s24 + $0x350] sm:$0xff] %v337_v42  ;;  %340 = vst [vmem:[%s2536_s24 + $0x358] sm:$0xff] %v339_v43  ;;  %v343_v45 = vld [vmem:[%s2531_s23 + $0x6c8] sm:$0xff]  ;;  %v345_v46 = vld [vmem:[%s2531_s23 + $0x6d0] sm:$0xff] }
  0x4b   : > { %342 = vst [vmem:[%s2536_s24 + $0x360] sm:$0xff] %v341_v44  ;;  %344 = vst [vmem:[%s2536_s24 + $0x368] sm:$0xff] %v343_v45  ;;  %v347_v47 = vld [vmem:[%s2531_s23 + $0x6d8] sm:$0xff]  ;;  %v349_v48 = vld [vmem:[%s2531_s23 + $0x700] sm:$0xff] }
  0x4c   : > { %346 = vst [vmem:[%s2536_s24 + $0x370] sm:$0xff] %v345_v46  ;;  %v351_v49 = vld [vmem:[%s2531_s23 + $0x708] sm:$0xff]  ;;  %348 = vst [vmem:[%s2536_s24 + $0x378] sm:$0xff] %v347_v47  ;;  %v353_v50 = vld [vmem:[%s2531_s23 + $0x710] sm:$0xff] }
  0x4d   : > { %350 = vst [vmem:[%s2536_s24 + $0x380] sm:$0xff] %v349_v48  ;;  %352 = vst [vmem:[%s2536_s24 + $0x388] sm:$0xff] %v351_v49  ;;  %v355_v51 = vld [vmem:[%s2531_s23 + $0x718] sm:$0xff]  ;;  %v357_v52 = vld [vmem:[%s2531_s23 + $0x740] sm:$0xff] }
  0x4e   : > { %354 = vst [vmem:[%s2536_s24 + $0x390] sm:$0xff] %v353_v50  ;;  %356 = vst [vmem:[%s2536_s24 + $0x398] sm:$0xff] %v355_v51  ;;  %v359_v53 = vld [vmem:[%s2531_s23 + $0x748] sm:$0xff]  ;;  %v361_v54 = vld [vmem:[%s2531_s23 + $0x750] sm:$0xff] }
  0x4f   : > { %358 = vst [vmem:[%s2536_s24 + $0x3a0] sm:$0xff] %v357_v52  ;;  %v363_v55 = vld [vmem:[%s2531_s23 + $0x758] sm:$0xff]  ;;  %360 = vst [vmem:[%s2536_s24 + $0x3a8] sm:$0xff] %v359_v53  ;;  %v365_v56 = vld [vmem:[%s2531_s23 + $0x780] sm:$0xff] }
  0x50   : > { %362 = vst [vmem:[%s2536_s24 + $0x3b0] sm:$0xff] %v361_v54  ;;  %364 = vst [vmem:[%s2536_s24 + $0x3b8] sm:$0xff] %v363_v55  ;;  %v367_v57 = vld [vmem:[%s2531_s23 + $0x788] sm:$0xff]  ;;  %v369_v58 = vld [vmem:[%s2531_s23 + $0x790] sm:$0xff] }
  0x51   : > { %366 = vst [vmem:[%s2536_s24 + $0x3c0] sm:$0xff] %v365_v56  ;;  %368 = vst [vmem:[%s2536_s24 + $0x3c8] sm:$0xff] %v367_v57  ;;  %v371_v59 = vld [vmem:[%s2531_s23 + $0x798] sm:$0xff]  ;;  %v373_v60 = vld [vmem:[%s2531_s23 + $0x7c0] sm:$0xff] }
  0x52   : > { %370 = vst [vmem:[%s2536_s24 + $0x3d0] sm:$0xff] %v369_v58  ;;  %v375_v61 = vld [vmem:[%s2531_s23 + $0x7c8] sm:$0xff]  ;;  %372 = vst [vmem:[%s2536_s24 + $0x3d8] sm:$0xff] %v371_v59  ;;  %v377_v62 = vld [vmem:[%s2531_s23 + $0x7d0] sm:$0xff] }
  0x53   : > { %374 = vst [vmem:[%s2536_s24 + $0x3e0] sm:$0xff] %v373_v60  ;;  %376 = vst [vmem:[%s2536_s24 + $0x3e8] sm:$0xff] %v375_v61  ;;  %v379_v63 = vld [vmem:[%s2531_s23 + $0x7d8] sm:$0xff] }
  0x54   : > { %378 = vst [vmem:[%s2536_s24 + $0x3f0] sm:$0xff] %v377_v62  ;;  %380 = vst [vmem:[%s2536_s24 + $0x3f8] sm:$0xff] %v379_v63 }
  0x55 PF: > { %p2097_p7 = scmp.ge.s32.totalorder %s2473_s11, 1  ;;  %p385_p8 = scmp.lt.s32.totalorder %s2473_s11, 3 }
  0x57   : > { %p386_p9 = pnand %p2097_p7, %p385_p8 }
  0x58   : > { %s392_s25 = sand.u32 (!%p386_p9), 1, %s2465_s9   ;;  %v2475_v0 = vmov (!%p386_p9), 0   ;;  %v2827_v43 = vld [vmem:[%s3041_s0] sm:$0x3] (!%p386_p9)  ;;  %vm608_vm0 = vcmask (!%p386_p9), 523264  }
  0x59   : > { %389 = sbr.rel (%p386_p9) target bundleno = 460 (0x1cc), region = 47  ;;  %s2098_s26 = sshll.u32 (!%p386_p9), %s392_s25, 10  ;;  %644 = vmatprep.mubr.bf16.mxu0 (!%p386_p9), %v2475_v0  ;;  %685 = vmatprep.mubr.bf16.mxu1 (!%p386_p9), %v2475_v0 }
  0x5a   : > { %s2798_s27 = scalar_lea.vmem (!%p386_p9), [#allocation2], %s2098_s26  ;;  %s2099_s8 = sshll.u32 (!%p386_p9), %s392_s25, 7 }
  0x5b   : > { %v416_v1 = vld [vmem:[%s2798_s27] sm:$0xff] (!%p386_p9)  ;;  %v417_v3 = vld [vmem:[%s2798_s27 + $0x8] sm:$0xff] (!%p386_p9)  ;;  %v418_v31 = vld [vmem:[%s2798_s27 + $0x10] sm:$0xff] (!%p386_p9)  ;;  %s2990_s14 = scalar_lea.vmem (!%p386_p9), [#allocation3], %s2099_s8 }
  0x5c   : > { %v420_v2 = vld [vmem:[%s2798_s27 + $0x20] sm:$0xff] (!%p386_p9)  ;;  %v421_v5 = vld [vmem:[%s2798_s27 + $0x28] sm:$0xff] (!%p386_p9)  ;;  %v422_v32 = vld [vmem:[%s2798_s27 + $0x30] sm:$0xff] (!%p386_p9) }
  0x5d   : > { %v2101_v4 = vcombine.high (!%p386_p9), %v416_v1, %v420_v2  ;;  %v2100_v6 = vcombine.low (!%p386_p9), %v416_v1, %v420_v2  ;;  %v424_v7 = vld [vmem:[%s2798_s27 + $0x40] sm:$0xff] (!%p386_p9)  ;;  %v2103_v9 = vcombine.high (!%p386_p9), %v417_v3, %v421_v5  ;;  %v2102_v10 = vcombine.low (!%p386_p9), %v417_v3, %v421_v5  ;;  %v425_v12 = vld [vmem:[%s2798_s27 + $0x48] sm:$0xff] (!%p386_p9)  ;;  %v419_v33 = vld [vmem:[%s2798_s27 + $0x18] sm:$0xff] (!%p386_p9) }
  0x5e   : > { %v428_v8 = vld [vmem:[%s2798_s27 + $0x60] sm:$0xff] (!%p386_p9)  ;;  %v429_v13 = vld [vmem:[%s2798_s27 + $0x68] sm:$0xff] (!%p386_p9)  ;;  %v423_v34 = vld [vmem:[%s2798_s27 + $0x38] sm:$0xff] (!%p386_p9)  ;;  %v2105_v37 = vcombine.high (!%p386_p9), %v418_v31, %v422_v32  ;;  %v2104_v44 = vcombine.low (!%p386_p9), %v418_v31, %v422_v32 }
  0x5f   : > { %v2109_v11 = vcombine.high (!%p386_p9), %v424_v7, %v428_v8  ;;  %v432_v14 = vld [vmem:[%s2798_s27 + $0x80] sm:$0xff] (!%p386_p9)  ;;  %612 = vmatprep.subr.bf16.mxu0 (!%p386_p9), %v2101_v4  ;;  %v2111_v15 = vcombine.high (!%p386_p9), %v425_v12, %v429_v13  ;;  %v433_v17 = vld [vmem:[%s2798_s27 + $0x88] sm:$0xff] (!%p386_p9)  ;;  %653 = vmatprep.subr.bf16.mxu1 (!%p386_p9), %v2103_v9  ;;  %v2108_v19 = vcombine.low (!%p386_p9), %v424_v7, %v428_v8  ;;  %v426_v39 = vld [vmem:[%s2798_s27 + $0x50] sm:$0xff] (!%p386_p9) }
  0x60   : > { %v436_v16 = vld [vmem:[%s2798_s27 + $0xa0] sm:$0xff]  ;;  %v437_v18 = vld [vmem:[%s2798_s27 + $0xa8] sm:$0xff]  ;;  %613 = vmatpush1.bf16.msra.mxu0 %v2100_v6  ;;  %654 = vmatpush1.bf16.msra.mxu1 %v2102_v10  ;;  %v2110_v20 = vcombine.low %v425_v12, %v429_v13  ;;  %v2107_v38 = vcombine.high %v419_v33, %v423_v34  ;;  %v430_v40 = vld [vmem:[%s2798_s27 + $0x70] sm:$0xff]  ;;  %v2106_v45 = vcombine.low %v419_v33, %v423_v34  ;;  %s2361_s9 = sshll.u32 (%p2521_p5), %s2090_s12, 5 }
  0x61   : > { %614 = vmatprep.subr.bf16.mxu0 %v2109_v11  ;;  %v2117_v21 = vcombine.high %v432_v14, %v436_v16  ;;  %655 = vmatprep.subr.bf16.mxu1 %v2111_v15  ;;  %v2119_v22 = vcombine.high %v433_v17, %v437_v18  ;;  %v440_v23 = vld [vmem:[%s2798_s27 + $0xc0] sm:$0xff]  ;;  %v441_v25 = vld [vmem:[%s2798_s27 + $0xc8] sm:$0xff]  ;;  %v2116_v27 = vcombine.low %v432_v14, %v436_v16  ;;  %v427_v41 = vld [vmem:[%s2798_s27 + $0x58] sm:$0xff]  ;;  %s1986_s17 = scalar_lea.vmem (%p2521_p5), %s3043_s2, %s2361_s9 }
  0x62   : > { %v444_v24 = vld [vmem:[%s2798_s27 + $0xe0] sm:$0xff]  ;;  %v445_v26 = vld [vmem:[%s2798_s27 + $0xe8] sm:$0xff]  ;;  %v2118_v28 = vcombine.low %v433_v17, %v437_v18  ;;  %v431_v42 = vld [vmem:[%s2798_s27 + $0x78] sm:$0xff]  ;;  %v2113_v46 = vcombine.high %v426_v39, %v430_v40  ;;  %v2112_v52 = vcombine.low %v426_v39, %v430_v40 }
  0x63   : > { %v2125_v29 = vcombine.high %v440_v23, %v444_v24  ;;  %v2127_v30 = vcombine.high %v441_v25, %v445_v26  ;;  %v2124_v35 = vcombine.low %v440_v23, %v444_v24  ;;  %v2126_v36 = vcombine.low %v441_v25, %v445_v26  ;;  %v434_v48 = vld [vmem:[%s2798_s27 + $0x90] sm:$0xff]  ;;  %v435_v50 = vld [vmem:[%s2798_s27 + $0x98] sm:$0xff]  ;;  %v2137_v1 = vld [vmem:[%s2798_s27 + $0x100] sm:$0xff] }
  0x64   : > { %615 = vmatpush1.bf16.msra.mxu0 %v2108_v19  ;;  %656 = vmatpush1.bf16.msra.mxu1 %v2110_v20  ;;  %v2115_v47 = vcombine.high %v427_v41, %v431_v42  ;;  %v438_v49 = vld [vmem:[%s2798_s27 + $0xb0] sm:$0xff]  ;;  %v439_v51 = vld [vmem:[%s2798_s27 + $0xb8] sm:$0xff]  ;;  %v2114_v53 = vcombine.low %v427_v41, %v431_v42  ;;  %v2141_v2 = vld [vmem:[%s2798_s27 + $0x120] sm:$0xff] }
  0x65   : > { %616 = vmatprep.subr.bf16.mxu0 %v2117_v21  ;;  %657 = vmatprep.subr.bf16.mxu1 %v2119_v22  ;;  %v2121_v54 = vcombine.high %v434_v48, %v438_v49  ;;  %v2123_v55 = vcombine.high %v435_v50, %v439_v51  ;;  %v442_v56 = vld [vmem:[%s2798_s27 + $0xd0] sm:$0xff]  ;;  %v443_v58 = vld [vmem:[%s2798_s27 + $0xd8] sm:$0xff]  ;;  %v2120_v60 = vcombine.low %v434_v48, %v438_v49  ;;  %v2138_v3 = vld [vmem:[%s2798_s27 + $0x108] sm:$0xff] }
  0x66   : > { %v446_v57 = vld [vmem:[%s2798_s27 + $0xf0] sm:$0xff]  ;;  %v447_v59 = vld [vmem:[%s2798_s27 + $0xf8] sm:$0xff]  ;;  %v2122_v61 = vcombine.low %v435_v50, %v439_v51  ;;  %v2142_v4 = vld [vmem:[%s2798_s27 + $0x128] sm:$0xff]  ;;  %v2170_v7 = vcombine.high %v2137_v1, %v2141_v2  ;;  %v2169_v13 = vcombine.low %v2137_v1, %v2141_v2 }
  0x67   : > { %v2129_v62 = vcombine.high %v442_v56, %v446_v57  ;;  %v2131_v63 = vcombine.high %v443_v58, %v447_v59  ;;  %v2128_v5 = vcombine.low %v442_v56, %v446_v57  ;;  %v2130_v6 = vcombine.low %v443_v58, %v447_v59  ;;  %v2145_v9 = vld [vmem:[%s2798_s27 + $0x140] sm:$0xff]  ;;  %v2146_v11 = vld [vmem:[%s2798_s27 + $0x148] sm:$0xff]  ;;  %v2139_v33 = vld [vmem:[%s2798_s27 + $0x110] sm:$0xff] }
  0x68   : > { %617 = vmatpush1.bf16.msra.mxu0 %v2116_v27  ;;  %658 = vmatpush1.bf16.msra.mxu1 %v2118_v28  ;;  %v2172_v8 = vcombine.high %v2138_v3, %v2142_v4  ;;  %v2149_v10 = vld [vmem:[%s2798_s27 + $0x160] sm:$0xff]  ;;  %v2150_v12 = vld [vmem:[%s2798_s27 + $0x168] sm:$0xff]  ;;  %v2171_v14 = vcombine.low %v2138_v3, %v2142_v4  ;;  %v2143_v34 = vld [vmem:[%s2798_s27 + $0x130] sm:$0xff] }
  0x69   : > { %618 = vmatprep.subr.bf16.mxu0 %v2125_v29  ;;  %659 = vmatprep.subr.bf16.mxu1 %v2127_v30  ;;  %v2178_v15 = vcombine.high %v2145_v9, %v2149_v10  ;;  %v2180_v16 = vcombine.high %v2146_v11, %v2150_v12  ;;  %v2153_v17 = vld [vmem:[%s2798_s27 + $0x180] sm:$0xff]  ;;  %v2154_v19 = vld [vmem:[%s2798_s27 + $0x188] sm:$0xff]  ;;  %v2177_v21 = vcombine.low %v2145_v9, %v2149_v10  ;;  %v2147_v41 = vld [vmem:[%s2798_s27 + $0x150] sm:$0xff] }
  0x6a   : > { %v2157_v18 = vld [vmem:[%s2798_s27 + $0x1a0] sm:$0xff]  ;;  %v2158_v20 = vld [vmem:[%s2798_s27 + $0x1a8] sm:$0xff]  ;;  %v2179_v22 = vcombine.low %v2146_v11, %v2150_v12  ;;  %v2174_v39 = vcombine.high %v2139_v33, %v2143_v34  ;;  %v2151_v42 = vld [vmem:[%s2798_s27 + $0x170] sm:$0xff] }
  0x6b   : > { %v2186_v23 = vcombine.high %v2153_v17, %v2157_v18  ;;  %v2188_v24 = vcombine.high %v2154_v19, %v2158_v20  ;;  %v2161_v25 = vld [vmem:[%s2798_s27 + $0x1c0] sm:$0xff]  ;;  %v2162_v27 = vld [vmem:[%s2798_s27 + $0x1c8] sm:$0xff]  ;;  %v2185_v29 = vcombine.low %v2153_v17, %v2157_v18  ;;  %v2187_v30 = vcombine.low %v2154_v19, %v2158_v20  ;;  %v2155_v50 = vld [vmem:[%s2798_s27 + $0x190] sm:$0xff] }
  0x6c   : > { %619 = vmatpush1.bf16.msra.mxu0 %v2124_v35  ;;  %660 = vmatpush1.bf16.msra.mxu1 %v2126_v36  ;;  %v2165_v26 = vld [vmem:[%s2798_s27 + $0x1e0] sm:$0xff]  ;;  %v2166_v28 = vld [vmem:[%s2798_s27 + $0x1e8] sm:$0xff]  ;;  %v2140_v35 = vld [vmem:[%s2798_s27 + $0x118] sm:$0xff]  ;;  %v2182_v48 = vcombine.high %v2147_v41, %v2151_v42 }
  0x6d   : > { %694 = vmatprep.subr.bf16.mxu0 %v2105_v37  ;;  %735 = vmatprep.subr.bf16.mxu1 %v2107_v38  ;;  %v2194_v31 = vcombine.high %v2161_v25, %v2165_v26  ;;  %v2196_v32 = vcombine.high %v2162_v27, %v2166_v28  ;;  %v2144_v36 = vld [vmem:[%s2798_s27 + $0x138] sm:$0xff]  ;;  %v2193_v37 = vcombine.low %v2161_v25, %v2165_v26  ;;  %v2159_v51 = vld [vmem:[%s2798_s27 + $0x1b0] sm:$0xff]  ;;  %v2210_v3 = vld [vmem:[%s2798_s27 + $0x200] sm:$0xff] }
  0x6e   : > { %v2195_v38 = vcombine.low %v2162_v27, %v2166_v28  ;;  %v2176_v40 = vcombine.high %v2140_v35, %v2144_v36  ;;  %v2190_v56 = vcombine.high %v2155_v50, %v2159_v51  ;;  %v2163_v58 = vld [vmem:[%s2798_s27 + $0x1d0] sm:$0xff]  ;;  %v2214_v4 = vld [vmem:[%s2798_s27 + $0x220] sm:$0xff] }
  0x6f   : > { %2132 = vmatmul.mubr.msk.bf16.vlgmr.msra.gmra.mrb[0].mxu0 %vm608_vm0, %v2827_v43  ;;  %2133 = vmatmul.mubr.msk.bf16.vlgmr.msra.gmra.mrb[0].mxu1 %vm608_vm0, %v2827_v43  ;;  %v2167_v59 = vld [vmem:[%s2798_s27 + $0x1f0] sm:$0xff]  ;;  %v2243_v9 = vcombine.high %v2210_v3, %v2214_v4  ;;  %v2218_v11 = vld [vmem:[%s2798_s27 + $0x240] sm:$0xff] }
  0x70   : > { %695 = vmatpush1.bf16.msra.mxu0 %v2104_v44  ;;  %736 = vmatpush1.bf16.msra.mxu1 %v2106_v45  ;;  %v2152_v44 = vld [vmem:[%s2798_s27 + $0x178] sm:$0xff]  ;;  %v2876_v45 = vld [vmem:[%s3041_s0 + $0x2] sm:$0x3]  ;;  %v2198_v1 = vcombine.high %v2163_v58, %v2167_v59 }
  0x71   : > { %696 = vmatprep.subr.bf16.mxu0 %v2113_v46  ;;  %737 = vmatprep.subr.bf16.mxu1 %v2115_v47  ;;  %v2173_v46 = vcombine.low %v2139_v33, %v2143_v34  ;;  %v2175_v47 = vcombine.low %v2140_v35, %v2144_v36  ;;  %v2222_v12 = vld [vmem:[%s2798_s27 + $0x260] sm:$0xff]  ;;  %v2212_v35 = vld [vmem:[%s2798_s27 + $0x210] sm:$0xff] }
  0x72   : > { %726 = vmatprep.mubr.bf16.mxu0 %v2475_v0  ;;  %767 = vmatprep.mubr.bf16.mxu1 %v2475_v0  ;;  %v2251_v17 = vcombine.high %v2218_v11, %v2222_v12  ;;  %v2226_v19 = vld [vmem:[%s2798_s27 + $0x280] sm:$0xff]  ;;  %v2216_v36 = vld [vmem:[%s2798_s27 + $0x230] sm:$0xff] }
  0x73   : > { %v2230_v20 = vld [vmem:[%s2798_s27 + $0x2a0] sm:$0xff] }
  0x74   : > { %697 = vmatpush1.bf16.msra.mxu0 %v2112_v52  ;;  %738 = vmatpush1.bf16.msra.mxu1 %v2114_v53  ;;  %v2156_v52 = vld [vmem:[%s2798_s27 + $0x198] sm:$0xff]  ;;  %v2259_v25 = vcombine.high %v2226_v19, %v2230_v20  ;;  %v2234_v27 = vld [vmem:[%s2798_s27 + $0x2c0] sm:$0xff] }
  0x75   : > { %698 = vmatprep.subr.bf16.mxu0 %v2121_v54  ;;  %739 = vmatprep.subr.bf16.mxu1 %v2123_v55  ;;  %v2160_v53 = vld [vmem:[%s2798_s27 + $0x1b8] sm:$0xff]  ;;  %v2181_v54 = vcombine.low %v2147_v41, %v2151_v42  ;;  %v2238_v28 = vld [vmem:[%s2798_s27 + $0x2e0] sm:$0xff]  ;;  %v2247_v41 = vcombine.high %v2212_v35, %v2216_v36 }
  0x76   : > { %v2192_v57 = vcombine.high %v2156_v52, %v2160_v53  ;;  %v2267_v33 = vcombine.high %v2234_v27, %v2238_v28 }
  0x78   : > { %699 = vmatpush1.bf16.msra.mxu0 %v2120_v60  ;;  %740 = vmatpush1.bf16.msra.mxu1 %v2122_v61  ;;  %v2164_v60 = vld [vmem:[%s2798_s27 + $0x1d8] sm:$0xff] }
  0x79   : > { %700 = vmatprep.subr.bf16.mxu0 %v2129_v62  ;;  %741 = vmatprep.subr.bf16.mxu1 %v2131_v63  ;;  %v2168_v61 = vld [vmem:[%s2798_s27 + $0x1f8] sm:$0xff]  ;;  %v2189_v62 = vcombine.low %v2155_v50, %v2159_v51  ;;  %v2191_v63 = vcombine.low %v2156_v52, %v2160_v53  ;;  %v2228_v52 = vld [vmem:[%s2798_s27 + $0x290] sm:$0xff] }
  0x7a   : > { %v2200_v2 = vcombine.high %v2164_v60, %v2168_v61  ;;  %v2232_v53 = vld [vmem:[%s2798_s27 + $0x2b0] sm:$0xff] }
  0x7c   : > { %701 = vmatpush1.bf16.msra.mxu0 %v2128_v5  ;;  %742 = vmatpush1.bf16.msra.mxu1 %v2130_v6  ;;  %v2211_v5 = vld [vmem:[%s2798_s27 + $0x208] sm:$0xff] }
  0x7d   : > { %1002 = vmatprep.subr.bf16.mxu0 %v2170_v7  ;;  %1043 = vmatprep.subr.bf16.mxu1 %v2172_v8  ;;  %v2215_v6 = vld [vmem:[%s2798_s27 + $0x228] sm:$0xff]  ;;  %v2197_v7 = vcombine.low %v2163_v58, %v2167_v59  ;;  %v2199_v8 = vcombine.low %v2164_v60, %v2168_v61  ;;  %v2263_v58 = vcombine.high %v2228_v52, %v2232_v53  ;;  %v2236_v60 = vld [vmem:[%s2798_s27 + $0x2d0] sm:$0xff] }
  0x7e   : > { %v2245_v10 = vcombine.high %v2211_v5, %v2215_v6  ;;  %v2240_v61 = vld [vmem:[%s2798_s27 + $0x2f0] sm:$0xff] }
  0x7f   : > { %2134 = vmatmul.mubr.msk.bf16.vlgmr.msra.gmra.mrb[4].mxu0 %vm608_vm0, %v2827_v43  ;;  %2135 = vmatmul.mubr.msk.bf16.vlgmr.msra.gmra.mrb[4].mxu1 %vm608_vm0, %v2827_v43  ;;  %v2148_v43 = vld [vmem:[%s2798_s27 + $0x158] sm:$0xff] }
  0x80   : > { %1003 = vmatpush1.bf16.msra.mxu0 %v2169_v13  ;;  %1044 = vmatpush1.bf16.msra.mxu1 %v2171_v14  ;;  %v2184_v49 = vcombine.high %v2148_v43, %v2152_v44  ;;  %v2183_v55 = vcombine.low %v2148_v43, %v2152_v44  ;;  %v2219_v13 = vld [vmem:[%s2798_s27 + $0x248] sm:$0xff]  ;;  %v2220_v43 = vld [vmem:[%s2798_s27 + $0x250] sm:$0xff] }
  0x81   : > { %1004 = vmatprep.subr.bf16.mxu0 %v2178_v15  ;;  %1045 = vmatprep.subr.bf16.mxu1 %v2180_v16  ;;  %v2223_v14 = vld [vmem:[%s2798_s27 + $0x268] sm:$0xff]  ;;  %v2242_v15 = vcombine.low %v2210_v3, %v2214_v4  ;;  %v2244_v16 = vcombine.low %v2211_v5, %v2215_v6  ;;  %v2224_v44 = vld [vmem:[%s2798_s27 + $0x270] sm:$0xff]  ;;  %v2271_v3 = vcombine.high %v2236_v60, %v2240_v61  ;;  %v2283_v5 = vld [vmem:[%s2798_s27 + $0x300] sm:$0xff] }
  0x82   : > { %1034 = vmatprep.mubr.bf16.mxu0 %v2475_v0  ;;  %1075 = vmatprep.mubr.bf16.mxu1 %v2475_v0  ;;  %v2253_v18 = vcombine.high %v2219_v13, %v2223_v14  ;;  %v2255_v50 = vcombine.high %v2220_v43, %v2224_v44  ;;  %v2287_v6 = vld [vmem:[%s2798_s27 + $0x320] sm:$0xff] }
  0x84   : > { %1005 = vmatpush1.bf16.msra.mxu0 %v2177_v21  ;;  %1046 = vmatpush1.bf16.msra.mxu1 %v2179_v22  ;;  %v2227_v21 = vld [vmem:[%s2798_s27 + $0x288] sm:$0xff] }
  0x85   : > { %1006 = vmatprep.subr.bf16.mxu0 %v2186_v23  ;;  %1047 = vmatprep.subr.bf16.mxu1 %v2188_v24  ;;  %v2231_v22 = vld [vmem:[%s2798_s27 + $0x2a8] sm:$0xff]  ;;  %v2250_v23 = vcombine.low %v2218_v11, %v2222_v12  ;;  %v2252_v24 = vcombine.low %v2219_v13, %v2223_v14  ;;  %v2316_v11 = vcombine.high %v2283_v5, %v2287_v6  ;;  %v2291_v13 = vld [vmem:[%s2798_s27 + $0x340] sm:$0xff] }
  0x86   : > { %v2261_v26 = vcombine.high %v2227_v21, %v2231_v22  ;;  %v2295_v14 = vld [vmem:[%s2798_s27 + $0x360] sm:$0xff] }
  0x88   : > { %1007 = vmatpush1.bf16.msra.mxu0 %v2185_v29  ;;  %1048 = vmatpush1.bf16.msra.mxu1 %v2187_v30  ;;  %v2235_v29 = vld [vmem:[%s2798_s27 + $0x2c8] sm:$0xff] }
  0x89   : > { %1008 = vmatprep.subr.bf16.mxu0 %v2194_v31  ;;  %1049 = vmatprep.subr.bf16.mxu1 %v2196_v32  ;;  %v2239_v30 = vld [vmem:[%s2798_s27 + $0x2e8] sm:$0xff]  ;;  %v2258_v31 = vcombine.low %v2226_v19, %v2230_v20  ;;  %v2260_v32 = vcombine.low %v2227_v21, %v2231_v22  ;;  %v2324_v19 = vcombine.high %v2291_v13, %v2295_v14  ;;  %v2299_v21 = vld [vmem:[%s2798_s27 + $0x380] sm:$0xff] }
  0x8a   : > { %v2269_v34 = vcombine.high %v2235_v29, %v2239_v30  ;;  %v2303_v22 = vld [vmem:[%s2798_s27 + $0x3a0] sm:$0xff] }
  0x8c   : > { %1009 = vmatpush1.bf16.msra.mxu0 %v2193_v37  ;;  %1050 = vmatpush1.bf16.msra.mxu1 %v2195_v38  ;;  %v2213_v37 = vld [vmem:[%s2798_s27 + $0x218] sm:$0xff] }
  0x8d   : > { %1084 = vmatprep.subr.bf16.mxu0 %v2174_v39  ;;  %1125 = vmatprep.subr.bf16.mxu1 %v2176_v40  ;;  %v2217_v38 = vld [vmem:[%s2798_s27 + $0x238] sm:$0xff]  ;;  %v2266_v39 = vcombine.low %v2234_v27, %v2238_v28  ;;  %v2268_v40 = vcombine.low %v2235_v29, %v2239_v30  ;;  %v2332_v27 = vcombine.high %v2299_v21, %v2303_v22  ;;  %v2307_v29 = vld [vmem:[%s2798_s27 + $0x3c0] sm:$0xff] }
  0x8e   : > { %v2249_v42 = vcombine.high %v2213_v37, %v2217_v38  ;;  %v2311_v30 = vld [vmem:[%s2798_s27 + $0x3e0] sm:$0xff] }
  0x8f   : > { %2201 = vmatmul.mubr.msk.bf16.vlgmr.msra.gmra.mrb[8].mxu0 %vm608_vm0, %v2876_v45  ;;  %2202 = vmatmul.mubr.msk.bf16.vlgmr.msra.gmra.mrb[8].mxu1 %vm608_vm0, %v2876_v45 }
  0x90   : > { %1085 = vmatpush1.bf16.msra.mxu0 %v2173_v46  ;;  %1126 = vmatpush1.bf16.msra.mxu1 %v2175_v47  ;;  %v2225_v46 = vld [vmem:[%s2798_s27 + $0x278] sm:$0xff]  ;;  %v2925_v47 = vld [vmem:[%s3041_s0 + $0x4] sm:$0x3] }
  0x91   : > { %1086 = vmatprep.subr.bf16.mxu0 %v2182_v48  ;;  %1127 = vmatprep.subr.bf16.mxu1 %v2184_v49  ;;  %v2246_v48 = vcombine.low %v2212_v35, %v2216_v36  ;;  %v2248_v49 = vcombine.low %v2213_v37, %v2217_v38  ;;  %v2340_v35 = vcombine.high %v2307_v29, %v2311_v30  ;;  %v2285_v37 = vld [vmem:[%s2798_s27 + $0x310] sm:$0xff] }
  0x92   : > { %1116 = vmatprep.mubr.bf16.mxu0 %v2475_v0  ;;  %1157 = vmatprep.mubr.bf16.mxu1 %v2475_v0  ;;  %v2289_v38 = vld [vmem:[%s2798_s27 + $0x330] sm:$0xff] }
  0x94   : > { %1087 = vmatpush1.bf16.msra.mxu0 %v2181_v54  ;;  %1128 = vmatpush1.bf16.msra.mxu1 %v2183_v55  ;;  %v2229_v54 = vld [vmem:[%s2798_s27 + $0x298] sm:$0xff] }
  0x95   : > { %1088 = vmatprep.subr.bf16.mxu0 %v2190_v56  ;;  %1129 = vmatprep.subr.bf16.mxu1 %v2192_v57  ;;  %v2233_v55 = vld [vmem:[%s2798_s27 + $0x2b8] sm:$0xff]  ;;  %v2254_v56 = vcombine.low %v2220_v43, %v2224_v44  ;;  %v2320_v43 = vcombine.high %v2285_v37, %v2289_v38 }
  0x96   : > { %v2265_v59 = vcombine.high %v2229_v54, %v2233_v55 }
  0x98   : > { %1089 = vmatpush1.bf16.msra.mxu0 %v2189_v62  ;;  %1130 = vmatpush1.bf16.msra.mxu1 %v2191_v63  ;;  %v2237_v62 = vld [vmem:[%s2798_s27 + $0x2d8] sm:$0xff] }
  0x99   : > { %1090 = vmatprep.subr.bf16.mxu0 %v2198_v1  ;;  %1131 = vmatprep.subr.bf16.mxu1 %v2200_v2  ;;  %v2241_v63 = vld [vmem:[%s2798_s27 + $0x2f8] sm:$0xff]  ;;  %v2262_v1 = vcombine.low %v2228_v52, %v2232_v53  ;;  %v2264_v2 = vcombine.low %v2229_v54, %v2233_v55  ;;  %v2301_v54 = vld [vmem:[%s2798_s27 + $0x390] sm:$0xff] }
  0x9a   : > { %v2273_v4 = vcombine.high %v2237_v62, %v2241_v63  ;;  %v2305_v55 = vld [vmem:[%s2798_s27 + $0x3b0] sm:$0xff] }
  0x9c   : > { %1091 = vmatpush1.bf16.msra.mxu0 %v2197_v7  ;;  %1132 = vmatpush1.bf16.msra.mxu1 %v2199_v8  ;;  %v2284_v7 = vld [vmem:[%s2798_s27 + $0x308] sm:$0xff] }
  0x9d   : > { %1393 = vmatprep.subr.bf16.mxu0 %v2243_v9  ;;  %1434 = vmatprep.subr.bf16.mxu1 %v2245_v10  ;;  %v2288_v8 = vld [vmem:[%s2798_s27 + $0x328] sm:$0xff]  ;;  %v2270_v9 = vcombine.low %v2236_v60, %v2240_v61  ;;  %v2272_v10 = vcombine.low %v2237_v62, %v2241_v63  ;;  %v2336_v60 = vcombine.high %v2301_v54, %v2305_v55  ;;  %v2309_v62 = vld [vmem:[%s2798_s27 + $0x3d0] sm:$0xff] }
  0x9e   : > { %v2318_v12 = vcombine.high %v2284_v7, %v2288_v8  ;;  %v2313_v63 = vld [vmem:[%s2798_s27 + $0x3f0] sm:$0xff] }
  0x9f   : > { %2203 = vmatmul.mubr.msk.bf16.vlgmr.msra.gmra.mrb[12].mxu0 %vm608_vm0, %v2876_v45  ;;  %2204 = vmatmul.mubr.msk.bf16.vlgmr.msra.gmra.mrb[12].mxu1 %vm608_vm0, %v2876_v45  ;;  %v2221_v45 = vld [vmem:[%s2798_s27 + $0x258] sm:$0xff] }
  0xa0   : > { %1394 = vmatpush1.bf16.msra.mxu0 %v2242_v15  ;;  %1435 = vmatpush1.bf16.msra.mxu1 %v2244_v16  ;;  %v2257_v51 = vcombine.high %v2221_v45, %v2225_v46  ;;  %v2256_v57 = vcombine.low %v2221_v45, %v2225_v46  ;;  %v2292_v15 = vld [vmem:[%s2798_s27 + $0x348] sm:$0xff]  ;;  %v2293_v45 = vld [vmem:[%s2798_s27 + $0x350] sm:$0xff] }
  0xa1   : > { %1395 = vmatprep.subr.bf16.mxu0 %v2251_v17  ;;  %1436 = vmatprep.subr.bf16.mxu1 %v2253_v18  ;;  %v2296_v16 = vld [vmem:[%s2798_s27 + $0x368] sm:$0xff]  ;;  %v2315_v17 = vcombine.low %v2283_v5, %v2287_v6  ;;  %v2317_v18 = vcombine.low %v2284_v7, %v2288_v8  ;;  %v2297_v46 = vld [vmem:[%s2798_s27 + $0x370] sm:$0xff]  ;;  %v2344_v5 = vcombine.high %v2309_v62, %v2313_v63 }
  0xa2   : > { %1425 = vmatprep.mubr.bf16.mxu0 %v2475_v0  ;;  %1466 = vmatprep.mubr.bf16.mxu1 %v2475_v0  ;;  %v2326_v20 = vcombine.high %v2292_v15, %v2296_v16  ;;  %v2328_v52 = vcombine.high %v2293_v45, %v2297_v46  ;;  %v2343_v7 = vcombine.low %v2309_v62, %v2313_v63 }
  0xa4   : > { %1396 = vmatpush1.bf16.msra.mxu0 %v2250_v23  ;;  %1437 = vmatpush1.bf16.msra.mxu1 %v2252_v24  ;;  %v2300_v23 = vld [vmem:[%s2798_s27 + $0x388] sm:$0xff] }
  0xa5   : > { %1397 = vmatprep.subr.bf16.mxu0 %v2259_v25  ;;  %1438 = vmatprep.subr.bf16.mxu1 %v2261_v26  ;;  %v2304_v24 = vld [vmem:[%s2798_s27 + $0x3a8] sm:$0xff]  ;;  %v2323_v25 = vcombine.low %v2291_v13, %v2295_v14  ;;  %v2325_v26 = vcombine.low %v2292_v15, %v2296_v16 }
  0xa6   : > { %v2334_v28 = vcombine.high %v2300_v23, %v2304_v24 }
  0xa8   : > { %1398 = vmatpush1.bf16.msra.mxu0 %v2258_v31  ;;  %1439 = vmatpush1.bf16.msra.mxu1 %v2260_v32  ;;  %v2308_v31 = vld [vmem:[%s2798_s27 + $0x3c8] sm:$0xff] }
  0xa9   : > { %1399 = vmatprep.subr.bf16.mxu0 %v2267_v33  ;;  %1440 = vmatprep.subr.bf16.mxu1 %v2269_v34  ;;  %v2312_v32 = vld [vmem:[%s2798_s27 + $0x3e8] sm:$0xff]  ;;  %v2331_v33 = vcombine.low %v2299_v21, %v2303_v22  ;;  %v2333_v34 = vcombine.low %v2300_v23, %v2304_v24 }
  0xaa   : > { %v2342_v36 = vcombine.high %v2308_v31, %v2312_v32 }
  0xac   : > { %1400 = vmatpush1.bf16.msra.mxu0 %v2266_v39  ;;  %1441 = vmatpush1.bf16.msra.mxu1 %v2268_v40  ;;  %v2286_v39 = vld [vmem:[%s2798_s27 + $0x318] sm:$0xff] }
  0xad   : > { %1475 = vmatprep.subr.bf16.mxu0 %v2247_v41  ;;  %1516 = vmatprep.subr.bf16.mxu1 %v2249_v42  ;;  %v2290_v40 = vld [vmem:[%s2798_s27 + $0x338] sm:$0xff]  ;;  %v2339_v41 = vcombine.low %v2307_v29, %v2311_v30  ;;  %v2341_v42 = vcombine.low %v2308_v31, %v2312_v32 }
  0xae   : > { %v2322_v44 = vcombine.high %v2286_v39, %v2290_v40 }
  0xaf   : > { %2274 = vmatmul.mubr.msk.bf16.vlgmr.msra.gmra.mrb[16].mxu0 %vm608_vm0, %v2925_v47  ;;  %2275 = vmatmul.mubr.msk.bf16.vlgmr.msra.gmra.mrb[16].mxu1 %vm608_vm0, %v2925_v47 }
  0xb0   : > { %1476 = vmatpush1.bf16.msra.mxu0 %v2246_v48  ;;  %1517 = vmatpush1.bf16.msra.mxu1 %v2248_v49  ;;  %v2298_v48 = vld [vmem:[%s2798_s27 + $0x378] sm:$0xff]  ;;  %v2282_v49 = vld [vmem:[%s3041_s0 + $0x6] sm:$0x3] }
  0xb1   : > { %1477 = vmatprep.subr.bf16.mxu0 %v2255_v50  ;;  %1518 = vmatprep.subr.bf16.mxu1 %v2257_v51  ;;  %v2319_v50 = vcombine.low %v2285_v37, %v2289_v38  ;;  %v2321_v51 = vcombine.low %v2286_v39, %v2290_v40 }
  0xb2   : > { %1507 = vmatprep.mubr.bf16.mxu0 %v2475_v0  ;;  %1548 = vmatprep.mubr.bf16.mxu1 %v2475_v0 }
  0xb4   : > { %1478 = vmatpush1.bf16.msra.mxu0 %v2254_v56  ;;  %1519 = vmatpush1.bf16.msra.mxu1 %v2256_v57  ;;  %v2302_v56 = vld [vmem:[%s2798_s27 + $0x398] sm:$0xff] }
  0xb5   : > { %1479 = vmatprep.subr.bf16.mxu0 %v2263_v58  ;;  %1520 = vmatprep.subr.bf16.mxu1 %v2265_v59  ;;  %v2306_v57 = vld [vmem:[%s2798_s27 + $0x3b8] sm:$0xff]  ;;  %v2327_v58 = vcombine.low %v2293_v45, %v2297_v46 }
  0xb6   : > { %v2338_v61 = vcombine.high %v2302_v56, %v2306_v57 }
  0xb8   : > { %1480 = vmatpush1.bf16.msra.mxu0 %v2262_v1  ;;  %1521 = vmatpush1.bf16.msra.mxu1 %v2264_v2  ;;  %v2310_v1 = vld [vmem:[%s2798_s27 + $0x3d8] sm:$0xff] }
  0xb9   : > { %1481 = vmatprep.subr.bf16.mxu0 %v2271_v3  ;;  %1522 = vmatprep.subr.bf16.mxu1 %v2273_v4  ;;  %v2314_v2 = vld [vmem:[%s2798_s27 + $0x3f8] sm:$0xff]  ;;  %v2335_v3 = vcombine.low %v2301_v54, %v2305_v55  ;;  %v2337_v4 = vcombine.low %v2302_v56, %v2306_v57 }
  0xba   : > { %v2346_v6 = vcombine.high %v2310_v1, %v2314_v2  ;;  %v2345_v8 = vcombine.low %v2310_v1, %v2314_v2 }
  0xbc   : > { %1482 = vmatpush1.bf16.msra.mxu0 %v2270_v9  ;;  %1523 = vmatpush1.bf16.msra.mxu1 %v2272_v10 }
  0xbd   : > { %1784 = vmatprep.subr.bf16.mxu0 %v2316_v11  ;;  %1825 = vmatprep.subr.bf16.mxu1 %v2318_v12 }
  0xbf   : > { %2276 = vmatmul.mubr.msk.bf16.vlgmr.msra.gmra.mrb[20].mxu0 %vm608_vm0, %v2925_v47  ;;  %2277 = vmatmul.mubr.msk.bf16.vlgmr.msra.gmra.mrb[20].mxu1 %vm608_vm0, %v2925_v47  ;;  %v2294_v47 = vld [vmem:[%s2798_s27 + $0x358] sm:$0xff] }
  0xc0   : > { %1785 = vmatpush1.bf16.msra.mxu0 %v2315_v17  ;;  %1826 = vmatpush1.bf16.msra.mxu1 %v2317_v18  ;;  %v2330_v53 = vcombine.high %v2294_v47, %v2298_v48  ;;  %v2329_v59 = vcombine.low %v2294_v47, %v2298_v48 }
  0xc1   : > { %1786 = vmatprep.subr.bf16.mxu0 %v2324_v19  ;;  %1827 = vmatprep.subr.bf16.mxu1 %v2326_v20 }
  0xc2   : > { %1816 = vmatprep.mubr.bf16.mxu0 %v2475_v0  ;;  %1857 = vmatprep.mubr.bf16.mxu1 %v2475_v0 }
  0xc4   : > { %1787 = vmatpush1.bf16.msra.mxu0 %v2323_v25  ;;  %1828 = vmatpush1.bf16.msra.mxu1 %v2325_v26 }
  0xc5   : > { %1788 = vmatprep.subr.bf16.mxu0 %v2332_v27  ;;  %1829 = vmatprep.subr.bf16.mxu1 %v2334_v28 }
  0xc8   : > { %1789 = vmatpush1.bf16.msra.mxu0 %v2331_v33  ;;  %1830 = vmatpush1.bf16.msra.mxu1 %v2333_v34 }
  0xc9   : > { %1790 = vmatprep.subr.bf16.mxu0 %v2340_v35  ;;  %1831 = vmatprep.subr.bf16.mxu1 %v2342_v36 }
  0xcc   : > { %1791 = vmatpush1.bf16.msra.mxu0 %v2339_v41  ;;  %1832 = vmatpush1.bf16.msra.mxu1 %v2341_v42 }
  0xcd   : > { %1866 = vmatprep.subr.bf16.mxu0 %v2320_v43  ;;  %1907 = vmatprep.subr.bf16.mxu1 %v2322_v44 }
  0xcf   : > { %2347 = vmatmul.mubr.msk.bf16.vlgmr.msra.gmra.mrb[24].mxu0 %vm608_vm0, %v2282_v49  ;;  %2348 = vmatmul.mubr.msk.bf16.vlgmr.msra.gmra.mrb[24].mxu1 %vm608_vm0, %v2282_v49 }
  0xd0   : > { %1867 = vmatpush1.bf16.msra.mxu0 %v2319_v50  ;;  %1908 = vmatpush1.bf16.msra.mxu1 %v2321_v51 }
  0xd1   : > { %1868 = vmatprep.subr.bf16.mxu0 %v2328_v52  ;;  %1909 = vmatprep.subr.bf16.mxu1 %v2330_v53 }
  0xd2   : > { %1898 = vmatprep.mubr.bf16.mxu0 %v2475_v0  ;;  %1939 = vmatprep.mubr.bf16.mxu1 %v2475_v0 }
  0xd4   : > { %1869 = vmatpush1.bf16.msra.mxu0 %v2327_v58  ;;  %1910 = vmatpush1.bf16.msra.mxu1 %v2329_v59 }
  0xd5   : > { %1870 = vmatprep.subr.bf16.mxu0 %v2336_v60  ;;  %1911 = vmatprep.subr.bf16.mxu1 %v2338_v61 }
  0xd8   : > { %1871 = vmatpush1.bf16.msra.mxu0 %v2335_v3  ;;  %1912 = vmatpush1.bf16.msra.mxu1 %v2337_v4 }
  0xd9   : > { %1872 = vmatprep.subr.bf16.mxu0 %v2344_v5  ;;  %1913 = vmatprep.subr.bf16.mxu1 %v2346_v6 }
  0xdc   : > { %1873 = vmatpush1.bf16.msra.mxu0 %v2343_v7  ;;  %1914 = vmatpush1.bf16.msra.mxu1 %v2345_v8 }
  0xdf   : > { %2349 = vmatmul.mubr.msk.bf16.vlgmr.msra.gmra.mrb[28].mxu0 %vm608_vm0, %v2282_v49  ;;  %2350 = vmatmul.mubr.msk.bf16.vlgmr.msra.gmra.mrb[28].mxu1 %vm608_vm0, %v2282_v49 }
 0x142   : > { %v646_v0 = vpop.f32.mrb[0].mxu0  ;;  %v687_v9 = vpop.f32.mrb[0].mxu1 }
 0x143   : > { %2387 = vtanh.f32 %v646_v0  ;;  %v648_v10 = vpop.f32.mrb[1].mxu0  ;;  %v689_v11 = vpop.f32.mrb[1].mxu1 }
 0x144   : > { %2389 = vtanh.f32 %v687_v9  ;;  %v650_v12 = vpop.f32.mrb[2].mxu0  ;;  %v691_v13 = vpop.f32.mrb[2].mxu1 }
 0x145   : > { %2391 = vtanh.f32 %v648_v10  ;;  %v651_v14 = vpop.f32.mrb[3].mxu0  ;;  %v692_v15 = vpop.f32.mrb[3].mxu1 }
 0x146   : > { %2393 = vtanh.f32 %v689_v11 }
 0x14d   : > { %v2388_v16 = vpop.eup %2387 }
 0x14e   : > { %v2390_v17 = vpop.eup %2389 }
 0x14f   : > { %v2392_v18 = vpop.eup %2391 }
 0x150   : > { %v2394_v19 = vpop.eup %2393  ;;  %v792_v20 = vcombine.low %v2388_v16, %v2392_v18 }
 0x151   : > { %v793_v21 = vcombine.low %v2390_v17, %v2394_v19 }
 0x152   : > { %800 = vst [vmem:[%s2990_s14] sm:$0x77] %v792_v20  ;;  %v728_v22 = vpop.f32.mrb[4].mxu0  ;;  %v769_v23 = vpop.f32.mrb[4].mxu1 }
 0x153   : > { %801 = vst [vmem:[%s2990_s14 + $0x8] sm:$0x77] %v793_v21  ;;  %2395 = vtanh.f32 %v728_v22  ;;  %v730_v24 = vpop.f32.mrb[5].mxu0  ;;  %v771_v25 = vpop.f32.mrb[5].mxu1 }
 0x154   : > { %2397 = vtanh.f32 %v769_v23  ;;  %v732_v26 = vpop.f32.mrb[6].mxu0  ;;  %v773_v27 = vpop.f32.mrb[6].mxu1 }
 0x155   : > { %2399 = vtanh.f32 %v730_v24  ;;  %v733_v28 = vpop.f32.mrb[7].mxu0  ;;  %v774_v29 = vpop.f32.mrb[7].mxu1 }
 0x156   : > { %2401 = vtanh.f32 %v771_v25 }
 0x15d   : > { %v2396_v30 = vpop.eup %2395 }
 0x15e   : > { %v2398_v31 = vpop.eup %2397 }
 0x15f   : > { %v2400_v32 = vpop.eup %2399 }
 0x160   : > { %v2402_v33 = vpop.eup %2401  ;;  %v794_v34 = vcombine.low %v2396_v30, %v2400_v32 }
 0x161   : > { %v795_v35 = vcombine.low %v2398_v31, %v2402_v33 }
 0x162   : > { %802 = vst [vmem:[%s2990_s14 + $0x10] sm:$0x77] %v794_v34  ;;  %v1036_v36 = vpop.f32.mrb[8].mxu0  ;;  %v1077_v37 = vpop.f32.mrb[8].mxu1 }
 0x163   : > { %803 = vst [vmem:[%s2990_s14 + $0x18] sm:$0x77] %v795_v35  ;;  %2403 = vtanh.f32 %v1036_v36  ;;  %v1038_v38 = vpop.f32.mrb[9].mxu0  ;;  %v1079_v39 = vpop.f32.mrb[9].mxu1 }
 0x164   : > { %2405 = vtanh.f32 %v1077_v37  ;;  %v1040_v40 = vpop.f32.mrb[10].mxu0  ;;  %v1081_v41 = vpop.f32.mrb[10].mxu1 }
 0x165   : > { %2407 = vtanh.f32 %v1038_v38  ;;  %v1041_v42 = vpop.f32.mrb[11].mxu0  ;;  %v1082_v43 = vpop.f32.mrb[11].mxu1 }
 0x166   : > { %2409 = vtanh.f32 %v1079_v39 }
 0x16d   : > { %v2404_v44 = vpop.eup %2403 }
 0x16e   : > { %v2406_v45 = vpop.eup %2405 }
 0x16f   : > { %v2408_v46 = vpop.eup %2407 }
 0x170   : > { %v2410_v47 = vpop.eup %2409  ;;  %v1182_v48 = vcombine.low %v2404_v44, %v2408_v46 }
 0x171   : > { %v1183_v49 = vcombine.low %v2406_v45, %v2410_v47 }
 0x172   : > { %2205 = vst [vmem:[%s2990_s14 + $0x20] sm:$0x77] %v1182_v48  ;;  %v1118_v50 = vpop.f32.mrb[12].mxu0  ;;  %v1159_v51 = vpop.f32.mrb[12].mxu1 }
 0x173   : > { %2206 = vst [vmem:[%s2990_s14 + $0x28] sm:$0x77] %v1183_v49  ;;  %2411 = vtanh.f32 %v1118_v50  ;;  %v1120_v52 = vpop.f32.mrb[13].mxu0  ;;  %v1161_v53 = vpop.f32.mrb[13].mxu1 }
 0x174   : > { %2413 = vtanh.f32 %v1159_v51  ;;  %v1122_v54 = vpop.f32.mrb[14].mxu0  ;;  %v1163_v55 = vpop.f32.mrb[14].mxu1 }
 0x175   : > { %2415 = vtanh.f32 %v1120_v52  ;;  %v1123_v56 = vpop.f32.mrb[15].mxu0  ;;  %v1164_v57 = vpop.f32.mrb[15].mxu1 }
 0x176   : > { %2417 = vtanh.f32 %v1161_v53  ;;  %v1999_v56 = vld [vmem:[%s2990_s14] sm:$0xff] (%p2521_p5)  ;;  %v2001_v57 = vld [vmem:[%s2990_s14 + $0x8] sm:$0xff] (%p2521_p5) }
 0x177   : > { %2000 = vst [vmem:[%s1986_s17] sm:$0xff] (%p2521_p5), %v1999_v56  ;;  %2002 = vst [vmem:[%s1986_s17 + $0x8] sm:$0xff] (%p2521_p5), %v2001_v57 }
 0x17d   : > { %v2412_v58 = vpop.eup %2411 }
 0x17e   : > { %v2414_v59 = vpop.eup %2413 }
 0x17f   : > { %v2416_v60 = vpop.eup %2415 }
 0x180   : > { %v2418_v61 = vpop.eup %2417  ;;  %v1184_v62 = vcombine.low %v2412_v58, %v2416_v60  ;;  %v2003_v58 = vld [vmem:[%s2990_s14 + $0x10] sm:$0xff] (%p2521_p5)  ;;  %v2007_v60 = vld [vmem:[%s2990_s14 + $0x20] sm:$0xff] (%p2521_p5) }
 0x181   : > { %v1185_v63 = vcombine.low %v2414_v59, %v2418_v61  ;;  %v2005_v59 = vld [vmem:[%s2990_s14 + $0x18] sm:$0xff] (%p2521_p5)  ;;  %v2009_v61 = vld [vmem:[%s2990_s14 + $0x28] sm:$0xff] (%p2521_p5)  ;;  %2004 = vst [vmem:[%s1986_s17 + $0x10] sm:$0xff] (%p2521_p5), %v2003_v58  ;;  %2008 = vst [vmem:[%s1986_s17 + $0x40] sm:$0xff] (%p2521_p5), %v2007_v60 }
 0x182   : > { %2207 = vst [vmem:[%s2990_s14 + $0x30] sm:$0x77] %v1184_v62  ;;  %v1427_v1 = vpop.f32.mrb[16].mxu0  ;;  %v1468_v2 = vpop.f32.mrb[16].mxu1  ;;  %2006 = vst [vmem:[%s1986_s17 + $0x18] sm:$0xff] (%p2521_p5), %v2005_v59 }
 0x183   : > { %2208 = vst [vmem:[%s2990_s14 + $0x38] sm:$0x77] %v1185_v63  ;;  %2419 = vtanh.f32 %v1427_v1  ;;  %v1429_v3 = vpop.f32.mrb[17].mxu0  ;;  %v1470_v4 = vpop.f32.mrb[17].mxu1  ;;  %2010 = vst [vmem:[%s1986_s17 + $0x48] sm:$0xff] (%p2521_p5), %v2009_v61 }
 0x184   : > { %2421 = vtanh.f32 %v1468_v2  ;;  %v1431_v5 = vpop.f32.mrb[18].mxu0  ;;  %v1472_v6 = vpop.f32.mrb[18].mxu1 }
 0x185   : > { %2423 = vtanh.f32 %v1429_v3  ;;  %v1432_v7 = vpop.f32.mrb[19].mxu0  ;;  %v1473_v8 = vpop.f32.mrb[19].mxu1 }
 0x186   : > { %2425 = vtanh.f32 %v1470_v4 }
 0x189   : > { %v2011_v62 = vld [vmem:[%s2990_s14 + $0x30] sm:$0xff] (%p2521_p5) }
 0x18a   : > { %v2013_v63 = vld [vmem:[%s2990_s14 + $0x38] sm:$0xff] (%p2521_p5)  ;;  %2012 = vst [vmem:[%s1986_s17 + $0x50] sm:$0xff] (%p2521_p5), %v2011_v62 }
 0x18b   : > { %2014 = vst [vmem:[%s1986_s17 + $0x58] sm:$0xff] (%p2521_p5), %v2013_v63 }
 0x18d   : > { %v2420_v0 = vpop.eup %2419 }
 0x18e   : > { %v2422_v9 = vpop.eup %2421 }
 0x18f   : > { %v2424_v10 = vpop.eup %2423 }
 0x190   : > { %v2426_v11 = vpop.eup %2425  ;;  %v1573_v12 = vcombine.low %v2420_v0, %v2424_v10 }
 0x191   : > { %v1574_v13 = vcombine.low %v2422_v9, %v2426_v11 }
 0x192   : > { %2278 = vst [vmem:[%s2990_s14 + $0x40] sm:$0x77] %v1573_v12  ;;  %v1509_v14 = vpop.f32.mrb[20].mxu0  ;;  %v1550_v15 = vpop.f32.mrb[20].mxu1 }
 0x193   : > { %2279 = vst [vmem:[%s2990_s14 + $0x48] sm:$0x77] %v1574_v13  ;;  %2427 = vtanh.f32 %v1509_v14  ;;  %v1511_v16 = vpop.f32.mrb[21].mxu0  ;;  %v1552_v17 = vpop.f32.mrb[21].mxu1 }
 0x194   : > { %2429 = vtanh.f32 %v1550_v15  ;;  %v1513_v18 = vpop.f32.mrb[22].mxu0  ;;  %v1554_v19 = vpop.f32.mrb[22].mxu1 }
 0x195   : > { %2431 = vtanh.f32 %v1511_v16  ;;  %v1514_v20 = vpop.f32.mrb[23].mxu0  ;;  %v1555_v21 = vpop.f32.mrb[23].mxu1 }
 0x196   : > { %2433 = vtanh.f32 %v1552_v17 }
 0x199   : > { %v2015_v1 = vld [vmem:[%s2990_s14 + $0x40] sm:$0xff] (%p2521_p5) }
 0x19a   : > { %2016 = vst [vmem:[%s1986_s17 + $0x80] sm:$0xff] (%p2521_p5), %v2015_v1  ;;  %v2017_v2 = vld [vmem:[%s2990_s14 + $0x48] sm:$0xff] (%p2521_p5) }
 0x19b   : > { %2018 = vst [vmem:[%s1986_s17 + $0x88] sm:$0xff] (%p2521_p5), %v2017_v2 }
 0x19d   : > { %v2428_v22 = vpop.eup %2427 }
 0x19e   : > { %v2430_v23 = vpop.eup %2429 }
 0x19f   : > { %v2432_v24 = vpop.eup %2431 }
 0x1a0   : > { %v2434_v25 = vpop.eup %2433  ;;  %v1575_v26 = vcombine.low %v2428_v22, %v2432_v24 }
 0x1a1   : > { %v1576_v27 = vcombine.low %v2430_v23, %v2434_v25 }
 0x1a2   : > { %2280 = vst [vmem:[%s2990_s14 + $0x50] sm:$0x77] %v1575_v26  ;;  %v1818_v28 = vpop.f32.mrb[24].mxu0  ;;  %v1859_v29 = vpop.f32.mrb[24].mxu1 }
 0x1a3   : > { %2281 = vst [vmem:[%s2990_s14 + $0x58] sm:$0x77] %v1576_v27  ;;  %2435 = vtanh.f32 %v1818_v28  ;;  %v1820_v30 = vpop.f32.mrb[25].mxu0  ;;  %v1861_v31 = vpop.f32.mrb[25].mxu1 }
 0x1a4   : > { %2437 = vtanh.f32 %v1859_v29  ;;  %v1822_v32 = vpop.f32.mrb[26].mxu0  ;;  %v1863_v33 = vpop.f32.mrb[26].mxu1 }
 0x1a5   : > { %2439 = vtanh.f32 %v1820_v30  ;;  %v1823_v34 = vpop.f32.mrb[27].mxu0  ;;  %v1864_v35 = vpop.f32.mrb[27].mxu1 }
 0x1a6   : > { %2441 = vtanh.f32 %v1861_v31 }
 0x1a9   : > { %v2019_v3 = vld [vmem:[%s2990_s14 + $0x50] sm:$0xff] (%p2521_p5) }
 0x1aa   : > { %v2021_v4 = vld [vmem:[%s2990_s14 + $0x58] sm:$0xff] (%p2521_p5)  ;;  %2020 = vst [vmem:[%s1986_s17 + $0x90] sm:$0xff] (%p2521_p5), %v2019_v3 }
 0x1ab   : > { %2022 = vst [vmem:[%s1986_s17 + $0x98] sm:$0xff] (%p2521_p5), %v2021_v4 }
 0x1ad   : > { %v2436_v36 = vpop.eup %2435 }
 0x1ae   : > { %v2438_v37 = vpop.eup %2437 }
 0x1af   : > { %v2440_v38 = vpop.eup %2439 }
 0x1b0   : > { %v2442_v39 = vpop.eup %2441  ;;  %v1964_v40 = vcombine.low %v2436_v36, %v2440_v38 }
 0x1b1   : > { %v1965_v41 = vcombine.low %v2438_v37, %v2442_v39 }
 0x1b2   : > { %2351 = vst [vmem:[%s2990_s14 + $0x60] sm:$0x77] %v1964_v40  ;;  %v1900_v42 = vpop.f32.mrb[28].mxu0  ;;  %v1941_v43 = vpop.f32.mrb[28].mxu1 }
 0x1b3   : > { %2352 = vst [vmem:[%s2990_s14 + $0x68] sm:$0x77] %v1965_v41  ;;  %2443 = vtanh.f32 %v1900_v42  ;;  %v1902_v44 = vpop.f32.mrb[29].mxu0  ;;  %v1943_v45 = vpop.f32.mrb[29].mxu1 }
 0x1b4   : > { %2445 = vtanh.f32 %v1941_v43  ;;  %v1904_v46 = vpop.f32.mrb[30].mxu0  ;;  %v1945_v47 = vpop.f32.mrb[30].mxu1 }
 0x1b5   : > { %2447 = vtanh.f32 %v1902_v44  ;;  %v1905_v48 = vpop.f32.mrb[31].mxu0  ;;  %v1946_v49 = vpop.f32.mrb[31].mxu1 }
 0x1b6   : > { %2449 = vtanh.f32 %v1943_v45 }
 0x1b9   : > { %v2023_v5 = vld [vmem:[%s2990_s14 + $0x60] sm:$0xff] (%p2521_p5) }
 0x1ba   : > { %v2025_v6 = vld [vmem:[%s2990_s14 + $0x68] sm:$0xff] (%p2521_p5)  ;;  %2024 = vst [vmem:[%s1986_s17 + $0xc0] sm:$0xff] (%p2521_p5), %v2023_v5 }
 0x1bb   : > { %2026 = vst [vmem:[%s1986_s17 + $0xc8] sm:$0xff] (%p2521_p5), %v2025_v6 }
 0x1bd   : > { %v2444_v50 = vpop.eup %2443  ;;  %1983 = sbr.rel (!%p2521_p5) target bundleno = 460 (0x1cc), region = 55 }
 0x1be   : > { %v2446_v51 = vpop.eup %2445 }
 0x1bf   : > { %v2448_v52 = vpop.eup %2447 }
 0x1c0   : > { %v2450_v53 = vpop.eup %2449  ;;  %v1966_v54 = vcombine.low %v2444_v50, %v2448_v52 }
 0x1c1   : > { %v1967_v55 = vcombine.low %v2446_v51, %v2450_v53 }
 0x1c2   : > { %2353 = vst [vmem:[%s2990_s14 + $0x70] sm:$0x77] %v1966_v54 }
 0x1c3   : > { %2354 = vst [vmem:[%s2990_s14 + $0x78] sm:$0x77] %v1967_v55 }
 0x1c9   : > { %v2027_v7 = vld [vmem:[%s2990_s14 + $0x70] sm:$0xff] }
 0x1ca   : > { %2028 = vst [vmem:[%s1986_s17 + $0xd0] sm:$0xff] %v2027_v7  ;;  %v2029_v8 = vld [vmem:[%s2990_s14 + $0x78] sm:$0xff] }
 0x1cb   : > { %2030 = vst [vmem:[%s1986_s17 + $0xd8] sm:$0xff] %v2029_v8 }
 0x1cc PF: > { %p9_p10 = scmp.ge.s32.totalorder %s2508_s13, 4   ;;  %s3045_s9 = smov %s2469_s10 }
 0x1cd   : > { %s3046_s10 = smov %s2519_s16  ;;  %s3047_s11 = smov %s2508_s13 }
 0x1ce   :  { %11 = sbr.rel (!%p9_p10) target bundleno = 2 (0x2), region = 118 }

</bundles_post_ra>
